<compile_context>
chip_gen: v5e
topology: v5e:2x2
jax: 0.10.0
libtpu: 0.0.40
codegen_flags: <defaults>
</compile_context>

<pallas_src>
import numpy as np
import jax
import jax.numpy as jnp
from jax.experimental import pallas as pl
from jax.experimental.pallas import tpu as pltpu

# ----- hyper-parameters (small, matching how CVAE instantiates the layer) --------------
B       = 16                     # batch (number of windows folded into one launch)
B_TILE  = 8                      # batch elements per grid step (parallel axis for v7x)
L       = 8                      # sequence length (number of unfolded sub-windows)
D_MODEL = 32                     # hp.d_model
D_INNER = 64                     # hp.d_inner
N_HEAD  = 4                      # hp.n_head
D_K     = D_INNER // N_HEAD      # 16  (CVAE passes d_inner // n_head)
D_V     = D_INNER // N_HEAD      # 16
HDK     = N_HEAD * D_K           # 64 (== D_INNER by construction)
LN_EPS  = 1e-5
TEMP    = float(np.power(D_K, 0.5))

assert B % B_TILE == 0
R = B_TILE * L                   # rows per grid step


def encoder_layer_kernel(x_ref, wqkv_ref, w1_ref, wfc_ref, w2_ref, blk_ref, sel_ref,
                         cv_ref, out_ref, attn_ref):
    """One grid step processes B_TILE whole batch elements (R = B_TILE*L rows).

    x_ref   : (R, D_MODEL)            activations (batch folded into rows)
    wqkv_ref: (D_MODEL, 3*HDK)        [Wq/temp | Wk | Wv]  (in, out) layout
    w1_ref  : (D_MODEL, D_INNER)      FFN first conv (k=1) weight, (in, out)
    wfc_ref : (HDK, D_MODEL)          attention output projection, (in, out)
    w2_ref  : (D_INNER, D_MODEL)      FFN second conv (k=1) weight, (in, out)
    blk_ref : (HDK, HDK)              head-block mask (1 where same head)
    sel_ref : (HDK, N_HEAD)           head-selection matrix (picks lane h*D_K)
    cv_ref  : (8, 3*HDK)              rows: [bq/temp|bk|bv], bfc, g1, be1, bw1, bw2, g2, be2
    out_ref : (R, D_MODEL)            enc_output rows
    attn_ref: (R*L, N_HEAD)           softmax probs, row = (b,i,j), col = head
    """
    x  = x_ref[...]                                       # (R, 32)
    cv = cv_ref[...]                                      # (8, 192)

    # ---- fused Q|K|V projection (one MXU pass; 1/sqrt(d_k) already folded in) --------
    qkv = jnp.dot(x, wqkv_ref[...],
                  preferred_element_type=jnp.float32) + cv[0:1, 0:3 * HDK]   # (R, 192)
    q = qkv[:, 0:HDK].reshape(B_TILE, L, HDK)             # (BT, L, 64)
    k = qkv[:, HDK:2 * HDK].reshape(B_TILE, L, HDK)
    v = qkv[:, 2 * HDK:3 * HDK].reshape(B_TILE, L, HDK)

    # ---- all-head attention scores in ONE block-masked matmul -------------------------
    # p[b,i,j,f] = q[b,i,f]*k[b,j,f]; blk sums features within each head's d_k block,
    # so scores[r, f] is the score of head f//D_K, replicated across its d_k lanes.
    p = q[:, :, None, :] * k[:, None, :, :]               # (BT, L, L, 64)   (VPU)
    scores = jnp.dot(p.reshape(R * L, HDK), blk_ref[...],
                     preferred_element_type=jnp.float32)  # (R*L, 64)
    s = scores.reshape(R, L, HDK)                         # [(b,i), j, f]

    # ---- per-head softmax over keys j (sublane axis); exact divide ---------------------
    m   = jnp.max(s, axis=1, keepdims=True)               # (R, 1, 64)
    e   = jnp.exp(s - m)
    den = jnp.sum(e, axis=1, keepdims=True)
    attn = e / den                                        # (R, L, 64)  exact
    # compact attention (one lane per head) emitted directly from the kernel
    attn_ref[...] = jnp.dot(attn.reshape(R * L, HDK), sel_ref[...],
                            preferred_element_type=jnp.float32)   # (R*L, N_HEAD)

    # ---- weighted sum of V (broadcast-multiply + sublane reduce) -----------------------
    ctx = jnp.sum(attn.reshape(B_TILE, L, L, HDK) * v[:, None, :, :], axis=2)  # (BT,L,64)
    ctx = ctx.reshape(R, HDK)                              # torch head-major lane order

    # ---- output projection + residual + LayerNorm --------------------------------------
    mha  = jnp.dot(ctx, wfc_ref[...],
                   preferred_element_type=jnp.float32) + cv[1:2, 0:D_MODEL]
    res1 = mha + x                                         # residual = enc_input
    mu1  = jnp.mean(res1, axis=-1, keepdims=True)
    var1 = jnp.mean((res1 - mu1) ** 2, axis=-1, keepdims=True)
    ln1  = (res1 - mu1) / jnp.sqrt(var1 + LN_EPS) * cv[2:3, 0:D_MODEL] + cv[3:4, 0:D_MODEL]

    # ---- position-wise FFN (Conv1d k=1 == dense on feature axis) + residual + LN -------
    h1   = jnp.maximum(
        jnp.dot(ln1, w1_ref[...],
                preferred_element_type=jnp.float32) + cv[4:5, 0:D_INNER], 0.0)   # (R, 64)
    ff   = jnp.dot(h1, w2_ref[...],
                   preferred_element_type=jnp.float32) + cv[5:6, 0:D_MODEL]
    res2 = ff + ln1
    mu2  = jnp.mean(res2, axis=-1, keepdims=True)
    var2 = jnp.mean((res2 - mu2) ** 2, axis=-1, keepdims=True)
    ln2  = (res2 - mu2) / jnp.sqrt(var2 + LN_EPS) * cv[6:7, 0:D_MODEL] + cv[7:8, 0:D_MODEL]

    out_ref[...] = ln2                                      # (R, 32)


def pack_params(params):
    """Host-side packing, run ONCE (outside the jitted per-call path):
    pre-transpose weights to (in, out), fold 1/sqrt(d_k) into Wq/bq, fuse Q|K|V,
    pack the 10 small vectors into one (8, 192) slab, and build the head-block mask
    and head-selection constants."""
    (wq, bq, wk, bk, wv, bv, wfc, bfc, g1, be1, w1, bw1, w2, bw2, g2, be2) = params
    inv_t = jnp.float32(1.0 / TEMP)
    w_qkv = jnp.concatenate([wq.T * inv_t, wk.T, wv.T], axis=1)           # (32, 192)
    w1_t  = jnp.asarray(w1.T, jnp.float32)                                # (32, 64)
    wfc_t = jnp.asarray(wfc.T, jnp.float32)                               # (64, 32)
    w2_t  = jnp.asarray(w2.T, jnp.float32)                                # (64, 32)

    f = np.arange(HDK)
    blk = (f[:, None] // D_K == f[None, :] // D_K).astype(np.float32)     # (64, 64)
    sel = np.zeros((HDK, N_HEAD), np.float32)
    sel[np.arange(N_HEAD) * D_K, np.arange(N_HEAD)] = 1.0                 # (64, 4)

    cv = jnp.zeros((8, 3 * HDK), jnp.float32)
    cv = cv.at[0, 0:HDK].set(bq * inv_t)
    cv = cv.at[0, HDK:2 * HDK].set(bk)
    cv = cv.at[0, 2 * HDK:3 * HDK].set(bv)
    cv = cv.at[1, 0:D_MODEL].set(bfc)
    cv = cv.at[2, 0:D_MODEL].set(g1)
    cv = cv.at[3, 0:D_MODEL].set(be1)
    cv = cv.at[4, 0:D_INNER].set(bw1)
    cv = cv.at[5, 0:D_MODEL].set(bw2)
    cv = cv.at[6, 0:D_MODEL].set(g2)
    cv = cv.at[7, 0:D_MODEL].set(be2)
    return (w_qkv, w1_t, wfc_t, w2_t, jnp.asarray(blk), jnp.asarray(sel), cv)


def _full_spec(a):
    nd = a.ndim
    return pl.BlockSpec(a.shape, lambda i: (0,) * nd)     # same block every step -> DMA'd once


@jax.jit
def encoder_layer_selfattn(x, w_qkv, w1_t, wfc_t, w2_t, blk, sel, cv):
    """x: (B, L, D_MODEL) f32; packed params from pack_params (precomputed once).
    Returns enc_output (B, L, D_MODEL) and attn (N_HEAD*B, L, L) (PyTorch layout)."""
    x2 = x.reshape(B * L, D_MODEL)

    out2, attn_c = pl.pallas_call(
        encoder_layer_kernel,
        grid=(B // B_TILE,),
        out_shape=(jax.ShapeDtypeStruct((B * L, D_MODEL), jnp.float32),
                   jax.ShapeDtypeStruct((B * L * L, N_HEAD), jnp.float32)),
        in_specs=[
            pl.BlockSpec((R, D_MODEL), lambda i: (i, 0)),          # activations: per-tile
            _full_spec(w_qkv), _full_spec(w1_t), _full_spec(wfc_t),
            _full_spec(w2_t), _full_spec(blk), _full_spec(sel), _full_spec(cv),
        ],
        out_specs=(pl.BlockSpec((R, D_MODEL), lambda i: (i, 0)),
                   pl.BlockSpec((R * L, N_HEAD), lambda i: (i, 0))),
        compiler_params=pltpu.CompilerParams(dimension_semantics=("parallel",)),
    )(x2, w_qkv, w1_t, wfc_t, w2_t, blk, sel, cv)

    enc_out = out2.reshape(B, L, D_MODEL)
    # attn_c[(b,i,j), h] -> torch layout (h*B + b, i, j); tiny (2 KiB) transpose.
    attn = attn_c.reshape(B, L, L, N_HEAD).transpose(3, 0, 1, 2).reshape(N_HEAD * B, L, L)
    return enc_out, attn


# ------------------------------ pure-JAX reference -------------------------------------
def reference_forward(x, params):
    (wq, bq, wk, bk, wv, bv, wfc, bfc, g1, be1, w1, bw1, w2, bw2, g2, be2) = params
    residual = x
    Q = x @ wq.T + bq                                   # (B, L, H*dk)
    K = x @ wk.T + bk
    V = x @ wv.T + bv

    def split_heads(t, d):
        return t.reshape(B, L, N_HEAD, d).transpose(2, 0, 1, 3).reshape(N_HEAD * B, L, d)

    Qh, Kh, Vh = split_heads(Q, D_K), split_heads(K, D_K), split_heads(V, D_V)
    scores = jnp.einsum('nqd,nkd->nqk', Qh, Kh) / TEMP
    attn = jax.nn.softmax(scores, axis=2)               # (N_HEAD*B, L, L)
    o = jnp.einsum('nqk,nkd->nqd', attn, Vh)
    o = o.reshape(N_HEAD, B, L, D_V).transpose(1, 2, 0, 3).reshape(B, L, N_HEAD * D_V)
    mha = o @ wfc.T + bfc
    res1 = mha + residual
    mu1 = res1.mean(-1, keepdims=True)
    var1 = ((res1 - mu1) ** 2).mean(-1, keepdims=True)
    ln1 = (res1 - mu1) / jnp.sqrt(var1 + LN_EPS) * g1 + be1
    h = jnp.maximum(ln1 @ w1.T + bw1, 0.0)
    ff = h @ w2.T + bw2
    res2 = ff + ln1
    mu2 = res2.mean(-1, keepdims=True)
    var2 = ((res2 - mu2) ** 2).mean(-1, keepdims=True)
    ln2 = (res2 - mu2) / jnp.sqrt(var2 + LN_EPS) * g2 + be2
    return ln2, attn


def make_params(key):
    ks = jax.random.split(key, 16)
    std_qk = np.sqrt(2.0 / (D_MODEL + D_K))
    std_v = np.sqrt(2.0 / (D_MODEL + D_V))
    wq = std_qk * jax.random.normal(ks[0], (N_HEAD * D_K, D_MODEL), jnp.float32)
    bq = 0.01 * jax.random.normal(ks[1], (N_HEAD * D_K,), jnp.float32)
    wk = std_qk * jax.random.normal(ks[2], (N_HEAD * D_K, D_MODEL), jnp.float32)
    bk = 0.01 * jax.random.normal(ks[3], (N_HEAD * D_K,), jnp.float32)
    wv = std_v * jax.random.normal(ks[4], (N_HEAD * D_V, D_MODEL), jnp.float32)
    bv = 0.01 * jax.random.normal(ks[5], (N_HEAD * D_V,), jnp.float32)
    wfc = np.sqrt(2.0 / (N_HEAD * D_V + D_MODEL)) * \
        jax.random.normal(ks[6], (D_MODEL, N_HEAD * D_V), jnp.float32)
    bfc = 0.01 * jax.random.normal(ks[7], (D_MODEL,), jnp.float32)
    # randomize LN params (learnable) so packing-row mistakes are caught by the test
    g1 = 1.0 + 0.1 * jax.random.normal(ks[8], (D_MODEL,), jnp.float32)
    be1 = 0.1 * jax.random.normal(ks[9], (D_MODEL,), jnp.float32)
    # Conv1d(kernel=1) weights squeezed to (out, in)
    w1 = (1.0 / np.sqrt(D_MODEL)) * jax.random.normal(ks[10], (D_INNER, D_MODEL), jnp.float32)
    bw1 = 0.01 * jax.random.normal(ks[11], (D_INNER,), jnp.float32)
    w2 = (1.0 / np.sqrt(D_INNER)) * jax.random.normal(ks[12], (D_MODEL, D_INNER), jnp.float32)
    bw2 = 0.01 * jax.random.normal(ks[13], (D_MODEL,), jnp.float32)
    g2 = 1.0 + 0.1 * jax.random.normal(ks[14], (D_MODEL,), jnp.float32)
    be2 = 0.1 * jax.random.normal(ks[15], (D_MODEL,), jnp.float32)
    return (wq, bq, wk, bk, wv, bv, wfc, bfc, g1, be1, w1, bw1, w2, bw2, g2, be2)


if __name__ == "__main__":
    key = jax.random.PRNGKey(0)
    kx, kp = jax.random.split(key)
    x = jax.random.normal(kx, (B, L, D_MODEL), jnp.float32)
    params = make_params(kp)

    packed = pack_params(params)          # host-side, runs ONCE (not in the jit path)

    out, attn = encoder_layer_selfattn(x, *packed)
    out = jax.block_until_ready(out)
    attn = jax.block_until_ready(attn)

    ref_out, ref_attn = reference_forward(x, params)
    np.testing.assert_allclose(np.asarray(out), np.asarray(ref_out), rtol=2e-3, atol=2e-3)
    np.testing.assert_allclose(np.asarray(attn), np.asarray(ref_attn), rtol=2e-3, atol=2e-3)

    assert out.shape == (B, L, D_MODEL)
    assert attn.shape == (N_HEAD * B, L, L)
    print("KERNEL_OK")
</pallas_src>

<mosaic_0001>
module attributes {stable_mosaic.version = 11 : i64} {
  func.func @encoder_layer_kernel(%arg0: i32, %arg1: memref<64x32xf32, #tpu.memory_space<vmem>>, %arg2: memref<32x192xf32, #tpu.memory_space<vmem>>, %arg3: memref<32x64xf32, #tpu.memory_space<vmem>>, %arg4: memref<64x32xf32, #tpu.memory_space<vmem>>, %arg5: memref<64x32xf32, #tpu.memory_space<vmem>>, %arg6: memref<64x64xf32, #tpu.memory_space<vmem>>, %arg7: memref<64x4xf32, #tpu.memory_space<vmem>>, %arg8: memref<8x192xf32, #tpu.memory_space<vmem>>, %arg9: memref<64x32xf32, #tpu.memory_space<vmem>>, %arg10: memref<512x4xf32, #tpu.memory_space<vmem>>) attributes {dimension_semantics = [#tpu.dimension_semantics<parallel>], iteration_bounds = array<i64: 2>, scalar_prefetch = 0 : i64, scratch_operands = 0 : i64, tpu.core_type = #tpu.core_type<tc>, window_params = [{transform_indices = @transform_0, window_bounds = array<i64: 64, 32>}, {pipeline_mode = #tpu.pipeline_mode<synchronous>, transform_indices = @transform_1, window_bounds = array<i64: 32, 192>}, {pipeline_mode = #tpu.pipeline_mode<synchronous>, transform_indices = @transform_2, window_bounds = array<i64: 32, 64>}, {pipeline_mode = #tpu.pipeline_mode<synchronous>, transform_indices = @transform_3, window_bounds = array<i64: 64, 32>}, {pipeline_mode = #tpu.pipeline_mode<synchronous>, transform_indices = @transform_4, window_bounds = array<i64: 64, 32>}, {pipeline_mode = #tpu.pipeline_mode<synchronous>, transform_indices = @transform_5, window_bounds = array<i64: 64, 64>}, {pipeline_mode = #tpu.pipeline_mode<synchronous>, transform_indices = @transform_6, window_bounds = array<i64: 64, 4>}, {pipeline_mode = #tpu.pipeline_mode<synchronous>, transform_indices = @transform_7, window_bounds = array<i64: 8, 192>}, {transform_indices = @transform_8, window_bounds = array<i64: 64, 32>}, {transform_indices = @transform_9, window_bounds = array<i64: 512, 4>}]} {
    %c0 = arith.constant 0 : index
    %c0_0 = arith.constant 0 : index
    %0 = vector.load %arg1[%c0, %c0_0] : memref<64x32xf32, #tpu.memory_space<vmem>>, vector<64x32xf32>
    %c0_1 = arith.constant 0 : index
    %c0_2 = arith.constant 0 : index
    %1 = vector.load %arg8[%c0_1, %c0_2] : memref<8x192xf32, #tpu.memory_space<vmem>>, vector<8x192xf32>
    %c0_3 = arith.constant 0 : index
    %c0_4 = arith.constant 0 : index
    %2 = vector.load %arg2[%c0_3, %c0_4] : memref<32x192xf32, #tpu.memory_space<vmem>>, vector<32x192xf32>
    %cst = arith.constant dense<0.000000e+00> : vector<64x192xf32>
    %3 = tpu.matmul %0, %2, %cst {dimension_numbers = #tpu.dot_dimension_numbers<[1], [0], [0], [1], [0, 0, 1, 1], [], []>} : vector<64x32xf32>, vector<32x192xf32>, vector<64x192xf32> -> vector<64x192xf32>
    %4 = vector.extract_strided_slice %1 {offsets = [0, 0], sizes = [1, 192], strides = [1, 1]} : vector<8x192xf32> to vector<1x192xf32>
    %5 = vector.broadcast %4 : vector<1x192xf32> to vector<64x192xf32>
    %6 = arith.addf %3, %5 : vector<64x192xf32>
    %7 = vector.extract_strided_slice %6 {offsets = [0, 0], sizes = [64, 64], strides = [1, 1]} : vector<64x192xf32> to vector<64x64xf32>
    %8 = vector.shape_cast %7 : vector<64x64xf32> to vector<8x8x64xf32>
    %9 = vector.extract_strided_slice %6 {offsets = [0, 64], sizes = [64, 64], strides = [1, 1]} : vector<64x192xf32> to vector<64x64xf32>
    %10 = vector.shape_cast %9 : vector<64x64xf32> to vector<8x8x64xf32>
    %11 = vector.extract_strided_slice %6 {offsets = [0, 128], sizes = [64, 64], strides = [1, 1]} : vector<64x192xf32> to vector<64x64xf32>
    %12 = vector.shape_cast %11 : vector<64x64xf32> to vector<8x8x64xf32>
    %13 = vector.shape_cast %8 : vector<8x8x64xf32> to vector<8x8x1x64xf32>
    %14 = vector.shape_cast %10 : vector<8x8x64xf32> to vector<8x1x8x64xf32>
    %15 = vector.broadcast %13 : vector<8x8x1x64xf32> to vector<8x8x8x64xf32>
    %16 = vector.broadcast %14 : vector<8x1x8x64xf32> to vector<8x8x8x64xf32>
    %17 = arith.mulf %15, %16 : vector<8x8x8x64xf32>
    %18 = vector.shape_cast %17 : vector<8x8x8x64xf32> to vector<512x64xf32>
    %c0_5 = arith.constant 0 : index
    %c0_6 = arith.constant 0 : index
    %19 = vector.load %arg6[%c0_5, %c0_6] : memref<64x64xf32, #tpu.memory_space<vmem>>, vector<64x64xf32>
    %cst_7 = arith.constant dense<0.000000e+00> : vector<512x64xf32>
    %20 = tpu.matmul %18, %19, %cst_7 {dimension_numbers = #tpu.dot_dimension_numbers<[1], [0], [0], [1], [0, 0, 1, 1], [], []>} : vector<512x64xf32>, vector<64x64xf32>, vector<512x64xf32> -> vector<512x64xf32>
    %21 = vector.shape_cast %20 : vector<512x64xf32> to vector<64x8x64xf32>
    %cst_8 = arith.constant dense<0xFF800000> : vector<64x64xf32>
    %22 = vector.multi_reduction <maximumf>, %21, %cst_8 [1] : vector<64x8x64xf32> to vector<64x64xf32>
    %23 = vector.shape_cast %22 : vector<64x64xf32> to vector<64x1x64xf32>
    %24 = vector.broadcast %23 : vector<64x1x64xf32> to vector<64x8x64xf32>
    %25 = arith.subf %21, %24 : vector<64x8x64xf32>
    %26 = math.exp %25 : vector<64x8x64xf32>
    %cst_9 = arith.constant dense<0.000000e+00> : vector<64x64xf32>
    %27 = vector.multi_reduction <add>, %26, %cst_9 [1] : vector<64x8x64xf32> to vector<64x64xf32>
    %28 = vector.shape_cast %27 : vector<64x64xf32> to vector<64x1x64xf32>
    %29 = vector.broadcast %28 : vector<64x1x64xf32> to vector<64x8x64xf32>
    %30 = arith.divf %26, %29 : vector<64x8x64xf32>
    %31 = vector.shape_cast %30 : vector<64x8x64xf32> to vector<512x64xf32>
    %c0_10 = arith.constant 0 : index
    %c0_11 = arith.constant 0 : index
    %32 = vector.load %arg7[%c0_10, %c0_11] : memref<64x4xf32, #tpu.memory_space<vmem>>, vector<64x4xf32>
    %cst_12 = arith.constant dense<0.000000e+00> : vector<512x4xf32>
    %33 = tpu.matmul %31, %32, %cst_12 {dimension_numbers = #tpu.dot_dimension_numbers<[1], [0], [0], [1], [0, 0, 1, 1], [], []>} : vector<512x64xf32>, vector<64x4xf32>, vector<512x4xf32> -> vector<512x4xf32>
    %c0_13 = arith.constant 0 : index
    %c0_14 = arith.constant 0 : index
    %34 = vector.load %arg10[%c0_13, %c0_14] : memref<512x4xf32, #tpu.memory_space<vmem>>, vector<512x4xf32>
    tpu.vector_store %arg10[%c0_13, %c0_14], %33 {strides = array<i32>} : memref<512x4xf32, #tpu.memory_space<vmem>>, vector<512x4xf32>,
    %35 = vector.shape_cast %30 : vector<64x8x64xf32> to vector<8x8x8x64xf32>
    %36 = vector.shape_cast %12 : vector<8x8x64xf32> to vector<8x1x8x64xf32>
    %37 = vector.broadcast %36 : vector<8x1x8x64xf32> to vector<8x8x8x64xf32>
    %38 = arith.mulf %35, %37 : vector<8x8x8x64xf32>
    %cst_15 = arith.constant dense<0.000000e+00> : vector<8x8x64xf32>
    %39 = vector.multi_reduction <add>, %38, %cst_15 [2] : vector<8x8x8x64xf32> to vector<8x8x64xf32>
    %40 = vector.shape_cast %39 : vector<8x8x64xf32> to vector<64x64xf32>
    %c0_16 = arith.constant 0 : index
    %c0_17 = arith.constant 0 : index
    %41 = vector.load %arg4[%c0_16, %c0_17] : memref<64x32xf32, #tpu.memory_space<vmem>>, vector<64x32xf32>
    %cst_18 = arith.constant dense<0.000000e+00> : vector<64x32xf32>
    %42 = tpu.matmul %40, %41, %cst_18 {dimension_numbers = #tpu.dot_dimension_numbers<[1], [0], [0], [1], [0, 0, 1, 1], [], []>} : vector<64x64xf32>, vector<64x32xf32>, vector<64x32xf32> -> vector<64x32xf32>
    %43 = vector.extract_strided_slice %1 {offsets = [1, 0], sizes = [1, 32], strides = [1, 1]} : vector<8x192xf32> to vector<1x32xf32>
    %44 = vector.broadcast %43 : vector<1x32xf32> to vector<64x32xf32>
    %45 = arith.addf %42, %44 : vector<64x32xf32>
    %46 = arith.addf %45, %0 : vector<64x32xf32>
    %cst_19 = arith.constant dense<0.000000e+00> : vector<64xf32>
    %47 = vector.multi_reduction <add>, %46, %cst_19 [1] : vector<64x32xf32> to vector<64xf32>
    %48 = vector.shape_cast %47 : vector<64xf32> to vector<64x1xf32>
    %cst_20 = arith.constant 3.200000e+01 : f32
    %49 = vector.broadcast %cst_20 : f32 to vector<64x1xf32>
    %50 = arith.divf %48, %49 : vector<64x1xf32>
    %51 = vector.broadcast %50 : vector<64x1xf32> to vector<64x32xf32>
    %52 = arith.subf %46, %51 : vector<64x32xf32>
    %53 = arith.mulf %52, %52 : vector<64x32xf32>
    %cst_21 = arith.constant dense<0.000000e+00> : vector<64xf32>
    %54 = vector.multi_reduction <add>, %53, %cst_21 [1] : vector<64x32xf32> to vector<64xf32>
    %55 = vector.shape_cast %54 : vector<64xf32> to vector<64x1xf32>
    %cst_22 = arith.constant 3.200000e+01 : f32
    %56 = vector.broadcast %cst_22 : f32 to vector<64x1xf32>
    %57 = arith.divf %55, %56 : vector<64x1xf32>
    %58 = vector.broadcast %50 : vector<64x1xf32> to vector<64x32xf32>
    %59 = arith.subf %46, %58 : vector<64x32xf32>
    %cst_23 = arith.constant 9.99999974E-6 : f32
    %60 = vector.broadcast %cst_23 : f32 to vector<64x1xf32>
    %61 = arith.addf %57, %60 : vector<64x1xf32>
    %62 = math.sqrt %61 : vector<64x1xf32>
    %63 = vector.broadcast %62 : vector<64x1xf32> to vector<64x32xf32>
    %64 = arith.divf %59, %63 : vector<64x32xf32>
    %65 = vector.extract_strided_slice %1 {offsets = [2, 0], sizes = [1, 32], strides = [1, 1]} : vector<8x192xf32> to vector<1x32xf32>
    %66 = vector.broadcast %65 : vector<1x32xf32> to vector<64x32xf32>
    %67 = arith.mulf %64, %66 : vector<64x32xf32>
    %68 = vector.extract_strided_slice %1 {offsets = [3, 0], sizes = [1, 32], strides = [1, 1]} : vector<8x192xf32> to vector<1x32xf32>
    %69 = vector.broadcast %68 : vector<1x32xf32> to vector<64x32xf32>
    %70 = arith.addf %67, %69 : vector<64x32xf32>
    %c0_24 = arith.constant 0 : index
    %c0_25 = arith.constant 0 : index
    %71 = vector.load %arg3[%c0_24, %c0_25] : memref<32x64xf32, #tpu.memory_space<vmem>>, vector<32x64xf32>
    %cst_26 = arith.constant dense<0.000000e+00> : vector<64x64xf32>
    %72 = tpu.matmul %70, %71, %cst_26 {dimension_numbers = #tpu.dot_dimension_numbers<[1], [0], [0], [1], [0, 0, 1, 1], [], []>} : vector<64x32xf32>, vector<32x64xf32>, vector<64x64xf32> -> vector<64x64xf32>
    %73 = vector.extract_strided_slice %1 {offsets = [4, 0], sizes = [1, 64], strides = [1, 1]} : vector<8x192xf32> to vector<1x64xf32>
    %74 = vector.broadcast %73 : vector<1x64xf32> to vector<64x64xf32>
    %75 = arith.addf %72, %74 : vector<64x64xf32>
    %cst_27 = arith.constant 0.000000e+00 : f32
    %76 = vector.broadcast %cst_27 : f32 to vector<64x64xf32>
    %77 = arith.maximumf %75, %76 : vector<64x64xf32>
    %c0_28 = arith.constant 0 : index
    %c0_29 = arith.constant 0 : index
    %78 = vector.load %arg5[%c0_28, %c0_29] : memref<64x32xf32, #tpu.memory_space<vmem>>, vector<64x32xf32>
    %cst_30 = arith.constant dense<0.000000e+00> : vector<64x32xf32>
    %79 = tpu.matmul %77, %78, %cst_30 {dimension_numbers = #tpu.dot_dimension_numbers<[1], [0], [0], [1], [0, 0, 1, 1], [], []>} : vector<64x64xf32>, vector<64x32xf32>, vector<64x32xf32> -> vector<64x32xf32>
    %80 = vector.extract_strided_slice %1 {offsets = [5, 0], sizes = [1, 32], strides = [1, 1]} : vector<8x192xf32> to vector<1x32xf32>
    %81 = vector.broadcast %80 : vector<1x32xf32> to vector<64x32xf32>
    %82 = arith.addf %79, %81 : vector<64x32xf32>
    %83 = arith.addf %82, %70 : vector<64x32xf32>
    %cst_31 = arith.constant dense<0.000000e+00> : vector<64xf32>
    %84 = vector.multi_reduction <add>, %83, %cst_31 [1] : vector<64x32xf32> to vector<64xf32>
    %85 = vector.shape_cast %84 : vector<64xf32> to vector<64x1xf32>
    %cst_32 = arith.constant 3.200000e+01 : f32
    %86 = vector.broadcast %cst_32 : f32 to vector<64x1xf32>
    %87 = arith.divf %85, %86 : vector<64x1xf32>
    %88 = vector.broadcast %87 : vector<64x1xf32> to vector<64x32xf32>
    %89 = arith.subf %83, %88 : vector<64x32xf32>
    %90 = arith.mulf %89, %89 : vector<64x32xf32>
    %cst_33 = arith.constant dense<0.000000e+00> : vector<64xf32>
    %91 = vector.multi_reduction <add>, %90, %cst_33 [1] : vector<64x32xf32> to vector<64xf32>
    %92 = vector.shape_cast %91 : vector<64xf32> to vector<64x1xf32>
    %cst_34 = arith.constant 3.200000e+01 : f32
    %93 = vector.broadcast %cst_34 : f32 to vector<64x1xf32>
    %94 = arith.divf %92, %93 : vector<64x1xf32>
    %95 = vector.broadcast %87 : vector<64x1xf32> to vector<64x32xf32>
    %96 = arith.subf %83, %95 : vector<64x32xf32>
    %cst_35 = arith.constant 9.99999974E-6 : f32
    %97 = vector.broadcast %cst_35 : f32 to vector<64x1xf32>
    %98 = arith.addf %94, %97 : vector<64x1xf32>
    %99 = math.sqrt %98 : vector<64x1xf32>
    %100 = vector.broadcast %99 : vector<64x1xf32> to vector<64x32xf32>
    %101 = arith.divf %96, %100 : vector<64x32xf32>
    %102 = vector.extract_strided_slice %1 {offsets = [6, 0], sizes = [1, 32], strides = [1, 1]} : vector<8x192xf32> to vector<1x32xf32>
    %103 = vector.broadcast %102 : vector<1x32xf32> to vector<64x32xf32>
    %104 = arith.mulf %101, %103 : vector<64x32xf32>
    %105 = vector.extract_strided_slice %1 {offsets = [7, 0], sizes = [1, 32], strides = [1, 1]} : vector<8x192xf32> to vector<1x32xf32>
    %106 = vector.broadcast %105 : vector<1x32xf32> to vector<64x32xf32>
    %107 = arith.addf %104, %106 : vector<64x32xf32>
    %c0_36 = arith.constant 0 : index
    %c0_37 = arith.constant 0 : index
    %108 = vector.load %arg9[%c0_36, %c0_37] : memref<64x32xf32, #tpu.memory_space<vmem>>, vector<64x32xf32>
    tpu.vector_store %arg9[%c0_36, %c0_37], %107 {strides = array<i32>} : memref<64x32xf32, #tpu.memory_space<vmem>>, vector<64x32xf32>,
    return
  }
  func.func @transform_0(%arg0: i32) -> (i32, i32) {
    %c0_i32 = arith.constant 0 : i32
    %c0_i32_0 = arith.constant 0 : i32
    return %arg0, %c0_i32 : i32, i32
  }
  func.func @transform_1(%arg0: i32) -> (i32, i32) {
    %c0_i32 = arith.constant 0 : i32
    %c0_i32_0 = arith.constant 0 : i32
    %c0_i32_1 = arith.constant 0 : i32
    return %c0_i32, %c0_i32_0 : i32, i32
  }
  func.func @transform_2(%arg0: i32) -> (i32, i32) {
    %c0_i32 = arith.constant 0 : i32
    %c0_i32_0 = arith.constant 0 : i32
    %c0_i32_1 = arith.constant 0 : i32
    return %c0_i32, %c0_i32_0 : i32, i32
  }
  func.func @transform_3(%arg0: i32) -> (i32, i32) {
    %c0_i32 = arith.constant 0 : i32
    %c0_i32_0 = arith.constant 0 : i32
    %c0_i32_1 = arith.constant 0 : i32
    return %c0_i32, %c0_i32_0 : i32, i32
  }
  func.func @transform_4(%arg0: i32) -> (i32, i32) {
    %c0_i32 = arith.constant 0 : i32
    %c0_i32_0 = arith.constant 0 : i32
    %c0_i32_1 = arith.constant 0 : i32
    return %c0_i32, %c0_i32_0 : i32, i32
  }
  func.func @transform_5(%arg0: i32) -> (i32, i32) {
    %c0_i32 = arith.constant 0 : i32
    %c0_i32_0 = arith.constant 0 : i32
    %c0_i32_1 = arith.constant 0 : i32
    return %c0_i32, %c0_i32_0 : i32, i32
  }
  func.func @transform_6(%arg0: i32) -> (i32, i32) {
    %c0_i32 = arith.constant 0 : i32
    %c0_i32_0 = arith.constant 0 : i32
    %c0_i32_1 = arith.constant 0 : i32
    return %c0_i32, %c0_i32_0 : i32, i32
  }
  func.func @transform_7(%arg0: i32) -> (i32, i32) {
    %c0_i32 = arith.constant 0 : i32
    %c0_i32_0 = arith.constant 0 : i32
    %c0_i32_1 = arith.constant 0 : i32
    return %c0_i32, %c0_i32_0 : i32, i32
  }
  func.func @transform_8(%arg0: i32) -> (i32, i32) {
    %c0_i32 = arith.constant 0 : i32
    %c0_i32_0 = arith.constant 0 : i32
    return %arg0, %c0_i32 : i32, i32
  }
  func.func @transform_9(%arg0: i32) -> (i32, i32) {
    %c0_i32 = arith.constant 0 : i32
    %c0_i32_0 = arith.constant 0 : i32
    return %arg0, %c0_i32 : i32, i32
  }
}

</mosaic_0001>

<bundles_post_ra>
// kernel: encoder_layer_selfattn.1
= control target key start
LH: loop header
LB: loop body
LE: loop exit
PB: predicated region body
PF: predicated region fallthrough
CT: control target
= control target key end

     0   :  { %15 = vsyncpa [#allocation3], 0  ;;  %s9743_s0 = inlined_call_operand.vmem [shape: f32[128,32], index: 0, kind: input, shape index: {}]   ;;  %s9744_s1 = inlined_call_operand.vmem [shape: f32[32,192], index: 1, kind: input, shape index: {}]   ;;  %s9745_s2 = inlined_call_operand.vmem [shape: f32[32,64], index: 2, kind: input, shape index: {}]   ;;  %s9746_s3 = inlined_call_operand.vmem [shape: f32[64,32], index: 3, kind: input, shape index: {}]   ;;  %s9747_s4 = inlined_call_operand.vmem [shape: f32[64,32], index: 4, kind: input, shape index: {}]   ;;  %s9748_s5 = inlined_call_operand.hbm [shape: f32[64,64], index: 5, kind: input, shape index: {}]   ;;  %s9749_s6 = inlined_call_operand.vmem [shape: f32[64,4], index: 6, kind: input, shape index: {}]   ;;  %s9750_s7 = inlined_call_operand.hbm [shape: f32[8,192], index: 7, kind: input, shape index: {}]   ;;  %s9751_s8 = inlined_call_operand.hbm [shape: f32[128,32], index: 8, kind: output, shape index: {0}]   ;;  %s9752_s9 = inlined_call_operand.vmem [shape: f32[1024,4], index: 9, kind: output, shape index: {1}]  }
   0x1   :  { %16 = vsyncpa [#allocation6], 0 }
   0x2   :  { %17 = vsyncpa [#allocation4], 0 }
   0x3   :  { %19 = vsyncpa [#allocation4 + $0x1], 0  ;;  %s6180_s30 = smov 0   ;;  %s6182_s10 = smov 0  }
   0x4   :  { %s6184_s11 = smov 0   ;;  %s6186_s12 = smov 0  }
   0x5 LB: > { %s6201_s13 = sadd.s32 4294967295, %s6120_s12   ;;  %s5385_s14 = sadd.s32 4294967294, %s6120_s12   ;;  %s6120_s12 = sphi %s6186_s12, %s9903_s12   ;;  %s6116_s11 = sphi %s6184_s11, %s9902_s11   ;;  %s6112_s10 = sphi %s6182_s10, %s9901_s10   ;;  %s6108_s30 = sphi %s6180_s30, %s9900_s30  }
   0x6   : > { %s6205_s15 = sadd.s32 1, %s6120_s12   ;;  %s205_s16 = sadd.s32 1, %s6116_s11 }
   0x7   : > { %s202_s17 = ssub.s32 %s6120_s12, %s6205_s15  ;;  %p215_p0 = scmp.ne.s32.totalorder %s6116_s11, %s6112_s10 }
   0x8   : > { %p203_p1 = scmp.eq.s32.totalorder %s202_s17, 0  ;;  %p216_p2 = scmp.eq.s32.totalorder %s6201_s13, 1 }
   0x9   : > { %p221_p3 = scmp.ne.s32.totalorder %s6112_s10, %s6108_s30  ;;  %p222_p4 = scmp.eq.s32.totalorder %s5385_s14, 1 }
   0xa   : > { %s6216_s18 = scalar_select %p203_p1, %s6116_s11, %s205_s16  }
   0xb   : > { %p6218_p5 = por %p216_p2, %p215_p0  ;;  %p6222_p6 = por %p222_p4, %p221_p3 }
   0xc   : > { %p5386_p7 = scmp.ge.s32.totalorder %s6120_s12, 1  ;;  %p255_p8 = scmp.lt.s32.totalorder %s6120_s12, 3 }
   0xd   : > { %p5613_p9 = scmp.eq.s32.totalorder %s6201_s13, 0  ;;  %s278_s24 = sshll.u32 %s9748_s5, 4  ;;  %s279_s24 = int_to_ptr.hbm [resolvable:$true] %s278_s24 }
   0xe   : > { %p6229_p10 = pnand %p5386_p7, %p255_p8  ;;  %s6122_s25 = smov [#allocation2]  }
   0xf   : > { %s280_s26 = sshll.u32 %s6122_s25, 4  ;;  %s296_s29 = sshll.u32 %s9750_s7, 4  ;;  %s281_s26 = int_to_ptr.vmem [resolvable:$true] %s280_s26  ;;  %s297_s29 = int_to_ptr.hbm [resolvable:$true] %s296_s29 }
  0x10   : > { %p5602_p11 = pneg %p6229_p10  ;;  %s6123_s14 = smov 128  }
  0x11   : > { %s6124_s16 = smov 8   ;;  %s6125_s17 = smov [#allocation5]  }
  0x12   : > { %p5603_p12 = pnand %p5613_p9, %p5602_p11  ;;  %s298_s22 = sshll.u32 %s6125_s17, 4  ;;  %s299_s22 = int_to_ptr.vmem [resolvable:$true] %s298_s22 }
  0x13   : > { %320 = sbr.rel (%p6229_p10) target bundleno = 2085 (0x825), region = 52 }
  0x14   : > { %5605 = dma.hbm_to_vmem [thread:$0]  (!%p5603_p12), %s279_s24, 1024, %s281_s26, [#allocation3], %s6123_s14, %s6123_s14, %s6124_s16  }
  0x15   : > { %5608 = dma.hbm_to_vmem [thread:$0]  (!%p5603_p12), %s297_s29, 256, %s299_s22, [#allocation6]  }
  0x18   : > { %6095 = dma.done.wait (%p5613_p9), [#allocation3], 1024  }
  0x19   : > { %6097 = vsyncadd (%p5613_p9), [#allocation3], 4294966272 }
  0x1a   : > { %6099 = dma.done.wait (%p5613_p9), [#allocation6], 256  }
  0x1b   : > { %6101 = vsyncadd (%p5613_p9), [#allocation6], 4294967040  ;;  %s5394_s23 = sshll.u32 %s6201_s13, 3  ;;  %v396_v0 = vld [vmem:[%s9744_s1 + $0x30] sm:$0xff]  ;;  %v394_v1 = vld [vmem:[%s9744_s1 + $0x20] sm:$0xff]  ;;  %vm400_vm0 = vcmask 261120  }
  0x1c   : > { %p368_p13 = scmp.lt.s32.totalorder %s5394_s23, 15  ;;  %437 = vmatpush.msra.mxu0 %v396_v0  ;;  %5572 = vmatpush.msra.mxu1 %v396_v0  ;;  %v392_v2 = vld [vmem:[%s9744_s1 + $0x10] sm:$0xff]  ;;  %v390_v3 = vld [vmem:[%s9744_s1] sm:$0xff]  ;;  %v397_v19 = vld [vmem:[%s9744_s1 + $0x38] sm:$0xff]  ;;  %vm795_vm1 = vcmask 523264   ;;  %s7904_s21 = sshll.u32 %s6201_s13, 6 }
  0x1d   : > { %v388_v12 = vld [vmem:[#allocation5] sm:$0xff]  ;;  %v395_v20 = vld [vmem:[%s9744_s1 + $0x28] sm:$0xff]  ;;  %v393_v21 = vld [vmem:[%s9744_s1 + $0x18] sm:$0xff]  ;;  %p375_p0 = scmp.lt.s32.totalorder %s7904_s21, 127 }
  0x1e   : > { %s9905_s23 = smov (!%p368_p13, %s5394_s23), 15  ;;  %438 = vmatpush.msra.mxu0 %v394_v1  ;;  %5573 = vmatpush.msra.mxu1 %v394_v1  ;;  %v398_v13 = vperm.slane %v388_v12, 0  ;;  %v391_v29 = vld [vmem:[%s9744_s1 + $0x8] sm:$0xff]  ;;  %v794_v31 = vld [vmem:[#allocation2 + $0x38] sm:$0xff]  ;;  %v793_v33 = vld [vmem:[#allocation2 + $0x30] sm:$0xff] }
  0x1f   : > { %s5395_s24 = sshll.u32 %s9905_s23, 3  ;;  %5576 = vmatpush.msra.mxu2 %v794_v31  ;;  %v792_v34 = vld [vmem:[#allocation2 + $0x28] sm:$0xff]  ;;  %v791_v35 = vld [vmem:[#allocation2 + $0x20] sm:$0xff]  ;;  %v790_v36 = vld [vmem:[#allocation2 + $0x18] sm:$0xff] }
  0x20   : > { %s6266_s17 = scalar_lea.vmem %s9743_s0, %s5395_s24  ;;  %439 = vmatpush.msra.mxu0 %v392_v2  ;;  %5574 = vmatpush.msra.mxu1 %v392_v2  ;;  %s6126_s24 = smov 64   ;;  %v789_v39 = vld [vmem:[#allocation2 + $0x10] sm:$0xff]  ;;  %v788_v40 = vld [vmem:[#allocation2 + $0x8] sm:$0xff]  ;;  %v787_v41 = vld [vmem:[#allocation2] sm:$0xff] }
  0x21   : > { %v380_v4 = vld [vmem:[%s6266_s17] sm:$0xff]  ;;  %v6273_v5 = vld [vmem:[%s6266_s17 + $0x28] sm:$0xff]  ;;  %v6280_v7 = vld [vmem:[%s6266_s17 + $0x30] sm:$0xff]  ;;  %5577 = vmatpush.msra.mxu2 %v793_v33  ;;  %s7945_s13 = scalar_select %p375_p0, %s7904_s21, 127 }
  0x22   : > { %440 = vmatpush.msra.mxu0 %v390_v3  ;;  %5575 = vmatpush.msra.mxu1 %v390_v3  ;;  %v381_v6 = vld [vmem:[%s6266_s17 + $0x8] sm:$0xff]  ;;  %v382_v8 = vld [vmem:[%s6266_s17 + $0x10] sm:$0xff]  ;;  %v6287_v9 = vld [vmem:[%s6266_s17 + $0x38] sm:$0xff] }
  0x23   : > { %5398 = vmatmul.msk.f32.vlgmr.msra.gmra.mxu0 %vm400_vm0, %v380_v4  ;;  %5403 = vmatmul.msk.f32.vlgmr.msra.gmra.mxu1 %vm400_vm0, %v6273_v5  ;;  %v6293_v10 = vld [vmem:[%s6266_s17 + $0x18] sm:$0xff]  ;;  %v384_v11 = vld [vmem:[%s6266_s17 + $0x20] sm:$0xff]  ;;  %s5397_s26 = sshll.u32 %s7945_s13, 3 }
  0x24   : > { %478 = vmatpush.msrb.mxu1 %v397_v19  ;;  %5578 = vmatpush.msra.mxu2 %v792_v34  ;;  %s7979_s29 = scalar_lea.vmem %s9752_s9, %s5397_s26 }
  0x26   : > { %479 = vmatpush.msrb.mxu1 %v395_v20  ;;  %5579 = vmatpush.msra.mxu2 %v791_v35 }
  0x28   : > { %480 = vmatpush.msrb.mxu1 %v393_v21  ;;  %5580 = vmatpush.msra.mxu2 %v790_v36 }
  0x2a   : > { %481 = vmatpush.msrb.mxu1 %v391_v29  ;;  %5581 = vmatpush.msra.mxu2 %v789_v39 }
  0x2b   : > { %5399 = vmatmul.msk.f32.gmra.mxu0 %vm400_vm0, %v381_v6  ;;  %5404 = vmatmul.msk.f32.gmra.mxu1 %vm400_vm0, %v6280_v7 }
  0x2c   : > { %996 = vmatpush.msra.mxu1 %v794_v31  ;;  %5582 = vmatpush.msra.mxu2 %v788_v40 }
  0x2e   : > { %997 = vmatpush.msra.mxu1 %v793_v33  ;;  %5583 = vmatpush.msra.mxu2 %v787_v41 }
  0x30   : > { %998 = vmatpush.msra.mxu1 %v792_v34 }
  0x32   : > { %999 = vmatpush.msra.mxu1 %v791_v35 }
  0x33   : > { %5400 = vmatmul.msk.f32.gmra.mxu0 %vm400_vm0, %v382_v8  ;;  %5405 = vmatmul.msk.f32.gmra.mxu1 %vm400_vm0, %v6287_v9 }
  0x34   : > { %1000 = vmatpush.msra.mxu1 %v790_v36 }
  0x36   : > { %1001 = vmatpush.msra.mxu1 %v789_v39 }
  0x38   : > { %1002 = vmatpush.msra.mxu1 %v788_v40 }
  0x3a   : > { %1003 = vmatpush.msra.mxu1 %v787_v41 }
  0x3b   : > { %5401 = vmatmul.msk.f32.gmra.mxu0 %vm400_vm0, %v6293_v10  ;;  %5406 = vmatmul.msk.f32.vlgmr.msrb.gmra.mxu1 %vm400_vm0, %v380_v4 }
  0x43   : > { %5402 = vmatmul.msk.f32.gmra.mxu0 %vm400_vm0, %v384_v11  ;;  %5407 = vmatmul.msk.f32.gmra.mxu1 %vm400_vm0, %v381_v6 }
  0x4b   : > { %5408 = vmatmul.msk.f32.gmra.mxu1 %vm400_vm0, %v382_v8 }
  0x53   : > { %5409 = vmatmul.msk.f32.gmra.mxu1 %vm400_vm0, %v6293_v10 }
  0x5b   : > { %5410 = vmatmul.msk.f32.gmra.mxu1 %vm400_vm0, %v384_v11 }
  0x63   : > { %5411 = vmatmul.msk.f32.gmra.mxu1 %vm400_vm0, %v6273_v5 }
  0x6b   : > { %5412 = vmatmul.msk.f32.gmra.mxu1 %vm400_vm0, %v6280_v7 }
  0x73   : > { %5413 = vmatmul.msk.f32.gmra.mxu1 %vm400_vm0, %v6287_v9 }
  0xa0   : > { %v442_v14 = vpop.f32.mrf.mxu0  ;;  %v457_v15 = vpop.f32.mrf.mxu1 }
  0xa1   : > { %v6299_v16 = vadd.f32 %v457_v15, %v398_v13  ;;  %v6328_v28 = vadd.f32 %v442_v14, %v398_v13 }
  0xa3   : > { %709 = vrot.lane.b32.xlu2 %v6299_v16, %s6126_s24  ;;  %v571_v35 = vperm.slane %v6328_v28, 0  ;;  %v515_v41 = vrot.slane %v6328_v28, 1 }
  0xa8   : > { %v445_v17 = vpop.f32.mrf.mxu0  ;;  %v460_v30 = vpop.f32.mrf.mxu1 }
  0xa9   : > { %v6303_v18 = vadd.f32 %v445_v17, %v398_v13  ;;  %v6336_v32 = vadd.f32 %v460_v30, %v398_v13 }
  0xab   : > { %701 = vrot.lane.b32.xlu2 %v6303_v18, %s6126_s24 }
  0xb0   : > { %v448_v22 = vpop.f32.mrf.mxu0  ;;  %v463_v37 = vpop.f32.mrf.mxu1 }
  0xb1   : > { %v6316_v23 = vadd.f32 %v448_v22, %v398_v13  ;;  %v6341_v38 = vadd.f32 %v463_v37, %v398_v13 }
  0xb3   : > { %703 = vrot.lane.b32.xlu0 %v6316_v23, %s6126_s24  ;;  %v534_v42 = vrot.slane %v6316_v23, 6  ;;  %v529_v43 = vrot.slane %v6316_v23, 1  ;;  %v530_v44 = vrot.slane %v6316_v23, 2  ;;  %v531_v45 = vrot.slane %v6316_v23, 3 }
  0xb4   : > { %v532_v46 = vrot.slane %v6316_v23, 4  ;;  %v533_v47 = vrot.slane %v6316_v23, 5  ;;  %v587_v49 = vperm.slane %v6316_v23, 0  ;;  %v535_v63 = vrot.slane %v6316_v23, 7 }
  0xb5   : > { %v593_v48 = vperm.slane %v534_v42, 0  ;;  %v588_v50 = vperm.slane %v529_v43, 0  ;;  %v589_v51 = vperm.slane %v530_v44, 0  ;;  %v590_v53 = vperm.slane %v531_v45, 0 }
  0xb6   : > { %v591_v54 = vperm.slane %v532_v46, 0  ;;  %v592_v55 = vperm.slane %v533_v47, 0  ;;  %v594_v0 = vperm.slane %v535_v63, 0  ;;  %v572_v43 = vperm.slane %v515_v41, 0 }
  0xb7   : > { %v516_v47 = vrot.slane %v6328_v28, 2 }
  0xb8   : > { %v451_v24 = vpop.f32.mrf.mxu0 }
  0xb9   : > { %v6320_v25 = vadd.f32 %v451_v24, %v398_v13 }
  0xbb   : > { %705 = vrot.lane.b32.xlu0 %v6320_v25, %s6126_s24  ;;  %v595_v10 = vperm.slane %v6320_v25, 0  ;;  %v536_v34 = vrot.slane %v6320_v25, 1  ;;  %v537_v42 = vrot.slane %v6320_v25, 2 }
  0xbd   : > { %v596_v36 = vperm.slane %v536_v34, 0  ;;  %v597_v44 = vperm.slane %v537_v42, 0  ;;  %v521_v34 = vrot.slane %v6328_v28, 7 }
  0xc0   : > { %v454_v26 = vpop.f32.mrf.mxu0 }
  0xc1   : > { %v6324_v27 = vadd.f32 %v454_v26, %v398_v13 }
  0xc3   : > { %707 = vrot.lane.b32.xlu1 %v6324_v27, %s6126_s24  ;;  %711 = vrot.lane.b32.xlu0 %v6336_v32, %s6126_s24  ;;  %v543_v2 = vrot.slane %v6324_v27, 1  ;;  %v544_v3 = vrot.slane %v6324_v27, 2  ;;  %v545_v4 = vrot.slane %v6324_v27, 3  ;;  %v546_v5 = vrot.slane %v6324_v27, 4 }
  0xc4   : > { %v547_v6 = vrot.slane %v6324_v27, 5  ;;  %v548_v7 = vrot.slane %v6324_v27, 6  ;;  %v549_v8 = vrot.slane %v6324_v27, 7  ;;  %v603_v11 = vperm.slane %v6324_v27, 0 }
  0xc5   : > { %v604_v12 = vperm.slane %v543_v2, 0  ;;  %v605_v13 = vperm.slane %v544_v3, 0  ;;  %v606_v14 = vperm.slane %v545_v4, 0  ;;  %v607_v15 = vperm.slane %v546_v5, 0 }
  0xc6   : > { %v608_v20 = vperm.slane %v547_v6, 0  ;;  %v609_v21 = vperm.slane %v548_v7, 0  ;;  %v610_v22 = vperm.slane %v549_v8, 0  ;;  %v540_v2 = vrot.slane %v6320_v25, 5 }
  0xc7   : > { %v519_v7 = vrot.slane %v6328_v28, 5  ;;  %v541_v8 = vrot.slane %v6320_v25, 6 }
  0xc8   : > { %v600_v4 = vperm.slane %v540_v2, 0 }
  0xcb   : > { %699 = vrot.lane.b32.xlu1 %v6328_v28, %s6126_s24 }
  0xd3   : > { %713 = vrot.lane.b32.xlu1 %v6341_v38, %s6126_s24 }
 0x125   : > { %v704_v52 = vpop.permute.xlu0 %703 }
 0x126   : > { %v745_v56 = vmul.f32 %v704_v52, %v593_v48  ;;  %v6362_v57 = vmul.f32 %v704_v52, %v587_v49  ;;  %v6364_v58 = vmul.f32 %v704_v52, %v588_v50  ;;  %v6366_v59 = vmul.f32 %v704_v52, %v589_v51 }
 0x127   : > { %v6368_v60 = vmul.f32 %v704_v52, %v590_v53  ;;  %v6370_v61 = vmul.f32 %v704_v52, %v591_v54  ;;  %v6372_v62 = vmul.f32 %v704_v52, %v592_v55  ;;  %v746_v1 = vmul.f32 %v704_v52, %v594_v0 }
 0x128   : > { %5436 = vmatmul.msk.f32.vlgmr.msra.gmra.mxu2 %vm795_vm1, %v745_v56  ;;  %v538_v48 = vrot.slane %v6320_v25, 3  ;;  %v573_v49 = vperm.slane %v516_v47, 0  ;;  %v517_v53 = vrot.slane %v6328_v28, 3  ;;  %v539_v54 = vrot.slane %v6320_v25, 4 }
 0x12a   : > { %v598_v50 = vperm.slane %v538_v48, 0  ;;  %v574_v55 = vperm.slane %v517_v53, 0  ;;  %v599_v56 = vperm.slane %v539_v54, 0 }
 0x12d   : > { %v6384_v9 = vpop.permute.xlu0 %705 }
 0x12e   : > { %v747_v19 = vmul.f32 %v6384_v9, %v595_v10  ;;  %v748_v40 = vmul.f32 %v6384_v9, %v596_v36  ;;  %v749_v46 = vmul.f32 %v6384_v9, %v597_v44  ;;  %v750_v52 = vmul.f32 %v6384_v9, %v598_v50 }
 0x12f   : > { %v751_v0 = vmul.f32 %v6384_v9, %v599_v56  ;;  %v752_v6 = vmul.f32 %v6384_v9, %v600_v4  ;;  %v576_v10 = vperm.slane %v519_v7, 0  ;;  %v578_v36 = vperm.slane %v521_v34, 0  ;;  %v3251_v34 = vld [vmem:[%s9749_s6 + $0x30] sm:$0xff] }
 0x130   : > { %5437 = vmatmul.msk.f32.gmra.mxu2 %vm795_vm1, %v746_v1  ;;  %v518_v1 = vrot.slane %v6328_v28, 4 }
 0x132   : > { %v575_v3 = vperm.slane %v518_v1, 0 }
 0x135   : > { %v708_v17 = vpop.permute.xlu1 %707 }
 0x136   : > { %v6389_v23 = vmul.f32 %v708_v17, %v603_v11  ;;  %v6391_v24 = vmul.f32 %v708_v17, %v604_v12  ;;  %v6393_v26 = vmul.f32 %v708_v17, %v605_v13  ;;  %v6395_v29 = vmul.f32 %v708_v17, %v606_v14 }
 0x137   : > { %v6397_v30 = vmul.f32 %v708_v17, %v607_v15  ;;  %v6399_v27 = vmul.f32 %v708_v17, %v608_v20  ;;  %v6401_v31 = vmul.f32 %v708_v17, %v609_v21  ;;  %v6403_v33 = vmul.f32 %v708_v17, %v610_v22  ;;  %v6438_v20 = vpop.f32.mrf.mxu1 }
 0x138   : > { %5438 = vmatmul.msk.f32.gmra.mxu2 %vm795_vm1, %v747_v19  ;;  %v601_v11 = vperm.slane %v541_v8, 0  ;;  %v520_v14 = vrot.slane %v6328_v28, 6  ;;  %v542_v15 = vrot.slane %v6320_v25, 7  ;;  %v522_v28 = vrot.slane %v6303_v18, 1 }
 0x13a   : > { %v753_v13 = vmul.f32 %v6384_v9, %v601_v11  ;;  %v577_v17 = vperm.slane %v520_v14, 0  ;;  %v602_v19 = vperm.slane %v542_v15, 0  ;;  %v550_v15 = vrot.slane %v6299_v16, 1 }
 0x13c   : > { %v754_v22 = vmul.f32 %v6384_v9, %v602_v19  ;;  %v579_v9 = vperm.slane %v6303_v18, 0 }
 0x13d   : > { %v700_v37 = vpop.permute.xlu1 %699 }
 0x13e   : > { %v723_v39 = vmul.f32 %v700_v37, %v571_v35  ;;  %v724_v45 = vmul.f32 %v700_v37, %v572_v43  ;;  %v725_v51 = vmul.f32 %v700_v37, %v573_v49  ;;  %v726_v63 = vmul.f32 %v700_v37, %v574_v55  ;;  %v6444_v35 = vpop.permute.xlu2 %709 }
 0x13f   : > { %v727_v5 = vmul.f32 %v700_v37, %v575_v3  ;;  %v728_v12 = vmul.f32 %v700_v37, %v576_v10  ;;  %v729_v21 = vmul.f32 %v700_v37, %v577_v17  ;;  %v528_v3 = vrot.slane %v6303_v18, 7 }
 0x140   : > { %5414 = vmatmul.msk.f32.vlgmr.msra.gmra.mxu1 %vm795_vm1, %v723_v39  ;;  %5439 = vmatmul.msk.f32.gmra.mxu2 %vm795_vm1, %v748_v40  ;;  %v730_v39 = vmul.f32 %v700_v37, %v578_v36  ;;  %v6446_v40 = vpop.f32.mrf.mxu1  ;;  %v580_v37 = vperm.slane %v522_v28, 0 }
 0x141   : > { %v586_v10 = vperm.slane %v528_v3, 0 }
 0x146   : > { %v702_v25 = vpop.permute.xlu2 %701 }
 0x147   : > { %v731_v41 = vmul.f32 %v702_v25, %v579_v9  ;;  %v732_v43 = vmul.f32 %v702_v25, %v580_v37 }
 0x148   : > { %5415 = vmatmul.msk.f32.gmra.mxu1 %vm795_vm1, %v724_v45  ;;  %5440 = vmatmul.msk.f32.gmra.mxu2 %vm795_vm1, %v749_v46  ;;  %v6456_v42 = vpop.f32.mrf.mxu1 }
 0x150   : > { %5416 = vmatmul.msk.f32.gmra.mxu1 %vm795_vm1, %v725_v51  ;;  %5441 = vmatmul.msk.f32.gmra.mxu2 %vm795_vm1, %v750_v52  ;;  %v6462_v44 = vpop.f32.mrf.mxu1 }
 0x158   : > { %5417 = vmatmul.msk.f32.gmra.mxu1 %vm795_vm1, %v726_v63  ;;  %5442 = vmatmul.msk.f32.gmra.mxu2 %vm795_vm1, %v751_v0  ;;  %v6468_v48 = vpop.f32.mrf.mxu1 }
 0x160   : > { %5418 = vmatmul.msk.f32.gmra.mxu1 %vm795_vm1, %v727_v5  ;;  %5443 = vmatmul.msk.f32.gmra.mxu2 %vm795_vm1, %v752_v6  ;;  %v6474_v52 = vpop.f32.mrf.mxu1 }
 0x168   : > { %5419 = vmatmul.msk.f32.gmra.mxu1 %vm795_vm1, %v728_v12  ;;  %5444 = vmatmul.msk.f32.gmra.mxu2 %vm795_vm1, %v753_v13  ;;  %v6484_v55 = vpop.f32.mrf.mxu1  ;;  %v738_v13 = vmul.f32 %v702_v25, %v586_v10 }
 0x170   : > { %5420 = vmatmul.msk.f32.gmra.mxu1 %vm795_vm1, %v729_v21  ;;  %5445 = vmatmul.msk.f32.gmra.mxu2 %vm795_vm1, %v754_v22  ;;  %v6492_v7 = vpop.f32.mrf.mxu1  ;;  %v612_v22 = vperm.slane %v550_v15, 0 }
 0x171   : > { %9785 = vst [vmem:[#allocation11_spill] sm:$0xff] %v6492_v7 }
 0x178   : > { %5421 = vmatmul.msk.f32.gmra.mxu1 %vm795_vm1, %v730_v39  ;;  %5446 = vmatmul.msk.f32.gmra.mxu2 %vm795_vm1, %v6389_v23  ;;  %v523_v23 = vrot.slane %v6303_v18, 2 }
 0x17a   : > { %v581_v45 = vperm.slane %v523_v23, 0 }
 0x17c   : > { %v733_v46 = vmul.f32 %v702_v25, %v581_v45  ;;  %v764_v45 = vmul.f32 %v6444_v35, %v612_v22 }
 0x180   : > { %5422 = vmatmul.msk.f32.gmra.mxu1 %vm795_vm1, %v731_v41  ;;  %5447 = vmatmul.msk.f32.gmra.mxu2 %vm795_vm1, %v6391_v24  ;;  %v524_v24 = vrot.slane %v6303_v18, 3  ;;  %v3250_v41 = vld [vmem:[%s9749_s6 + $0x28] sm:$0xff] }
 0x182   : > { %v582_v47 = vperm.slane %v524_v24, 0  ;;  %v3249_v24 = vld [vmem:[%s9749_s6 + $0x20] sm:$0xff] }
 0x184   : > { %v734_v49 = vmul.f32 %v702_v25, %v582_v47 }
 0x188   : > { %5423 = vmatmul.msk.f32.gmra.mxu1 %vm795_vm1, %v732_v43  ;;  %5448 = vmatmul.msk.f32.gmra.mxu2 %vm795_vm1, %v6393_v26  ;;  %v525_v26 = vrot.slane %v6303_v18, 4 }
 0x18a   : > { %v583_v50 = vperm.slane %v525_v26, 0 }
 0x18c   : > { %v735_v51 = vmul.f32 %v702_v25, %v583_v50 }
 0x190   : > { %5424 = vmatmul.msk.f32.gmra.mxu1 %vm795_vm1, %v733_v46  ;;  %5449 = vmatmul.msk.f32.gmra.mxu2 %vm795_vm1, %v6395_v29  ;;  %v526_v29 = vrot.slane %v6303_v18, 5  ;;  %v551_v46 = vrot.slane %v6299_v16, 2 }
 0x192   : > { %v584_v53 = vperm.slane %v526_v29, 0  ;;  %v3248_v29 = vld [vmem:[%s9749_s6 + $0x18] sm:$0xff] }
 0x194   : > { %v736_v54 = vmul.f32 %v702_v25, %v584_v53 }
 0x198   : > { %5425 = vmatmul.msk.f32.gmra.mxu1 %vm795_vm1, %v734_v49  ;;  %5450 = vmatmul.msk.f32.gmra.mxu2 %vm795_vm1, %v6397_v30  ;;  %v527_v30 = vrot.slane %v6303_v18, 6  ;;  %v3252_v18 = vld [vmem:[%s9749_s6 + $0x38] sm:$0xff] }
 0x199   : > { %5584 = vmatpush.msra.mxu3 %v3252_v18  ;;  %3453 = vmatpush.msrb.mxu0 %v3252_v18 }
 0x19a   : > { %v585_v0 = vperm.slane %v527_v30, 0 }
 0x19b   : > { %5585 = vmatpush.msra.mxu3 %v3251_v34  ;;  %3454 = vmatpush.msrb.mxu0 %v3251_v34 }
 0x19c   : > { %v737_v2 = vmul.f32 %v702_v25, %v585_v0 }
 0x19d   : > { %5586 = vmatpush.msra.mxu3 %v3250_v41  ;;  %3455 = vmatpush.msrb.mxu0 %v3250_v41 }
 0x19f   : > { %5587 = vmatpush.msra.mxu3 %v3249_v24  ;;  %3456 = vmatpush.msrb.mxu0 %v3249_v24 }
 0x1a0   : > { %5426 = vmatmul.msk.f32.gmra.mxu1 %vm795_vm1, %v735_v51  ;;  %5451 = vmatmul.msk.f32.gmra.mxu2 %vm795_vm1, %v6399_v27 }
 0x1a1   : > { %5588 = vmatpush.msra.mxu3 %v3248_v29  ;;  %3457 = vmatpush.msrb.mxu0 %v3248_v29 }
 0x1a8   : > { %5427 = vmatmul.msk.f32.gmra.mxu1 %vm795_vm1, %v736_v54  ;;  %5452 = vmatmul.msk.f32.gmra.mxu2 %vm795_vm1, %v6401_v31  ;;  %v611_v31 = vperm.slane %v6299_v16, 0  ;;  %v613_v54 = vperm.slane %v551_v46, 0 }
 0x1aa   : > { %v763_v14 = vmul.f32 %v6444_v35, %v611_v31 }
 0x1ab   : > { %v1071_v56 = vpop.f32.mrf.mxu2 }
 0x1ac   : > { %v1351_v63 = vsel %vm795_vm1, %v1071_v56, -inf }
 0x1ad   : > { %v1352_v1 = vrot.slane %v1351_v63, 4 }
 0x1af   : > { %v1353_v27 = vmax.f32 %v1351_v63, %v1352_v1 }
 0x1b0   : > { %5428 = vmatmul.msk.f32.gmra.mxu1 %vm795_vm1, %v737_v2  ;;  %5453 = vmatmul.msk.f32.gmra.mxu2 %vm795_vm1, %v6403_v33 }
 0x1b1   : > { %v1354_v4 = vrot.slane %v1353_v27, 2 }
 0x1b3   : > { %v1355_v5 = vmax.f32 %v1353_v27, %v1354_v4  ;;  %v1074_v6 = vpop.f32.mrf.mxu2  ;;  %v3246_v4 = vld [vmem:[%s9749_s6 + $0x8] sm:$0xff] }
 0x1b4   : > { %v1358_v8 = vsel %vm795_vm1, %v1074_v6, -inf }
 0x1b5   : > { %v1356_v11 = vrot.slane %v1355_v5, 1  ;;  %v1359_v12 = vrot.slane %v1358_v8, 4 }
 0x1b7   : > { %v1357_v33 = vmax.f32 %v1355_v5, %v1356_v11  ;;  %v1360_v17 = vmax.f32 %v1358_v8, %v1359_v12  ;;  %v552_v8 = vrot.slane %v6299_v16, 3 }
 0x1b8   : > { %5429 = vmatmul.msk.f32.gmra.mxu1 %vm795_vm1, %v738_v13  ;;  %5454 = vmatmul.msk.f32.gmra.mxu2 %vm795_vm1, %v763_v14  ;;  %v3245_v14 = vld [vmem:[%s9749_s6] sm:$0xff] }
 0x1b9   : > { %v1667_v19 = vsub.f32 %v1071_v56, %v1357_v33  ;;  %v1361_v21 = vrot.slane %v1360_v17, 2 }
 0x1bb   : > { %v1753_v36 = vmul.f32 1.442695, %v1667_v19  ;;  %v1362_v39 = vmax.f32 %v1360_v17, %v1361_v21  ;;  %v6505_v25 = vpop.f32.mrf.mxu2  ;;  %v614_v17 = vperm.slane %v552_v8, 0 }
 0x1bc   : > { %v1365_v9 = vsel %vm795_vm1, %v6505_v25, -inf }
 0x1bd   : > { %5658 = vpow2.f32 %v1753_v36  ;;  %v1363_v28 = vrot.slane %v1362_v39, 1  ;;  %v1366_v37 = vrot.slane %v1365_v9, 4  ;;  %v6512_v43 = vpop.f32.mrf.mxu1 }
 0x1be   : > { %v1197_v23 = vsel %vm795_vm1, %v6512_v43, -inf }
 0x1bf   : > { %v1364_v47 = vmax.f32 %v1362_v39, %v1363_v28  ;;  %v1367_v49 = vmax.f32 %v1365_v9, %v1366_v37  ;;  %v1198_v26 = vrot.slane %v1197_v23, 4  ;;  %v766_v39 = vmul.f32 %v6444_v35, %v614_v17 }
 0x1c0   : > { %5430 = vmatmul.msk.f32.gmra.mxu1 %vm795_vm1, %v6362_v57  ;;  %5455 = vmatmul.msk.f32.gmra.mxu2 %vm795_vm1, %v764_v45  ;;  %v3247_v57 = vld [vmem:[%s9749_s6 + $0x10] sm:$0xff]  ;;  %v553_v9 = vrot.slane %v6299_v16, 4 }
 0x1c1   : > { %v1668_v50 = vsub.f32 %v1074_v6, %v1364_v47  ;;  %v1368_v51 = vrot.slane %v1367_v49, 2  ;;  %v1199_v53 = vmax.f32 %v1197_v23, %v1198_v26  ;;  %5589 = vmatpush.msra.mxu3 %v3247_v57  ;;  %3458 = vmatpush.msrb.mxu0 %v3247_v57  ;;  %v765_v6 = vmul.f32 %v6444_v35, %v613_v54 }
 0x1c3   : > { %v6527_v30 = vpop.eup %5658  ;;  %v6529_v56 = vpop.f32.mrf.mxu2  ;;  %v1755_v2 = vmul.f32 1.442695, %v1668_v50  ;;  %v1369_v27 = vmax.f32 %v1367_v49, %v1368_v51  ;;  %v1200_v31 = vrot.slane %v1199_v53, 2  ;;  %5590 = vmatpush.msra.mxu3 %v3246_v4  ;;  %3459 = vmatpush.msrb.mxu0 %v3246_v4  ;;  %v615_v49 = vperm.slane %v553_v9, 0 }
 0x1c4   : > { %v1991_v63 = vsel %vm795_vm1, %v6527_v30, 0.0  ;;  %v1372_v0 = vsel %vm795_vm1, %v6529_v56, -inf }
 0x1c5   : > { %v1992_v1 = vrot.slane %v1991_v63, 4  ;;  %v6538_v3 = vpop.f32.mrf.mxu1  ;;  %v1373_v5 = vrot.slane %v1372_v0, 4  ;;  %5660 = vpow2.f32 %v1755_v2  ;;  %v1370_v12 = vrot.slane %v1369_v27, 1  ;;  %5591 = vmatpush.msra.mxu3 %v3245_v14  ;;  %3460 = vmatpush.msrb.mxu0 %v3245_v14 }
 0x1c6   : > { %v1204_v11 = vsel %vm795_vm1, %v6538_v3, -inf  ;;  %v1201_v15 = vmax.f32 %v1199_v53, %v1200_v31  ;;  %v554_v2 = vrot.slane %v6299_v16, 5 }
 0x1c7   : > { %v1993_v10 = vadd.f32 %v1992_v1, %v1991_v63  ;;  %v1374_v13 = vmax.f32 %v1372_v0, %v1373_v5  ;;  %v1205_v33 = vrot.slane %v1204_v11, 4  ;;  %v1371_v21 = vmax.f32 %v1369_v27, %v1370_v12 }
 0x1c8   : > { %5431 = vmatmul.msk.f32.gmra.mxu1 %vm795_vm1, %v6364_v58  ;;  %5456 = vmatmul.msk.f32.gmra.mxu2 %vm795_vm1, %v765_v6  ;;  %v1202_v34 = vrot.slane %v1201_v15, 1  ;;  %v767_v1 = vmul.f32 %v6444_v35, %v615_v49 }
 0x1c9   : > { %v1994_v18 = vrot.slane %v1993_v10, 2  ;;  %v1375_v22 = vrot.slane %v1374_v13, 2  ;;  %v1206_v36 = vmax.f32 %v1204_v11, %v1205_v33  ;;  %v1669_v23 = vsub.f32 %v6505_v25, %v1371_v21 }
 0x1ca   : > { %v1203_v24 = vmax.f32 %v1201_v15, %v1202_v34  ;;  %v616_v11 = vperm.slane %v554_v2, 0  ;;  %v555_v33 = vrot.slane %v6299_v16, 6 }
 0x1cb   : > { %v6553_v19 = vpop.f32.mrf.mxu2  ;;  %v6559_v41 = vpop.eup %5660  ;;  %v1995_v28 = vadd.f32 %v1994_v18, %v1993_v10  ;;  %v1376_v45 = vmax.f32 %v1374_v13, %v1375_v22  ;;  %v1207_v47 = vrot.slane %v1206_v36, 2  ;;  %v556_v18 = vrot.slane %v6299_v16, 7 }
 0x1cc   : > { %v1379_v37 = vsel %vm795_vm1, %v6553_v19, -inf  ;;  %v1998_v46 = vsel %vm795_vm1, %v6559_v41, 0.0  ;;  %v1645_v63 = vsub.f32 %v6512_v43, %v1203_v24  ;;  %v768_v34 = vmul.f32 %v6444_v35, %v616_v11 }
 0x1cd   : > { %v6555_v58 = vpop.f32.mrf.mxu1  ;;  %v1996_v26 = vrot.slane %v1995_v28, 1  ;;  %v1380_v50 = vrot.slane %v1379_v37, 4  ;;  %v1999_v53 = vrot.slane %v1998_v46, 4  ;;  %v1377_v54 = vrot.slane %v1376_v45, 1 }
 0x1ce   : > { %v1211_v29 = vsel %vm795_vm1, %v6555_v58, -inf  ;;  %v1208_v0 = vmax.f32 %v1206_v36, %v1207_v47  ;;  %v1709_v10 = vmul.f32 1.442695, %v1645_v63  ;;  %v617_v16 = vperm.slane %v555_v33, 0 }
 0x1cf   : > { %v6580_v27 = vadd.f32 %v1996_v26, %v1995_v28  ;;  %v1381_v4 = vmax.f32 %v1379_v37, %v1380_v50  ;;  %v1212_v31 = vrot.slane %v1211_v29, 4  ;;  %v2000_v6 = vadd.f32 %v1999_v53, %v1998_v46 }
 0x1d0   : > { %5432 = vmatmul.msk.f32.gmra.mxu1 %vm795_vm1, %v6366_v59  ;;  %5457 = vmatmul.msk.f32.gmra.mxu2 %vm795_vm1, %v766_v39  ;;  %v1757_v59 = vmul.f32 1.442695, %v1669_v23  ;;  %v1378_v8 = vmax.f32 %v1376_v45, %v1377_v54  ;;  %v1209_v43 = vrot.slane %v1208_v0, 1  ;;  %v389_v39 = vld [vmem:[#allocation5 + $0x8] sm:$0xff]  ;;  %v618_v49 = vperm.slane %v556_v18, 0 }
 0x1d1   : > { %v1382_v12 = vrot.slane %v1381_v4, 2  ;;  %v1213_v13 = vmax.f32 %v1211_v29, %v1212_v31  ;;  %v2001_v17 = vrot.slane %v2000_v6, 2  ;;  %v6605_v26 = vperm.slane %v389_v39, 0 }
 0x1d2   : > { %5662 = vpow2.f32 %v1757_v59  ;;  %v1210_v9 = vmax.f32 %v1208_v0, %v1209_v43  ;;  %v769_v2 = vmul.f32 %v6444_v35, %v617_v16  ;;  %v619_v18 = vperm.slane %v6336_v32, 0 }
 0x1d3   : > { %v6569_v51 = vpop.f32.mrf.mxu2  ;;  %5664 = vrcp.f32 %v6580_v27  ;;  %v1383_v28 = vmax.f32 %v1381_v4, %v1382_v12  ;;  %v1214_v37 = vrot.slane %v1213_v13, 2  ;;  %v2002_v46 = vadd.f32 %v2001_v17, %v2000_v6  ;;  %9786 = vst [vmem:[#allocation12_spill] sm:$0xff] %v6605_v26 }
 0x1d4   : > { %v1386_v25 = vsel %vm795_vm1, %v6569_v51, -inf  ;;  %5666 = vpow2.f32 %v1709_v10  ;;  %v1646_v53 = vsub.f32 %v6538_v3, %v1210_v9  ;;  %v6619_v6 = vadd.f32 %v6438_v20, %v6605_v26 }
 0x1d5   : > { %v6575_v57 = vpop.f32.mrf.mxu1  ;;  %v1387_v5 = vrot.slane %v1386_v25, 4  ;;  %v1384_v59 = vrot.slane %v1383_v28, 1  ;;  %v1215_v54 = vmax.f32 %v1213_v13, %v1214_v37  ;;  %v2003_v4 = vrot.slane %v2002_v46, 1 }
 0x1d6   : > { %v1218_v14 = vsel %vm795_vm1, %v6575_v57, -inf  ;;  %v6623_v3 = vadd.f32 %v6446_v40, %v6605_v26  ;;  %v770_v10 = vmul.f32 %v6444_v35, %v618_v49  ;;  %v1711_v11 = vmul.f32 1.442695, %v1646_v53 }
 0x1d7   : > { %v1388_v15 = vmax.f32 %v1386_v25, %v1387_v5  ;;  %v1219_v21 = vrot.slane %v1218_v14, 4  ;;  %v1385_v12 = vmax.f32 %v1383_v28, %v1384_v59  ;;  %v1216_v13 = vrot.slane %v1215_v54, 1 }
 0x1d8   : > { %5433 = vmatmul.msk.f32.gmra.mxu1 %vm795_vm1, %v6368_v60  ;;  %5458 = vmatmul.msk.f32.gmra.mxu2 %vm795_vm1, %v767_v1  ;;  %v1670_v60 = vsub.f32 %v6529_v56, %v1378_v8  ;;  %v6594_v36 = vpop.eup %5662  ;;  %9787 = vst [vmem:[#allocation13_spill] sm:$0xff] %v6623_v3  ;;  %v6635_v40 = vadd.f32 %v2003_v4, %v2002_v46  ;;  %v557_v39 = vrot.slane %v6336_v32, 1  ;;  %v2624_v49 = vand.u32 2147483647, %v6580_v27 }
 0x1d9   : > { %v1389_v45 = vrot.slane %v1388_v15, 2  ;;  %v6601_v56 = vpop.eup %5664  ;;  %v2005_v50 = vsel %vm795_vm1, %v6594_v36, 0.0  ;;  %v1220_v29 = vmax.f32 %v1218_v14, %v1219_v21  ;;  %v6630_v14 = vadd.f32 %v6456_v42, %v6605_v26 }
 0x1da   : > { %v1759_v24 = vmul.f32 1.442695, %v1670_v60  ;;  %v6612_v25 = vpop.eup %5666  ;;  %v2616_v1 = vmul.f32 %v6601_v56, %v6580_v27  ;;  %v2006_v31 = vrot.slane %v2005_v50, 4  ;;  %v2626_v42 = vand.u32 2147483648, %v6580_v27 }
 0x1db   : > { %v6591_v22 = vpop.f32.mrf.mxu2  ;;  %v1390_v63 = vmax.f32 %v1388_v15, %v1389_v45  ;;  %v1221_v8 = vrot.slane %v1220_v29, 2  ;;  %v1837_v43 = vsel %vm795_vm1, %v6612_v25, 0.0  ;;  %9788 = vst [vmem:[#allocation14_spill] sm:$0xff] %v6630_v14  ;;  %v1217_v28 = vmax.f32 %v1215_v54, %v1216_v13 }
 0x1dc   : > { %v1393_v47 = vsel %vm795_vm1, %v6591_v22, -inf  ;;  %5668 = vpow2.f32 %v1759_v24  ;;  %v2617_v33 = vsub.f32 1.0, %v2616_v1  ;;  %v2007_v35 = vadd.f32 %v2006_v31, %v2005_v50 }
 0x1dd   : > { %v6596_v23 = vpop.f32.mrf.mxu1  ;;  %v1394_v0 = vrot.slane %v1393_v47, 4  ;;  %v1391_v15 = vrot.slane %v1390_v63, 1  ;;  %v1838_v21 = vrot.slane %v1837_v43, 4  ;;  %5670 = vpow2.f32 %v1711_v11 }
 0x1de   : > { %vm2621_vm2 = vweird.f32 %v6601_v56  ;;  %v2618_v46 = vmul.f32 %v6601_v56, %v2617_v33  ;;  %5672 = vrcp.f32 %v6635_v40  ;;  %v2008_v24 = vrot.slane %v2007_v35, 2 }
 0x1df   : > { %v1395_v20 = vmax.f32 %v1393_v47, %v1394_v0  ;;  %v1392_v37 = vmax.f32 %v1390_v63, %v1391_v15  ;;  %vm2620_vm3 = vweird.f32 %v6580_v27  ;;  %v1839_v53 = vadd.f32 %v1838_v21, %v1837_v43 }
 0x1e0   : > { %5434 = vmatmul.msk.f32.gmra.mxu1 %vm795_vm1, %v6370_v61  ;;  %5459 = vmatmul.msk.f32.gmra.mxu2 %vm795_vm1, %v768_v34  ;;  %v1225_v61 = vsel %vm795_vm1, %v6596_v23, -inf  ;;  %v1222_v34 = vmax.f32 %v1220_v29, %v1221_v8  ;;  %v2619_v29 = vadd.f32 %v6601_v56, %v2618_v46  ;;  %v1647_v54 = vsub.f32 %v6555_v58, %v1217_v28  ;;  %vm2622_vm4 = vmor %vm2620_vm3, %vm2621_vm2 }
 0x1e1   : > { %v1226_v5 = vrot.slane %v1225_v61, 4  ;;  %v1396_v45 = vrot.slane %v1395_v20, 2  ;;  %v1672_v0 = vsub.f32 %v6569_v51, %v1392_v37  ;;  %v2627_v4 = vor.u32 1.1754944e-38, %v2626_v42 }
 0x1e2   : > { %v6642_v9 = vpop.eup %5668  ;;  %vm2625_vm5 = vcmp.eq.f32.partialorder %v2624_v49, 8.507059e+37  ;;  %v620_v13 = vperm.slane %v557_v39, 0  ;;  %vm2635_vm7 = vweird.f32 %v6635_v40 }
 0x1e3   : > { %v1227_v17 = vmax.f32 %v1225_v61, %v1226_v5  ;;  %v6637_v60 = vpop.f32.mrf.mxu2  ;;  %v2012_v50 = vsel %vm795_vm1, %v6642_v9, 0.0  ;;  %v6655_v61 = vpop.permute.xlu0 %711  ;;  %v1397_v1 = vmax.f32 %v1395_v20, %v1396_v45  ;;  %v2009_v5 = vadd.f32 %v2008_v24, %v2007_v35 }
 0x1e4   : > { %v1400_v16 = vsel %vm795_vm1, %v6637_v60, -inf  ;;  %v6665_v27 = vpop.eup %5670  ;;  %v2013_v8 = vrot.slane %v2012_v50, 4  ;;  %v1763_v33 = vmul.f32 1.442695, %v1672_v0  ;;  %v558_v45 = vrot.slane %v6336_v32, 2 }
 0x1e5   : > { %v1228_v47 = vrot.slane %v1227_v17, 2  ;;  %v1401_v63 = vrot.slane %v1400_v16, 4  ;;  %v6662_v31 = vpop.f32.mrf.mxu1  ;;  %v6668_v51 = vpop.eup %5672  ;;  %v1398_v35 = vrot.slane %v1397_v1, 1 }
 0x1e6   : > { %v1232_v20 = vsel %vm795_vm1, %v6662_v31, -inf  ;;  %v2014_v42 = vadd.f32 %v2013_v8, %v2012_v50  ;;  %v2631_v37 = vmul.f32 %v6668_v51, %v6635_v40  ;;  %vm2636_vm6 = vweird.f32 %v6668_v51 }
 0x1e7   : > { %v1229_v43 = vmax.f32 %v1227_v17, %v1228_v47  ;;  %v1402_v15 = vmax.f32 %v1400_v16, %v1401_v63  ;;  %v1233_v28 = vrot.slane %v1232_v20, 4  ;;  %v1399_v24 = vmax.f32 %v1397_v1, %v1398_v35  ;;  %vm6717_vm8 = vmor %vm2635_vm7, %vm2636_vm6 }
 0x1e8   : > { %5435 = vmatmul.msk.f32.gmra.mxu1 %vm795_vm1, %v6372_v62  ;;  %5460 = vmatmul.msk.f32.gmra.mxu2 %vm795_vm1, %v769_v2  ;;  %v1671_v62 = vsub.f32 %v6553_v19, %v1385_v12  ;;  %v1223_v19 = vrot.slane %v1222_v34, 1  ;;  %v2623_v2 = vsel %vm2622_vm4, %v6601_v56, %v2619_v29  ;;  %v771_v12 = vmul.f32 %v6655_v61, %v619_v18 }
 0x1e9   : > { %v2628_v11 = vsel %vm2625_vm5, %v2627_v4, %v2623_v2  ;;  %v1713_v56 = vmul.f32 1.442695, %v1647_v54  ;;  %v2010_v18 = vrot.slane %v2009_v5, 1  ;;  %v1230_v39 = vrot.slane %v1229_v43, 1 }
 0x1ea   : > { %v1761_v59 = vmul.f32 1.442695, %v1671_v62  ;;  %v1224_v58 = vmax.f32 %v1222_v34, %v1223_v19  ;;  %v6675_v17 = vmul.f32 %v6527_v30, %v2628_v11  ;;  %v1840_v34 = vrot.slane %v1839_v53, 2 }
 0x1eb   : > { %v6677_v21 = vpop.f32.mrf.mxu2  ;;  %v1403_v30 = vrot.slane %v1402_v15, 2  ;;  %v2632_v47 = vsub.f32 1.0, %v2631_v37  ;;  %v6691_v50 = vadd.f32 %v2010_v18, %v2009_v5  ;;  %v2015_v29 = vrot.slane %v2014_v42, 2 }
 0x1ec   : > { %5674 = vpow2.f32 %v1761_v59  ;;  %v1648_v62 = vsub.f32 %v6575_v57, %v1224_v58  ;;  %5500 = vmatmul.msk.f32.vlgmr.msra.gmra.mxu3 %vm795_vm1, %v6675_v17  ;;  %v1407_v46 = vsel %vm795_vm1, %v6677_v21, -inf  ;;  %v559_v57 = vrot.slane %v6336_v32, 3 }
 0x1ed   : > { %5676 = vpow2.f32 %v1713_v56  ;;  %v1841_v19 = vadd.f32 %v1840_v34, %v1839_v53  ;;  %v1231_v59 = vmax.f32 %v1229_v43, %v1230_v39  ;;  %v1234_v63 = vmax.f32 %v1232_v20, %v1233_v28 }
 0x1ee   : > { %5678 = vpow2.f32 %v1763_v33  ;;  %v1715_v54 = vmul.f32 1.442695, %v1648_v62  ;;  %v1408_v0 = vrot.slane %v1407_v46, 4  ;;  %v2633_v2 = vmul.f32 %v6668_v51, %v2632_v47 }
 0x1ef   : > { %v6696_v1 = vadd.f32 %v6462_v44, %v6605_v26  ;;  %v1404_v8 = vmax.f32 %v1402_v15, %v1403_v30  ;;  %v772_v58 = vmul.f32 %v6655_v61, %v620_v13  ;;  %v1673_v53 = vsub.f32 %v6591_v22, %v1399_v24 }
 0x1f0   : > { %5461 = vmatmul.msk.f32.gmra.mxu2 %vm795_vm1, %v770_v10  ;;  %v1844_v10 = vsel %vm795_vm1, %v6665_v27, 0.0  ;;  %v621_v11 = vperm.slane %v558_v45, 0  ;;  %v622_v43 = vperm.slane %v559_v57, 0  ;;  %5680 = vrcp.f32 %v6691_v50 }
 0x1f1   : > { %v1845_v16 = vrot.slane %v1844_v10, 4  ;;  %v1842_v56 = vrot.slane %v1841_v19, 1  ;;  %v2016_v20 = vadd.f32 %v2015_v29, %v2014_v42  ;;  %v1649_v44 = vsub.f32 %v6596_v23, %v1231_v59 }
 0x1f2   : > { %v6689_v49 = vpop.eup %5674  ;;  %5682 = vpow2.f32 %v1715_v54  ;;  %v1235_v15 = vrot.slane %v1234_v63, 2  ;;  %v1409_v13 = vmax.f32 %v1407_v46, %v1408_v0  ;;  %v1405_v22 = vrot.slane %v1404_v8, 1 }
 0x1f3   : > { %v1846_v4 = vadd.f32 %v1845_v16, %v1844_v10  ;;  %v2019_v5 = vsel %vm795_vm1, %v6689_v49, 0.0  ;;  %v2634_v10 = vadd.f32 %v6668_v51, %v2633_v2  ;;  %v1765_v39 = vmul.f32 1.442695, %v1673_v53 }
 0x1f4   : > { %v2020_v18 = vrot.slane %v2019_v5, 4  ;;  %v2639_v23 = vand.u32 2147483647, %v6635_v40  ;;  %v2017_v42 = vrot.slane %v2016_v20, 1  ;;  %v1717_v28 = vmul.f32 1.442695, %v1649_v44 }
 0x1f5   : > { %v1847_v35 = vrot.slane %v1846_v4, 2  ;;  %v2641_v45 = vand.u32 2147483648, %v6635_v40  ;;  %v6722_v16 = vadd.f32 %v1842_v56, %v1841_v19  ;;  %v1236_v30 = vmax.f32 %v1234_v63, %v1235_v15 }
 0x1f6   : > { %v1410_v46 = vrot.slane %v1409_v13, 2  ;;  %v2638_v24 = vsel %vm6717_vm8, %v6668_v51, %v2634_v10  ;;  %v1406_v59 = vmax.f32 %v1404_v8, %v1405_v22  ;;  %v2021_v2 = vadd.f32 %v2020_v18, %v2019_v5 }
 0x1f7   : > { %v1848_v57 = vadd.f32 %v1847_v35, %v1846_v4  ;;  %v2642_v54 = vor.u32 1.1754944e-38, %v2641_v45  ;;  %5684 = vpow2.f32 %v1765_v39  ;;  %vm2640_vm9 = vcmp.eq.f32.partialorder %v2639_v23, 8.507059e+37  ;;  %v6751_v23 = vpop.f32.mrf.mxu1 }
 0x1f8   : > { %5462 = vmatmul.msk.f32.gmra.mxu2 %vm795_vm1, %v771_v12  ;;  %v6702_v12 = vpop.eup %5676  ;;  %v6731_v40 = vadd.f32 %v2017_v42, %v2016_v20  ;;  %5686 = vpow2.f32 %v1717_v28  ;;  %v560_v63 = vrot.slane %v6336_v32, 4  ;;  %v1237_v53 = vrot.slane %v1236_v30, 1 }
 0x1f9   : > { %v6706_v33 = vpop.eup %5678  ;;  %v1851_v34 = vsel %vm795_vm1, %v6702_v12, 0.0  ;;  %v2643_v19 = vsel %vm2640_vm9, %v2642_v54, %v2638_v24  ;;  %v1411_v51 = vmax.f32 %v1409_v13, %v1410_v46  ;;  %v773_v4 = vmul.f32 %v6655_v61, %v621_v11 }
 0x1fa   : > { %v2026_v62 = vsel %vm795_vm1, %v6706_v33, 0.0  ;;  %v6727_v47 = vpop.eup %5680  ;;  %v1852_v29 = vrot.slane %v1851_v34, 4  ;;  %v6735_v56 = vmul.f32 %v6559_v41, %v2643_v19  ;;  %5688 = vrcp.f32 %v6722_v16 }
 0x1fb   : > { %v6729_v0 = vpop.eup %5682  ;;  %v1674_v5 = vsub.f32 %v6637_v60, %v1406_v59  ;;  %v2646_v20 = vmul.f32 %v6727_v47, %v6691_v50  ;;  %v1849_v44 = vrot.slane %v1848_v57, 1  ;;  %v2022_v15 = vrot.slane %v2021_v2, 2 }
 0x1fc   : > { %v1858_v8 = vsel %vm795_vm1, %v6729_v0, 0.0  ;;  %v1853_v10 = vadd.f32 %v1852_v29, %v1851_v34  ;;  %5501 = vmatmul.msk.f32.gmra.mxu3 %vm795_vm1, %v6735_v56  ;;  %5690 = vrcp.f32 %v6731_v40  ;;  %v774_v11 = vmul.f32 %v6655_v61, %v622_v43 }
 0x1fd   : > { %v2647_v41 = vsub.f32 1.0, %v2646_v20  ;;  %v623_v13 = vperm.slane %v560_v63, 0  ;;  %v6749_v18 = vpop.eup %5684  ;;  %v1859_v60 = vrot.slane %v1858_v8, 4  ;;  %v1238_v22 = vmax.f32 %v1236_v30, %v1237_v53 }
 0x1fe   : > { %v1412_v39 = vrot.slane %v1411_v51, 1  ;;  %v2656_v34 = vand.u32 2147483648, %v6691_v50  ;;  %v6754_v42 = vpop.eup %5686  ;;  %vm2651_vm10 = vweird.f32 %v6727_v47  ;;  %v2654_v37 = vand.u32 2147483647, %v6691_v50 }
 0x1ff   : > { %v2648_v28 = vmul.f32 %v6727_v47, %v2647_v41  ;;  %v6759_v43 = vadd.f32 %v1849_v44, %v1848_v57  ;;  %v2023_v45 = vadd.f32 %v2022_v15, %v2021_v2  ;;  %v1854_v46 = vrot.slane %v1853_v10, 2 }
 0x200   : > { %5463 = vmatmul.msk.f32.gmra.mxu2 %vm795_vm1, %v772_v58  ;;  %v2027_v58 = vrot.slane %v2026_v62, 4  ;;  %v6761_v30 = vpop.eup %5688  ;;  %v2033_v29 = vsel %vm795_vm1, %v6749_v18, 0.0  ;;  %v1239_v59 = vsel %vm795_vm1, %v6751_v23, -inf  ;;  %vm2650_vm11 = vweird.f32 %v6691_v50 }
 0x201   : > { %v2649_v54 = vadd.f32 %v6727_v47, %v2648_v28  ;;  %v1650_v57 = vsub.f32 %v6662_v31, %v1238_v22  ;;  %v1413_v2 = vmax.f32 %v1411_v51, %v1412_v39  ;;  %vm2652_vm12 = vmor %vm2650_vm11, %vm2651_vm10  ;;  %v2657_v19 = vor.u32 1.1754944e-38, %v2656_v34 }
 0x202   : > { %v2028_v35 = vadd.f32 %v2027_v58, %v2026_v62  ;;  %v1767_v62 = vmul.f32 1.442695, %v1674_v5  ;;  %v1865_v58 = vsel %vm795_vm1, %v6754_v42, 0.0  ;;  %v6772_v63 = vpop.eup %5690  ;;  %v1860_v53 = vadd.f32 %v1859_v60, %v1858_v8 }
 0x203   : > { %v2653_v5 = vsel %vm2652_vm12, %v6727_v47, %v2649_v54  ;;  %vm2655_vm13 = vcmp.eq.f32.partialorder %v2654_v37, 8.507059e+37  ;;  %v2024_v20 = vrot.slane %v2023_v45, 1  ;;  %v1855_v44 = vadd.f32 %v1854_v46, %v1853_v10 }
 0x204   : > { %v2029_v24 = vrot.slane %v2028_v35, 2  ;;  %5692 = vpow2.f32 %v1767_v62  ;;  %v1240_v50 = vrot.slane %v1239_v59, 4  ;;  %v2658_v15 = vsel %vm2655_vm13, %v2657_v19, %v2653_v5 }
 0x205   : > { %v2034_v41 = vrot.slane %v2033_v29, 4  ;;  %v1866_v31 = vrot.slane %v1865_v58, 4  ;;  %v3741_v51 = vmul.f32 %v6675_v17, %v6630_v14  ;;  %v6781_v22 = vmul.f32 %v6594_v36, %v2658_v15 }
 0x206   : > { %v1719_v8 = vmul.f32 1.442695, %v1650_v57  ;;  %v1675_v60 = vsub.f32 %v6677_v21, %v1413_v2  ;;  %v2286_v10 = vmul.f32 %v6761_v30, %v6722_v16  ;;  %5694 = vrcp.f32 %v6759_v43 }
 0x207   : > { %v1861_v39 = vrot.slane %v1860_v53, 2  ;;  %5502 = vmatmul.msk.f32.gmra.mxu3 %vm795_vm1, %v6781_v22  ;;  %v775_v17 = vmul.f32 %v6655_v61, %v623_v13  ;;  %v6792_v36 = vadd.f32 %v2024_v20, %v2023_v45  ;;  %v1856_v34 = vrot.slane %v1855_v44, 1 }
 0x208   : > { %5464 = vmatmul.msk.f32.gmra.mxu2 %vm795_vm1, %v773_v4  ;;  %v6774_v4 = vpop.f32.mrf.mxu2  ;;  %v1241_v62 = vmax.f32 %v1239_v59, %v1240_v50  ;;  %v2287_v21 = vsub.f32 1.0, %v2286_v10  ;;  %v2035_v37 = vadd.f32 %v2034_v41, %v2033_v29  ;;  %v1867_v46 = vadd.f32 %v1866_v31, %v1865_v58 }
 0x209   : > { %v1414_v47 = vsel %vm795_vm1, %v6774_v4, -inf  ;;  %v3937_v54 = vsel %vm795_vm1, %v3741_v51, 0.0  ;;  %5696 = vpow2.f32 %v1719_v8  ;;  %vm2291_vm14 = vweird.f32 %v6761_v30 }
 0x20a   : > { %v6794_v28 = vpop.eup %5692  ;;  %v1415_v57 = vrot.slane %v1414_v47, 4  ;;  %v1862_v13 = vadd.f32 %v1861_v39, %v1860_v53  ;;  %v2294_v45 = vand.u32 2147483647, %v6722_v16  ;;  %v2296_v59 = vand.u32 2147483648, %v6722_v16 }
 0x20b   : > { %v2040_v19 = vsel %vm795_vm1, %v6794_v28, 0.0  ;;  %v1242_v29 = vrot.slane %v1241_v62, 2  ;;  %vm2290_vm15 = vweird.f32 %v6722_v16  ;;  %v2036_v20 = vrot.slane %v2035_v37, 2 }
 0x20c   : > { %v6806_v5 = vpop.eup %5694  ;;  %v1868_v50 = vrot.slane %v1867_v46, 2  ;;  %v1416_v15 = vmax.f32 %v1414_v47, %v1415_v57  ;;  %vm2292_vm2 = vmor %vm2290_vm15, %vm2291_vm14  ;;  %v2297_v53 = vor.u32 1.1754944e-38, %v2296_v59  ;;  %v3938_v41 = vrot.slane %v3937_v54, 4  ;;  %v6840_v59 = vpop.f32.mrf.mxu1 }
 0x20d   : > { %vm2295_vm3 = vcmp.eq.f32.partialorder %v2294_v45, 8.507059e+37  ;;  %v6809_v51 = vadd.f32 %v1856_v34, %v1855_v44  ;;  %v2041_v8 = vrot.slane %v2040_v19, 4  ;;  %v2661_v16 = vmul.f32 %v6772_v63, %v6731_v40 }
 0x20e   : > { %v1243_v47 = vmax.f32 %v1241_v62, %v1242_v29  ;;  %v2037_v57 = vadd.f32 %v2036_v20, %v2035_v37  ;;  %v6820_v44 = vadd.f32 %v6468_v48, %v6605_v26  ;;  %v6824_v34 = vadd.f32 %v6474_v52, %v6605_v26 }
 0x20f   : > { %v6813_v10 = vpop.eup %5696  ;;  %vm2666_vm4 = vweird.f32 %v6772_v63  ;;  %vm2665_vm5 = vweird.f32 %v6731_v40  ;;  %v2669_v20 = vand.u32 2147483647, %v6731_v40  ;;  %vm2306_vm8 = vweird.f32 %v6806_v5 }
 0x210   : > { %5465 = vmatmul.msk.f32.gmra.mxu2 %vm795_vm1, %v774_v11  ;;  %v2030_v11 = vadd.f32 %v2029_v24, %v2028_v35  ;;  %v1769_v35 = vmul.f32 1.442695, %v1675_v60  ;;  %v2288_v24 = vmul.f32 %v6761_v30, %v2287_v21  ;;  %9791 = vst [vmem:[#allocation15_spill] sm:$0xff] %v6820_v44  ;;  %v1872_v62 = vsel %vm795_vm1, %v6813_v10, 0.0  ;;  %vm6850_vm6 = vmor %vm2665_vm5, %vm2666_vm4 }
 0x211   : > { %9792 = vst [vmem:[#allocation16_spill] sm:$0xff] %v6824_v34  ;;  %vm2670_vm7 = vcmp.eq.f32.partialorder %v2669_v20, 8.507059e+37  ;;  %vm2305_vm9 = vweird.f32 %v6759_v43  ;;  %vm2680_vm13 = vweird.f32 %v6792_v36  ;;  %vm4304_vm5 = vcmask 1041409  }
 0x212   : > { %v2031_v2 = vrot.slane %v2030_v11, 1  ;;  %v2289_v58 = vadd.f32 %v6761_v30, %v2288_v24  ;;  %5698 = vpow2.f32 %v1769_v35  ;;  %v1869_v35 = vadd.f32 %v1868_v50, %v1867_v46  ;;  %vm6906_vm10 = vmor %vm2305_vm9, %vm2306_vm8 }
 0x213   : > { %v1417_v24 = vrot.slane %v1416_v15, 2  ;;  %5700 = vrcp.f32 %v6792_v36  ;;  %v1244_v46 = vrot.slane %v1243_v47, 1 }
 0x214   : > { %v2293_v31 = vsel %vm2292_vm2, %v6761_v30, %v2289_v58  ;;  %v6815_v39 = vadd.f32 %v2031_v2, %v2030_v11  ;;  %v2662_v30 = vsub.f32 1.0, %v2661_v16  ;;  %v6827_v11 = vadd.f32 %v3938_v41, %v3937_v54 }
 0x215   : > { %v2298_v60 = vsel %vm2295_vm3, %v2297_v53, %v2293_v31  ;;  %5702 = vrcp.f32 %v6809_v51  ;;  %v2038_v54 = vrot.slane %v2037_v57, 1  ;;  %v1870_v2 = vrot.slane %v1869_v35, 1 }
 0x216   : > { %v2299_v21 = vmul.f32 %v6612_v25, %v2298_v60  ;;  %v2042_v25 = vadd.f32 %v2041_v8, %v2040_v19  ;;  %v2663_v37 = vmul.f32 %v6772_v63, %v2662_v30  ;;  %5704 = vrcp.f32 %v6815_v39 }
 0x217   : > { %v1418_v45 = vmax.f32 %v1416_v15, %v1417_v24  ;;  %v3940_v29 = vrot.slane %v6827_v11, 2  ;;  %v1873_v58 = vrot.slane %v1872_v62, 4  ;;  %v3742_v53 = vmul.f32 %v6735_v56, %v6630_v14 }
 0x218   : > { %5466 = vmatmul.msk.f32.gmra.mxu2 %vm795_vm1, %v775_v17  ;;  %v1863_v17 = vrot.slane %v1862_v13, 1  ;;  %5478 = vmatmul.msk.f32.vlgmr.msrb.gmra.mxu0 %vm795_vm1, %v2299_v21  ;;  %v6834_v48 = vpop.eup %5698  ;;  %v2664_v19 = vadd.f32 %v6772_v63, %v2663_v37  ;;  %v2043_v50 = vrot.slane %v2042_v25, 2  ;;  %v2671_v41 = vand.u32 2147483648, %v6731_v40 }
 0x219   : > { %v6855_v31 = vpop.eup %5700  ;;  %v1245_v8 = vmax.f32 %v1243_v47, %v1244_v46  ;;  %v1246_v60 = vsel %vm795_vm1, %v6840_v59, -inf  ;;  %v6866_v24 = vadd.f32 %v2038_v54, %v2037_v57  ;;  %v6868_v30 = vadd.f32 %v1870_v2, %v1869_v35 }
 0x21a   : > { %v6837_v52 = vadd.f32 %v1863_v17, %v1862_v13  ;;  %v2047_v13 = vsel %vm795_vm1, %v6834_v48, 0.0  ;;  %v2668_v16 = vsel %vm6850_vm6, %v6772_v63, %v2664_v19  ;;  %v2301_v17 = vmul.f32 %v6806_v5, %v6759_v43 }
 0x21b   : > { %v6864_v56 = vpop.eup %5702  ;;  %v1419_v40 = vrot.slane %v1418_v45, 1  ;;  %v2672_v37 = vor.u32 1.1754944e-38, %v2671_v41  ;;  %v1874_v47 = vadd.f32 %v1873_v58, %v1872_v62  ;;  %v2048_v46 = vrot.slane %v2047_v13, 4  ;;  %v6884_v58 = vpop.f32.mrf.mxu2 }
 0x21c   : > { %v6870_v7 = vpop.eup %5704  ;;  %v2302_v14 = vsub.f32 1.0, %v2301_v17  ;;  %v3944_v15 = vsel %vm795_vm1, %v3742_v53, 0.0  ;;  %v1247_v63 = vrot.slane %v1246_v60, 4  ;;  %v3719_v19 = vmul.f32 %v2299_v21, %v6619_v6  ;;  %v6900_v41 = vpop.f32.mrf.mxu1 }
 0x21d   : > { %v2673_v34 = vsel %vm2670_vm7, %v2672_v37, %v2668_v16  ;;  %v2044_v3 = vadd.f32 %v2043_v50, %v2042_v25  ;;  %v1651_v57 = vsub.f32 %v6751_v23, %v1245_v8  ;;  %v6881_v62 = vadd.f32 %v6484_v55, %v6605_v26 }
 0x21e   : > { %v6876_v35 = vmul.f32 %v6642_v9, %v2673_v34  ;;  %v2303_v54 = vmul.f32 %v6806_v5, %v2302_v14  ;;  %5706 = vrcp.f32 %v6837_v52  ;;  %v1420_v2 = vmax.f32 %v1418_v45, %v1419_v40 }
 0x21f   : > { %9795 = vst [vmem:[#allocation17_spill] sm:$0xff] %v6881_v62  ;;  %5708 = vrcp.f32 %v6866_v24  ;;  %v1875_v25 = vrot.slane %v1874_v47, 2  ;;  %v2049_v23 = vadd.f32 %v2048_v46, %v2047_v13  ;;  %v3945_v20 = vrot.slane %v3944_v15, 4 }
 0x220   : > { %5503 = vmatmul.msk.f32.gmra.mxu3 %vm795_vm1, %v6876_v35  ;;  %v1248_v14 = vmax.f32 %v1246_v60, %v1247_v63  ;;  %v3783_v9 = vsel %vm795_vm1, %v3719_v19, 0.0  ;;  %v2304_v55 = vadd.f32 %v6806_v5, %v2303_v54  ;;  %5710 = vrcp.f32 %v6868_v30 }
 0x221   : > { %v2045_v34 = vrot.slane %v2044_v3, 1  ;;  %v6895_v45 = vadd.f32 %v3940_v29, %v6827_v11  ;;  %v1721_v50 = vmul.f32 1.442695, %v1651_v57  ;;  %v1676_v13 = vsub.f32 %v6774_v4, %v1420_v2 }
 0x222   : > { %v1421_v53 = vsel %vm795_vm1, %v6884_v58, -inf  ;;  %v2309_v8 = vand.u32 2147483647, %v6759_v43  ;;  %v1876_v60 = vadd.f32 %v1875_v25, %v1874_v47  ;;  %v6904_v16 = vadd.f32 %v3945_v20, %v3944_v15 }
 0x223   : > { %9796 = vst [vmem:[#allocation18_spill] sm:$0xff] %v6895_v45  ;;  %v3784_v17 = vrot.slane %v3783_v9, 4  ;;  %v2311_v11 = vand.u32 2147483648, %v6759_v43  ;;  %v2050_v29 = vrot.slane %v2049_v23, 2  ;;  %v1249_v37 = vrot.slane %v1248_v14, 2  ;;  %v6929_v62 = vpop.f32.mrf.mxu2 }
 0x224   : > { %9797 = vst [vmem:[#allocation19_spill] sm:$0xff] %v6904_v16  ;;  %v6911_v4 = vpop.eup %5706  ;;  %v2308_v46 = vsel %vm6906_vm10, %v6806_v5, %v2304_v55  ;;  %v2676_v47 = vmul.f32 %v6855_v31, %v6792_v36  ;;  %v3743_v63 = vmul.f32 %v6781_v22, %v6696_v1  ;;  %v1422_v19 = vrot.slane %v1421_v53, 4 }
 0x225   : > { %v6918_v15 = vpop.eup %5708  ;;  %v1253_v43 = vsel %vm795_vm1, %v6900_v41, -inf  ;;  %v2312_v57 = vor.u32 1.1754944e-38, %v2311_v11  ;;  %5712 = vpow2.f32 %v1721_v50  ;;  %v1771_v54 = vmul.f32 1.442695, %v1676_v13 }
 0x226   : > { %vm2310_vm11 = vcmp.eq.f32.partialorder %v2309_v8, 8.507059e+37  ;;  %v2677_v2 = vsub.f32 1.0, %v2676_v47  ;;  %v6924_v25 = vpop.eup %5710  ;;  %v6926_v5 = vadd.f32 %v2045_v34, %v2044_v3  ;;  %v1877_v20 = vrot.slane %v1876_v60, 1 }
 0x227   : > { %v3785_v55 = vadd.f32 %v3784_v17, %v3783_v9  ;;  %v2313_v40 = vsel %vm2310_vm11, %v2312_v57, %v2308_v46  ;;  %v1250_v21 = vmax.f32 %v1248_v14, %v1249_v37  ;;  %v1254_v26 = vrot.slane %v1253_v43, 4 }
 0x228   : > { %v2314_v22 = vmul.f32 %v6665_v27, %v2313_v40  ;;  %v2686_v45 = vand.u32 2147483648, %v6792_v36  ;;  %v1423_v11 = vmax.f32 %v1421_v53, %v1422_v19  ;;  %v2678_v50 = vmul.f32 %v6855_v31, %v2677_v2  ;;  %v6950_v19 = vpop.f32.mrf.mxu1 }
 0x229   : > { %vm2681_vm12 = vweird.f32 %v6855_v31  ;;  %v2684_v13 = vand.u32 2147483647, %v6792_v36  ;;  %v6935_v3 = vadd.f32 %v2050_v29, %v2049_v23  ;;  %5714 = vpow2.f32 %v1771_v54 }
 0x22a   : > { %v3951_v9 = vsel %vm795_vm1, %v3743_v63, 0.0  ;;  %5479 = vmatmul.msk.f32.gmra.mxu0 %vm795_vm1, %v2314_v22  ;;  %v3720_v27 = vmul.f32 %v2314_v22, %v6619_v6  ;;  %v3786_v14 = vrot.slane %v3785_v55, 2  ;;  %v1428_v34 = vsel %vm795_vm1, %v6929_v62, -inf  ;;  %vm2682_vm14 = vmor %vm2680_vm13, %vm2681_vm12 }
 0x22b   : > { %v2679_v53 = vadd.f32 %v6855_v31, %v2678_v50  ;;  %v6944_v8 = vpop.eup %5712  ;;  %v1251_v17 = vrot.slane %v1250_v21, 1  ;;  %v1255_v23 = vmax.f32 %v1253_v43, %v1254_v26  ;;  %v2687_v37 = vor.u32 1.1754944e-38, %v2686_v45 }
 0x22c   : > { %v3790_v29 = vsel %vm795_vm1, %v3720_v27, 0.0  ;;  %v1424_v46 = vrot.slane %v1423_v11, 2  ;;  %vm2685_vm15 = vcmp.eq.f32.partialorder %v2684_v13, 8.507059e+37  ;;  %v3952_v57 = vrot.slane %v3951_v9, 4 }
 0x22d   : > { %v3791_v47 = vrot.slane %v3790_v29, 4  ;;  %v2683_v63 = vsel %vm2682_vm14, %v6855_v31, %v2679_v53  ;;  %v1429_v54 = vrot.slane %v1428_v34, 4  ;;  %v2316_v2 = vmul.f32 %v6864_v56, %v6809_v51 }
 0x22e   : > { %v2688_v36 = vsel %vm2685_vm15, %v2687_v37, %v2683_v63  ;;  %v1879_v26 = vsel %vm795_vm1, %v6944_v8, 0.0  ;;  %v3787_v43 = vadd.f32 %v3786_v14, %v3785_v55  ;;  %v6961_v31 = vadd.f32 %v1877_v20, %v1876_v60 }
 0x22f   : > { %v3792_v40 = vadd.f32 %v3791_v47, %v3790_v29  ;;  %v6957_v45 = vmul.f32 %v6689_v49, %v2688_v36  ;;  %v6959_v22 = vpop.eup %5714  ;;  %v1256_v50 = vrot.slane %v1255_v23, 2  ;;  %v1260_v13 = vsel %vm795_vm1, %v6950_v19, -inf }
 0x230   : > { %9800 = vst [vmem:[#allocation20_spill] sm:$0xff] %v6959_v22  ;;  %v2317_v27 = vsub.f32 1.0, %v2316_v2  ;;  %v2052_v53 = vrot.slane %v6935_v3, 1  ;;  %v1252_v37 = vmax.f32 %v1250_v21, %v1251_v17  ;;  %v1425_v63 = vmax.f32 %v1423_v11, %v1424_v46  ;;  %v4238_v21 = vld [vmem:[%s9746_s3 + $0x38] sm:$0xff] }
 0x231   : > { %v3793_v44 = vrot.slane %v3792_v40, 2  ;;  %5504 = vmatmul.msk.f32.gmra.mxu3 %vm795_vm1, %v6957_v45  ;;  %v1880_v55 = vrot.slane %v1879_v26, 4  ;;  %v1430_v49 = vmax.f32 %v1428_v34, %v1429_v54  ;;  %vm2321_vm2 = vweird.f32 %v6864_v56  ;;  %4391 = vmatpush.msra.mxu0 %v4238_v21 }
 0x232   : > { %v2318_v14 = vmul.f32 %v6864_v56, %v2317_v27  ;;  %v6970_v60 = vadd.f32 %v3952_v57, %v3951_v9  ;;  %v3788_v20 = vrot.slane %v3787_v43, 1  ;;  %v1261_v47 = vrot.slane %v1260_v13, 4 }
 0x233   : > { %v3794_v29 = vadd.f32 %v3793_v44, %v3792_v40  ;;  %v1257_v11 = vmax.f32 %v1255_v23, %v1256_v50  ;;  %vm2320_vm3 = vweird.f32 %v6809_v51  ;;  %v2324_v34 = vand.u32 2147483647, %v6809_v51 }
 0x234   : > { %v2319_v17 = vadd.f32 %v6864_v56, %v2318_v14  ;;  %v1652_v46 = vsub.f32 %v6840_v59, %v1252_v37  ;;  %v1426_v54 = vrot.slane %v1425_v63, 1  ;;  %vm6979_vm4 = vmor %vm2320_vm3, %vm2321_vm2  ;;  %v2326_v44 = vand.u32 2147483648, %v6809_v51 }
 0x235   : > { %v3795_v9 = vrot.slane %v3794_v29, 1  ;;  %v1881_v36 = vadd.f32 %v1880_v55, %v1879_v26  ;;  %v2054_v23 = vsel %vm795_vm1, %v6959_v22, 0.0  ;;  %v1431_v2 = vrot.slane %v1430_v49, 2 }
 0x236   : > { %v2323_v40 = vsel %vm6979_vm4, %v6864_v56, %v2319_v17  ;;  %v3789_v50 = vadd.f32 %v3788_v20, %v3787_v43  ;;  %v1262_v59 = vmax.f32 %v1260_v13, %v1261_v47  ;;  %v2327_v37 = vor.u32 1.1754944e-38, %v2326_v44  ;;  %v7000_v47 = vpop.f32.mrf.mxu2 }
 0x237   : > { %v3796_v27 = vadd.f32 %v3795_v9, %v3794_v29  ;;  %v1258_v14 = vrot.slane %v1257_v11, 1  ;;  %vm2325_vm6 = vcmp.eq.f32.partialorder %v2324_v34, 8.507059e+37  ;;  %v2691_v21 = vmul.f32 %v6870_v7, %v6815_v39 }
 0x238   : > { %v1723_v51 = vmul.f32 1.442695, %v1652_v46  ;;  %v1427_v26 = vmax.f32 %v1425_v63, %v1426_v54  ;;  %v2328_v22 = vsel %vm2325_vm6, %v2327_v37, %v2323_v40  ;;  %5716 = vrcp.f32 %v6926_v5 }
 0x239   : > { %v6992_v55 = vsel %vm4304_vm5, %v3796_v27, %v3789_v50  ;;  %v1432_v57 = vmax.f32 %v1430_v49, %v1431_v2  ;;  %v2329_v56 = vmul.f32 %v6702_v12, %v2328_v22  ;;  %v2692_v43 = vsub.f32 1.0, %v2691_v21 }
 0x23a   : > { %5718 = vrcp.f32 %v6961_v31  ;;  %v6998_v13 = vadd.f32 %v2052_v53, %v6935_v3  ;;  %v2055_v20 = vrot.slane %v2054_v23, 4  ;;  %v1263_v29 = vrot.slane %v1262_v59, 2 }
 0x23b   : > { %v1882_v63 = vrot.slane %v1881_v36, 2  ;;  %v1259_v17 = vmax.f32 %v1257_v11, %v1258_v14  ;;  %5480 = vmatmul.msk.f32.gmra.mxu0 %vm795_vm1, %v2329_v56  ;;  %v3721_v34 = vmul.f32 %v2329_v56, %v6619_v6  ;;  %v2693_v49 = vmul.f32 %v6870_v7, %v2692_v43 }
 0x23c   : > { %v3954_v12 = vrot.slane %v6970_v60, 2  ;;  %5720 = vpow2.f32 %v1723_v51  ;;  %v1677_v22 = vsub.f32 %v6884_v58, %v1427_v26  ;;  %vm2696_vm7 = vweird.f32 %v6870_v7 }
 0x23d   : > { %v1433_v3 = vrot.slane %v1432_v57, 1  ;;  %v3797_v53 = vsel %vm795_vm1, %v3721_v34, 0.0  ;;  %v1435_v46 = vsel %vm795_vm1, %v7000_v47, -inf  ;;  %v2694_v11 = vadd.f32 %v6870_v7, %v2693_v49 }
 0x23e   : > { %v1264_v54 = vmax.f32 %v1262_v59, %v1263_v29  ;;  %v3798_v9 = vrot.slane %v3797_v53, 4  ;;  %vm2695_vm8 = vweird.f32 %v6815_v39  ;;  %v2699_v44 = vand.u32 2147483647, %v6815_v39  ;;  %v7014_v2 = vpop.eup %5716 }
 0x23f   : > { %v1883_v40 = vadd.f32 %v1882_v63, %v1881_v36  ;;  %v2056_v58 = vadd.f32 %v2055_v20, %v2054_v23  ;;  %v1653_v50 = vsub.f32 %v6900_v41, %v1259_v17  ;;  %vm7017_vm9 = vmor %vm2695_vm8, %vm2696_vm7  ;;  %v2701_v37 = vand.u32 2147483648, %v6815_v39 }
 0x240   : > { %v7022_v14 = vpop.eup %5718  ;;  %v3799_v59 = vadd.f32 %v3798_v9, %v3797_v53  ;;  %v1436_v21 = vrot.slane %v1435_v46, 4  ;;  %v2698_v51 = vsel %vm7017_vm9, %v6870_v7, %v2694_v11  ;;  %v2331_v36 = vmul.f32 %v6911_v4, %v6837_v52  ;;  %v7034_v7 = vpop.f32.mrf.mxu1 }
 0x241   : > { %v7030_v23 = vadd.f32 %v3954_v12, %v6970_v60  ;;  %v1773_v41 = vmul.f32 1.442695, %v1677_v22  ;;  %v1434_v26 = vmax.f32 %v1432_v57, %v1433_v3  ;;  %v2702_v56 = vor.u32 1.1754944e-38, %v2701_v37 }
 0x242   : > { %v7032_v43 = vpop.eup %5720  ;;  %v1265_v39 = vrot.slane %v1264_v54, 1  ;;  %v3800_v20 = vrot.slane %v3799_v59, 2  ;;  %vm2700_vm10 = vcmp.eq.f32.partialorder %v2699_v44, 8.507059e+37  ;;  %v2332_v29 = vsub.f32 1.0, %v2331_v36 }
 0x243   : > { %v1884_v63 = vrot.slane %v1883_v40, 1  ;;  %v2057_v17 = vrot.slane %v2056_v58, 2  ;;  %v1725_v34 = vmul.f32 1.442695, %v1653_v50  ;;  %v2703_v49 = vsel %vm2700_vm10, %v2702_v56, %v2698_v51 }
 0x244   : > { %v3801_v53 = vadd.f32 %v3800_v20, %v3799_v59  ;;  %v1437_v11 = vmax.f32 %v1435_v46, %v1436_v21  ;;  %v7037_v60 = vmul.f32 %v6706_v33, %v2703_v49  ;;  %v2333_v57 = vmul.f32 %v6911_v4, %v2332_v29 }
 0x245   : > { %v1886_v12 = vsel %vm795_vm1, %v7032_v43, 0.0  ;;  %v3744_v22 = vmul.f32 %v6876_v35, %v6696_v1  ;;  %v1678_v3 = vsub.f32 %v6929_v62, %v1434_v26  ;;  %vm2336_vm11 = vweird.f32 %v6911_v4 }
 0x246   : > { %5722 = vpow2.f32 %v1773_v41  ;;  %v1266_v9 = vmax.f32 %v1264_v54, %v1265_v39  ;;  %v3802_v44 = vrot.slane %v3801_v53, 1  ;;  %5505 = vmatmul.msk.f32.gmra.mxu3 %vm795_vm1, %v7037_v60  ;;  %v1267_v33 = vsel %vm795_vm1, %v7034_v7, -inf }
 0x247   : > { %v2334_v46 = vadd.f32 %v6911_v4, %v2333_v57  ;;  %vm2335_vm12 = vweird.f32 %v6837_v52  ;;  %v2339_v50 = vand.u32 2147483647, %v6837_v52  ;;  %v2341_v35 = vand.u32 2147483648, %v6837_v52 }
 0x248   : > { %v1887_v62 = vrot.slane %v1886_v12, 4  ;;  %5724 = vpow2.f32 %v1725_v34  ;;  %v3803_v27 = vadd.f32 %v3802_v44, %v3801_v53  ;;  %v1438_v37 = vrot.slane %v1437_v11, 2  ;;  %vm7054_vm13 = vmor %vm2335_vm12, %vm2336_vm11 }
 0x249   : > { %v1775_v59 = vmul.f32 1.442695, %v1678_v3  ;;  %vm4306_vm14 = vcmask 1042434   ;;  %v1268_v21 = vrot.slane %v1267_v33, 4  ;;  %v2338_v51 = vsel %vm7054_vm13, %v6911_v4, %v2334_v46 }
 0x24a   : > { %v7061_v36 = vadd.f32 %v1884_v63, %v1883_v40  ;;  %v2058_v41 = vadd.f32 %v2057_v17, %v2056_v58  ;;  %v7065_v52 = vsel %vm4306_vm14, %v3803_v27, %v6992_v55  ;;  %v2342_v26 = vor.u32 1.1754944e-38, %v2341_v35  ;;  %v7074_v63 = vpop.f32.mrf.mxu2 }
 0x24b   : > { %9807 = vst [vmem:[#allocation21_spill] sm:$0xff] %v7065_v52  ;;  %v3958_v56 = vsel %vm795_vm1, %v3744_v22, 0.0  ;;  %v1654_v39 = vsub.f32 %v6950_v19, %v1266_v9  ;;  %vm2340_vm15 = vcmp.eq.f32.partialorder %v2339_v50, 8.507059e+37  ;;  %v2706_v20 = vmul.f32 %v6918_v15, %v6866_v24 }
 0x24c   : > { %v7071_v29 = vpop.eup %5722  ;;  %5726 = vrcp.f32 %v6998_v13  ;;  %v1888_v4 = vadd.f32 %v1887_v62, %v1886_v12  ;;  %v1439_v40 = vmax.f32 %v1437_v11, %v1438_v37  ;;  %v2343_v58 = vsel %vm2340_vm15, %v2342_v26, %v2338_v51 }
 0x24d   : > { %5728 = vpow2.f32 %v1775_v59  ;;  %v1269_v17 = vmax.f32 %v1267_v33, %v1268_v21  ;;  %v7078_v34 = vmul.f32 %v6729_v0, %v2343_v58  ;;  %v2059_v49 = vrot.slane %v2058_v41, 1 }
 0x24e   : > { %v7080_v19 = vpop.eup %5724  ;;  %v3956_v53 = vrot.slane %v7030_v23, 1  ;;  %v3959_v57 = vrot.slane %v3958_v56, 4  ;;  %v2707_v22 = vsub.f32 1.0, %v2706_v20  ;;  %5730 = vrcp.f32 %v7061_v36 }
 0x24f   : > { %v2061_v11 = vsel %vm795_vm1, %v7071_v29, 0.0  ;;  %v1727_v12 = vmul.f32 1.442695, %v1654_v39  ;;  %5481 = vmatmul.msk.f32.gmra.mxu0 %vm795_vm1, %v7078_v34  ;;  %v1442_v0 = vsel %vm795_vm1, %v7074_v63, -inf  ;;  %v1889_v3 = vrot.slane %v1888_v4, 2 }
 0x250   : > { %v1440_v9 = vrot.slane %v1439_v40, 1  ;;  %v2708_v44 = vmul.f32 %v6918_v15, %v2707_v22  ;;  %v2716_v33 = vand.u32 2147483648, %v6866_v24  ;;  %v1893_v46 = vsel %vm795_vm1, %v7080_v19, 0.0 }
 0x251   : > { %v1270_v50 = vrot.slane %v1269_v17, 2  ;;  %vm2711_vm2 = vweird.f32 %v6918_v15  ;;  %v2714_v35 = vand.u32 2147483647, %v6866_v24  ;;  %v7098_v27 = vadd.f32 %v2059_v49, %v2058_v41 }
 0x252   : > { %v7096_v62 = vpop.eup %5726  ;;  %v2062_v37 = vrot.slane %v2061_v11, 4  ;;  %v3960_v54 = vadd.f32 %v3959_v57, %v3958_v56  ;;  %v1443_v59 = vrot.slane %v1442_v0, 4  ;;  %v3745_v51 = vmul.f32 %v6957_v45, %v6696_v1 }
 0x253   : > { %v7100_v21 = vpop.eup %5728  ;;  %5732 = vpow2.f32 %v1727_v12  ;;  %v2709_v26 = vadd.f32 %v6918_v15, %v2708_v44  ;;  %vm2710_vm3 = vweird.f32 %v6866_v24  ;;  %v7106_v39 = vadd.f32 %v1889_v3, %v1888_v4 }
 0x254   : > { %v1894_v20 = vrot.slane %v1893_v46, 4  ;;  %v1441_v58 = vmax.f32 %v1439_v40, %v1440_v9  ;;  %vm2712_vm4 = vmor %vm2710_vm3, %vm2711_vm2  ;;  %v2717_v41 = vor.u32 1.1754944e-38, %v2716_v33  ;;  %v7110_v56 = vpop.eup %5730  ;;  %v1271_v49 = vmax.f32 %v1269_v17, %v1270_v50 }
 0x255   : > { %v2713_v57 = vsel %vm2712_vm4, %v6918_v15, %v2709_v26  ;;  %vm2715_vm6 = vcmp.eq.f32.partialorder %v2714_v35, 8.507059e+37  ;;  %v2346_v45 = vmul.f32 %v6924_v25, %v6868_v30  ;;  %v3961_v22 = vrot.slane %v3960_v54, 2 }
 0x256   : > { %v2068_v24 = vsel %vm795_vm1, %v7100_v21, 0.0  ;;  %v1444_v4 = vmax.f32 %v1442_v0, %v1443_v59  ;;  %v2718_v12 = vsel %vm2715_vm6, %v2717_v41, %v2713_v57  ;;  %v2063_v40 = vadd.f32 %v2062_v37, %v2061_v11  ;;  %v7130_v11 = vpop.f32.mrf.mxu1 }
 0x257   : > { %v3965_v3 = vsel %vm795_vm1, %v3745_v51, 0.0  ;;  %v7119_v9 = vmul.f32 %v6749_v18, %v2718_v12  ;;  %v2347_v44 = vsub.f32 1.0, %v2346_v45  ;;  %5734 = vrcp.f32 %v7098_v27 }
 0x258   : > { %v7123_v15 = vadd.f32 %v3956_v53, %v7030_v23  ;;  %v1895_v17 = vadd.f32 %v1894_v20, %v1893_v46  ;;  %v1679_v33 = vsub.f32 %v7000_v47, %v1441_v58  ;;  %v2069_v35 = vrot.slane %v2068_v24, 4 }
 0x259   : > { %v7126_v50 = vpop.eup %5732  ;;  %v1272_v0 = vrot.slane %v1271_v49, 1  ;;  %5506 = vmatmul.msk.f32.gmra.mxu3 %vm795_vm1, %v7119_v9  ;;  %v2348_v18 = vmul.f32 %v6924_v25, %v2347_v44  ;;  %vm2351_vm7 = vweird.f32 %v6924_v25  ;;  %v1891_v37 = vrot.slane %v7106_v39, 1 }
 0x25a   : > { %9808 = vst [vmem:[#allocation22_spill] sm:$0xff] %v7123_v15  ;;  %v7135_v23 = vadd.f32 %v3961_v22, %v3960_v54  ;;  %v3966_v53 = vrot.slane %v3965_v3, 4  ;;  %v1445_v46 = vrot.slane %v1444_v4, 2  ;;  %v2064_v47 = vrot.slane %v2063_v40, 2 }
 0x25b   : > { %v2349_v59 = vadd.f32 %v6924_v25, %v2348_v18  ;;  %vm2350_vm8 = vweird.f32 %v6868_v30  ;;  %v2354_v51 = vand.u32 2147483647, %v6868_v30  ;;  %v1900_v26 = vsel %vm795_vm1, %v7126_v50, 0.0 }
 0x25c   : > { %v1777_v20 = vmul.f32 1.442695, %v1679_v33  ;;  %v1274_v58 = vsel %vm795_vm1, %v7130_v11, -inf  ;;  %vm7144_vm9 = vmor %vm2350_vm8, %vm2351_vm7  ;;  %v2356_v54 = vand.u32 2147483648, %v6868_v30  ;;  %v1896_v57 = vrot.slane %v1895_v17, 2 }
 0x25d   : > { %v2070_v45 = vadd.f32 %v2069_v35, %v2068_v24  ;;  %v1273_v22 = vmax.f32 %v1271_v49, %v1272_v0  ;;  %v2353_v12 = vsel %vm7144_vm9, %v6924_v25, %v2349_v59  ;;  %v7152_v44 = vpop.eup %5734  ;;  %v3967_v18 = vadd.f32 %v3966_v53, %v3965_v3  ;;  %v7162_v3 = vpop.f32.mrf.mxu2 }
 0x25e   : > { %v1446_v33 = vmax.f32 %v1444_v4, %v1445_v46  ;;  %v2357_v55 = vor.u32 1.1754944e-38, %v2356_v54  ;;  %v2721_v52 = vmul.f32 %v7014_v2, %v6926_v5  ;;  %v1901_v16 = vrot.slane %v1900_v26, 4 }
 0x25f   : > { %v3746_v15 = vmul.f32 %v7037_v60, %v6696_v1  ;;  %v1275_v30 = vrot.slane %v1274_v58, 4  ;;  %vm2355_vm10 = vcmp.eq.f32.partialorder %v2354_v51, 8.507059e+37  ;;  %v2065_v24 = vadd.f32 %v2064_v47, %v2063_v40 }
 0x260   : > { %5736 = vpow2.f32 %v1777_v20  ;;  %v2358_v49 = vsel %vm2355_vm10, %v2357_v55, %v2353_v12  ;;  %v2722_v35 = vsub.f32 1.0, %v2721_v52  ;;  %v1897_v0 = vadd.f32 %v1896_v57, %v1895_v17 }
 0x261   : > { %v2071_v25 = vrot.slane %v2070_v45, 2  ;;  %v1655_v59 = vsub.f32 %v7034_v7, %v1273_v22  ;;  %v7160_v4 = vmul.f32 %v6754_v42, %v2358_v49  ;;  %v3968_v53 = vrot.slane %v3967_v18, 2 }
 0x262   : > { %v1447_v46 = vrot.slane %v1446_v33, 1  ;;  %v2723_v41 = vmul.f32 %v7014_v2, %v2722_v35  ;;  %vm2726_vm11 = vweird.f32 %v7014_v2  ;;  %v1902_v60 = vadd.f32 %v1901_v16, %v1900_v26 }
 0x263   : > { %v3972_v40 = vsel %vm795_vm1, %v3746_v15, 0.0  ;;  %v1276_v55 = vmax.f32 %v1274_v58, %v1275_v30  ;;  %5482 = vmatmul.msk.f32.gmra.mxu0 %vm795_vm1, %v7160_v4  ;;  %v2731_v7 = vand.u32 2147483648, %v6926_v5  ;;  %v1449_v42 = vsel %vm795_vm1, %v7162_v3, -inf }
 0x264   : > { %v2724_v52 = vadd.f32 %v7014_v2, %v2723_v41  ;;  %vm2725_vm12 = vweird.f32 %v6926_v5  ;;  %v2729_v17 = vand.u32 2147483647, %v6926_v5  ;;  %v7176_v47 = vadd.f32 %v1891_v37, %v7106_v39 }
 0x265   : > { %v3963_v16 = vrot.slane %v7135_v23, 1  ;;  %v2072_v15 = vadd.f32 %v2071_v25, %v2070_v45  ;;  %v1729_v51 = vmul.f32 1.442695, %v1655_v59  ;;  %vm7179_vm13 = vmor %vm2725_vm12, %vm2726_vm11  ;;  %v2066_v58 = vrot.slane %v2065_v24, 1 }
 0x266   : > { %v7183_v20 = vpop.eup %5736  ;;  %v3973_v54 = vrot.slane %v3972_v40, 4  ;;  %v1448_v57 = vmax.f32 %v1446_v33, %v1447_v46  ;;  %v2728_v5 = vsel %vm7179_vm13, %v7014_v2, %v2724_v52  ;;  %v1898_v22 = vrot.slane %v1897_v0, 1 }
 0x267   : > { %9813 = vst [vmem:[#allocation23_spill] sm:$0xff] %v7183_v20  ;;  %v1903_v39 = vrot.slane %v1902_v60, 2  ;;  %v1450_v37 = vrot.slane %v1449_v42, 4  ;;  %v2732_v12 = vor.u32 1.1754944e-38, %v2731_v7  ;;  %v7188_v30 = vadd.f32 %v3968_v53, %v3967_v18 }
 0x268   : > { %v1277_v45 = vrot.slane %v1276_v55, 2  ;;  %vm2730_vm15 = vcmp.eq.f32.partialorder %v2729_v17, 8.507059e+37  ;;  %v2361_v49 = vmul.f32 %v7022_v14, %v6961_v31  ;;  %v2073_v35 = vrot.slane %v2072_v15, 1 }
 0x269   : > { %v2075_v25 = vsel %vm795_vm1, %v7183_v20, 0.0  ;;  %5738 = vpow2.f32 %v1729_v51  ;;  %v2733_v33 = vsel %vm2730_vm15, %v2732_v12, %v2728_v5  ;;  %v3974_v59 = vadd.f32 %v3973_v54, %v3972_v40 }
 0x26a   : > { %v1680_v2 = vsub.f32 %v7074_v63, %v1448_v57  ;;  %v7196_v46 = vmul.f32 %v6794_v28, %v2733_v33  ;;  %v2362_v41 = vsub.f32 1.0, %v2361_v49  ;;  %5740 = vrcp.f32 %v7176_v47  ;;  %v4237_v28 = vld [vmem:[%s9746_s3 + $0x30] sm:$0xff]  ;;  %v7217_v57 = vpop.f32.mrf.mxu1 }
 0x26b   : > { %v1904_v18 = vadd.f32 %v1903_v39, %v1902_v60  ;;  %v3722_v53 = vmul.f32 %v7078_v34, %v6619_v6  ;;  %v1451_v7 = vmax.f32 %v1449_v42, %v1450_v37  ;;  %v2076_v52 = vrot.slane %v2075_v25, 4  ;;  %4392 = vmatpush.msra.mxu0 %v4237_v28 }
 0x26c   : > { %v1278_v17 = vmax.f32 %v1276_v55, %v1277_v45  ;;  %5507 = vmatmul.msk.f32.gmra.mxu3 %vm795_vm1, %v7196_v46  ;;  %v2363_v40 = vmul.f32 %v7022_v14, %v2362_v41  ;;  %v2371_v63 = vand.u32 2147483648, %v6961_v31  ;;  %v7208_v51 = vadd.f32 %v2066_v58, %v2065_v24 }
 0x26d   : > { %v7210_v60 = vadd.f32 %v1898_v22, %v1897_v0  ;;  %vm2366_vm2 = vweird.f32 %v7022_v14  ;;  %v2369_v34 = vand.u32 2147483647, %v6961_v31  ;;  %v7214_v55 = vadd.f32 %v2073_v35, %v2072_v15 }
 0x26e   : > { %v3970_v42 = vrot.slane %v7188_v30, 1  ;;  %v3975_v26 = vrot.slane %v3974_v59, 2  ;;  %v1779_v54 = vmul.f32 1.442695, %v1680_v2  ;;  %v3804_v24 = vsel %vm795_vm1, %v3722_v53, 0.0 }
 0x26f   : > { %v7219_v5 = vpop.eup %5738  ;;  %v1452_v58 = vrot.slane %v1451_v7, 2  ;;  %v2364_v0 = vadd.f32 %v7022_v14, %v2363_v40  ;;  %vm2365_vm3 = vweird.f32 %v6961_v31  ;;  %v1905_v22 = vrot.slane %v1904_v18, 1 }
 0x270   : > { %9814 = vst [vmem:[#allocation24_spill] sm:$0xff] %v7219_v5  ;;  %v2077_v39 = vadd.f32 %v2076_v52, %v2075_v25  ;;  %v1279_v37 = vrot.slane %v1278_v17, 1  ;;  %vm2367_vm4 = vmor %vm2365_vm3, %vm2366_vm2  ;;  %v2372_v15 = vor.u32 1.1754944e-38, %v2371_v63  ;;  %v7226_v12 = vpop.eup %5740  ;;  %v1281_v45 = vsel %vm795_vm1, %v7217_v57, -inf }
 0x271   : > { %v2368_v49 = vsel %vm2367_vm4, %v7022_v14, %v2364_v0  ;;  %vm2370_vm6 = vcmp.eq.f32.partialorder %v2369_v34, 8.507059e+37  ;;  %v9815_v35 = vrot.slane %v6336_v32, 5  ;;  %v1907_v31 = vsel %vm795_vm1, %v7219_v5, 0.0  ;;  %v7246_v34 = vpop.f32.mrf.mxu2 }
 0x272   : > { %v3805_v25 = vrot.slane %v3804_v24, 4  ;;  %5742 = vpow2.f32 %v1779_v54  ;;  %v2373_v2 = vsel %vm2370_vm6, %v2372_v15, %v2368_v49  ;;  %v3747_v41 = vmul.f32 %v7119_v9, %v6696_v1 }
 0x273   : > { %v624_v33 = vperm.slane %v9815_v35, 0  ;;  %v1453_v53 = vmax.f32 %v1451_v7, %v1452_v58  ;;  %v7238_v52 = vmul.f32 %v6813_v10, %v2373_v2  ;;  %5744 = vrcp.f32 %v7208_v51 }
 0x274   : > { %v7242_v14 = vadd.f32 %v1905_v22, %v1904_v18  ;;  %v7244_v63 = vadd.f32 %v3975_v26, %v3974_v59  ;;  %v1282_v28 = vrot.slane %v1281_v45, 4  ;;  %v2078_v54 = vrot.slane %v2077_v39, 2 }
 0x275   : > { %v776_v40 = vmul.f32 %v6655_v61, %v624_v33  ;;  %v1908_v0 = vrot.slane %v1907_v31, 4  ;;  %v1280_v15 = vmax.f32 %v1278_v17, %v1279_v37  ;;  %5483 = vmatmul.msk.f32.gmra.mxu0 %vm795_vm1, %v7238_v52  ;;  %v562_v10 = vrot.slane %v6336_v32, 6 }
 0x276   : > { %v7255_v9 = vadd.f32 %v3963_v16, %v7135_v23  ;;  %5746 = vrcp.f32 %v7210_v60  ;;  %v7259_v59 = vadd.f32 %v3970_v42, %v7188_v30  ;;  %v3806_v18 = vadd.f32 %v3805_v25, %v3804_v24 }
 0x277   : > { %5467 = vmatmul.msk.f32.gmra.mxu2 %vm795_vm1, %v776_v40  ;;  %5748 = vrcp.f32 %v7214_v55  ;;  %v3979_v7 = vsel %vm795_vm1, %v3747_v41, 0.0  ;;  %v1454_v17 = vrot.slane %v1453_v53, 1  ;;  %v1456_v26 = vsel %vm795_vm1, %v7246_v34, -inf }
 0x278   : > { %9816 = vst [vmem:[#allocation25_spill] sm:$0xff] %v7255_v9  ;;  %v7265_v58 = vpop.eup %5742  ;;  %5750 = vrcp.f32 %v7242_v14  ;;  %v3977_v23 = vrot.slane %v7244_v63, 1  ;;  %v1283_v16 = vmax.f32 %v1281_v45, %v1282_v28  ;;  %v2736_v30 = vmul.f32 %v7096_v62, %v6998_v13 }
 0x279   : > { %9817 = vst [vmem:[#allocation26_spill] sm:$0xff] %v7259_v59  ;;  %v2079_v42 = vadd.f32 %v2078_v54, %v2077_v39  ;;  %v1909_v24 = vadd.f32 %v1908_v0, %v1907_v31  ;;  %v1656_v22 = vsub.f32 %v7130_v11, %v1280_v15  ;;  %v625_v37 = vperm.slane %v562_v10, 0  ;;  %v7272_v49 = vpop.eup %5744 }
 0x27a   : > { %9818 = vst [vmem:[#allocation27_spill] sm:$0xff] %v7265_v58  ;;  %v3807_v35 = vrot.slane %v3806_v18, 2  ;;  %v3980_v33 = vrot.slane %v3979_v7, 4  ;;  %v1457_v25 = vrot.slane %v1456_v26, 4  ;;  %v2737_v2 = vsub.f32 1.0, %v2736_v30 }
 0x27b   : > { %v2082_v41 = vsel %vm795_vm1, %v7265_v58, 0.0  ;;  %v3723_v45 = vmul.f32 %v7160_v4, %v6619_v6  ;;  %v1455_v40 = vmax.f32 %v1453_v53, %v1454_v17  ;;  %v2746_v28 = vand.u32 2147483648, %v6998_v13 }
 0x27c   : > { %v7279_v39 = vpop.eup %5746  ;;  %v1284_v31 = vrot.slane %v1283_v16, 2  ;;  %v2738_v11 = vmul.f32 %v7096_v62, %v2737_v2  ;;  %vm2741_vm7 = vweird.f32 %v7096_v62  ;;  %v2744_v54 = vand.u32 2147483647, %v6998_v13 }
 0x27d   : > { %v7284_v0 = vpop.eup %5748  ;;  %v2080_v15 = vrot.slane %v2079_v42, 1  ;;  %v1910_v10 = vrot.slane %v1909_v24, 2  ;;  %v1731_v30 = vmul.f32 1.442695, %v1656_v22  ;;  %v777_v59 = vmul.f32 %v6655_v61, %v625_v37 }
 0x27e   : > { %v7287_v4 = vpop.eup %5750  ;;  %v3981_v53 = vadd.f32 %v3980_v33, %v3979_v7  ;;  %v1458_v17 = vmax.f32 %v1456_v26, %v1457_v25  ;;  %v2739_v9 = vadd.f32 %v7096_v62, %v2738_v11  ;;  %vm2740_vm8 = vweird.f32 %v6998_v13 }
 0x27f   : > { %v2083_v2 = vrot.slane %v2082_v41, 4  ;;  %v3811_v58 = vsel %vm795_vm1, %v3723_v45, 0.0  ;;  %v1681_v5 = vsub.f32 %v7162_v3, %v1455_v40  ;;  %vm2742_vm9 = vmor %vm2740_vm8, %vm2741_vm7  ;;  %v2747_v20 = vor.u32 1.1754944e-38, %v2746_v28  ;;  %5468 = vmatmul.msk.f32.gmra.mxu2 %vm795_vm1, %v777_v59 }
 0x280   : > { %v1285_v22 = vmax.f32 %v1283_v16, %v1284_v31  ;;  %v2743_v37 = vsel %vm2742_vm9, %v7096_v62, %v2739_v9  ;;  %vm2745_vm10 = vcmp.eq.f32.partialorder %v2744_v54, 8.507059e+37  ;;  %v563_v7 = vrot.slane %v6336_v32, 7 }
 0x281   : > { %v3808_v26 = vadd.f32 %v3807_v35, %v3806_v18  ;;  %5752 = vpow2.f32 %v1731_v30  ;;  %v2748_v13 = vsel %vm2745_vm10, %v2747_v20, %v2743_v37  ;;  %v2376_v33 = vmul.f32 %v7110_v56, %v7061_v36  ;;  %v7310_v20 = vpop.f32.mrf.mxu1 }
 0x282   : > { %v1911_v25 = vadd.f32 %v1910_v10, %v1909_v24  ;;  %v3982_v3 = vrot.slane %v3981_v53, 2  ;;  %v1459_v45 = vrot.slane %v1458_v17, 2  ;;  %v7301_v40 = vmul.f32 %v6834_v48, %v2748_v13 }
 0x283   : > { %v7303_v28 = vadd.f32 %v2080_v15, %v2079_v42  ;;  %v7306_v59 = vadd.f32 %v3977_v23, %v7244_v63  ;;  %v3812_v62 = vrot.slane %v3811_v58, 4  ;;  %v2377_v9 = vsub.f32 1.0, %v2376_v33 }
 0x284   : > { %v2084_v32 = vadd.f32 %v2083_v2, %v2082_v41  ;;  %v1781_v18 = vmul.f32 1.442695, %v1681_v5  ;;  %v1286_v16 = vrot.slane %v1285_v22, 1  ;;  %5508 = vmatmul.msk.f32.gmra.mxu3 %vm795_vm1, %v7301_v40  ;;  %v626_v24 = vperm.slane %v563_v7, 0 }
 0x285   : > { %9819 = vst [vmem:[#allocation28_spill] sm:$0xff] %v7306_v59  ;;  %v2378_v35 = vmul.f32 %v7110_v56, %v2377_v9  ;;  %vm2381_vm11 = vweird.f32 %v7110_v56  ;;  %v2384_v48 = vand.u32 2147483647, %v7061_v36  ;;  %v2386_v63 = vand.u32 2147483648, %v7061_v36  ;;  %v7346_v9 = vpop.permute.xlu1 %713 }
 0x286   : > { %v1912_v23 = vrot.slane %v1911_v25, 1  ;;  %v3809_v42 = vrot.slane %v3808_v26, 1  ;;  %v7316_v31 = vadd.f32 %v3982_v3, %v3981_v53  ;;  %v1460_v5 = vmax.f32 %v1458_v17, %v1459_v45  ;;  %v7343_v45 = vpop.f32.mrf.mxu2 }
 0x287   : > { %v7318_v41 = vpop.eup %5752  ;;  %v3813_v11 = vadd.f32 %v3812_v62, %v3811_v58  ;;  %v1288_v54 = vsel %vm795_vm1, %v7310_v20, -inf  ;;  %v2379_v15 = vadd.f32 %v7110_v56, %v2378_v35  ;;  %vm2380_vm12 = vweird.f32 %v7061_v36 }
 0x288   : > { %5754 = vpow2.f32 %v1781_v18  ;;  %v1287_v10 = vmax.f32 %v1285_v22, %v1286_v16  ;;  %vm2382_vm13 = vmor %vm2380_vm12, %vm2381_vm11  ;;  %v2387_v30 = vor.u32 1.1754944e-38, %v2386_v63  ;;  %v778_v2 = vmul.f32 %v6655_v61, %v626_v24 }
 0x289   : > { %v2085_v37 = vrot.slane %v2084_v32, 2  ;;  %v3748_v53 = vmul.f32 %v7196_v46, %v6696_v1  ;;  %v2383_v17 = vsel %vm2382_vm13, %v7110_v56, %v2379_v15  ;;  %vm2385_vm15 = vcmp.eq.f32.partialorder %v2384_v48, 8.507059e+37 }
 0x28a   : > { %v1914_v58 = vsel %vm795_vm1, %v7318_v41, 0.0  ;;  %v1461_v7 = vrot.slane %v1460_v5, 1  ;;  %v1289_v13 = vrot.slane %v1288_v54, 4  ;;  %v2388_v33 = vsel %vm2385_vm15, %v2387_v30, %v2383_v17  ;;  %5469 = vmatmul.msk.f32.gmra.mxu2 %vm795_vm1, %v778_v2 }
 0x28b   : > { %5756 = vrcp.f32 %v7303_v28  ;;  %v7332_v36 = vadd.f32 %v3809_v42, %v3808_v26  ;;  %v7335_v61 = vmul.f32 %v6944_v8, %v2388_v33  ;;  %v2751_v46 = vmul.f32 %v7152_v44, %v7098_v27 }
 0x28c   : > { %v7339_v56 = vadd.f32 %v1912_v23, %v1911_v25  ;;  %v3984_v22 = vrot.slane %v7316_v31, 1  ;;  %v1657_v3 = vsub.f32 %v7217_v57, %v1287_v10  ;;  %v627_v62 = vperm.slane %v6341_v38, 0 }
 0x28d   : > { %9820 = vst [vmem:[#allocation29_spill] sm:$0xff] %v7332_v36  ;;  %v7348_v26 = vadd.f32 %v2085_v37, %v2084_v32  ;;  %v1915_v18 = vrot.slane %v1914_v58, 4  ;;  %v3814_v8 = vrot.slane %v3813_v11, 2  ;;  %5484 = vmatmul.msk.f32.gmra.mxu0 %vm795_vm1, %v7335_v61  ;;  %v2752_v16 = vsub.f32 1.0, %v2751_v46  ;;  %v7371_v37 = vpop.f32.mrf.mxu1 }
 0x28e   : > { %v7352_v25 = vpop.eup %5754  ;;  %v3986_v24 = vsel %vm795_vm1, %v3748_v53, 0.0  ;;  %v3724_v57 = vmul.f32 %v7238_v52, %v6619_v6  ;;  %v1462_v35 = vmax.f32 %v1460_v5, %v1461_v7  ;;  %v1290_v48 = vmax.f32 %v1288_v54, %v1289_v13 }
 0x28f   : > { %v1463_v63 = vsel %vm795_vm1, %v7343_v45, -inf  ;;  %v2753_v32 = vmul.f32 %v7152_v44, %v2752_v16  ;;  %vm2756_vm2 = vweird.f32 %v7152_v44  ;;  %v2761_v23 = vand.u32 2147483648, %v7098_v27 }
 0x290   : > { %v1733_v42 = vmul.f32 1.442695, %v1657_v3  ;;  %v2759_v15 = vand.u32 2147483647, %v7098_v27  ;;  %v779_v10 = vmul.f32 %v7346_v9, %v627_v62  ;;  %v564_v30 = vrot.slane %v6341_v38, 1 }
 0x291   : > { %v7365_v2 = vpop.eup %5756  ;;  %v1916_v52 = vadd.f32 %v1915_v18, %v1914_v58  ;;  %v2089_v5 = vsel %vm795_vm1, %v7352_v25, 0.0  ;;  %v2754_v54 = vadd.f32 %v7152_v44, %v2753_v32  ;;  %vm2755_vm3 = vweird.f32 %v7098_v27 }
 0x292   : > { %v3818_v53 = vsel %vm795_vm1, %v3724_v57, 0.0  ;;  %v1682_v17 = vsub.f32 %v7246_v34, %v1462_v35  ;;  %v1291_v7 = vrot.slane %v1290_v48, 2  ;;  %v1464_v13 = vrot.slane %v1463_v63, 4  ;;  %vm2757_vm4 = vmor %vm2755_vm3, %vm2756_vm2  ;;  %5470 = vmatmul.msk.f32.gmra.mxu2 %vm795_vm1, %v779_v10  ;;  %v9821_v10 = vld [vmem:[#allocation20_spill] sm:$0xff] }
 0x293   : > { %v7378_v58 = vadd.f32 %v3814_v8, %v3813_v11  ;;  %v3987_v33 = vrot.slane %v3986_v24, 4  ;;  %v2758_v46 = vsel %vm2757_vm4, %v7152_v44, %v2754_v54  ;;  %v2762_v3 = vor.u32 1.1754944e-38, %v2761_v23 }
 0x294   : > { %5758 = vpow2.f32 %v1733_v42  ;;  %vm2760_vm6 = vcmp.eq.f32.partialorder %v2759_v15, 8.507059e+37  ;;  %v1295_v27 = vsel %vm795_vm1, %v7371_v37, -inf  ;;  %v628_v62 = vperm.slane %v564_v30, 0 }
 0x295   : > { %v1917_v34 = vrot.slane %v1916_v52, 2  ;;  %v2090_v18 = vrot.slane %v2089_v5, 4  ;;  %v3819_v16 = vrot.slane %v3818_v53, 4  ;;  %v2763_v57 = vsel %vm2760_vm6, %v2762_v3, %v2758_v46 }
 0x296   : > { %v1783_v35 = vmul.f32 1.442695, %v1682_v17  ;;  %v1292_v32 = vmax.f32 %v1290_v48, %v1291_v7  ;;  %v1465_v59 = vmax.f32 %v1463_v63, %v1464_v13  ;;  %v7384_v11 = vmul.f32 %v9821_v10, %v2763_v57 }
 0x297   : > { %5760 = vrcp.f32 %v7339_v56  ;;  %v1296_v44 = vrot.slane %v1295_v27, 4  ;;  %v2391_v8 = vmul.f32 %v7226_v12, %v7176_v47  ;;  %v565_v23 = vrot.slane %v6341_v38, 2 }
 0x298   : > { %v2087_v42 = vrot.slane %v7348_v26, 1  ;;  %v7392_v15 = vadd.f32 %v3984_v22, %v7316_v31  ;;  %v3988_v30 = vadd.f32 %v3987_v33, %v3986_v24  ;;  %5509 = vmatmul.msk.f32.gmra.mxu3 %vm795_vm1, %v7384_v11  ;;  %v780_v48 = vmul.f32 %v7346_v9, %v628_v62 }
 0x299   : > { %v1918_v63 = vadd.f32 %v1917_v34, %v1916_v52  ;;  %v2091_v54 = vadd.f32 %v2090_v18, %v2089_v5  ;;  %v3820_v17 = vadd.f32 %v3819_v16, %v3818_v53  ;;  %v2392_v7 = vsub.f32 1.0, %v2391_v8 }
 0x29a   : > { %9822 = vst [vmem:[#allocation20_spill] sm:$0xff] %v7392_v15  ;;  %v7397_v13 = vpop.eup %5758  ;;  %v3816_v46 = vrot.slane %v7378_v58, 1  ;;  %5762 = vpow2.f32 %v1783_v35  ;;  %v1293_v3 = vrot.slane %v1292_v32, 1  ;;  %v1466_v57 = vrot.slane %v1465_v59, 2  ;;  %5471 = vmatmul.msk.f32.gmra.mxu2 %vm795_vm1, %v780_v48  ;;  %v7412_v35 = vpop.f32.mrf.mxu2 }
 0x29b   : > { %v1297_v31 = vmax.f32 %v1295_v27, %v1296_v44  ;;  %v2393_v22 = vmul.f32 %v7226_v12, %v2392_v7  ;;  %v2401_v24 = vand.u32 2147483648, %v7176_v47  ;;  %v629_v33 = vperm.slane %v565_v23, 0 }
 0x29c   : > { %v7404_v52 = vadd.f32 %v2087_v42, %v7348_v26  ;;  %v3989_v5 = vrot.slane %v3988_v30, 2  ;;  %vm2396_vm7 = vweird.f32 %v7226_v12  ;;  %v2399_v53 = vand.u32 2147483647, %v7176_v47 }
 0x29d   : > { %v7408_v62 = vpop.eup %5760  ;;  %v1919_v34 = vrot.slane %v1918_v63, 1  ;;  %v2092_v18 = vrot.slane %v2091_v54, 2  ;;  %v1921_v27 = vsel %vm795_vm1, %v7397_v13, 0.0  ;;  %v3821_v16 = vrot.slane %v3820_v17, 2 }
 0x29e   : > { %v1294_v10 = vmax.f32 %v1292_v32, %v1293_v3  ;;  %v1467_v44 = vmax.f32 %v1465_v59, %v1466_v57  ;;  %v2394_v26 = vadd.f32 %v7226_v12, %v2393_v22  ;;  %vm2395_vm8 = vweird.f32 %v7176_v47 }
 0x29f   : > { %v1298_v8 = vrot.slane %v1297_v31, 2  ;;  %vm2397_vm9 = vmor %vm2395_vm8, %vm2396_vm7  ;;  %v2402_v23 = vor.u32 1.1754944e-38, %v2401_v24  ;;  %v781_v42 = vmul.f32 %v7346_v9, %v629_v33  ;;  %v566_v48 = vrot.slane %v6341_v38, 3 }
 0x2a0   : > { %v7418_v7 = vpop.eup %5762  ;;  %v2398_v15 = vsel %vm2397_vm9, %v7226_v12, %v2394_v26  ;;  %vm2400_vm10 = vcmp.eq.f32.partialorder %v2399_v53, 8.507059e+37  ;;  %v1470_v32 = vsel %vm795_vm1, %v7412_v35, -inf  ;;  %v2766_v59 = vmul.f32 %v7272_v49, %v7208_v51 }
 0x2a1   : > { %v7426_v47 = vadd.f32 %v3816_v46, %v7378_v58  ;;  %v7428_v3 = vadd.f32 %v3989_v5, %v3988_v30  ;;  %v1922_v57 = vrot.slane %v1921_v27, 4  ;;  %v2403_v22 = vsel %vm2400_vm10, %v2402_v23, %v2398_v15 }
 0x2a2   : > { %v7430_v24 = vadd.f32 %v1919_v34, %v1918_v63  ;;  %v1658_v33 = vsub.f32 %v7310_v20, %v1294_v10  ;;  %v1468_v36 = vrot.slane %v1467_v44, 1  ;;  %v7434_v12 = vmul.f32 %v7032_v43, %v2403_v22  ;;  %5472 = vmatmul.msk.f32.gmra.mxu2 %vm795_vm1, %v781_v42 }
 0x2a3   : > { %9823 = vst [vmem:[#allocation30_spill] sm:$0xff] %v7426_v47  ;;  %v2096_v53 = vsel %vm795_vm1, %v7418_v7, 0.0  ;;  %v1299_v26 = vmax.f32 %v1297_v31, %v1298_v8  ;;  %v1471_v58 = vrot.slane %v1470_v32, 4  ;;  %v2767_v46 = vsub.f32 1.0, %v2766_v59 }
 0x2a4   : > { %9824 = vst [vmem:[#allocation31_spill] sm:$0xff] %v7428_v3  ;;  %v7439_v30 = vadd.f32 %v2092_v18, %v2091_v54  ;;  %v7441_v5 = vadd.f32 %v3821_v16, %v3820_v17  ;;  %5485 = vmatmul.msk.f32.gmra.mxu0 %vm795_vm1, %v7434_v12  ;;  %v2776_v20 = vand.u32 2147483648, %v7208_v51  ;;  %v630_v15 = vperm.slane %v566_v48, 0  ;;  %v7451_v16 = vpop.f32.mrf.mxu1 }
 0x2a5   : > { %v1923_v43 = vadd.f32 %v1922_v57, %v1921_v27  ;;  %v2768_v63 = vmul.f32 %v7272_v49, %v2767_v46  ;;  %vm2771_vm11 = vweird.f32 %v7272_v49  ;;  %v2774_v34 = vand.u32 2147483647, %v7208_v51 }
 0x2a6   : > { %v2097_v31 = vrot.slane %v2096_v53, 4  ;;  %v3749_v54 = vmul.f32 %v7301_v40, %v6696_v1  ;;  %v1735_v18 = vmul.f32 1.442695, %v1658_v33  ;;  %v1469_v17 = vmax.f32 %v1467_v44, %v1468_v36  ;;  %v4236_v44 = vld [vmem:[%s9746_s3 + $0x28] sm:$0xff] }
 0x2a7   : > { %v1300_v10 = vrot.slane %v1299_v26, 1  ;;  %v1472_v8 = vmax.f32 %v1470_v32, %v1471_v58  ;;  %v2769_v23 = vadd.f32 %v7272_v49, %v2768_v63  ;;  %vm2770_vm12 = vweird.f32 %v7208_v51  ;;  %4393 = vmatpush.msra.mxu0 %v4236_v44 }
 0x2a8   : > { %v3725_v27 = vmul.f32 %v7335_v61, %v6619_v6  ;;  %vm2772_vm13 = vmor %vm2770_vm12, %vm2771_vm11  ;;  %v2777_v42 = vor.u32 1.1754944e-38, %v2776_v20  ;;  %v782_v48 = vmul.f32 %v7346_v9, %v630_v15  ;;  %v567_v59 = vrot.slane %v6341_v38, 4 }
 0x2a9   : > { %v2773_v40 = vsel %vm2772_vm13, %v7272_v49, %v2769_v23  ;;  %vm2775_vm15 = vcmp.eq.f32.partialorder %v2774_v34, 8.507059e+37  ;;  %v1302_v36 = vsel %vm795_vm1, %v7451_v16, -inf  ;;  %v2406_v51 = vmul.f32 %v7279_v39, %v7210_v60 }
 0x2aa   : > { %5764 = vrcp.f32 %v7404_v52  ;;  %v2098_v61 = vadd.f32 %v2097_v31, %v2096_v53  ;;  %v1683_v32 = vsub.f32 %v7343_v45, %v1469_v17  ;;  %v2778_v57 = vsel %vm2775_vm15, %v2777_v42, %v2773_v40  ;;  %5473 = vmatmul.msk.f32.gmra.mxu2 %vm795_vm1, %v782_v48 }
 0x2ab   : > { %v1301_v49 = vmax.f32 %v1299_v26, %v1300_v10  ;;  %v1473_v22 = vrot.slane %v1472_v8, 2  ;;  %v7471_v33 = vmul.f32 %v7071_v29, %v2778_v57  ;;  %v2407_v58 = vsub.f32 1.0, %v2406_v51 }
 0x2ac   : > { %v1924_v46 = vrot.slane %v1923_v43, 2  ;;  %v3993_v20 = vsel %vm795_vm1, %v3749_v54, 0.0  ;;  %v1303_v15 = vrot.slane %v1302_v36, 4  ;;  %v631_v63 = vperm.slane %v567_v59, 0 }
 0x2ad   : > { %5766 = vpow2.f32 %v1735_v18  ;;  %v3825_v53 = vsel %vm795_vm1, %v3725_v27, 0.0  ;;  %5510 = vmatmul.msk.f32.gmra.mxu3 %vm795_vm1, %v7471_v33  ;;  %v2408_v45 = vmul.f32 %v7279_v39, %v2407_v58  ;;  %vm2411_vm2 = vweird.f32 %v7279_v39 }
 0x2ae   : > { %v2099_v26 = vrot.slane %v2098_v61, 2  ;;  %v1785_v34 = vmul.f32 1.442695, %v1683_v32  ;;  %v2414_v29 = vand.u32 2147483647, %v7210_v60  ;;  %v2416_v31 = vand.u32 2147483648, %v7210_v60 }
 0x2af   : > { %v1659_v54 = vsub.f32 %v7371_v37, %v1301_v49  ;;  %v1474_v17 = vmax.f32 %v1472_v8, %v1473_v22  ;;  %v2409_v18 = vadd.f32 %v7279_v39, %v2408_v45  ;;  %vm2410_vm3 = vweird.f32 %v7210_v60  ;;  %v7490_v37 = vpop.f32.mrf.mxu2 }
 0x2b0   : > { %v7484_v10 = vpop.eup %5764  ;;  %v1304_v23 = vmax.f32 %v1302_v36, %v1303_v15  ;;  %vm2412_vm4 = vmor %vm2410_vm3, %vm2411_vm2  ;;  %v2417_v27 = vor.u32 1.1754944e-38, %v2416_v31  ;;  %v783_v42 = vmul.f32 %v7346_v9, %v631_v63  ;;  %v568_v48 = vrot.slane %v6341_v38, 5 }
 0x2b1   : > { %v2094_v59 = vrot.slane %v7439_v30, 1  ;;  %v1925_v40 = vadd.f32 %v1924_v46, %v1923_v43  ;;  %v2413_v44 = vsel %vm2412_vm4, %v7279_v39, %v2409_v18  ;;  %vm2415_vm6 = vcmp.eq.f32.partialorder %v2414_v29, 8.507059e+37 }
 0x2b2   : > { %v2100_v8 = vadd.f32 %v2099_v26, %v2098_v61  ;;  %v3994_v51 = vrot.slane %v3993_v20, 4  ;;  %v3826_v60 = vrot.slane %v3825_v53, 4  ;;  %v2418_v32 = vsel %vm2415_vm6, %v2417_v27, %v2413_v44  ;;  %5474 = vmatmul.msk.f32.gmra.mxu2 %vm795_vm1, %v783_v42 }
 0x2b3   : > { %v7493_v36 = vpop.eup %5766  ;;  %5768 = vpow2.f32 %v1785_v34  ;;  %v1737_v49 = vmul.f32 1.442695, %v1659_v54  ;;  %v7497_v22 = vmul.f32 %v7080_v19, %v2418_v32  ;;  %v1475_v43 = vrot.slane %v1474_v17, 1 }
 0x2b4   : > { %v1305_v39 = vrot.slane %v1304_v23, 2  ;;  %v1477_v58 = vsel %vm795_vm1, %v7490_v37, -inf  ;;  %v632_v61 = vperm.slane %v568_v48, 0  ;;  %5770 = vrcp.f32 %v7430_v24 }
 0x2b5   : > { %v7503_v46 = vadd.f32 %v2094_v59, %v7439_v30  ;;  %v3823_v15 = vrot.slane %v7441_v5, 1  ;;  %5486 = vmatmul.msk.f32.gmra.mxu0 %vm795_vm1, %v7497_v22  ;;  %v2781_v19 = vmul.f32 %v7284_v0, %v7214_v55  ;;  %v1926_v63 = vrot.slane %v1925_v40, 1 }
 0x2b6   : > { %v2101_v45 = vrot.slane %v2100_v8, 1  ;;  %v3995_v26 = vadd.f32 %v3994_v51, %v3993_v20  ;;  %v3827_v34 = vadd.f32 %v3826_v60, %v3825_v53  ;;  %v1928_v29 = vsel %vm795_vm1, %v7493_v36, 0.0 }
 0x2b7   : > { %5772 = vpow2.f32 %v1737_v49  ;;  %v1478_v31 = vrot.slane %v1477_v58, 4  ;;  %v2782_v54 = vsub.f32 1.0, %v2781_v19  ;;  %v1476_v30 = vmax.f32 %v1474_v17, %v1475_v43 }
 0x2b8   : > { %v1306_v18 = vmax.f32 %v1304_v23, %v1305_v39  ;;  %v784_v27 = vmul.f32 %v7346_v9, %v632_v61  ;;  %v569_v42 = vrot.slane %v6341_v38, 6  ;;  %vm2786_vm7 = vweird.f32 %v7284_v0 }
 0x2b9   : > { %v7514_v48 = vpop.eup %5768  ;;  %v2783_v59 = vmul.f32 %v7284_v0, %v2782_v54  ;;  %v2789_v20 = vand.u32 2147483647, %v7214_v55  ;;  %v2791_v53 = vand.u32 2147483648, %v7214_v55  ;;  %5774 = vrcp.f32 %v7503_v46 }
 0x2ba   : > { %v7521_v44 = vadd.f32 %v1926_v63, %v1925_v40  ;;  %v3996_v17 = vrot.slane %v3995_v26, 2  ;;  %v1929_v23 = vrot.slane %v1928_v29, 4  ;;  %5475 = vmatmul.msk.f32.gmra.mxu2 %vm795_vm1, %v784_v27  ;;  %v7524_v51 = vpop.eup %5770  ;;  %v3828_v60 = vrot.slane %v3827_v34, 2 }
 0x2bb   : > { %v1479_v32 = vmax.f32 %v1477_v58, %v1478_v31  ;;  %v2784_v49 = vadd.f32 %v7284_v0, %v2783_v59  ;;  %vm2785_vm8 = vweird.f32 %v7214_v55  ;;  %v2103_v43 = vsel %vm795_vm1, %v7514_v48, 0.0  ;;  %v7538_v31 = vpop.f32.mrf.mxu1 }
 0x2bc   : > { %v1684_v39 = vsub.f32 %v7412_v35, %v1476_v30  ;;  %vm2787_vm9 = vmor %vm2785_vm8, %vm2786_vm7  ;;  %v2792_v40 = vor.u32 1.1754944e-38, %v2791_v53  ;;  %v633_v61 = vperm.slane %v569_v42, 0  ;;  %v7535_v63 = vadd.f32 %v2101_v45, %v2100_v8 }
 0x2bd   : > { %v7533_v19 = vpop.eup %5772  ;;  %v1307_v54 = vrot.slane %v1306_v18, 1  ;;  %v2788_v58 = vsel %vm2787_vm9, %v7284_v0, %v2784_v49  ;;  %vm2790_vm10 = vcmp.eq.f32.partialorder %v2789_v20, 8.507059e+37  ;;  %5776 = vrcp.f32 %v7521_v44 }
 0x2be   : > { %v7542_v55 = vadd.f32 %v3823_v15, %v7441_v5  ;;  %v1930_v35 = vadd.f32 %v1929_v23, %v1928_v29  ;;  %v2793_v30 = vsel %vm2790_vm10, %v2792_v40, %v2788_v58  ;;  %v7544_v27 = vadd.f32 %v3996_v17, %v3995_v26 }
 0x2bf   : > { %v2104_v42 = vrot.slane %v2103_v43, 4  ;;  %v1480_v59 = vrot.slane %v1479_v32, 2  ;;  %v7547_v8 = vmul.f32 %v7100_v21, %v2793_v30  ;;  %v7549_v45 = vpop.eup %5774  ;;  %v1787_v0 = vmul.f32 1.442695, %v1684_v39 }
 0x2c0   : > { %9825 = vst [vmem:[#allocation32_spill] sm:$0xff] %v7542_v55  ;;  %v1309_v20 = vsel %vm795_vm1, %v7538_v31, -inf  ;;  %v2421_v53 = vmul.f32 %v7287_v4, %v7242_v14  ;;  %v785_v5 = vmul.f32 %v7346_v9, %v633_v61  ;;  %5778 = vrcp.f32 %v7535_v63 }
 0x2c1   : > { %9826 = vst [vmem:[#allocation33_spill] sm:$0xff] %v7544_v27  ;;  %v3829_v15 = vadd.f32 %v3828_v60, %v3827_v34  ;;  %v3750_v26 = vmul.f32 %v7384_v11, %v6696_v1  ;;  %v1308_v29 = vmax.f32 %v1306_v18, %v1307_v54  ;;  %5511 = vmatmul.msk.f32.gmra.mxu3 %vm795_vm1, %v7547_v8  ;;  %v1931_v21 = vrot.slane %v1930_v35, 2 }
 0x2c2   : > { %v1935_v17 = vsel %vm795_vm1, %v7533_v19, 0.0  ;;  %v2422_v23 = vsub.f32 1.0, %v2421_v53  ;;  %5476 = vmatmul.msk.f32.gmra.mxu2 %vm795_vm1, %v785_v5  ;;  %v570_v49 = vrot.slane %v6341_v38, 7  ;;  %v2105_v39 = vadd.f32 %v2104_v42, %v2103_v43 }
 0x2c3   : > { %v1481_v40 = vmax.f32 %v1479_v32, %v1480_v59  ;;  %v1310_v61 = vrot.slane %v1309_v20, 4  ;;  %v2431_v34 = vand.u32 2147483648, %v7242_v14  ;;  %v7566_v60 = vpop.eup %5776  ;;  %5780 = vpow2.f32 %v1787_v0 }
 0x2c4   : > { %v2423_v1 = vmul.f32 %v7287_v4, %v2422_v23  ;;  %vm2426_vm11 = vweird.f32 %v7287_v4  ;;  %v2429_v11 = vand.u32 2147483647, %v7242_v14  ;;  %v3830_v18 = vrot.slane %v3829_v15, 1 }
 0x2c5   : > { %v1936_v54 = vrot.slane %v1935_v17, 4  ;;  %v3726_v58 = vmul.f32 %v7434_v12, %v6619_v6  ;;  %v1660_v38 = vsub.f32 %v7451_v16, %v1308_v29  ;;  %v4000_v32 = vsel %vm795_vm1, %v3750_v26, 0.0  ;;  %v7580_v6 = vpop.f32.mrf.mxu2 }
 0x2c6   : > { %v2424_v43 = vadd.f32 %v7287_v4, %v2423_v1  ;;  %vm2425_vm12 = vweird.f32 %v7242_v14  ;;  %v634_v30 = vperm.slane %v570_v49, 0  ;;  %v7577_v42 = vpop.eup %5778  ;;  %v1932_v59 = vadd.f32 %v1931_v21, %v1930_v35 }
 0x2c7   : > { %v1482_v0 = vrot.slane %v1481_v40, 1  ;;  %v1311_v53 = vmax.f32 %v1309_v20, %v1310_v61  ;;  %vm2427_vm13 = vmor %vm2425_vm12, %vm2426_vm11  ;;  %v2432_v5 = vor.u32 1.1754944e-38, %v2431_v34  ;;  %v2106_v23 = vrot.slane %v2105_v39, 2 }
 0x2c8   : > { %v2428_v57 = vsel %vm2427_vm13, %v7287_v4, %v2424_v43  ;;  %vm2430_vm15 = vcmp.eq.f32.partialorder %v2429_v11, 8.507059e+37  ;;  %v786_v12 = vmul.f32 %v7346_v9, %v634_v30  ;;  %v1937_v16 = vadd.f32 %v1936_v54, %v1935_v17  ;;  %v9828_v11 = vld [vmem:[#allocation15_spill] sm:$0xff] }
 0x2c9   : > { %v3832_v26 = vsel %vm795_vm1, %v3726_v58, 0.0  ;;  %v1739_v14 = vmul.f32 1.442695, %v1660_v38  ;;  %v2433_v29 = vsel %vm2430_vm15, %v2432_v5, %v2428_v57  ;;  %v7584_v49 = vpop.eup %5780  ;;  %v7586_v35 = vadd.f32 %v3830_v18, %v3829_v15  ;;  %v7603_v58 = vpop.f32.mrf.mxu1 }
 0x2ca   : > { %v4001_v20 = vrot.slane %v4000_v32, 4  ;;  %v7589_v21 = vmul.f32 %v7126_v50, %v2433_v29  ;;  %v2796_v4 = vmul.f32 %v7365_v2, %v7303_v28  ;;  %5477 = vmatmul.msk.f32.gmra.mxu2 %vm795_vm1, %v786_v12  ;;  %v1933_v61 = vrot.slane %v1932_v59, 1 }
 0x2cb   : > { %9827 = vst [vmem:[#allocation34_spill] sm:$0xff] %v7586_v35  ;;  %v1483_v9 = vmax.f32 %v1481_v40, %v1482_v0  ;;  %v1312_v17 = vrot.slane %v1311_v53, 2  ;;  %v1484_v34 = vsel %vm795_vm1, %v7580_v6, -inf  ;;  %v2107_v57 = vadd.f32 %v2106_v23, %v2105_v39  ;;  %v9835_v35 = vld [vmem:[#allocation24_spill] sm:$0xff] }
 0x2cc   : > { %v3833_v1 = vrot.slane %v3832_v26, 4  ;;  %v3751_v15 = vmul.f32 %v7471_v33, %v9828_v11  ;;  %5487 = vmatmul.msk.f32.gmra.mxu0 %vm795_vm1, %v7589_v21  ;;  %v2797_v50 = vsub.f32 1.0, %v2796_v4  ;;  %v1938_v18 = vrot.slane %v1937_v16, 2 }
 0x2cd   : > { %v2110_v54 = vsel %vm795_vm1, %v7584_v49, 0.0  ;;  %5782 = vpow2.f32 %v1739_v14  ;;  %v2806_v40 = vand.u32 2147483648, %v7303_v28  ;;  %v1485_v38 = vrot.slane %v1484_v34, 4 }
 0x2ce   : > { %v2798_v39 = vmul.f32 %v7365_v2, %v2797_v50  ;;  %vm2801_vm2 = vweird.f32 %v7365_v2  ;;  %v2804_v33 = vand.u32 2147483647, %v7303_v28  ;;  %v7608_v43 = vadd.f32 %v1933_v61, %v1932_v59 }
 0x2cf   : > { %v7610_v30 = vadd.f32 %v4001_v20, %v4000_v32  ;;  %v1685_v0 = vsub.f32 %v7490_v37, %v1483_v9  ;;  %v1313_v5 = vmax.f32 %v1311_v53, %v1312_v17  ;;  %v2108_v23 = vrot.slane %v2107_v57, 1 }
 0x2d0   : > { %v2799_v12 = vadd.f32 %v7365_v2, %v2798_v39  ;;  %vm2800_vm3 = vweird.f32 %v7303_v28  ;;  %v1316_v14 = vsel %vm795_vm1, %v7603_v58, -inf  ;;  %v3834_v29 = vadd.f32 %v3833_v1, %v3832_v26  ;;  %v9831_v1 = vld [vmem:[#allocation23_spill] sm:$0xff] }
 0x2d1   : > { %9829 = vst [vmem:[#allocation15_spill] sm:$0xff] %v7610_v30  ;;  %v2111_v4 = vrot.slane %v2110_v54, 4  ;;  %v4007_v50 = vsel %vm795_vm1, %v3751_v15, 0.0  ;;  %vm2802_vm4 = vmor %vm2800_vm3, %vm2801_vm2  ;;  %v2807_v59 = vor.u32 1.1754944e-38, %v2806_v40  ;;  %v1939_v61 = vadd.f32 %v1938_v18, %v1937_v16  ;;  %v9832_v18 = vld [vmem:[#allocation13_spill] sm:$0xff] }
 0x2d2   : > { %v1486_v32 = vmax.f32 %v1484_v34, %v1485_v38  ;;  %v2803_v20 = vsel %vm2802_vm4, %v7365_v2, %v2799_v12  ;;  %vm2805_vm6 = vcmp.eq.f32.partialorder %v2804_v33, 8.507059e+37  ;;  %v1789_v53 = vmul.f32 1.442695, %v1685_v0 }
 0x2d3   : > { %v7619_v37 = vpop.eup %5782  ;;  %v1314_v9 = vrot.slane %v1313_v5, 1  ;;  %v2808_v17 = vsel %vm2805_vm6, %v2807_v59, %v2803_v20  ;;  %v1317_v28 = vrot.slane %v1316_v14, 4  ;;  %5784 = vrcp.f32 %v7608_v43 }
 0x2d4   : > { %9830 = vst [vmem:[#allocation35_spill] sm:$0xff] %v7619_v37  ;;  %v7624_v39 = vmul.f32 %v9831_v1, %v2808_v17  ;;  %v2436_v16 = vmul.f32 %v7408_v62, %v7339_v56  ;;  %v7628_v34 = vadd.f32 %v2108_v23, %v2107_v57  ;;  %v2112_v2 = vadd.f32 %v2111_v4, %v2110_v54  ;;  %v7636_v57 = vpop.f32.mrf.mxu2 }
 0x2d5   : > { %v4008_v15 = vrot.slane %v4007_v50, 4  ;;  %v3727_v40 = vmul.f32 %v7497_v22, %v9832_v18  ;;  %v3835_v38 = vrot.slane %v3834_v29, 2  ;;  %v1942_v33 = vsel %vm795_vm1, %v7619_v37, 0.0 }
 0x2d6   : > { %v1487_v0 = vrot.slane %v1486_v32, 2  ;;  %5512 = vmatmul.msk.f32.gmra.mxu3 %vm795_vm1, %v7624_v39  ;;  %v2437_v12 = vsub.f32 1.0, %v2436_v16  ;;  %v1940_v59 = vrot.slane %v1939_v61, 1  ;;  %5786 = vpow2.f32 %v1789_v53 }
 0x2d7   : > { %v1315_v20 = vmax.f32 %v1313_v5, %v1314_v9  ;;  %v1318_v17 = vmax.f32 %v1316_v14, %v1317_v28  ;;  %vm2441_vm7 = vweird.f32 %v7408_v62  ;;  %v2444_v22 = vand.u32 2147483647, %v7339_v56 }
 0x2d8   : > { %v2438_v54 = vmul.f32 %v7408_v62, %v2437_v12  ;;  %v2446_v23 = vand.u32 2147483648, %v7339_v56  ;;  %v2113_v4 = vrot.slane %v2112_v2, 2  ;;  %v4009_v1 = vadd.f32 %v4008_v15, %v4007_v50 }
 0x2d9   : > { %v1943_v26 = vrot.slane %v1942_v33, 4  ;;  %v3839_v30 = vsel %vm795_vm1, %v3727_v40, 0.0  ;;  %v7643_v16 = vpop.eup %5784  ;;  %v1488_v53 = vmax.f32 %v1486_v32, %v1487_v0  ;;  %vm2440_vm8 = vweird.f32 %v7339_v56 }
 0x2da   : > { %v2439_v5 = vadd.f32 %v7408_v62, %v2438_v54  ;;  %v1491_v14 = vsel %vm795_vm1, %v7636_v57, -inf  ;;  %v3752_v9 = vmul.f32 %v7547_v8, %v9828_v11  ;;  %v1661_v28 = vsub.f32 %v7538_v31, %v1315_v20  ;;  %vm2442_vm9 = vmor %vm2440_vm8, %vm2441_vm7 }
 0x2db   : > { %v1319_v12 = vrot.slane %v1318_v17, 2  ;;  %v2447_v50 = vor.u32 1.1754944e-38, %v2446_v23  ;;  %v7654_v15 = vadd.f32 %v3835_v38, %v3834_v29  ;;  %vm2445_vm10 = vcmp.eq.f32.partialorder %v2444_v22, 8.507059e+37  ;;  %v7681_v23 = vpop.f32.mrf.mxu1 }
 0x2dc   : > { %v2443_v32 = vsel %vm2442_vm9, %v7408_v62, %v2439_v5  ;;  %v1492_v40 = vrot.slane %v1491_v14, 4  ;;  %v7657_v56 = vpop.eup %5786  ;;  %v7659_v0 = vadd.f32 %v1940_v59, %v1939_v61  ;;  %v4010_v54 = vrot.slane %v4009_v1, 2 }
 0x2dd   : > { %9833 = vst [vmem:[#allocation23_spill] sm:$0xff] %v7654_v15  ;;  %v3840_v27 = vrot.slane %v3839_v30, 4  ;;  %v2448_v8 = vsel %vm2445_vm10, %v2447_v50, %v2443_v32  ;;  %v2114_v3 = vadd.f32 %v2113_v4, %v2112_v2  ;;  %v1944_v31 = vadd.f32 %v1943_v26, %v1942_v33 }
 0x2de   : > { %9834 = vst [vmem:[#allocation13_spill] sm:$0xff] %v7657_v56  ;;  %v1489_v20 = vrot.slane %v1488_v53, 1  ;;  %v7662_v55 = vmul.f32 %v9835_v35, %v2448_v8  ;;  %5788 = vrcp.f32 %v7628_v34  ;;  %v4014_v29 = vsel %vm795_vm1, %v3752_v9, 0.0  ;;  %v4235_v35 = vld [vmem:[%s9746_s3 + $0x20] sm:$0xff] }
 0x2df   : > { %v1741_v62 = vmul.f32 1.442695, %v1661_v28  ;;  %v1320_v38 = vmax.f32 %v1318_v17, %v1319_v12  ;;  %v2117_v61 = vsel %vm795_vm1, %v7657_v56, 0.0  ;;  %v3728_v59 = vmul.f32 %v7589_v21, %v9832_v18  ;;  %4394 = vmatpush.msra.mxu0 %v4235_v35 }
 0x2e0   : > { %5488 = vmatmul.msk.f32.gmra.mxu0 %vm795_vm1, %v7662_v55  ;;  %v1493_v26 = vmax.f32 %v1491_v14, %v1492_v40  ;;  %5790 = vrcp.f32 %v7659_v0  ;;  %v7677_v2 = vadd.f32 %v4010_v54, %v4009_v1  ;;  %v3841_v33 = vadd.f32 %v3840_v27, %v3839_v30 }
 0x2e1   : > { %v2811_v17 = vmul.f32 %v7484_v10, %v7404_v52  ;;  %v2115_v21 = vrot.slane %v2114_v3, 1  ;;  %v1945_v4 = vrot.slane %v1944_v31, 2  ;;  %v4015_v5 = vrot.slane %v4014_v29, 4 }
 0x2e2   : > { %v1490_v9 = vmax.f32 %v1488_v53, %v1489_v20  ;;  %v2118_v14 = vrot.slane %v2117_v61, 4  ;;  %5792 = vpow2.f32 %v1741_v62  ;;  %v1321_v28 = vrot.slane %v1320_v38, 1 }
 0x2e3   : > { %v2812_v12 = vsub.f32 1.0, %v2811_v17  ;;  %v3846_v50 = vsel %vm795_vm1, %v3728_v59, 0.0  ;;  %v1494_v32 = vrot.slane %v1493_v26, 2  ;;  %v2821_v1 = vand.u32 2147483648, %v7404_v52 }
 0x2e4   : > { %v1323_v27 = vsel %vm795_vm1, %v7681_v23, -inf  ;;  %v7687_v30 = vpop.eup %5788  ;;  %vm2816_vm11 = vweird.f32 %v7484_v10  ;;  %v2819_v53 = vand.u32 2147483647, %v7404_v52  ;;  %v1946_v8 = vadd.f32 %v1945_v4, %v1944_v31 }
 0x2e5   : > { %v2813_v40 = vmul.f32 %v7484_v10, %v2812_v12  ;;  %v1324_v54 = vrot.slane %v1323_v27, 4  ;;  %v3842_v20 = vrot.slane %v3841_v33, 2  ;;  %v4016_v62 = vadd.f32 %v4015_v5, %v4014_v29 }
 0x2e6   : > { %v1686_v59 = vsub.f32 %v7580_v6, %v1490_v9  ;;  %v7693_v35 = vpop.eup %5790  ;;  %v1322_v17 = vmax.f32 %v1320_v38, %v1321_v28  ;;  %vm2815_vm12 = vweird.f32 %v7404_v52  ;;  %v2119_v56 = vadd.f32 %v2118_v14, %v2117_v61  ;;  %v9837_v14 = vld [vmem:[#allocation27_spill] sm:$0xff] }
 0x2e7   : > { %v2814_v22 = vadd.f32 %v7484_v10, %v2813_v40  ;;  %v1325_v15 = vmax.f32 %v1323_v27, %v1324_v54  ;;  %v3847_v12 = vrot.slane %v3846_v50, 4  ;;  %v1495_v47 = vmax.f32 %v1493_v26, %v1494_v32  ;;  %vm2817_vm13 = vmor %vm2815_vm12, %vm2816_vm11 }
 0x2e8   : > { %v2822_v37 = vor.u32 1.1754944e-38, %v2821_v1  ;;  %v7699_v31 = vpop.eup %5792  ;;  %vm2820_vm15 = vcmp.eq.f32.partialorder %v2819_v53, 8.507059e+37  ;;  %v2451_v38 = vmul.f32 %v7524_v51, %v7430_v24  ;;  %v7704_v4 = vadd.f32 %v2115_v21, %v2114_v3  ;;  %v7712_v1 = vpop.f32.mrf.mxu2 }
 0x2e9   : > { %9836 = vst [vmem:[#allocation24_spill] sm:$0xff] %v7699_v31  ;;  %v2818_v29 = vsel %vm2817_vm13, %v7484_v10, %v2814_v22  ;;  %v1326_v6 = vrot.slane %v1325_v15, 2  ;;  %v7706_v52 = vadd.f32 %v3842_v20, %v3841_v33  ;;  %v1791_v61 = vmul.f32 1.442695, %v1686_v59 }
 0x2ea   : > { %v2823_v5 = vsel %vm2820_vm15, %v2822_v37, %v2818_v29  ;;  %v1947_v26 = vrot.slane %v1946_v8, 1  ;;  %v1662_v9 = vsub.f32 %v7603_v58, %v1322_v17  ;;  %v2452_v32 = vsub.f32 1.0, %v2451_v38 }
 0x2eb   : > { %v7710_v28 = vmul.f32 %v9837_v14, %v2823_v5  ;;  %v2120_v10 = vrot.slane %v2119_v56, 2  ;;  %v4017_v22 = vrot.slane %v4016_v62, 2  ;;  %v3848_v27 = vadd.f32 %v3847_v12, %v3846_v50 }
 0x2ec   : > { %v1496_v40 = vrot.slane %v1495_v47, 1  ;;  %v1949_v3 = vsel %vm795_vm1, %v7699_v31, 0.0  ;;  %v1327_v37 = vmax.f32 %v1325_v15, %v1326_v6  ;;  %v2453_v33 = vmul.f32 %v7524_v51, %v2452_v32 }
 0x2ed   : > { %5513 = vmatmul.msk.f32.gmra.mxu3 %vm795_vm1, %v7710_v28  ;;  %vm2456_vm2 = vweird.f32 %v7524_v51  ;;  %5794 = vpow2.f32 %v1791_v61  ;;  %v2459_v58 = vand.u32 2147483647, %v7430_v24  ;;  %v2461_v21 = vand.u32 2147483648, %v7430_v24 }
 0x2ee   : > { %v1498_v50 = vsel %vm795_vm1, %v7712_v1, -inf  ;;  %v3753_v53 = vmul.f32 %v7624_v39, %v9828_v11  ;;  %v1743_v54 = vmul.f32 1.442695, %v1662_v9  ;;  %v2454_v20 = vadd.f32 %v7524_v51, %v2453_v33 }
 0x2ef   : > { %vm2455_vm3 = vweird.f32 %v7430_v24  ;;  %v7728_v15 = vadd.f32 %v1947_v26, %v1946_v8  ;;  %v1950_v59 = vrot.slane %v1949_v3, 4  ;;  %v1497_v17 = vmax.f32 %v1495_v47, %v1496_v40 }
 0x2f0   : > { %vm2457_vm4 = vmor %vm2455_vm3, %vm2456_vm2  ;;  %v2462_v12 = vor.u32 1.1754944e-38, %v2461_v21  ;;  %v1328_v29 = vrot.slane %v1327_v37, 1  ;;  %vm2460_vm6 = vcmp.eq.f32.partialorder %v2459_v58, 8.507059e+37  ;;  %v1499_v38 = vrot.slane %v1498_v50, 4  ;;  %v7749_v58 = vpop.f32.mrf.mxu1 }
 0x2f1   : > { %v2458_v6 = vsel %vm2457_vm4, %v7524_v51, %v2454_v20  ;;  %v2121_v5 = vadd.f32 %v2120_v10, %v2119_v56  ;;  %v7732_v39 = vadd.f32 %v4017_v22, %v4016_v62  ;;  %v3849_v14 = vrot.slane %v3848_v27, 2 }
 0x2f2   : > { %v2463_v9 = vsel %vm2460_vm6, %v2462_v12, %v2458_v6  ;;  %v4021_v24 = vsel %vm795_vm1, %v3753_v53, 0.0  ;;  %5796 = vpow2.f32 %v1743_v54  ;;  %v3844_v51 = vrot.slane %v7706_v52, 1 }
 0x2f3   : > { %v7736_v8 = vmul.f32 %v7318_v41, %v2463_v9  ;;  %v7738_v47 = vpop.eup %5794  ;;  %5798 = vrcp.f32 %v7704_v4  ;;  %v1687_v26 = vsub.f32 %v7636_v57, %v1497_v17  ;;  %v2826_v56 = vmul.f32 %v7549_v45, %v7503_v46 }
 0x2f4   : > { %9838 = vst [vmem:[#allocation27_spill] sm:$0xff] %v7738_v47  ;;  %5800 = vrcp.f32 %v7728_v15  ;;  %v1951_v62 = vadd.f32 %v1950_v59, %v1949_v3  ;;  %v1329_v32 = vmax.f32 %v1327_v37, %v1328_v29  ;;  %v1500_v41 = vmax.f32 %v1498_v50, %v1499_v38 }
 0x2f5   : > { %5489 = vmatmul.msk.f32.gmra.mxu0 %vm795_vm1, %v7736_v8  ;;  %v2122_v10 = vrot.slane %v2121_v5, 1  ;;  %v4019_v22 = vrot.slane %v7732_v39, 1  ;;  %v4022_v40 = vrot.slane %v4021_v24, 4  ;;  %v2827_v33 = vsub.f32 1.0, %v2826_v56 }
 0x2f6   : > { %v3850_v21 = vadd.f32 %v3849_v14, %v3848_v27  ;;  %v2124_v57 = vsel %vm795_vm1, %v7738_v47, 0.0  ;;  %v3729_v53 = vmul.f32 %v7662_v55, %v9832_v18  ;;  %v2836_v3 = vand.u32 2147483648, %v7503_v46 }
 0x2f7   : > { %v1793_v37 = vmul.f32 1.442695, %v1687_v26  ;;  %v2828_v54 = vmul.f32 %v7549_v45, %v2827_v33  ;;  %vm2831_vm7 = vweird.f32 %v7549_v45  ;;  %v2834_v50 = vand.u32 2147483647, %v7503_v46 }
 0x2f8   : > { %v7759_v20 = vpop.eup %5796  ;;  %v1952_v59 = vrot.slane %v1951_v62, 2  ;;  %v1663_v27 = vsub.f32 %v7681_v23, %v1329_v32  ;;  %v1501_v17 = vrot.slane %v1500_v41, 2  ;;  %v1330_v12 = vsel %vm795_vm1, %v7749_v58, -inf }
 0x2f9   : > { %9839 = vst [vmem:[#allocation36_spill] sm:$0xff] %v7759_v20  ;;  %v7764_v29 = vpop.eup %5798  ;;  %v2125_v55 = vrot.slane %v2124_v57, 4  ;;  %v4023_v6 = vadd.f32 %v4022_v40, %v4021_v24  ;;  %v2829_v38 = vadd.f32 %v7549_v45, %v2828_v54  ;;  %vm2830_vm8 = vweird.f32 %v7503_v46 }
 0x2fa   : > { %v7768_v9 = vpop.eup %5800  ;;  %v7770_v14 = vadd.f32 %v2122_v10, %v2121_v5  ;;  %v3853_v26 = vsel %vm795_vm1, %v3729_v53, 0.0  ;;  %vm2832_vm9 = vmor %vm2830_vm8, %vm2831_vm7  ;;  %v2837_v23 = vor.u32 1.1754944e-38, %v2836_v3  ;;  %v1331_v56 = vrot.slane %v1330_v12, 4 }
 0x2fb   : > { %v1956_v32 = vsel %vm795_vm1, %v7759_v20, 0.0  ;;  %5802 = vpow2.f32 %v1793_v37  ;;  %v2833_v24 = vsel %vm2832_vm9, %v7549_v45, %v2829_v38  ;;  %vm2835_vm10 = vcmp.eq.f32.partialorder %v2834_v50, 8.507059e+37 }
 0x2fc   : > { %v3851_v40 = vrot.slane %v3850_v21, 1  ;;  %v1745_v46 = vmul.f32 1.442695, %v1663_v27  ;;  %v1502_v33 = vmax.f32 %v1500_v41, %v1501_v17  ;;  %v2838_v54 = vsel %vm2835_vm10, %v2837_v23, %v2833_v24 }
 0x2fd   : > { %v1953_v5 = vadd.f32 %v1952_v59, %v1951_v62  ;;  %v2126_v10 = vadd.f32 %v2125_v55, %v2124_v57  ;;  %v4024_v61 = vrot.slane %v4023_v6, 2  ;;  %v7779_v53 = vmul.f32 %v7352_v25, %v2838_v54  ;;  %v7799_v59 = vpop.f32.mrf.mxu2 }
 0x2fe   : > { %v1957_v47 = vrot.slane %v1956_v32, 4  ;;  %v3854_v3 = vrot.slane %v3853_v26, 4  ;;  %v1332_v31 = vmax.f32 %v1330_v12, %v1331_v56  ;;  %v2466_v20 = vmul.f32 %v7566_v60, %v7521_v44 }
 0x2ff   : > { %v9840_v45 = vrot.slane %v7677_v2, 1  ;;  %v7789_v41 = vadd.f32 %v3844_v51, %v7706_v52  ;;  %5804 = vrcp.f32 %v7770_v14  ;;  %v3754_v25 = vmul.f32 %v7710_v28, %v9828_v11  ;;  %5514 = vmatmul.msk.f32.gmra.mxu3 %vm795_vm1, %v7779_v53 }
 0x300   : > { %v7797_v62 = vadd.f32 %v4019_v22, %v7732_v39  ;;  %5806 = vpow2.f32 %v1745_v46  ;;  %v1503_v57 = vrot.slane %v1502_v33, 1  ;;  %v2467_v50 = vsub.f32 1.0, %v2466_v20 }
 0x301   : > { %v7786_v37 = vadd.f32 %v9840_v45, %v7677_v2  ;;  %v7801_v2 = vpop.eup %5802  ;;  %v1954_v52 = vrot.slane %v1953_v5, 1  ;;  %v7803_v51 = vadd.f32 %v3851_v40, %v3850_v21  ;;  %v2127_v27 = vrot.slane %v2126_v10, 2 }
 0x302   : > { %9842 = vst [vmem:[#allocation38_spill] sm:$0xff] %v7797_v62  ;;  %v7805_v17 = vadd.f32 %v4024_v61, %v4023_v6  ;;  %v1958_v28 = vadd.f32 %v1957_v47, %v1956_v32  ;;  %v3855_v12 = vadd.f32 %v3854_v3, %v3853_v26  ;;  %v1333_v55 = vrot.slane %v1332_v31, 2 }
 0x303   : > { %9841 = vst [vmem:[#allocation37_spill] sm:$0xff] %v7786_v37  ;;  %v2468_v38 = vmul.f32 %v7566_v60, %v2467_v50  ;;  %v4028_v39 = vsel %vm795_vm1, %v3754_v25, 0.0  ;;  %vm2471_vm11 = vweird.f32 %v7566_v60  ;;  %v2476_v22 = vand.u32 2147483648, %v7521_v44 }
 0x304   : > { %9843 = vst [vmem:[#allocation39_spill] sm:$0xff] %v7803_v51  ;;  %v1505_v20 = vsel %vm795_vm1, %v7799_v59, -inf  ;;  %v2131_v21 = vsel %vm795_vm1, %v7801_v2, 0.0  ;;  %v1504_v23 = vmax.f32 %v1502_v33, %v1503_v57  ;;  %v2474_v47 = vand.u32 2147483647, %v7521_v44 }
 0x305   : > { %v2469_v61 = vadd.f32 %v7566_v60, %v2468_v38  ;;  %v7817_v6 = vpop.eup %5804  ;;  %v7819_v26 = vadd.f32 %v1954_v52, %v1953_v5  ;;  %v7821_v56 = vadd.f32 %v2127_v27, %v2126_v10  ;;  %vm2470_vm12 = vweird.f32 %v7521_v44 }
 0x306   : > { %v1506_v32 = vrot.slane %v1505_v20, 4  ;;  %v7824_v24 = vpop.eup %5806  ;;  %v1959_v40 = vrot.slane %v1958_v28, 2  ;;  %v3856_v46 = vrot.slane %v3855_v12, 2  ;;  %v4029_v54 = vrot.slane %v4028_v39, 4  ;;  %vm2472_vm13 = vmor %vm2470_vm12, %vm2471_vm11 }
 0x307   : > { %9844 = vst [vmem:[#allocation40_spill] sm:$0xff] %v7824_v24  ;;  %v1334_v3 = vmax.f32 %v1332_v31, %v1333_v55  ;;  %v2132_v33 = vrot.slane %v2131_v21, 4  ;;  %v3730_v45 = vmul.f32 %v7736_v8, %v9832_v18  ;;  %v2473_v5 = vsel %vm2472_vm13, %v7566_v60, %v2469_v61 }
 0x308   : > { %v2477_v10 = vor.u32 1.1754944e-38, %v2476_v22  ;;  %v4026_v25 = vrot.slane %v7805_v17, 1  ;;  %v1688_v44 = vsub.f32 %v7712_v1, %v1504_v23  ;;  %vm2475_vm15 = vcmp.eq.f32.partialorder %v2474_v47, 8.507059e+37  ;;  %v7843_v22 = vpop.f32.mrf.mxu1 }
 0x309   : > { %v1507_v57 = vmax.f32 %v1505_v20, %v1506_v32  ;;  %v2129_v50 = vrot.slane %v7821_v56, 1  ;;  %v1963_v31 = vsel %vm795_vm1, %v7824_v24, 0.0  ;;  %v2841_v27 = vmul.f32 %v7577_v42, %v7535_v63 }
 0x30a   : > { %v2478_v52 = vsel %vm2475_vm15, %v2477_v10, %v2473_v5  ;;  %v1960_v55 = vadd.f32 %v1959_v40, %v1958_v28  ;;  %v7838_v8 = vadd.f32 %v3856_v46, %v3855_v12  ;;  %v1335_v60 = vrot.slane %v1334_v3, 1 }
 0x30b   : > { %v7841_v38 = vmul.f32 %v7397_v13, %v2478_v52  ;;  %v2133_v1 = vadd.f32 %v2132_v33, %v2131_v21  ;;  %v4030_v20 = vadd.f32 %v4029_v54, %v4028_v39  ;;  %v3860_v23 = vsel %vm795_vm1, %v3730_v45, 0.0 }
 0x30c   : > { %v2842_v61 = vsub.f32 1.0, %v2841_v27  ;;  %v1964_v47 = vrot.slane %v1963_v31, 4  ;;  %v1795_v32 = vmul.f32 1.442695, %v1688_v44  ;;  %v1508_v5 = vrot.slane %v1507_v57, 2 }
 0x30d   : > { %5490 = vmatmul.msk.f32.gmra.mxu0 %vm795_vm1, %v7841_v38  ;;  %v2851_v28 = vand.u32 2147483648, %v7535_v63  ;;  %vm2846_vm2 = vweird.f32 %v7577_v42  ;;  %v2849_v13 = vand.u32 2147483647, %v7535_v63  ;;  %v1337_v39 = vsel %vm795_vm1, %v7843_v22, -inf }
 0x30e   : > { %v2843_v12 = vmul.f32 %v7577_v42, %v2842_v61  ;;  %v1961_v21 = vrot.slane %v1960_v55, 1  ;;  %v3861_v40 = vrot.slane %v3860_v23, 4  ;;  %v1336_v46 = vmax.f32 %v1334_v3, %v1335_v60 }
 0x30f   : > { %v1338_v54 = vrot.slane %v1337_v39, 4  ;;  %v2134_v33 = vrot.slane %v2133_v1, 2  ;;  %v4031_v45 = vrot.slane %v4030_v20, 2  ;;  %vm2845_vm3 = vweird.f32 %v7535_v63 }
 0x310   : > { %v2844_v10 = vadd.f32 %v7577_v42, %v2843_v12  ;;  %v1965_v44 = vadd.f32 %v1964_v47, %v1963_v31  ;;  %v1509_v52 = vmax.f32 %v1507_v57, %v1508_v5  ;;  %vm2847_vm4 = vmor %vm2845_vm3, %vm2846_vm2  ;;  %v2852_v27 = vor.u32 1.1754944e-38, %v2851_v28 }
 0x311   : > { %v1339_v61 = vmax.f32 %v1337_v39, %v1338_v54  ;;  %5808 = vpow2.f32 %v1795_v32  ;;  %v3755_v62 = vmul.f32 %v7779_v53, %v9828_v11  ;;  %vm2850_vm6 = vcmp.eq.f32.partialorder %v2849_v13, 8.507059e+37 }
 0x312   : > { %v2848_v37 = vsel %vm2847_vm4, %v7577_v42, %v2844_v10  ;;  %v3862_v3 = vadd.f32 %v3861_v40, %v3860_v23  ;;  %v1664_v60 = vsub.f32 %v7749_v58, %v1336_v46  ;;  %5810 = vrcp.f32 %v7819_v26  ;;  %v4234_v42 = vld [vmem:[%s9746_s3 + $0x18] sm:$0xff] }
 0x313   : > { %v2853_v24 = vsel %vm2850_vm6, %v2852_v27, %v2848_v37  ;;  %v1340_v51 = vrot.slane %v1339_v61, 2  ;;  %v7862_v63 = vadd.f32 %v4026_v25, %v7805_v17  ;;  %v2481_v31 = vmul.f32 %v7643_v16, %v7608_v43  ;;  %4395 = vmatpush.msra.mxu0 %v4234_v42  ;;  %v7876_v17 = vpop.f32.mrf.mxu2 }
 0x314   : > { %v7865_v57 = vmul.f32 %v7418_v7, %v2853_v24  ;;  %v7873_v53 = vadd.f32 %v2129_v50, %v7821_v56  ;;  %v3858_v58 = vrot.slane %v7838_v8, 1  ;;  %v1966_v37 = vrot.slane %v1965_v44, 2 }
 0x315   : > { %9845 = vst [vmem:[#allocation41_spill] sm:$0xff] %v7862_v63  ;;  %v1510_v23 = vrot.slane %v1509_v52, 1  ;;  %v7878_v25 = vadd.f32 %v1961_v21, %v1960_v55  ;;  %v4032_v7 = vadd.f32 %v4031_v45, %v4030_v20  ;;  %v4035_v24 = vsel %vm795_vm1, %v3755_v62, 0.0 }
 0x316   : > { %5515 = vmatmul.msk.f32.gmra.mxu3 %vm795_vm1, %v7865_v57  ;;  %v2482_v47 = vsub.f32 1.0, %v2481_v31  ;;  %v2135_v32 = vadd.f32 %v2134_v33, %v2133_v1  ;;  %v3863_v5 = vrot.slane %v3862_v3, 2  ;;  %v1747_v56 = vmul.f32 1.442695, %v1664_v60 }
 0x317   : > { %v1341_v50 = vmax.f32 %v1339_v61, %v1340_v51  ;;  %v7883_v28 = vpop.eup %5808  ;;  %vm2486_vm7 = vweird.f32 %v7643_v16  ;;  %v2491_v55 = vand.u32 2147483648, %v7608_v43  ;;  %v1512_v20 = vsel %vm795_vm1, %v7876_v17, -inf }
 0x318   : > { %v2483_v12 = vmul.f32 %v7643_v16, %v2482_v47  ;;  %v1967_v62 = vadd.f32 %v1966_v37, %v1965_v44  ;;  %v4036_v13 = vrot.slane %v4035_v24, 4  ;;  %v1511_v39 = vmax.f32 %v1509_v52, %v1510_v23  ;;  %v7891_v1 = vpop.eup %5810 }
 0x319   : > { %v2489_v21 = vand.u32 2147483647, %v7608_v43  ;;  %v4033_v40 = vrot.slane %v4032_v7, 1  ;;  %vm2485_vm8 = vweird.f32 %v7608_v43  ;;  %v1513_v46 = vrot.slane %v1512_v20, 4 }
 0x31a   : > { %v2484_v51 = vadd.f32 %v7643_v16, %v2483_v12  ;;  %v2136_v54 = vrot.slane %v2135_v32, 1  ;;  %v7895_v33 = vadd.f32 %v3863_v5, %v3862_v3  ;;  %v2138_v45 = vsel %vm795_vm1, %v7883_v28, 0.0  ;;  %vm2487_vm9 = vmor %vm2485_vm8, %vm2486_vm7 }
 0x31b   : > { %5812 = vpow2.f32 %v1747_v56  ;;  %v1342_v10 = vrot.slane %v1341_v50, 1  ;;  %v2492_v52 = vor.u32 1.1754944e-38, %v2491_v55  ;;  %v1514_v27 = vmax.f32 %v1512_v20, %v1513_v46 }
 0x31c   : > { %v2488_v44 = vsel %vm2487_vm9, %v7643_v16, %v2484_v51  ;;  %v1968_v61 = vrot.slane %v1967_v62, 1  ;;  %v4037_v60 = vadd.f32 %v4036_v13, %v4035_v24  ;;  %v1689_v43 = vsub.f32 %v7799_v59, %v1511_v39 }
 0x31d   : > { %vm2490_vm10 = vcmp.eq.f32.partialorder %v2489_v21, 8.507059e+37  ;;  %v2139_v3 = vrot.slane %v2138_v45, 4  ;;  %v3731_v31 = vmul.f32 %v7841_v38, %v9832_v18  ;;  %v1515_v37 = vrot.slane %v1514_v27, 2  ;;  %v7920_v38 = vpop.f32.mrf.mxu1 }
 0x31e   : > { %v2493_v42 = vsel %vm2490_vm10, %v2492_v52, %v2488_v44  ;;  %5814 = vrcp.f32 %v7873_v53  ;;  %v7910_v16 = vadd.f32 %v3858_v58, %v7838_v8  ;;  %v2856_v59 = vmul.f32 %v7687_v30, %v7628_v34 }
 0x31f   : > { %v7913_v23 = vmul.f32 %v7493_v36, %v2493_v42  ;;  %5816 = vrcp.f32 %v7878_v25  ;;  %v7918_v24 = vadd.f32 %v4033_v40, %v4032_v7  ;;  %v1343_v47 = vmax.f32 %v1341_v50, %v1342_v10 }
 0x320   : > { %v1516_v5 = vmax.f32 %v1514_v27, %v1515_v37  ;;  %v7925_v12 = vadd.f32 %v2136_v54, %v2135_v32  ;;  %v3865_v8 = vrot.slane %v7895_v33, 1  ;;  %v1797_v36 = vmul.f32 1.442695, %v1689_v43  ;;  %v9847_v27 = vld [vmem:[#allocation22_spill] sm:$0xff] }
 0x321   : > { %9846 = vst [vmem:[#allocation42_spill] sm:$0xff] %v7918_v24  ;;  %v7923_v56 = vpop.eup %5812  ;;  %5491 = vmatmul.msk.f32.gmra.mxu0 %vm795_vm1, %v7913_v23  ;;  %v2857_v58 = vsub.f32 1.0, %v2856_v59  ;;  %v7930_v7 = vadd.f32 %v1968_v61, %v1967_v62  ;;  %v2140_v50 = vadd.f32 %v2139_v3, %v2138_v45  ;;  %v4038_v55 = vrot.slane %v4037_v60, 2  ;;  %v9848_v61 = vld [vmem:[#allocation25_spill] sm:$0xff] }
 0x322   : > { %v3867_v20 = vsel %vm795_vm1, %v3731_v31, 0.0  ;;  %vm2861_vm11 = vweird.f32 %v7687_v30  ;;  %v2866_v32 = vand.u32 2147483648, %v7628_v34  ;;  %v1344_v39 = vsel %vm795_vm1, %v7920_v38, -inf }
 0x323   : > { %v2858_v13 = vmul.f32 %v7687_v30, %v2857_v58  ;;  %v1970_v21 = vsel %vm795_vm1, %v7923_v56, 0.0  ;;  %v1665_v40 = vsub.f32 %v7843_v22, %v1343_v47  ;;  %v1517_v62 = vrot.slane %v1516_v5, 1  ;;  %v9849_v58 = vld [vmem:[#allocation18_spill] sm:$0xff] }
 0x324   : > { %v2864_v51 = vand.u32 2147483647, %v7628_v34  ;;  %v7947_v46 = vpop.eup %5814  ;;  %5818 = vpow2.f32 %v1797_v36  ;;  %vm2860_vm12 = vweird.f32 %v7628_v34  ;;  %v1345_v45 = vrot.slane %v1344_v39, 4 }
 0x325   : > { %v2859_v54 = vadd.f32 %v7687_v30, %v2858_v13  ;;  %v7951_v10 = vpop.eup %5816  ;;  %v2141_v44 = vrot.slane %v2140_v50, 2  ;;  %v7953_v52 = vadd.f32 %v4038_v55, %v4037_v60  ;;  %v3868_v22 = vrot.slane %v3867_v20, 4  ;;  %vm2862_vm13 = vmor %vm2860_vm12, %vm2861_vm11 }
 0x326   : > { %v4332_v43 = vsel %vm4304_vm5, %v9848_v61, %v9847_v27  ;;  %v1971_v3 = vrot.slane %v1970_v21, 4  ;;  %v2867_v42 = vor.u32 1.1754944e-38, %v2866_v32  ;;  %v1346_v34 = vmax.f32 %v1344_v39, %v1345_v45  ;;  %v3528_v39 = vpop.f32.mrf.mxu3 }
 0x327   : > { %v2863_v31 = vsel %vm2862_vm13, %v7687_v30, %v2859_v54  ;;  %5820 = vrcp.f32 %v7925_v12  ;;  %v1749_v37 = vmul.f32 1.442695, %v1665_v40  ;;  %v1518_v59 = vmax.f32 %v1516_v5, %v1517_v62 }
 0x328   : > { %vm2865_vm15 = vcmp.eq.f32.partialorder %v2864_v51, 8.507059e+37  ;;  %v7964_v60 = vadd.f32 %v3865_v8, %v7895_v33  ;;  %v2496_v36 = vmul.f32 %v7693_v35, %v7659_v0  ;;  %v3942_v55 = vrot.slane %v9849_v58, 1  ;;  %v7981_v51 = vpop.f32.mrf.mxu2 }
 0x329   : > { %v2868_v47 = vsel %vm2865_vm15, %v2867_v42, %v2863_v31  ;;  %5822 = vrcp.f32 %v7930_v7  ;;  %v2142_v30 = vadd.f32 %v2141_v44, %v2140_v50  ;;  %v1347_v32 = vrot.slane %v1346_v34, 2 }
 0x32a   : > { %v7971_v13 = vmul.f32 %v7514_v48, %v2868_v47  ;;  %v7973_v5 = vpop.eup %5818  ;;  %v4040_v40 = vrot.slane %v7953_v52, 1  ;;  %v1972_v33 = vadd.f32 %v1971_v3, %v1970_v21  ;;  %v3869_v8 = vadd.f32 %v3868_v22, %v3867_v20 }
 0x32b   : > { %v2497_v62 = vsub.f32 1.0, %v2496_v36  ;;  %v3756_v48 = vmul.f32 %v7865_v57, %v9828_v11  ;;  %5824 = vpow2.f32 %v1749_v37  ;;  %v1690_v50 = vsub.f32 %v7876_v17, %v1518_v59  ;;  %v9850_v59 = vld [vmem:[#allocation26_spill] sm:$0xff] }
 0x32c   : > { %5516 = vmatmul.msk.f32.gmra.mxu3 %vm795_vm1, %v7971_v13  ;;  %vm2501_vm2 = vweird.f32 %v7693_v35  ;;  %v2504_v21 = vand.u32 2147483647, %v7659_v0  ;;  %v2506_v54 = vand.u32 2147483648, %v7659_v0  ;;  %vm3654_vm3 = vcmask 31744  }
 0x32d   : > { %v2498_v20 = vmul.f32 %v7693_v35, %v2497_v62  ;;  %v7992_v45 = vpop.eup %5820  ;;  %v2143_v44 = vrot.slane %v2142_v30, 1  ;;  %v2145_v57 = vsel %vm795_vm1, %v7973_v5, 0.0  ;;  %v1348_v22 = vmax.f32 %v1346_v34, %v1347_v32  ;;  %3677 = vst.msk [vmem:[%s7979_s29 + $0xb0] sm:$0xff] %vm3654_vm3, %v3528_v39 }
 0x32e   : > { %v1519_v17 = vsel %vm795_vm1, %v7981_v51, -inf  ;;  %v1973_v27 = vrot.slane %v1972_v33, 2  ;;  %v3870_v61 = vrot.slane %v3869_v8, 2  ;;  %vm2500_vm4 = vweird.f32 %v7659_v0 }
 0x32f   : > { %v2499_v3 = vadd.f32 %v7693_v35, %v2498_v20  ;;  %v8002_v31 = vpop.eup %5822  ;;  %v4042_v42 = vsel %vm795_vm1, %v3756_v48, 0.0  ;;  %vm2502_vm6 = vmor %vm2500_vm4, %vm2501_vm2  ;;  %v2507_v37 = vor.u32 1.1754944e-38, %v2506_v54  ;;  %v1520_v34 = vrot.slane %v1519_v17, 4 }
 0x330   : > { %v8009_v47 = vsel %vm4306_vm14, %v9850_v59, %v4332_v43  ;;  %v2146_v36 = vrot.slane %v2145_v57, 4  ;;  %v1799_v32 = vmul.f32 1.442695, %v1690_v50  ;;  %vm2505_vm7 = vcmp.eq.f32.partialorder %v2504_v21, 8.507059e+37 }
 0x331   : > { %v2503_v39 = vsel %vm2502_vm6, %v7693_v35, %v2499_v3  ;;  %v8012_v62 = vpop.eup %5824  ;;  %v3732_v0 = vmul.f32 %v7913_v23, %v9832_v18  ;;  %v1349_v48 = vrot.slane %v1348_v22, 1  ;;  %v1521_v24 = vmax.f32 %v1519_v17, %v1520_v34  ;;  %v3531_v23 = vpop.f32.mrf.mxu3  ;;  %v9853_v17 = vld [vmem:[#allocation19_spill] sm:$0xff] }
 0x332   : > { %v2508_v20 = vsel %vm2505_vm7, %v2507_v37, %v2503_v39  ;;  %v8017_v54 = vadd.f32 %v4040_v40, %v7953_v52  ;;  %v8019_v63 = vadd.f32 %v1973_v27, %v1972_v33  ;;  %v8021_v43 = vadd.f32 %v3870_v61, %v3869_v8  ;;  %3678 = vst.msk [vmem:[%s7979_s29 + $0xb8] sm:$0xff] %vm3654_vm3, %v3531_v23 }
 0x333   : > { %v8024_v50 = vmul.f32 %v7533_v19, %v2508_v20  ;;  %v8026_v35 = vadd.f32 %v2143_v44, %v2142_v30  ;;  %v2871_v21 = vmul.f32 %v7764_v29, %v7704_v4  ;;  %v8031_v3 = vadd.f32 %v3942_v55, %v9849_v58 }
 0x334   : > { %9851 = vst [vmem:[#allocation22_spill] sm:$0xff] %v8017_v54  ;;  %v9854_v52 = vrot.slane %v9853_v17, 2  ;;  %v2147_v33 = vadd.f32 %v2146_v36, %v2145_v57  ;;  %v4043_v8 = vrot.slane %v4042_v42, 4  ;;  %v1977_v19 = vsel %vm795_vm1, %v8012_v62, 0.0 }
 0x335   : > { %9852 = vst [vmem:[#allocation25_spill] sm:$0xff] %v8031_v3  ;;  %5826 = vpow2.f32 %v1799_v32  ;;  %5492 = vmatmul.msk.f32.gmra.mxu0 %vm795_vm1, %v8024_v50  ;;  %v3874_v30 = vsel %vm795_vm1, %v3732_v0, 0.0  ;;  %v1350_v58 = vmax.f32 %v1348_v22, %v1349_v48  ;;  %v1522_v55 = vrot.slane %v1521_v24, 2 }
 0x336   : > { %v8036_v40 = vadd.f32 %v9854_v52, %v9853_v17  ;;  %v2872_v44 = vsub.f32 1.0, %v2871_v21  ;;  %v1975_v27 = vrot.slane %v8019_v63, 1  ;;  %v3872_v61 = vrot.slane %v8021_v43, 1 }
 0x337   : > { %v2881_v57 = vand.u32 2147483648, %v7704_v4  ;;  %v2511_v37 = vmul.f32 %v7768_v9, %v7728_v15  ;;  %v1978_v34 = vrot.slane %v1977_v19, 4  ;;  %vm2876_vm8 = vweird.f32 %v7764_v29 }
 0x338   : > { %v2873_v59 = vmul.f32 %v7764_v29, %v2872_v44  ;;  %v2879_v36 = vand.u32 2147483647, %v7704_v4  ;;  %v2148_v32 = vrot.slane %v2147_v33, 2  ;;  %v8053_v22 = vadd.f32 %v4043_v8, %v4042_v42 }
 0x339   : > { %v3875_v39 = vrot.slane %v3874_v30, 4  ;;  %v2512_v0 = vsub.f32 1.0, %v2511_v37  ;;  %v1666_v48 = vsub.f32 %v7920_v38, %v1350_v58  ;;  %v1523_v20 = vmax.f32 %v1521_v24, %v1522_v55  ;;  %v8069_v55 = vpop.f32.mrf.mxu2 }
 0x33a   : > { %v2874_v21 = vadd.f32 %v7764_v29, %v2873_v59  ;;  %vm2875_vm9 = vweird.f32 %v7704_v4  ;;  %v2882_v17 = vor.u32 1.1754944e-38, %v2881_v57  ;;  %vm2516_vm11 = vweird.f32 %v7768_v9 }
 0x33b   : > { %v8058_v23 = vpop.eup %5826  ;;  %vm2877_vm10 = vmor %vm2875_vm9, %vm2876_vm8  ;;  %v2513_v52 = vmul.f32 %v7768_v9, %v2512_v0  ;;  %v2521_v42 = vand.u32 2147483648, %v7728_v15  ;;  %v1979_v8 = vadd.f32 %v1978_v34, %v1977_v19  ;;  %vm2880_vm12 = vcmp.eq.f32.partialorder %v2879_v36, 8.507059e+37 }
 0x33c   : > { %v2878_v44 = vsel %vm2877_vm10, %v7764_v29, %v2874_v21  ;;  %v2519_v24 = vand.u32 2147483647, %v7728_v15  ;;  %v3757_v38 = vmul.f32 %v7971_v13, %v9828_v11  ;;  %vm2515_vm13 = vweird.f32 %v7728_v15  ;;  %v9856_v21 = vld [vmem:[#allocation29_spill] sm:$0xff] }
 0x33d   : > { %v2883_v4 = vsel %vm2880_vm12, %v2882_v17, %v2878_v44  ;;  %v2514_v58 = vadd.f32 %v7768_v9, %v2513_v52  ;;  %v2149_v57 = vadd.f32 %v2148_v32, %v2147_v33  ;;  %v2152_v37 = vsel %vm795_vm1, %v8058_v23, 0.0  ;;  %vm2517_vm15 = vmor %vm2515_vm13, %vm2516_vm11 }
 0x33e   : > { %v1751_v19 = vmul.f32 1.442695, %v1666_v48  ;;  %v8074_v29 = vmul.f32 %v7584_v49, %v2883_v4  ;;  %v3876_v34 = vadd.f32 %v3875_v39, %v3874_v30  ;;  %v1524_v13 = vrot.slane %v1523_v20, 1  ;;  %v9855_v48 = vld [vmem:[#allocation21_spill] sm:$0xff] }
 0x33f   : > { %v2518_v59 = vsel %vm2517_vm15, %v7768_v9, %v2514_v58  ;;  %v2522_v36 = vor.u32 1.1754944e-38, %v2521_v42  ;;  %v1980_v0 = vrot.slane %v1979_v8, 2  ;;  %vm2520_vm2 = vcmp.eq.f32.partialorder %v2519_v24, 8.507059e+37  ;;  %v9857_v9 = vld [vmem:[#allocation35_spill] sm:$0xff]  ;;  %v9858_v24 = vld [vmem:[#allocation30_spill] sm:$0xff] }
 0x340   : > { %5517 = vmatmul.msk.f32.gmra.mxu3 %vm795_vm1, %v8074_v29  ;;  %v1526_v15 = vsel %vm795_vm1, %v8069_v55, -inf  ;;  %vm4308_vm4 = vcmask 1043459   ;;  %v2153_v33 = vrot.slane %v2152_v37, 4  ;;  %v4049_v49 = vsel %vm795_vm1, %v3757_v38, 0.0 }
 0x341   : > { %v2523_v32 = vsel %vm2520_vm2, %v2522_v36, %v2518_v59  ;;  %v4309_v30 = vsel %vm4308_vm4, %v9856_v21, %v9855_v48  ;;  %5828 = vpow2.f32 %v1751_v19  ;;  %v1527_v17 = vrot.slane %v1526_v15, 4  ;;  %v9859_v19 = vld [vmem:[#allocation28_spill] sm:$0xff]  ;;  %v3462_v48 = vpop.f32.mrf.mxu0  ;;  %v4233_v21 = vld [vmem:[%s9746_s3 + $0x10] sm:$0xff] }
 0x342   : > { %v8088_v39 = vmul.f32 %v9857_v9, %v2523_v32  ;;  %vm4310_vm6 = vcmask 1044484   ;;  %v2150_v52 = vrot.slane %v2149_v57, 1  ;;  %v4045_v42 = vrot.slane %v8053_v22, 2  ;;  %v9860_v32 = vld [vmem:[#allocation20_spill] sm:$0xff]  ;;  %3655 = vst.msk [vmem:[%s7979_s29] sm:$0xff] %vm3654_vm3, %v3462_v48  ;;  %4396 = vmatpush.msra.mxu0 %v4233_v21 }
 0x343   : > { %v1525_v44 = vmax.f32 %v1523_v20, %v1524_v13  ;;  %v8093_v4 = vsel %vm4310_vm6, %v9858_v24, %v4309_v30  ;;  %v8095_v38 = vadd.f32 %v1980_v0, %v1979_v8  ;;  %v3877_v58 = vrot.slane %v3876_v34, 2 }
 0x344   : > { %v3733_v59 = vmul.f32 %v8024_v50, %v9832_v18  ;;  %5493 = vmatmul.msk.f32.gmra.mxu0 %vm795_vm1, %v8088_v39  ;;  %v4334_v36 = vsel %vm4308_vm4, %v9859_v19, %v8009_v47  ;;  %5830 = vrcp.f32 %v8026_v35  ;;  %v8105_v20 = vadd.f32 %v2153_v33, %v2152_v37  ;;  %v3534_v33 = vpop.f32.mrf.mxu3 }
 0x345   : > { %v4050_v13 = vrot.slane %v4049_v49, 4  ;;  %v8109_v8 = vsel %vm4310_vm6, %v9860_v32, %v4334_v36  ;;  %v8114_v50 = vadd.f32 %v1975_v27, %v8019_v63  ;;  %v8119_v0 = vadd.f32 %v3872_v61, %v8021_v43  ;;  %3679 = vst.msk [vmem:[%s7979_s29 + $0xc0] sm:$0xff] %vm3654_vm3, %v3534_v33 }
 0x346   : > { %v1528_v47 = vmax.f32 %v1526_v15, %v1527_v17  ;;  %v2886_v37 = vmul.f32 %v7817_v6, %v7770_v14  ;;  %v8126_v30 = vadd.f32 %v2150_v52, %v2149_v57  ;;  %v8129_v63 = vadd.f32 %v4045_v42, %v8053_v22 }
 0x347   : > { %v1691_v27 = vsub.f32 %v7981_v51, %v1525_v44  ;;  %v3949_v43 = vrot.slane %v8036_v40, 1  ;;  %v8135_v61 = vpop.eup %5828  ;;  %v1982_v15 = vrot.slane %v8095_v38, 1  ;;  %v8138_v9 = vadd.f32 %v3877_v58, %v3876_v34  ;;  %v8152_v58 = vpop.f32.mrf.mxu2 }
 0x348   : > { %9861 = vst [vmem:[#allocation18_spill] sm:$0xff] %v8135_v61  ;;  %v3881_v17 = vsel %vm795_vm1, %v3733_v59, 0.0  ;;  %v2887_v57 = vsub.f32 1.0, %v2886_v37  ;;  %v2155_v22 = vrot.slane %v8105_v20, 2  ;;  %v8144_v52 = vadd.f32 %v4050_v13, %v4049_v49 }
 0x349   : > { %v2896_v51 = vand.u32 2147483648, %v7770_v14  ;;  %v2526_v42 = vmul.f32 %v7891_v1, %v7819_v26  ;;  %v1529_v44 = vrot.slane %v1528_v47, 2  ;;  %vm2891_vm7 = vweird.f32 %v7817_v6 }
 0x34a   : > { %v2888_v24 = vmul.f32 %v7817_v6, %v2887_v57  ;;  %v2894_v34 = vand.u32 2147483647, %v7770_v14  ;;  %v8154_v59 = vpop.eup %5830  ;;  %v1984_v49 = vsel %vm795_vm1, %v8135_v61, 0.0  ;;  %v3882_v19 = vrot.slane %v3881_v17, 4 }
 0x34b   : > { %v1801_v36 = vmul.f32 1.442695, %v1691_v27  ;;  %v2527_v13 = vsub.f32 1.0, %v2526_v42  ;;  %vm2890_vm8 = vweird.f32 %v7770_v14  ;;  %v2897_v48 = vor.u32 1.1754944e-38, %v2896_v51 }
 0x34c   : > { %v2889_v32 = vadd.f32 %v7817_v6, %v2888_v24  ;;  %vm2531_vm9 = vweird.f32 %v7891_v1  ;;  %vm2892_vm10 = vmor %vm2890_vm8, %vm2891_vm7  ;;  %v2534_v33 = vand.u32 2147483647, %v7819_v26  ;;  %v2536_v21 = vand.u32 2147483648, %v7819_v26 }
 0x34d   : > { %v2528_v37 = vmul.f32 %v7891_v1, %v2527_v13  ;;  %v1533_v57 = vsel %vm795_vm1, %v8152_v58, -inf  ;;  %v1530_v3 = vmax.f32 %v1528_v47, %v1529_v44  ;;  %vm2895_vm11 = vcmp.eq.f32.partialorder %v2894_v34, 8.507059e+37  ;;  %v9862_v13 = vld [vmem:[#allocation13_spill] sm:$0xff]  ;;  %v9863_v44 = vld [vmem:[#allocation32_spill] sm:$0xff] }
 0x34e   : > { %v2893_v27 = vsel %vm2892_vm10, %v7817_v6, %v2889_v32  ;;  %v1534_v42 = vrot.slane %v1533_v57, 4  ;;  %v1985_v24 = vrot.slane %v1984_v49, 4  ;;  %vm2530_vm12 = vweird.f32 %v7819_v26 }
 0x34f   : > { %v2898_v14 = vsel %vm2895_vm11, %v2897_v48, %v2893_v27  ;;  %v2529_v51 = vadd.f32 %v7891_v1, %v2528_v37  ;;  %5832 = vpow2.f32 %v1801_v36  ;;  %vm2532_vm13 = vmor %vm2530_vm12, %vm2531_vm9  ;;  %v2537_v61 = vor.u32 1.1754944e-38, %v2536_v21  ;;  %v9865_v37 = vld [vmem:[#allocation24_spill] sm:$0xff] }
 0x350   : > { %v2899_v54 = vmul.f32 %v9862_v13, %v2898_v14  ;;  %vm4312_vm15 = vcmask 1045509   ;;  %vm2535_vm2 = vcmp.eq.f32.partialorder %v2534_v33, 8.507059e+37  ;;  %v1535_v6 = vmax.f32 %v1533_v57, %v1534_v42 }
 0x351   : > { %v2533_v47 = vsel %vm2532_vm13, %v7891_v1, %v2529_v51  ;;  %v8176_v34 = vsel %vm4312_vm15, %v9863_v44, %v8093_v4  ;;  %v2156_v26 = vadd.f32 %v2155_v22, %v8105_v20  ;;  %v1531_v36 = vrot.slane %v1530_v3, 1  ;;  %v3465_v4 = vpop.f32.mrf.mxu0  ;;  %v3537_v20 = vpop.f32.mrf.mxu3 }
 0x352   : > { %5518 = vmatmul.msk.f32.gmra.mxu3 %vm795_vm1, %v2899_v54  ;;  %v2538_v32 = vsel %vm2535_vm2, %v2537_v61, %v2533_v47  ;;  %v8181_v48 = vadd.f32 %v3949_v43, %v8036_v40  ;;  %5834 = vrcp.f32 %v8114_v50  ;;  %v8184_v1 = vadd.f32 %v3882_v19, %v3881_v17  ;;  %3656 = vst.msk [vmem:[%s7979_s29 + $0x8] sm:$0xff] %vm3654_vm3, %v3465_v4 }
 0x353   : > { %v8187_v33 = vmul.f32 %v9865_v37, %v2538_v32  ;;  %v2901_v21 = vmul.f32 %v7947_v46, %v7873_v53  ;;  %5836 = vrcp.f32 %v8126_v30  ;;  %v1986_v43 = vadd.f32 %v1985_v24, %v1984_v49  ;;  %3680 = vst.msk [vmem:[%s7979_s29 + $0xc8] sm:$0xff] %vm3654_vm3, %v3537_v20 }
 0x354   : > { %9864 = vst [vmem:[#allocation26_spill] sm:$0xff] %v8181_v48  ;;  %v8197_v17 = vadd.f32 %v1982_v15, %v8095_v38  ;;  %v4052_v22 = vrot.slane %v8144_v52, 2  ;;  %v1536_v19 = vrot.slane %v1535_v6, 2  ;;  %v2157_v42 = vrot.slane %v2156_v26, 1 }
 0x355   : > { %5494 = vmatmul.msk.f32.gmra.mxu0 %vm795_vm1, %v8187_v33  ;;  %v2902_v57 = vsub.f32 1.0, %v2901_v21  ;;  %v8204_v27 = vpop.eup %5832  ;;  %v1532_v14 = vmax.f32 %v1530_v3, %v1531_v36  ;;  %v2911_v49 = vand.u32 2147483648, %v7873_v53  ;;  %v2541_v24 = vmul.f32 %v7951_v10, %v7878_v25 }
 0x356   : > { %v3884_v38 = vrot.slane %v8184_v1, 2  ;;  %vm2906_vm7 = vweird.f32 %v7947_v46  ;;  %v2909_v51 = vand.u32 2147483647, %v7873_v53  ;;  %v1987_v13 = vrot.slane %v1986_v43, 2 }
 0x357   : > { %v2903_v15 = vmul.f32 %v7947_v46, %v2902_v57  ;;  %v3758_v47 = vmul.f32 %v8074_v29, %v9828_v11  ;;  %v3734_v3 = vmul.f32 %v8088_v39, %v9832_v18  ;;  %v2542_v44 = vsub.f32 1.0, %v2541_v24 }
 0x358   : > { %v8217_v36 = vpop.eup %5834  ;;  %v2159_v32 = vsel %vm795_vm1, %v8204_v27, 0.0  ;;  %v1537_v37 = vmax.f32 %v1535_v6, %v1536_v19  ;;  %vm2905_vm8 = vweird.f32 %v7873_v53  ;;  %v1692_v20 = vsub.f32 %v8069_v55, %v1532_v14  ;;  %v9866_v19 = vld [vmem:[#allocation16_spill] sm:$0xff]  ;;  %v8234_v55 = vpop.f32.mrf.mxu2 }
 0x359   : > { %v2904_v4 = vadd.f32 %v7947_v46, %v2903_v15  ;;  %v8223_v21 = vpop.eup %5836  ;;  %vm2907_vm9 = vmor %vm2905_vm8, %vm2906_vm7  ;;  %v2912_v11 = vor.u32 1.1754944e-38, %v2911_v49  ;;  %v2543_v29 = vmul.f32 %v7951_v10, %v2542_v44  ;;  %vm2546_vm10 = vweird.f32 %v7951_v10 }
 0x35a   : > { %vm2910_vm11 = vcmp.eq.f32.partialorder %v2909_v51, 8.507059e+37  ;;  %v2549_v39 = vand.u32 2147483647, %v7878_v25  ;;  %v2551_v6 = vand.u32 2147483648, %v7878_v25  ;;  %v3759_v57 = vmul.f32 %v2899_v54, %v9866_v19 }
 0x35b   : > { %v2908_v18 = vsel %vm2907_vm9, %v7947_v46, %v2904_v4  ;;  %v2544_v24 = vadd.f32 %v7951_v10, %v2543_v29  ;;  %vm2545_vm12 = vweird.f32 %v7878_v25  ;;  %v8236_v14 = vadd.f32 %v2157_v42, %v2156_v26  ;;  %v9867_v46 = vld [vmem:[#allocation27_spill] sm:$0xff] }
 0x35c   : > { %v2913_v53 = vsel %vm2910_vm11, %v2912_v11, %v2908_v18  ;;  %v4056_v49 = vsel %vm795_vm1, %v3758_v47, 0.0  ;;  %v1538_v15 = vrot.slane %v1537_v37, 1  ;;  %vm2547_vm13 = vmor %vm2545_vm12, %vm2546_vm10  ;;  %v2160_v44 = vrot.slane %v2159_v32, 4 }
 0x35d   : > { %v8240_v51 = vmul.f32 %v9867_v46, %v2913_v53  ;;  %v1803_v4 = vmul.f32 1.442695, %v1692_v20  ;;  %v2548_v54 = vsel %vm2547_vm13, %v7951_v10, %v2544_v24  ;;  %v2552_v11 = vor.u32 1.1754944e-38, %v2551_v6  ;;  %v9868_v20 = vld [vmem:[#allocation36_spill] sm:$0xff]  ;;  %v9869_v10 = vld [vmem:[#allocation23_spill] sm:$0xff] }
 0x35e   : > { %v1988_v18 = vadd.f32 %v1987_v13, %v1986_v43  ;;  %v3888_v29 = vsel %vm795_vm1, %v3734_v3, 0.0  ;;  %vm2550_vm2 = vcmp.eq.f32.partialorder %v2549_v39, 8.507059e+37  ;;  %v1540_v25 = vsel %vm795_vm1, %v8234_v55, -inf  ;;  %v9871_v3 = vld [vmem:[#allocation34_spill] sm:$0xff] }
 0x35f   : > { %5519 = vmatmul.msk.f32.gmra.mxu3 %vm795_vm1, %v8240_v51  ;;  %v4063_v26 = vsel %vm795_vm1, %v3759_v57, 0.0  ;;  %v2553_v42 = vsel %vm2550_vm2, %v2552_v11, %v2548_v54  ;;  %v1541_v47 = vrot.slane %v1540_v25, 4  ;;  %vm4314_vm7 = vcmask 1046534   ;;  %v9872_v54 = vld [vmem:[#allocation14_spill] sm:$0xff] }
 0x360   : > { %v1539_v53 = vmax.f32 %v1537_v37, %v1538_v15  ;;  %v8250_v46 = vmul.f32 %v9868_v20, %v2553_v42  ;;  %v9870_v43 = vrot.slane %v9869_v10, 1  ;;  %v4315_v39 = vsel %vm4314_vm7, %v9871_v3, %v8176_v34 }
 0x361   : > { %v2161_v6 = vadd.f32 %v2160_v44, %v2159_v32  ;;  %v4057_v24 = vrot.slane %v4056_v49, 4  ;;  %5838 = vpow2.f32 %v1803_v4  ;;  %v1542_v61 = vmax.f32 %v1540_v25, %v1541_v47  ;;  %v3468_v4 = vpop.f32.mrf.mxu0  ;;  %v3540_v47 = vpop.f32.mrf.mxu3 }
 0x362   : > { %v3838_v13 = vadd.f32 %v9870_v43, %v9869_v10  ;;  %5840 = vrcp.f32 %v8197_v17  ;;  %v1989_v57 = vrot.slane %v1988_v18, 1  ;;  %v3735_v37 = vmul.f32 %v8187_v33, %v9872_v54  ;;  %5495 = vmatmul.msk.f32.gmra.mxu0 %vm795_vm1, %v8250_v46  ;;  %3657 = vst.msk [vmem:[%s7979_s29 + $0x10] sm:$0xff] %vm3654_vm3, %v3468_v4 }
 0x363   : > { %vm4316_vm8 = vcmask 1047559   ;;  %v3889_v15 = vrot.slane %v3888_v29, 4  ;;  %v4064_v11 = vrot.slane %v4063_v26, 4  ;;  %v1543_v42 = vrot.slane %v1542_v61, 2  ;;  %3681 = vst.msk [vmem:[%s7979_s29 + $0xd0] sm:$0xff] %vm3654_vm3, %v3540_v47 }
 0x364   : > { %v8264_v34 = vsel %vm4316_vm8, %v3838_v13, %v4315_v39  ;;  %v8269_v32 = vadd.f32 %v4052_v22, %v8144_v52  ;;  %v8274_v33 = vadd.f32 %v3884_v38, %v8184_v1  ;;  %v1693_v44 = vsub.f32 %v8152_v58, %v1539_v53  ;;  %v9873_v52 = vld [vmem:[#allocation31_spill] sm:$0xff] }
 0x365   : > { %v2916_v25 = vmul.f32 %v7992_v45, %v7925_v12  ;;  %5842 = vrcp.f32 %v8236_v14  ;;  %v2162_v20 = vrot.slane %v2161_v6, 2  ;;  %v8280_v10 = vadd.f32 %v4057_v24, %v4056_v49 }
 0x366   : > { %v9874_v22 = vrot.slane %v9873_v52, 1  ;;  %v8287_v1 = vadd.f32 %v1989_v57, %v1988_v18  ;;  %v3895_v58 = vsel %vm795_vm1, %v3735_v37, 0.0  ;;  %v1544_v38 = vmax.f32 %v1542_v61, %v1543_v42 }
 0x367   : > { %v2917_v53 = vsub.f32 1.0, %v2916_v25  ;;  %v8292_v13 = vpop.eup %5838  ;;  %v8294_v3 = vadd.f32 %v3889_v15, %v3888_v29  ;;  %v4065_v49 = vadd.f32 %v4064_v11, %v4063_v26  ;;  %v2926_v39 = vand.u32 2147483648, %v7925_v12  ;;  %v9876_v29 = vld [vmem:[#allocation33_spill] sm:$0xff] }
 0x368   : > { %v3992_v43 = vadd.f32 %v9874_v22, %v9873_v52  ;;  %9875 = vst [vmem:[#allocation19_spill] sm:$0xff] %v8292_v13  ;;  %v2556_v24 = vmul.f32 %v8002_v31, %v7930_v7  ;;  %v8299_v4 = vpop.eup %5840  ;;  %v1805_v18 = vmul.f32 1.442695, %v1693_v44  ;;  %vm2921_vm9 = vweird.f32 %v7992_v45 }
 0x369   : > { %v2918_v57 = vmul.f32 %v7992_v45, %v2917_v53  ;;  %v2924_v61 = vand.u32 2147483647, %v7925_v12  ;;  %v2163_v37 = vadd.f32 %v2162_v20, %v2161_v6  ;;  %v3896_v42 = vrot.slane %v3895_v58, 4 }
 0x36a   : > { %v2557_v25 = vsub.f32 1.0, %v2556_v24  ;;  %v3998_v15 = vrot.slane %v9876_v29, 1  ;;  %v2166_v26 = vsel %vm795_vm1, %v8292_v13, 0.0  ;;  %v1545_v11 = vrot.slane %v1544_v38, 1  ;;  %v8315_v24 = vpop.f32.mrf.mxu2 }
 0x36b   : > { %v2919_v47 = vadd.f32 %v7992_v45, %v2918_v57  ;;  %vm2920_vm10 = vweird.f32 %v7925_v12  ;;  %v8309_v44 = vpop.eup %5842  ;;  %v4066_v52 = vrot.slane %v4065_v49, 2  ;;  %v2927_v22 = vor.u32 1.1754944e-38, %v2926_v39 }
 0x36c   : > { %vm2922_vm11 = vmor %vm2920_vm10, %vm2921_vm9  ;;  %v2558_v53 = vmul.f32 %v8002_v31, %v2557_v25  ;;  %vm2561_vm12 = vweird.f32 %v8002_v31  ;;  %5844 = vpow2.f32 %v1805_v18  ;;  %vm2925_vm13 = vcmp.eq.f32.partialorder %v2924_v61, 8.507059e+37 }
 0x36d   : > { %v2923_v6 = vsel %vm2922_vm11, %v7992_v45, %v2919_v47  ;;  %v2564_v20 = vand.u32 2147483647, %v7930_v7  ;;  %vm2560_vm2 = vweird.f32 %v7930_v7  ;;  %v2566_v40 = vand.u32 2147483648, %v7930_v7 }
 0x36e   : > { %v2928_v57 = vsel %vm2925_vm13, %v2927_v22, %v2923_v6  ;;  %v2559_v12 = vadd.f32 %v8002_v31, %v2558_v53  ;;  %v2167_v39 = vrot.slane %v2166_v26, 4  ;;  %v3897_v48 = vadd.f32 %v3896_v42, %v3895_v58  ;;  %vm2562_vm9 = vmor %vm2560_vm2, %vm2561_vm12 }
 0x36f   : > { %v1546_v25 = vmax.f32 %v1544_v38, %v1545_v11  ;;  %v2929_v13 = vmul.f32 %v7801_v2, %v2928_v57  ;;  %v2567_v18 = vor.u32 1.1754944e-38, %v2566_v40  ;;  %v1547_v61 = vsel %vm795_vm1, %v8315_v24, -inf  ;;  %v9877_v38 = vld [vmem:[#allocation39_spill] sm:$0xff]  ;;  %v9878_v11 = vld [vmem:[#allocation40_spill] sm:$0xff]  ;;  %v3543_v57 = vpop.f32.mrf.mxu3 }
 0x370   : > { %v2563_v45 = vsel %vm2562_vm9, %v8002_v31, %v2559_v12  ;;  %v3999_v47 = vadd.f32 %v3998_v15, %v9876_v29  ;;  %v2164_v22 = vrot.slane %v2163_v37, 1  ;;  %v8325_v53 = vadd.f32 %v4066_v52, %v4065_v49  ;;  %3682 = vst.msk [vmem:[%s7979_s29 + $0xd8] sm:$0xff] %vm3654_vm3, %v3543_v57 }
 0x371   : > { %5520 = vmatmul.msk.f32.gmra.mxu3 %vm795_vm1, %v2929_v13  ;;  %vm2565_vm10 = vcmp.eq.f32.partialorder %v2564_v20, 8.507059e+37  ;;  %v1548_v7 = vrot.slane %v1547_v61, 4  ;;  %v3760_v58 = vmul.f32 %v8240_v51, %v9866_v19  ;;  %v4318_v31 = vsel %vm4304_vm5, %v9877_v38, %v7789_v41 }
 0x372   : > { %v2568_v2 = vsel %vm2565_vm10, %v2567_v18, %v2563_v45  ;;  %v4336_v40 = vsel %vm4312_vm15, %v3992_v43, %v8109_v8  ;;  %v8335_v42 = vpop.eup %5844  ;;  %v2168_v29 = vadd.f32 %v2167_v39, %v2166_v26  ;;  %v1694_v15 = vsub.f32 %v8234_v55, %v1546_v25  ;;  %v3471_v55 = vpop.f32.mrf.mxu0  ;;  %v9879_v25 = vld [vmem:[#allocation15_spill] sm:$0xff] }
 0x373   : > { %v8340_v52 = vmul.f32 %v9878_v11, %v2568_v2  ;;  %v3898_v51 = vrot.slane %v3897_v48, 2  ;;  %v1549_v6 = vmax.f32 %v1547_v61, %v1548_v7  ;;  %v8344_v20 = vsel %vm4306_vm14, %v7910_v16, %v4318_v31  ;;  %v4232_v16 = vld [vmem:[%s9746_s3 + $0x8] sm:$0xff]  ;;  %3658 = vst.msk [vmem:[%s7979_s29 + $0x18] sm:$0xff] %vm3654_vm3, %v3471_v55  ;;  %v8392_v49 = vpop.f32.mrf.mxu2 }
 0x374   : > { %v8347_v41 = vsel %vm4314_vm7, %v3999_v47, %v4336_v40  ;;  %5846 = vrcp.f32 %v8287_v1  ;;  %v8350_v8 = vadd.f32 %v2164_v22, %v2163_v37  ;;  %v3891_v43 = vrot.slane %v8294_v3, 2  ;;  %4397 = vmatpush.msra.mxu0 %v4232_v16 }
 0x375   : > { %5496 = vmatmul.msk.f32.gmra.mxu0 %vm795_vm1, %v8340_v52  ;;  %v2931_v26 = vmul.f32 %v8154_v59, %v8026_v35  ;;  %v4068_v12 = vrot.slane %v8325_v53, 1  ;;  %v4070_v37 = vsel %vm795_vm1, %v3760_v58, 0.0  ;;  %v3736_v39 = vmul.f32 %v8250_v46, %v9872_v54 }
 0x376   : > { %v9880_v45 = vrot.slane %v9879_v25, 2  ;;  %v2173_v61 = vsel %vm795_vm1, %v8335_v42, 0.0  ;;  %v1807_v47 = vmul.f32 1.442695, %v1694_v15  ;;  %v2571_v7 = vmul.f32 %v8217_v36, %v8114_v50 }
 0x377   : > { %v2932_v22 = vsub.f32 1.0, %v2931_v26  ;;  %v2169_v58 = vrot.slane %v2168_v29, 2  ;;  %v8375_v2 = vadd.f32 %v3898_v51, %v3897_v48  ;;  %v1550_v46 = vrot.slane %v1549_v6, 2 }
 0x378   : > { %v4004_v18 = vadd.f32 %v9880_v45, %v9879_v25  ;;  %v2941_v38 = vand.u32 2147483648, %v8026_v35  ;;  %v4071_v31 = vrot.slane %v4070_v37, 4  ;;  %vm2936_vm11 = vweird.f32 %v8154_v59 }
 0x379   : > { %v2933_v40 = vmul.f32 %v8154_v59, %v2932_v22  ;;  %v2939_v11 = vand.u32 2147483647, %v8026_v35  ;;  %v2174_v15 = vrot.slane %v2173_v61, 4  ;;  %v3902_v55 = vsel %vm795_vm1, %v3736_v39, 0.0 }
 0x37a   : > { %v2572_v26 = vsub.f32 1.0, %v2571_v7  ;;  %v4005_v16 = vrot.slane %v4004_v18, 1  ;;  %v8382_v25 = vpop.eup %5846  ;;  %5848 = vpow2.f32 %v1807_v47  ;;  %v3761_v48 = vmul.f32 %v2929_v13, %v9866_v19 }
 0x37b   : > { %v2934_v51 = vadd.f32 %v8154_v59, %v2933_v40  ;;  %vm2935_vm12 = vweird.f32 %v8026_v35  ;;  %v1551_v57 = vmax.f32 %v1549_v6, %v1550_v46  ;;  %v2942_v45 = vor.u32 1.1754944e-38, %v2941_v38 }
 0x37c   : > { %vm2937_vm13 = vmor %vm2935_vm12, %vm2936_vm11  ;;  %v2573_v22 = vmul.f32 %v8217_v36, %v2572_v26  ;;  %vm2576_vm2 = vweird.f32 %v8217_v36  ;;  %vm2940_vm9 = vcmp.eq.f32.partialorder %v2939_v11, 8.507059e+37  ;;  %v2579_v7 = vand.u32 2147483647, %v8114_v50 }
 0x37d   : > { %v2938_v39 = vsel %vm2937_vm13, %v8154_v59, %v2934_v51  ;;  %v2581_v47 = vand.u32 2147483648, %v8114_v50  ;;  %vm2575_vm10 = vweird.f32 %v8114_v50  ;;  %v4006_v35 = vadd.f32 %v4005_v16, %v4004_v18 }
 0x37e   : > { %v2943_v13 = vsel %vm2940_vm9, %v2942_v45, %v2938_v39  ;;  %v2574_v40 = vadd.f32 %v8217_v36, %v2573_v22  ;;  %v2170_v6 = vadd.f32 %v2169_v58, %v2168_v29  ;;  %v4072_v46 = vadd.f32 %v4071_v31, %v4070_v37  ;;  %vm2577_vm11 = vmor %vm2575_vm10, %vm2576_vm2 }
 0x37f   : > { %v3903_v38 = vrot.slane %v3902_v55, 4  ;;  %v8397_v26 = vmul.f32 %v7883_v28, %v2943_v13  ;;  %v4077_v59 = vsel %vm795_vm1, %v3761_v48, 0.0  ;;  %v2582_v51 = vor.u32 1.1754944e-38, %v2581_v47  ;;  %v3474_v47 = vpop.f32.mrf.mxu0 }
 0x380   : > { %v2578_v11 = vsel %vm2577_vm11, %v8217_v36, %v2574_v40  ;;  %v1554_v45 = vsel %vm795_vm1, %v8392_v49, -inf  ;;  %v8403_v39 = vpop.eup %5848  ;;  %v3737_v50 = vmul.f32 %v8340_v52, %v9872_v54  ;;  %v1552_v29 = vrot.slane %v1551_v57, 1  ;;  %3659 = vst.msk [vmem:[%s7979_s29 + $0x20] sm:$0xff] %vm3654_vm3, %v3474_v47 }
 0x381   : > { %5521 = vmatmul.msk.f32.gmra.mxu3 %vm795_vm1, %v8397_v26  ;;  %vm2580_vm12 = vcmp.eq.f32.partialorder %v2579_v7, 8.507059e+37  ;;  %v1555_v28 = vrot.slane %v1554_v45, 4  ;;  %v2175_v37 = vadd.f32 %v2174_v15, %v2173_v61  ;;  %v4320_v36 = vsel %vm4308_vm4, %v7964_v60, %v8344_v20  ;;  %v9881_v60 = vld [vmem:[#allocation37_spill] sm:$0xff]  ;;  %v9882_v20 = vld [vmem:[#allocation38_spill] sm:$0xff] }
 0x382   : > { %v2583_v18 = vsel %vm2580_vm12, %v2582_v51, %v2578_v11  ;;  %v8414_v58 = vsel %vm4316_vm8, %v4006_v35, %v8347_v41  ;;  %v2171_v31 = vrot.slane %v2170_v6, 1  ;;  %v3900_v16 = vrot.slane %v8375_v2, 1 }
 0x383   : > { %v4078_v52 = vrot.slane %v4077_v59, 4  ;;  %v8418_v48 = vmul.f32 %v7923_v56, %v2583_v18  ;;  %v2180_v61 = vsel %vm795_vm1, %v8403_v39, 0.0  ;;  %v1556_v15 = vmax.f32 %v1554_v45, %v1555_v28 }
 0x384   : > { %v8424_v22 = vsel %vm4310_vm6, %v8119_v0, %v4320_v36  ;;  %v8429_v41 = vsel %vm4304_vm5, %v9882_v20, %v9881_v60  ;;  %5850 = vrcp.f32 %v8350_v8  ;;  %v3909_v56 = vsel %vm795_vm1, %v3737_v50, 0.0  ;;  %v3546_v0 = vpop.f32.mrf.mxu3 }
 0x385   : > { %v1553_v7 = vmax.f32 %v1551_v57, %v1552_v29  ;;  %5497 = vmatmul.msk.f32.gmra.mxu0 %vm795_vm1, %v8418_v48  ;;  %v2946_v13 = vmul.f32 %v8223_v21, %v8126_v30  ;;  %v8440_v40 = vadd.f32 %v4068_v12, %v8325_v53  ;;  %v2176_v35 = vrot.slane %v2175_v37, 2  ;;  %3683 = vst.msk [vmem:[%s7979_s29 + $0xe0] sm:$0xff] %vm3654_vm3, %v3546_v0 }
 0x386   : > { %v4073_v11 = vrot.slane %v4072_v46, 2  ;;  %v3904_v51 = vadd.f32 %v3903_v38, %v3902_v55  ;;  %v8445_v57 = vadd.f32 %v3900_v16, %v8375_v2  ;;  %v2181_v45 = vrot.slane %v2180_v61, 4 }
 0x387   : > { %v4079_v50 = vadd.f32 %v4078_v52, %v4077_v59  ;;  %v2947_v29 = vsub.f32 1.0, %v2946_v13  ;;  %v8449_v28 = vadd.f32 %v2171_v31, %v2170_v6  ;;  %v3910_v18 = vrot.slane %v3909_v56, 4 }
 0x388   : > { %v1557_v36 = vrot.slane %v1556_v15, 2  ;;  %v2956_v53 = vand.u32 2147483648, %v8126_v30  ;;  %v1695_v12 = vsub.f32 %v8315_v24, %v1553_v7  ;;  %vm2951_vm13 = vweird.f32 %v8223_v21 }
 0x389   : > { %v2948_v55 = vmul.f32 %v8223_v21, %v2947_v29  ;;  %v2954_v2 = vand.u32 2147483647, %v8126_v30  ;;  %v2177_v38 = vadd.f32 %v2176_v35, %v2175_v37  ;;  %v8456_v16 = vadd.f32 %v4073_v11, %v4072_v46  ;;  %v8466_v35 = vpop.f32.mrf.mxu2 }
 0x38a   : > { %v3905_v59 = vrot.slane %v3904_v51, 2  ;;  %v2586_v6 = vmul.f32 %v8299_v4, %v8197_v17  ;;  %v8460_v31 = vpop.eup %5850  ;;  %v2182_v52 = vadd.f32 %v2181_v45, %v2180_v61  ;;  %v4080_v60 = vrot.slane %v4079_v50, 2 }
 0x38b   : > { %v2949_v20 = vadd.f32 %v8223_v21, %v2948_v55  ;;  %vm2950_vm2 = vweird.f32 %v8126_v30  ;;  %v3911_v24 = vadd.f32 %v3910_v18, %v3909_v56  ;;  %v1558_v7 = vmax.f32 %v1556_v15, %v1557_v36 }
 0x38c   : > { %vm2952_vm9 = vmor %vm2950_vm2, %vm2951_vm13  ;;  %v2957_v47 = vor.u32 1.1754944e-38, %v2956_v53  ;;  %v2587_v13 = vsub.f32 1.0, %v2586_v6  ;;  %v1809_v37 = vmul.f32 1.442695, %v1695_v12  ;;  %vm2955_vm10 = vcmp.eq.f32.partialorder %v2954_v2, 8.507059e+37 }
 0x38d   : > { %v2953_v46 = vsel %vm2952_vm9, %v8223_v21, %v2949_v20  ;;  %v2596_v0 = vand.u32 2147483648, %v8197_v17  ;;  %vm2591_vm11 = vweird.f32 %v8299_v4  ;;  %v2594_v30 = vand.u32 2147483647, %v8197_v17 }
 0x38e   : > { %v2958_v11 = vsel %vm2955_vm10, %v2957_v47, %v2953_v46  ;;  %v2588_v61 = vmul.f32 %v8299_v4, %v2587_v13  ;;  %v8471_v56 = vadd.f32 %v3905_v59, %v3904_v51  ;;  %v2183_v15 = vrot.slane %v2182_v52, 2  ;;  %v3549_v46 = vpop.f32.mrf.mxu3 }
 0x38f   : > { %v3762_v45 = vmul.f32 %v8397_v26, %v9866_v19  ;;  %v8476_v21 = vmul.f32 %v7973_v5, %v2958_v11  ;;  %v1559_v29 = vrot.slane %v1558_v7, 1  ;;  %vm2590_vm12 = vweird.f32 %v8197_v17  ;;  %3684 = vst.msk [vmem:[%s7979_s29 + $0xe8] sm:$0xff] %vm3654_vm3, %v3549_v46 }
 0x390   : > { %v2589_v18 = vadd.f32 %v8299_v4, %v2588_v61  ;;  %v1561_v36 = vsel %vm795_vm1, %v8466_v35, -inf  ;;  %v2178_v53 = vrot.slane %v2177_v38, 1  ;;  %5852 = vpow2.f32 %v1809_v37  ;;  %vm2592_vm13 = vmor %vm2590_vm12, %vm2591_vm11  ;;  %v3477_v37 = vpop.f32.mrf.mxu0 }
 0x391   : > { %5522 = vmatmul.msk.f32.gmra.mxu3 %vm795_vm1, %v8476_v21  ;;  %v2597_v51 = vor.u32 1.1754944e-38, %v2596_v0  ;;  %v1562_v12 = vrot.slane %v1561_v36, 4  ;;  %v8484_v26 = vadd.f32 %v4080_v60, %v4079_v50  ;;  %v3912_v5 = vrot.slane %v3911_v24, 2  ;;  %3660 = vst.msk [vmem:[%s7979_s29 + $0x28] sm:$0xff] %vm3654_vm3, %v3477_v37 }
 0x392   : > { %v2593_v55 = vsel %vm2592_vm13, %v8299_v4, %v2589_v18  ;;  %vm2595_vm2 = vcmp.eq.f32.partialorder %v2594_v30, 8.507059e+37  ;;  %v4084_v2 = vsel %vm795_vm1, %v3762_v45, 0.0  ;;  %v3738_v17 = vmul.f32 %v8418_v48, %v9872_v54 }
 0x393   : > { %v2598_v59 = vsel %vm2595_vm2, %v2597_v51, %v2593_v55  ;;  %v1563_v6 = vmax.f32 %v1561_v36, %v1562_v12  ;;  %5854 = vrcp.f32 %v8449_v28  ;;  %v8491_v20 = vadd.f32 %v2183_v15, %v2182_v52 }
 0x394   : > { %v1560_v47 = vmax.f32 %v1558_v7, %v1559_v29  ;;  %v2599_v50 = vmul.f32 %v8012_v62, %v2598_v59  ;;  %v4075_v60 = vrot.slane %v8456_v16, 1  ;;  %v3907_v4 = vrot.slane %v8471_v56, 1 }
 0x395   : > { %v1564_v13 = vrot.slane %v1563_v6, 2  ;;  %v2961_v48 = vmul.f32 %v8309_v44, %v8236_v14  ;;  %v8498_v0 = vadd.f32 %v2178_v53, %v2177_v38  ;;  %v4082_v11 = vrot.slane %v8484_v26, 1 }
 0x396   : > { %v8501_v52 = vadd.f32 %v3912_v5, %v3911_v24  ;;  %v4085_v7 = vrot.slane %v4084_v2, 4  ;;  %5498 = vmatmul.msk.f32.gmra.mxu0 %vm795_vm1, %v2599_v50  ;;  %v8506_v62 = vpop.eup %5852  ;;  %v3916_v61 = vsel %vm795_vm1, %v3738_v17, 0.0  ;;  %v2601_v45 = vmul.f32 %v8382_v25, %v8287_v1 }
 0x397   : > { %v1565_v30 = vmax.f32 %v1563_v6, %v1564_v13  ;;  %v2962_v15 = vsub.f32 1.0, %v2961_v48  ;;  %v2185_v38 = vrot.slane %v8491_v20, 1  ;;  %v1696_v24 = vsub.f32 %v8392_v49, %v1560_v47 }
 0x398   : > { %v2971_v29 = vand.u32 2147483648, %v8236_v14  ;;  %v3892_v18 = vadd.f32 %v3891_v43, %v8294_v3  ;;  %vm2966_vm9 = vweird.f32 %v8309_v44  ;;  %v2969_v53 = vand.u32 2147483647, %v8236_v14 }
 0x399   : > { %v2963_v36 = vmul.f32 %v8309_v44, %v2962_v15  ;;  %v9883_v51 = vrot.slane %v8138_v9, 1  ;;  %v8525_v5 = vpop.eup %5854  ;;  %v2187_v49 = vsel %vm795_vm1, %v8506_v62, 0.0  ;;  %v3917_v55 = vrot.slane %v3916_v61, 4  ;;  %v8535_v15 = vpop.f32.mrf.mxu2 }
 0x39a   : > { %v2602_v17 = vsub.f32 1.0, %v2601_v45  ;;  %v3886_v59 = vrot.slane %v8274_v33, 1  ;;  %v4086_v3 = vadd.f32 %v4085_v7, %v4084_v2  ;;  %v1566_v43 = vrot.slane %v1565_v30, 1 }
 0x39b   : > { %v3880_v12 = vadd.f32 %v9883_v51, %v8138_v9  ;;  %v2964_v6 = vadd.f32 %v8309_v44, %v2963_v36  ;;  %vm2965_vm10 = vweird.f32 %v8236_v14  ;;  %v1811_v47 = vmul.f32 1.442695, %v1696_v24 }
 0x39c   : > { %vm2967_vm11 = vmor %vm2965_vm10, %vm2966_vm9  ;;  %v2972_v13 = vor.u32 1.1754944e-38, %v2971_v29  ;;  %v2603_v9 = vmul.f32 %v8382_v25, %v2602_v17  ;;  %v3893_v37 = vrot.slane %v3892_v18, 1  ;;  %v2188_v48 = vrot.slane %v2187_v49, 4 }
 0x39d   : > { %v2968_v46 = vsel %vm2967_vm11, %v8309_v44, %v2964_v6  ;;  %vm2970_vm12 = vcmp.eq.f32.partialorder %v2969_v53, 8.507059e+37  ;;  %vm2606_vm13 = vweird.f32 %v8382_v25  ;;  %v3918_v2 = vadd.f32 %v3917_v55, %v3916_v61 }
 0x39e   : > { %v2973_v7 = vsel %vm2970_vm12, %v2972_v13, %v2968_v46  ;;  %v2604_v45 = vadd.f32 %v8382_v25, %v2603_v9  ;;  %v3887_v14 = vadd.f32 %v3886_v59, %v8274_v33  ;;  %v1567_v24 = vmax.f32 %v1565_v30, %v1566_v43  ;;  %v3480_v46 = vpop.f32.mrf.mxu0 }
 0x39f   : > { %v8540_v29 = vmul.f32 %v8058_v23, %v2973_v7  ;;  %vm2605_vm2 = vweird.f32 %v8287_v1  ;;  %v2609_v36 = vand.u32 2147483647, %v8287_v1  ;;  %5856 = vpow2.f32 %v1811_v47  ;;  %v3552_v7 = vpop.f32.mrf.mxu3  ;;  %3661 = vst.msk [vmem:[%s7979_s29 + $0x30] sm:$0xff] %vm3654_vm3, %v3480_v46 }
 0x3a0   : > { %vm8544_vm9 = vmor %vm2605_vm2, %vm2606_vm13  ;;  %v2611_v61 = vand.u32 2147483648, %v8287_v1  ;;  %v1568_v53 = vsel %vm795_vm1, %v8535_v15, -inf  ;;  %v3894_v51 = vadd.f32 %v3893_v37, %v3892_v18  ;;  %v3914_v33 = vrot.slane %v8501_v52, 1  ;;  %3685 = vst.msk [vmem:[%s7979_s29 + $0xf0] sm:$0xff] %vm3654_vm3, %v3552_v7 }
 0x3a1   : > { %v2189_v30 = vadd.f32 %v2188_v48, %v2187_v49  ;;  %v3739_v23 = vmul.f32 %v2599_v50, %v9872_v54  ;;  %5523 = vmatmul.msk.f32.gmra.mxu3 %vm795_vm1, %v8540_v29  ;;  %v2608_v55 = vsel %vm8544_vm9, %v8382_v25, %v2604_v45  ;;  %v8559_v17 = vadd.f32 %v2185_v38, %v8491_v20  ;;  %v9886_v38 = vld [vmem:[#allocation18_spill] sm:$0xff] }
 0x3a2   : > { %v2612_v1 = vor.u32 1.1754944e-38, %v2611_v61  ;;  %v1569_v59 = vrot.slane %v1568_v53, 4  ;;  %v4322_v18 = vsel %vm4312_vm15, %v3880_v12, %v8424_v22  ;;  %v4087_v43 = vrot.slane %v4086_v3, 2  ;;  %v8604_v61 = vpop.f32.mrf.mxu2 }
 0x3a3   : > { %v1697_v49 = vsub.f32 %v8466_v35, %v1567_v24  ;;  %vm2610_vm10 = vcmp.eq.f32.partialorder %v2609_v36, 8.507059e+37  ;;  %v4323_v50 = vsel %vm4314_vm7, %v3887_v14, %v4322_v18  ;;  %v3919_v6 = vrot.slane %v3918_v2, 2 }
 0x3a4   : > { %v2613_v47 = vsel %vm2610_vm10, %v2612_v1, %v2608_v55  ;;  %v1570_v13 = vmax.f32 %v1568_v53, %v1569_v59  ;;  %v8566_v9 = vsel %vm4316_vm8, %v3894_v51, %v4323_v50  ;;  %v8571_v25 = vadd.f32 %v4075_v60, %v8456_v16  ;;  %v4231_v16 = vld [vmem:[%s9746_s3] sm:$0xff] }
 0x3a5   : > { %v2190_v20 = vrot.slane %v2189_v30, 2  ;;  %v3923_v22 = vsel %vm795_vm1, %v3739_v23, 0.0  ;;  %v2614_v35 = vmul.f32 %v9886_v38, %v2613_v47  ;;  %v8575_v12 = vpop.eup %5856  ;;  %5858 = vrcp.f32 %v8498_v0  ;;  %4398 = vmatpush.msra.mxu0 %v4231_v16  ;;  %v9891_v16 = vld [vmem:[#allocation22_spill] sm:$0xff] }
 0x3a6   : > { %v3908_v37 = vadd.f32 %v3907_v4, %v8471_v56  ;;  %v1571_v48 = vrot.slane %v1570_v13, 2  ;;  %v2976_v60 = vmul.f32 %v8460_v31, %v8350_v8  ;;  %5860 = vrcp.f32 %v8559_v17 }
 0x3a7   : > { %v8590_v45 = vadd.f32 %v4082_v11, %v8484_v26  ;;  %v8593_v56 = vadd.f32 %v3914_v33, %v8501_v52  ;;  %v1813_v4 = vmul.f32 1.442695, %v1697_v49  ;;  %5499 = vmatmul.msk.f32.gmra.mxu0 %vm795_vm1, %v2614_v35  ;;  %v8598_v14 = vadd.f32 %v4087_v43, %v4086_v3 }
 0x3a8   : > { %v8600_v24 = vadd.f32 %v3919_v6, %v3918_v2  ;;  %v3924_v36 = vrot.slane %v3923_v22, 4  ;;  %v2977_v44 = vsub.f32 1.0, %v2976_v60  ;;  %v8606_v26 = vadd.f32 %v2190_v20, %v2189_v30  ;;  %v9888_v6 = vld [vmem:[#allocation41_spill] sm:$0xff] }
 0x3a9   : > { %v2194_v11 = vsel %vm795_vm1, %v8575_v12, 0.0  ;;  %v3740_v52 = vmul.f32 %v2614_v35, %v9872_v54  ;;  %v2986_v53 = vand.u32 2147483648, %v8350_v8  ;;  %v1572_v3 = vmax.f32 %v1570_v13, %v1571_v48  ;;  %v9889_v35 = vld [vmem:[#allocation42_spill] sm:$0xff] }
 0x3aa   : > { %v2978_v2 = vmul.f32 %v8460_v31, %v2977_v44  ;;  %vm2981_vm11 = vweird.f32 %v8460_v31  ;;  %v2984_v51 = vand.u32 2147483647, %v8350_v8  ;;  %5862 = vpow2.f32 %v1813_v4  ;;  %v3483_v44 = vpop.f32.mrf.mxu0 }
 0x3ab   : > { %v1575_v33 = vsel %vm795_vm1, %v8604_v61, -inf  ;;  %v8619_v30 = vsel %vm4304_vm5, %v3908_v37, %v8445_v57  ;;  %v9887_v54 = vrot.slane %v8280_v10, 2  ;;  %v8624_v55 = vpop.eup %5858  ;;  %v2195_v1 = vrot.slane %v2194_v11, 4  ;;  %3662 = vst.msk [vmem:[%s7979_s29 + $0x38] sm:$0xff] %vm3654_vm3, %v3483_v44 }
 0x3ac   : > { %v3925_v59 = vadd.f32 %v3924_v36, %v3923_v22  ;;  %v2979_v18 = vadd.f32 %v8460_v31, %v2978_v2  ;;  %vm2980_vm12 = vweird.f32 %v8350_v8  ;;  %v8628_v43 = vpop.eup %5860  ;;  %v2987_v49 = vor.u32 1.1754944e-38, %v2986_v53 }
 0x3ad   : > { %v4060_v23 = vadd.f32 %v9887_v54, %v8280_v10  ;;  %vm2982_vm13 = vmor %vm2980_vm12, %vm2981_vm11  ;;  %v1576_v50 = vrot.slane %v1575_v33, 4  ;;  %v4054_v57 = vrot.slane %v8269_v32, 1  ;;  %v4340_v47 = vsel %vm4306_vm14, %v9888_v6, %v8429_v41 }
 0x3ae   : > { %v3930_v10 = vsel %vm795_vm1, %v3740_v52, 0.0  ;;  %v1573_v13 = vrot.slane %v1572_v3, 1  ;;  %v2983_v20 = vsel %vm2982_vm13, %v8460_v31, %v2979_v18  ;;  %vm2985_vm2 = vcmp.eq.f32.partialorder %v2984_v51, 8.507059e+37  ;;  %v3555_v52 = vpop.f32.mrf.mxu3  ;;  %v8660_v51 = vpop.f32.mrf.mxu2 }
 0x3af   : > { %v2988_v22 = vsel %vm2985_vm2, %v2987_v49, %v2983_v20  ;;  %5542 = vmatmul.msk.f32.vlgmr.msra.gmra.mxu0 %vm795_vm1, %v8264_v34  ;;  %v1577_v8 = vmax.f32 %v1575_v33, %v1576_v50  ;;  %v4061_v38 = vrot.slane %v4060_v23, 1  ;;  %v4341_v37 = vsel %vm4308_vm4, %v9889_v35, %v4340_v47  ;;  %3686 = vst.msk [vmem:[%s7979_s29 + $0xf8] sm:$0xff] %vm3654_vm3, %v3555_v52 }
 0x3b0   : > { %v3921_v48 = vrot.slane %v8600_v24, 1  ;;  %v8642_v41 = vmul.f32 %v8204_v27, %v2988_v22  ;;  %v9890_v46 = vrot.slane %v8129_v63, 1  ;;  %v4342_v60 = vsel %vm4310_vm6, %v9891_v16, %v4341_v37  ;;  %v8649_v7 = vpop.eup %5862 }
 0x3b1   : > { %v2192_v34 = vrot.slane %v8606_v26, 1  ;;  %v3763_v4 = vmul.f32 %v8476_v21, %v9866_v19  ;;  %v1578_v36 = vrot.slane %v1577_v8, 2  ;;  %v2991_v27 = vmul.f32 %v8525_v5, %v8449_v28 }
 0x3b2   : > { %v4048_v31 = vadd.f32 %v9890_v46, %v8129_v63  ;;  %v2196_v53 = vadd.f32 %v2195_v1, %v2194_v11  ;;  %v3931_v2 = vrot.slane %v3930_v10, 4  ;;  %v1574_v63 = vmax.f32 %v1572_v3, %v1573_v13  ;;  %5524 = vmatmul.msk.f32.gmra.mxu3 %vm795_vm1, %v8642_v41  ;;  %v3486_v52 = vpop.f32.mrf.mxu0 }
 0x3b3   : > { %v4055_v33 = vadd.f32 %v4054_v57, %v8269_v32  ;;  %v3926_v54 = vrot.slane %v3925_v59, 2  ;;  %v1579_v21 = vmax.f32 %v1577_v8, %v1578_v36  ;;  %v2992_v18 = vsub.f32 1.0, %v2991_v27  ;;  %v9892_v27 = vld [vmem:[#allocation19_spill] sm:$0xff]  ;;  %3663 = vst.msk [vmem:[%s7979_s29 + $0x40] sm:$0xff] %vm3654_vm3, %v3486_v52 }
 0x3b4   : > { %v4062_v49 = vadd.f32 %v4061_v38, %v4060_v23  ;;  %v2201_v11 = vsel %vm795_vm1, %v8649_v7, 0.0  ;;  %v3001_v3 = vand.u32 2147483648, %v8449_v28  ;;  %v1582_v1 = vsel %vm795_vm1, %v8660_v51, -inf }
 0x3b5   : > { %v4343_v50 = vsel %vm4312_vm15, %v4048_v31, %v4342_v60  ;;  %v1580_v6 = vrot.slane %v1579_v21, 1  ;;  %v2993_v47 = vmul.f32 %v8525_v5, %v2992_v18  ;;  %vm2996_vm9 = vweird.f32 %v8525_v5 }
 0x3b6   : > { %v2999_v32 = vand.u32 2147483647, %v8449_v28  ;;  %v3932_v57 = vadd.f32 %v3931_v2, %v3930_v10  ;;  %v1698_v23 = vsub.f32 %v8535_v15, %v1574_v63  ;;  %v1583_v13 = vrot.slane %v1582_v1, 4  ;;  %v3558_v63 = vpop.f32.mrf.mxu3 }
 0x3b7   : > { %v4344_v20 = vsel %vm4314_vm7, %v4055_v33, %v4343_v50  ;;  %v1581_v22 = vmax.f32 %v1579_v21, %v1580_v6  ;;  %v2994_v8 = vadd.f32 %v8525_v5, %v2993_v47  ;;  %vm2995_vm10 = vweird.f32 %v8449_v28  ;;  %5543 = vmatmul.msk.f32.gmra.mxu0 %vm795_vm1, %v8566_v9  ;;  %3687 = vst.msk [vmem:[%s7979_s29 + $0x100] sm:$0xff] %vm3654_vm3, %v3558_v63 }
 0x3b8   : > { %v8681_v38 = vsel %vm4316_vm8, %v4062_v49, %v4344_v20  ;;  %v8684_v35 = vsel %vm795_vm1, %v3763_v4, 0.0  ;;  %v3927_v10 = vadd.f32 %v3926_v54, %v3925_v59  ;;  %vm2997_vm11 = vmor %vm2995_vm10, %vm2996_vm9  ;;  %v3002_v15 = vor.u32 1.1754944e-38, %v3001_v3 }
 0x3b9   : > { %v1584_v37 = vmax.f32 %v1582_v1, %v1583_v13  ;;  %v2197_v46 = vrot.slane %v2196_v53, 2  ;;  %v2202_v31 = vrot.slane %v2201_v11, 4  ;;  %v2998_v16 = vsel %vm2997_vm11, %v8525_v5, %v2994_v8 }
 0x3ba   : > { %vm3000_vm12 = vcmp.eq.f32.partialorder %v2999_v32, 8.507059e+37  ;;  %v1815_v28 = vmul.f32 1.442695, %v1698_v23  ;;  %v1699_v60 = vsub.f32 %v8604_v61, %v1581_v22  ;;  %v3922_v44 = vadd.f32 %v3921_v48, %v8600_v24 }
 0x3bb   : > { %v3003_v9 = vsel %vm3000_vm12, %v3002_v15, %v2998_v16  ;;  %v1585_v36 = vrot.slane %v1584_v37, 2  ;;  %v3933_v4 = vrot.slane %v3932_v57, 2  ;;  %v3006_v2 = vmul.f32 %v8624_v55, %v8498_v0 }
 0x3bc   : > { %v8690_v59 = vmul.f32 %v9892_v27, %v3003_v9  ;;  %v8695_v5 = vadd.f32 %v2192_v34, %v8606_v26  ;;  %v4092_v33 = vrot.slane %v8684_v35, 4  ;;  %v3928_v61 = vrot.slane %v3927_v10, 1  ;;  %v8710_v26 = vpop.f32.mrf.mxu2 }
 0x3bd   : > { %v1586_v54 = vmax.f32 %v1584_v37, %v1585_v36  ;;  %v8700_v24 = vadd.f32 %v2197_v46, %v2196_v53  ;;  %v8702_v48 = vadd.f32 %v2202_v31, %v2201_v11  ;;  %v3764_v21 = vmul.f32 %v8540_v29, %v9866_v19  ;;  %v3489_v36 = vpop.f32.mrf.mxu0 }
 0x3be   : > { %5525 = vmatmul.msk.f32.gmra.mxu3 %vm795_vm1, %v8690_v59  ;;  %v3007_v18 = vsub.f32 1.0, %v3006_v2  ;;  %5864 = vpow2.f32 %v1815_v28  ;;  %v1817_v34 = vmul.f32 1.442695, %v1699_v60  ;;  %v3016_v3 = vand.u32 2147483648, %v8498_v0  ;;  %v9893_v60 = vld [vmem:[#allocation25_spill] sm:$0xff]  ;;  %v9894_v2 = vld [vmem:[#allocation26_spill] sm:$0xff] }
 0x3bf   : > { %v1587_v49 = vrot.slane %v1586_v54, 1  ;;  %vm3011_vm13 = vweird.f32 %v8624_v55  ;;  %v3014_v11 = vand.u32 2147483647, %v8498_v0  ;;  %v3934_v29 = vadd.f32 %v3933_v4, %v3932_v57  ;;  %v3561_v4 = vpop.f32.mrf.mxu3  ;;  %3664 = vst.msk [vmem:[%s7979_s29 + $0x48] sm:$0xff] %vm3654_vm3, %v3489_v36 }
 0x3c0   : > { %v3008_v53 = vmul.f32 %v8624_v55, %v3007_v18  ;;  %v3929_v50 = vadd.f32 %v3928_v61, %v3927_v10  ;;  %v4326_v6 = vsel %vm4306_vm14, %v8593_v56, %v8619_v30  ;;  %v1589_v47 = vsel %vm795_vm1, %v8710_v26, -inf  ;;  %3688 = vst.msk [vmem:[%s7979_s29 + $0x108] sm:$0xff] %vm3654_vm3, %v3561_v4 }
 0x3c1   : > { %v1588_v1 = vmax.f32 %v1586_v54, %v1587_v49  ;;  %vm3010_vm2 = vweird.f32 %v8498_v0  ;;  %v3935_v23 = vrot.slane %v3934_v29, 1  ;;  %v1590_v13 = vrot.slane %v1589_v47, 4 }
 0x3c2   : > { %v3009_v32 = vadd.f32 %v8624_v55, %v3008_v53  ;;  %5866 = vpow2.f32 %v1817_v34  ;;  %vm3012_vm9 = vmor %vm3010_vm2, %vm3011_vm13  ;;  %v3017_v57 = vor.u32 1.1754944e-38, %v3016_v3  ;;  %v4327_v22 = vsel %vm4308_vm4, %v3922_v44, %v4326_v6 }
 0x3c3   : > { %v1700_v20 = vsub.f32 %v8660_v51, %v1588_v1  ;;  %vm3015_vm10 = vcmp.eq.f32.partialorder %v3014_v11, 8.507059e+37  ;;  %v3936_v56 = vadd.f32 %v3935_v23, %v3934_v29  ;;  %v1591_v30 = vmax.f32 %v1589_v47, %v1590_v13 }
 0x3c4   : > { %v3013_v8 = vsel %vm3012_vm9, %v8624_v55, %v3009_v32  ;;  %v8726_v10 = vpop.eup %5864  ;;  %v4089_v15 = vrot.slane %v8598_v14, 1  ;;  %v4098_v0 = vsel %vm795_vm1, %v3764_v21, 0.0  ;;  %v4328_v46 = vsel %vm4310_vm6, %v3929_v50, %v4327_v22  ;;  %v8746_v63 = vpop.f32.mrf.mxu2  ;;  %v9895_v32 = vld [vmem:[#allocation17_spill] sm:$0xff] }
 0x3c5   : > { %v3018_v37 = vsel %vm3015_vm10, %v3017_v57, %v3013_v8  ;;  %5868 = vrcp.f32 %v8695_v5  ;;  %v4329_v31 = vsel %vm4312_vm15, %v3936_v56, %v4328_v46  ;;  %v1592_v55 = vrot.slane %v1591_v30, 2 }
 0x3c6   : > { %v3019_v51 = vmul.f32 %v8335_v42, %v3018_v37  ;;  %v4093_v16 = vadd.f32 %v4092_v33, %v8684_v35  ;;  %v1819_v28 = vmul.f32 1.442695, %v1700_v20  ;;  %v4330_v9 = vsel %vm4314_vm7, %v9893_v60, %v4329_v31 }
 0x3c7   : > { %v3021_v44 = vmul.f32 %v8628_v43, %v8559_v17  ;;  %v2199_v27 = vrot.slane %v8700_v24, 1  ;;  %v2204_v52 = vrot.slane %v8702_v48, 2  ;;  %v4099_v42 = vrot.slane %v4098_v0, 4 }
 0x3c8   : > { %5526 = vmatmul.msk.f32.gmra.mxu3 %vm795_vm1, %v3019_v51  ;;  %v4331_v35 = vsel %vm4316_vm8, %v9894_v2, %v4330_v9  ;;  %v8748_v33 = vpop.eup %5866  ;;  %v2208_v61 = vsel %vm795_vm1, %v8726_v10, 0.0  ;;  %v1593_v54 = vmax.f32 %v1591_v30, %v1592_v55  ;;  %v3029_v18 = vand.u32 2147483647, %v8559_v17 }
 0x3c9   : > { %5544 = vmatmul.msk.f32.gmra.mxu0 %vm795_vm1, %v4331_v35  ;;  %v3022_v21 = vsub.f32 1.0, %v3021_v44  ;;  %vm3026_vm11 = vweird.f32 %v8628_v43  ;;  %v3031_v34 = vand.u32 2147483648, %v8559_v17  ;;  %v1596_v49 = vsel %vm795_vm1, %v8746_v63, -inf }
 0x3ca   : > { %v4346_v3 = vsel %vm4304_vm5, %v8571_v25, %v8440_v40  ;;  %5870 = vpow2.f32 %v1819_v28  ;;  %v1594_v53 = vrot.slane %v1593_v54, 1  ;;  %v1597_v29 = vrot.slane %v1596_v49, 4 }
 0x3cb   : > { %v3023_v11 = vmul.f32 %v8628_v43, %v3022_v21  ;;  %v8764_v1 = vpop.eup %5868  ;;  %v8767_v50 = vadd.f32 %v2199_v27, %v8700_v24  ;;  %v4094_v6 = vrot.slane %v4093_v16, 2  ;;  %v2215_v47 = vsel %vm795_vm1, %v8748_v33, 0.0 }
 0x3cc   : > { %vm3025_vm12 = vweird.f32 %v8559_v17  ;;  %v3767_v23 = vmul.f32 %v3019_v51, %v9895_v32  ;;  %v1595_v13 = vmax.f32 %v1593_v54, %v1594_v53  ;;  %v1598_v25 = vmax.f32 %v1596_v49, %v1597_v29 }
 0x3cd   : > { %v3024_v40 = vadd.f32 %v8628_v43, %v3023_v11  ;;  %v4100_v20 = vadd.f32 %v4099_v42, %v4098_v0  ;;  %v2209_v57 = vrot.slane %v2208_v61, 4  ;;  %vm3027_vm13 = vmor %vm3025_vm12, %vm3026_vm11  ;;  %v3032_v22 = vor.u32 1.1754944e-38, %v3031_v34 }
 0x3ce   : > { %v4347_v24 = vsel %vm4306_vm14, %v8590_v45, %v4346_v3  ;;  %v2205_v8 = vadd.f32 %v2204_v52, %v8702_v48  ;;  %v1701_v56 = vsub.f32 %v8710_v26, %v1595_v13  ;;  %vm3030_vm2 = vcmp.eq.f32.partialorder %v3029_v18, 8.507059e+37  ;;  %v3564_v26 = vpop.f32.mrf.mxu3 }
 0x3cf   : > { %v3028_v17 = vsel %vm3027_vm13, %v8628_v43, %v3024_v40  ;;  %v3765_v30 = vmul.f32 %v8642_v41, %v9866_v19  ;;  %v2216_v0 = vrot.slane %v2215_v47, 4  ;;  %v1599_v46 = vrot.slane %v1598_v25, 2  ;;  %v3492_v43 = vpop.f32.mrf.mxu0  ;;  %3689 = vst.msk [vmem:[%s7979_s29 + $0x110] sm:$0xff] %vm3654_vm3, %v3564_v26 }
 0x3d0   : > { %v3033_v37 = vsel %vm3030_vm2, %v3032_v22, %v3028_v17  ;;  %v8783_v51 = vpop.eup %5870  ;;  %v4090_v31 = vadd.f32 %v4089_v15, %v8598_v14  ;;  %v4119_v45 = vsel %vm795_vm1, %v3767_v23, 0.0  ;;  %v3036_v41 = vmul.f32 %v8764_v1, %v8695_v5  ;;  %3665 = vst.msk [vmem:[%s7979_s29 + $0x50] sm:$0xff] %vm3654_vm3, %v3492_v43 }
 0x3d1   : > { %v3034_v48 = vmul.f32 %v8403_v39, %v3033_v37  ;;  %5545 = vmatmul.msk.f32.gmra.mxu0 %vm795_vm1, %v8414_v58  ;;  %5872 = vrcp.f32 %v8767_v50  ;;  %v4095_v55 = vadd.f32 %v4094_v6, %v4093_v16  ;;  %v2210_v28 = vadd.f32 %v2209_v57, %v2208_v61  ;;  %v8801_v16 = vpop.f32.mrf.mxu2 }
 0x3d2   : > { %v1600_v60 = vmax.f32 %v1598_v25, %v1599_v46  ;;  %v2206_v14 = vrot.slane %v2205_v8, 1  ;;  %v4101_v15 = vrot.slane %v4100_v20, 2  ;;  %v1821_v9 = vmul.f32 1.442695, %v1701_v56 }
 0x3d3   : > { %5527 = vmatmul.msk.f32.gmra.mxu3 %vm795_vm1, %v3034_v48  ;;  %v3037_v39 = vsub.f32 1.0, %v3036_v41  ;;  %v4105_v58 = vsel %vm795_vm1, %v3765_v30, 0.0  ;;  %v2217_v36 = vadd.f32 %v2216_v0, %v2215_v47  ;;  %v2222_v44 = vsel %vm795_vm1, %v8783_v51, 0.0 }
 0x3d4   : > { %v4120_v4 = vrot.slane %v4119_v45, 4  ;;  %v1601_v27 = vrot.slane %v1600_v60, 1  ;;  %vm3041_vm9 = vweird.f32 %v8764_v1  ;;  %v3046_v42 = vand.u32 2147483648, %v8695_v5 }
 0x3d5   : > { %v3038_v52 = vmul.f32 %v8764_v1, %v3037_v39  ;;  %v2211_v2 = vrot.slane %v2210_v28, 2  ;;  %v3766_v35 = vmul.f32 %v8690_v59, %v9866_v19  ;;  %vm3040_vm10 = vweird.f32 %v8695_v5 }
 0x3d6   : > { %v3044_v61 = vand.u32 2147483647, %v8695_v5  ;;  %5874 = vpow2.f32 %v1821_v9  ;;  %v1603_v21 = vsel %vm795_vm1, %v8801_v16, -inf  ;;  %v4348_v18 = vsel %vm4308_vm4, %v4090_v31, %v4347_v24  ;;  %vm3042_vm11 = vmor %vm3040_vm10, %vm3041_vm9  ;;  %v3567_v37 = vpop.f32.mrf.mxu3 }
 0x3d7   : > { %v3039_v54 = vadd.f32 %v8764_v1, %v3038_v52  ;;  %v8814_v34 = vpop.eup %5872  ;;  %v2218_v49 = vrot.slane %v2217_v36, 2  ;;  %v2223_v3 = vrot.slane %v2222_v44, 4  ;;  %v4121_v53 = vadd.f32 %v4120_v4, %v4119_v45  ;;  %v3495_v30 = vpop.f32.mrf.mxu0  ;;  %3690 = vst.msk [vmem:[%s7979_s29 + $0x118] sm:$0xff] %vm3654_vm3, %v3567_v37 }
 0x3d8   : > { %v1604_v11 = vrot.slane %v1603_v21, 4  ;;  %v4096_v19 = vrot.slane %v4095_v55, 1  ;;  %v1602_v59 = vmax.f32 %v1600_v60, %v1601_v27  ;;  %v3047_v5 = vor.u32 1.1754944e-38, %v3046_v42  ;;  %3666 = vst.msk [vmem:[%s7979_s29 + $0x58] sm:$0xff] %vm3654_vm3, %v3495_v30 }
 0x3d9   : > { %v3043_v29 = vsel %vm3042_vm11, %v8764_v1, %v3039_v54  ;;  %5546 = vmatmul.msk.f32.gmra.mxu0 %vm795_vm1, %v8681_v38  ;;  %v8819_v6 = vadd.f32 %v2206_v14, %v2205_v8  ;;  %v4102_v47 = vadd.f32 %v4101_v15, %v4100_v20  ;;  %v4106_v23 = vrot.slane %v4105_v58, 4 }
 0x3da   : > { %vm3045_vm12 = vcmp.eq.f32.partialorder %v3044_v61, 8.507059e+37  ;;  %v8821_v13 = vadd.f32 %v2211_v2, %v2210_v28  ;;  %v4112_v40 = vsel %vm795_vm1, %v3766_v35, 0.0  ;;  %v1605_v57 = vmax.f32 %v1603_v21, %v1604_v11 }
 0x3db   : > { %v3048_v25 = vsel %vm3045_vm12, %v3047_v5, %v3043_v29  ;;  %v8824_v22 = vadd.f32 %v2218_v49, %v2217_v36  ;;  %v2224_v24 = vadd.f32 %v2223_v3, %v2222_v44  ;;  %v4122_v1 = vrot.slane %v4121_v53, 2  ;;  %v8858_v3 = vpop.f32.mrf.mxu2 }
 0x3dc   : > { %v3049_v56 = vmul.f32 %v8506_v62, %v3048_v25  ;;  %v8827_v17 = vpop.eup %5874  ;;  %v3768_v38 = vmul.f32 %v3034_v48, %v9895_v32  ;;  %v1702_v20 = vsub.f32 %v8746_v63, %v1602_v59  ;;  %v1606_v8 = vrot.slane %v1605_v57, 2 }
 0x3dd   : > { %v3051_v0 = vmul.f32 %v8814_v34, %v8767_v50  ;;  %v4097_v46 = vadd.f32 %v4096_v19, %v4095_v55  ;;  %v4103_v31 = vrot.slane %v4102_v47, 1  ;;  %v4107_v45 = vadd.f32 %v4106_v23, %v4105_v58 }
 0x3de   : > { %v4113_v43 = vrot.slane %v4112_v40, 4  ;;  %5528 = vmatmul.msk.f32.gmra.mxu3 %vm795_vm1, %v3049_v56  ;;  %5876 = vrcp.f32 %v8819_v6  ;;  %v2213_v62 = vrot.slane %v8821_v13, 1  ;;  %v1607_v48 = vmax.f32 %v1605_v57, %v1606_v8 }
 0x3df   : > { %v3052_v63 = vsub.f32 1.0, %v3051_v0  ;;  %v2220_v41 = vrot.slane %v8824_v22, 1  ;;  %v2225_v26 = vrot.slane %v2224_v24, 2  ;;  %v8841_v28 = vadd.f32 %v4122_v1, %v4121_v53 }
 0x3e0   : > { %v2229_v55 = vsel %vm795_vm1, %v8827_v17, 0.0  ;;  %v4126_v60 = vsel %vm795_vm1, %v3768_v38, 0.0  ;;  %v1823_v14 = vmul.f32 1.442695, %v1702_v20  ;;  %v1608_v15 = vrot.slane %v1607_v48, 1 }
 0x3e1   : > { %v3053_v9 = vmul.f32 %v8814_v34, %v3052_v63  ;;  %vm3056_vm13 = vweird.f32 %v8814_v34  ;;  %v3061_v39 = vand.u32 2147483648, %v8767_v50  ;;  %v4108_v58 = vrot.slane %v4107_v45, 2 }
 0x3e2   : > { %v4114_v36 = vadd.f32 %v4113_v43, %v4112_v40  ;;  %v2230_v44 = vrot.slane %v2229_v55, 4  ;;  %v1609_v4 = vmax.f32 %v1607_v48, %v1608_v15  ;;  %v3059_v52 = vand.u32 2147483647, %v8767_v50  ;;  %v3498_v43 = vpop.f32.mrf.mxu0  ;;  %v3570_v48 = vpop.f32.mrf.mxu3 }
 0x3e3   : > { %v3054_v27 = vadd.f32 %v8814_v34, %v3053_v9  ;;  %vm3055_vm2 = vweird.f32 %v8767_v50  ;;  %v4109_v42 = vadd.f32 %v4108_v58, %v4107_v45  ;;  %v4349_v35 = vsel %vm4310_vm6, %v4097_v46, %v4348_v18  ;;  %3667 = vst.msk [vmem:[%s7979_s29 + $0x60] sm:$0xff] %vm3654_vm3, %v3498_v43 }
 0x3e4   : > { %v4115_v2 = vrot.slane %v4114_v36, 2  ;;  %v8853_v61 = vpop.eup %5876  ;;  %v2226_v54 = vadd.f32 %v2225_v26, %v2224_v24  ;;  %5878 = vpow2.f32 %v1823_v14  ;;  %v1703_v21 = vsub.f32 %v8801_v16, %v1609_v4  ;;  %vm3057_vm9 = vmor %vm3055_vm2, %vm3056_vm13  ;;  %v8890_v26 = vpop.f32.mrf.mxu2  ;;  %3691 = vst.msk [vmem:[%s7979_s29 + $0x120] sm:$0xff] %vm3654_vm3, %v3570_v48 }
 0x3e5   : > { %v4104_v49 = vadd.f32 %v4103_v31, %v4102_v47  ;;  %v3058_v53 = vsel %vm3057_vm9, %v8814_v34, %v3054_v27  ;;  %v3062_v11 = vor.u32 1.1754944e-38, %v3061_v39  ;;  %v4110_v50 = vrot.slane %v4109_v42, 1 }
 0x3e6   : > { %v4116_v19 = vadd.f32 %v4115_v2, %v4114_v36  ;;  %v2231_v59 = vadd.f32 %v2230_v44, %v2229_v55  ;;  %v4127_v29 = vrot.slane %v4126_v60, 4  ;;  %v1825_v18 = vmul.f32 1.442695, %v1703_v21 }
 0x3e7   : > { %vm3060_vm10 = vcmp.eq.f32.partialorder %v3059_v52, 8.507059e+37  ;;  %v4111_v23 = vadd.f32 %v4110_v50, %v4109_v42  ;;  %v1610_v16 = vsel %vm795_vm1, %v8858_v3, -inf  ;;  %v8864_v25 = vadd.f32 %v2213_v62, %v8821_v13 }
 0x3e8   : > { %v3063_v5 = vsel %vm3060_vm10, %v3062_v11, %v3058_v53  ;;  %v4117_v40 = vrot.slane %v4116_v19, 1  ;;  %v2227_v47 = vrot.slane %v2226_v54, 1  ;;  %v3769_v57 = vmul.f32 %v3049_v56, %v9895_v32 }
 0x3e9   : > { %v3064_v34 = vmul.f32 %v8575_v12, %v3063_v5  ;;  %5880 = vpow2.f32 %v1825_v18  ;;  %v4350_v1 = vsel %vm4312_vm15, %v4104_v49, %v4349_v35  ;;  %v1611_v38 = vrot.slane %v1610_v16, 4 }
 0x3ea   : > { %v4118_v24 = vadd.f32 %v4117_v40, %v4116_v19  ;;  %v8869_v20 = vpop.eup %5878  ;;  %v8872_v8 = vadd.f32 %v2220_v41, %v8824_v22  ;;  %v2232_v30 = vrot.slane %v2231_v59, 2  ;;  %v4128_v0 = vadd.f32 %v4127_v29, %v4126_v60 }
 0x3eb   : > { %5529 = vmatmul.msk.f32.gmra.mxu3 %vm795_vm1, %v3064_v34  ;;  %v4351_v13 = vsel %vm4314_vm7, %v4111_v23, %v4350_v1  ;;  %v4124_v56 = vrot.slane %v8841_v28, 1  ;;  %v1612_v37 = vmax.f32 %v1610_v16, %v1611_v38  ;;  %v8878_v46 = vadd.f32 %v2227_v47, %v2226_v54  ;;  %v3501_v47 = vpop.f32.mrf.mxu0 }
 0x3ec   : > { %v4352_v12 = vsel %vm4316_vm8, %v4118_v24, %v4351_v13  ;;  %v4133_v31 = vsel %vm795_vm1, %v3769_v57, 0.0  ;;  %5882 = vrcp.f32 %v8864_v25  ;;  %v2236_v22 = vsel %vm795_vm1, %v8869_v20, 0.0  ;;  %3668 = vst.msk [vmem:[%s7979_s29 + $0x68] sm:$0xff] %vm3654_vm3, %v3501_v47 }
 0x3ed   : > { %5547 = vmatmul.msk.f32.gmra.mxu0 %vm795_vm1, %v4352_v12  ;;  %v1613_v45 = vrot.slane %v1612_v37, 2  ;;  %v3066_v62 = vmul.f32 %v8853_v61, %v8819_v6  ;;  %5884 = vrcp.f32 %v8872_v8  ;;  %v2233_v63 = vadd.f32 %v2232_v30, %v2231_v59 }
 0x3ee   : > { %v4129_v41 = vrot.slane %v4128_v0, 2  ;;  %v8895_v60 = vadd.f32 %v4124_v56, %v8841_v28  ;;  %v4134_v14 = vrot.slane %v4133_v31, 4  ;;  %5886 = vrcp.f32 %v8878_v46 }
 0x3ef   : > { %v8892_v55 = vpop.eup %5880  ;;  %v1614_v15 = vmax.f32 %v1612_v37, %v1613_v45  ;;  %v3067_v9 = vsub.f32 1.0, %v3066_v62  ;;  %v2237_v39 = vrot.slane %v2236_v22, 4  ;;  %vm3071_vm11 = vweird.f32 %v8853_v61 }
 0x3f0   : > { %v3076_v58 = vand.u32 2147483648, %v8819_v6  ;;  %v3074_v4 = vand.u32 2147483647, %v8819_v6  ;;  %v1617_v28 = vsel %vm795_vm1, %v8890_v26, -inf  ;;  %v2234_v27 = vrot.slane %v2233_v63, 1 }
 0x3f1   : > { %v1615_v36 = vrot.slane %v1614_v15, 1  ;;  %v3068_v44 = vmul.f32 %v8853_v61, %v3067_v9  ;;  %v4130_v52 = vadd.f32 %v4129_v41, %v4128_v0  ;;  %v2243_v42 = vsel %vm795_vm1, %v8892_v55, 0.0 }
 0x3f2   : > { %v1618_v2 = vrot.slane %v1617_v28, 4  ;;  %v8908_v35 = vpop.eup %5882  ;;  %v4135_v54 = vadd.f32 %v4134_v14, %v4133_v31  ;;  %vm3070_vm12 = vweird.f32 %v8819_v6  ;;  %v2238_v11 = vadd.f32 %v2237_v39, %v2236_v22 }
 0x3f3   : > { %v1616_v21 = vmax.f32 %v1614_v15, %v1615_v36  ;;  %v3069_v49 = vadd.f32 %v8853_v61, %v3068_v44  ;;  %v8912_v53 = vpop.eup %5884  ;;  %v3770_v50 = vmul.f32 %v3064_v34, %v9895_v32  ;;  %vm3072_vm13 = vmor %vm3070_vm12, %vm3071_vm11  ;;  %v3077_v19 = vor.u32 1.1754944e-38, %v3076_v58  ;;  %v3573_v34 = vpop.f32.mrf.mxu3 }
 0x3f4   : > { %v1619_v59 = vmax.f32 %v1617_v28, %v1618_v2  ;;  %v2244_v29 = vrot.slane %v2243_v42, 4  ;;  %vm3075_vm2 = vcmp.eq.f32.partialorder %v3074_v4, 8.507059e+37  ;;  %v8919_v23 = vpop.eup %5886  ;;  %v4131_v6 = vrot.slane %v4130_v52, 1  ;;  %3692 = vst.msk [vmem:[%s7979_s29 + $0x128] sm:$0xff] %vm3654_vm3, %v3573_v34 }
 0x3f5   : > { %v1704_v18 = vsub.f32 %v8858_v3, %v1616_v21  ;;  %v3073_v5 = vsel %vm3072_vm13, %v8853_v61, %v3069_v49  ;;  %v3081_v57 = vmul.f32 %v8908_v35, %v8864_v25  ;;  %v8923_v24 = vadd.f32 %v2234_v27, %v2233_v63  ;;  %v8928_v61 = vpop.f32.mrf.mxu2 }
 0x3f6   : > { %v3078_v40 = vsel %vm3075_vm2, %v3077_v19, %v3073_v5  ;;  %v1620_v16 = vrot.slane %v1619_v59, 2  ;;  %v4136_v1 = vrot.slane %v4135_v54, 2  ;;  %v2239_v30 = vrot.slane %v2238_v11, 2 }
 0x3f7   : > { %v1827_v38 = vmul.f32 1.442695, %v1704_v18  ;;  %v3079_v3 = vmul.f32 %v8649_v7, %v3078_v40  ;;  %v4140_v0 = vsel %vm795_vm1, %v3770_v50, 0.0  ;;  %v3082_v56 = vsub.f32 1.0, %v3081_v57 }
 0x3f8   : > { %v1621_v13 = vmax.f32 %v1619_v59, %v1620_v16  ;;  %v2245_v12 = vadd.f32 %v2244_v29, %v2243_v42  ;;  %vm3086_vm9 = vweird.f32 %v8908_v35  ;;  %v3091_v37 = vand.u32 2147483648, %v8864_v25  ;;  %v3504_v42 = vpop.f32.mrf.mxu0 }
 0x3f9   : > { %5888 = vpow2.f32 %v1827_v38  ;;  %5530 = vmatmul.msk.f32.gmra.mxu3 %vm795_vm1, %v3079_v3  ;;  %v3083_v31 = vmul.f32 %v8908_v35, %v3082_v56  ;;  %v3089_v22 = vand.u32 2147483647, %v8864_v25  ;;  %v1624_v45 = vsel %vm795_vm1, %v8928_v61, -inf  ;;  %3669 = vst.msk [vmem:[%s7979_s29 + $0x70] sm:$0xff] %vm3654_vm3, %v3504_v42 }
 0x3fa   : > { %v1622_v7 = vrot.slane %v1621_v13, 1  ;;  %5890 = vrcp.f32 %v8923_v24  ;;  %v4132_v43 = vadd.f32 %v4131_v6, %v4130_v52  ;;  %v3771_v62 = vmul.f32 %v3079_v3, %v9895_v32 }
 0x3fb   : > { %v1625_v48 = vrot.slane %v1624_v45, 4  ;;  %v4141_v63 = vrot.slane %v4140_v0, 4  ;;  %v3084_v14 = vadd.f32 %v8908_v35, %v3083_v31  ;;  %vm3085_vm10 = vweird.f32 %v8864_v25 }
 0x3fc   : > { %v1623_v41 = vmax.f32 %v1621_v13, %v1622_v7  ;;  %v2240_v15 = vadd.f32 %v2239_v30, %v2238_v11  ;;  %v8944_v9 = vadd.f32 %v4136_v1, %v4135_v54  ;;  %vm3087_vm11 = vmor %vm3085_vm10, %vm3086_vm9  ;;  %v3092_v39 = vor.u32 1.1754944e-38, %v3091_v37  ;;  %v3576_v54 = vpop.f32.mrf.mxu3 }
 0x3fd   : > { %v1626_v58 = vmax.f32 %v1624_v45, %v1625_v48  ;;  %v2246_v36 = vrot.slane %v2245_v12, 2  ;;  %v3088_v4 = vsel %vm3087_vm11, %v8908_v35, %v3084_v14  ;;  %vm3090_vm12 = vcmp.eq.f32.partialorder %v3089_v22, 8.507059e+37  ;;  %3693 = vst.msk [vmem:[%s7979_s29 + $0x130] sm:$0xff] %vm3654_vm3, %v3576_v54  ;;  %v8965_v18 = vpop.f32.mrf.mxu2 }
 0x3fe   : > { %v1705_v44 = vsub.f32 %v8890_v26, %v1623_v41  ;;  %v4147_v27 = vsel %vm795_vm1, %v3771_v62, 0.0  ;;  %v3093_v25 = vsel %vm3090_vm12, %v3092_v39, %v3088_v4  ;;  %v3096_v2 = vmul.f32 %v8912_v53, %v8872_v8 }
 0x3ff   : > { %v8950_v28 = vpop.eup %5888  ;;  %v1627_v52 = vrot.slane %v1626_v58, 2  ;;  %v4142_v21 = vadd.f32 %v4141_v63, %v4140_v0  ;;  %v3094_v35 = vmul.f32 %v8726_v10, %v3093_v25  ;;  %v4138_v50 = vrot.slane %v8944_v9, 1 }
 0x400   : > { %v2250_v49 = vsel %vm795_vm1, %v8950_v28, 0.0  ;;  %v1829_v26 = vmul.f32 1.442695, %v1705_v44  ;;  %v8960_v11 = vpop.eup %5890  ;;  %v3097_v29 = vsub.f32 1.0, %v3096_v2  ;;  %v2247_v5 = vadd.f32 %v2246_v36, %v2245_v12  ;;  %v3507_v44 = vpop.f32.mrf.mxu0 }
 0x401   : > { %v2251_v19 = vrot.slane %v2250_v49, 4  ;;  %v1628_v59 = vmax.f32 %v1626_v58, %v1627_v52  ;;  %v4148_v6 = vrot.slane %v4147_v27, 4  ;;  %5531 = vmatmul.msk.f32.gmra.mxu3 %vm795_vm1, %v3094_v35  ;;  %vm3101_vm13 = vweird.f32 %v8912_v53  ;;  %3670 = vst.msk [vmem:[%s7979_s29 + $0x78] sm:$0xff] %vm3654_vm3, %v3507_v44 }
 0x402   : > { %5892 = vpow2.f32 %v1829_v26  ;;  %v3098_v40 = vmul.f32 %v8912_v53, %v3097_v29  ;;  %v3104_v16 = vand.u32 2147483647, %v8872_v8  ;;  %v3106_v47 = vand.u32 2147483648, %v8872_v8 }
 0x403   : > { %v1629_v10 = vrot.slane %v1628_v59, 1  ;;  %v2241_v57 = vrot.slane %v2240_v15, 1  ;;  %v4143_v34 = vrot.slane %v4142_v21, 2  ;;  %v2252_v1 = vadd.f32 %v2251_v19, %v2250_v49 }
 0x404   : > { %v1631_v38 = vsel %vm795_vm1, %v8965_v18, -inf  ;;  %v3772_v3 = vmul.f32 %v3094_v35, %v9895_v32  ;;  %v3099_v0 = vadd.f32 %v8912_v53, %v3098_v40  ;;  %vm3100_vm2 = vweird.f32 %v8872_v8 }
 0x405   : > { %v1630_v30 = vmax.f32 %v1628_v59, %v1629_v10  ;;  %v2248_v13 = vrot.slane %v2247_v5, 1  ;;  %vm3102_vm9 = vmor %vm3100_vm2, %vm3101_vm13  ;;  %v3107_v56 = vor.u32 1.1754944e-38, %v3106_v47  ;;  %v1632_v12 = vrot.slane %v1631_v38, 4 }
 0x406   : > { %v8979_v37 = vsel %vm4304_vm5, %v4132_v43, %v8895_v60  ;;  %v4149_v7 = vadd.f32 %v4148_v6, %v4147_v27  ;;  %v3103_v22 = vsel %vm3102_vm9, %v8912_v53, %v3099_v0  ;;  %vm3105_vm10 = vcmp.eq.f32.partialorder %v3104_v16, 8.507059e+37  ;;  %v3579_v27 = vpop.f32.mrf.mxu3 }
 0x407   : > { %v1706_v31 = vsub.f32 %v8928_v61, %v1630_v30  ;;  %v8985_v62 = vadd.f32 %v2241_v57, %v2240_v15  ;;  %v2253_v48 = vrot.slane %v2252_v1, 2  ;;  %v3108_v8 = vsel %vm3105_vm10, %v3107_v56, %v3103_v22  ;;  %3694 = vst.msk [vmem:[%s7979_s29 + $0x138] sm:$0xff] %vm3654_vm3, %v3579_v27 }
 0x408   : > { %v8983_v45 = vpop.eup %5892  ;;  %v1633_v63 = vmax.f32 %v1631_v38, %v1632_v12  ;;  %v8987_v41 = vadd.f32 %v4143_v34, %v4142_v21  ;;  %v4154_v60 = vsel %vm795_vm1, %v3772_v3, 0.0  ;;  %v8992_v61 = vadd.f32 %v2248_v13, %v2247_v5 }
 0x409   : > { %v2257_v14 = vsel %vm795_vm1, %v8983_v45, 0.0  ;;  %v1831_v43 = vmul.f32 1.442695, %v1706_v31  ;;  %v3109_v39 = vmul.f32 %v8748_v33, %v3108_v8  ;;  %v8996_v15 = vadd.f32 %v4138_v50, %v8944_v9  ;;  %v9004_v33 = vpop.f32.mrf.mxu2 }
 0x40a   : > { %v2258_v53 = vrot.slane %v2257_v14, 4  ;;  %v1634_v58 = vrot.slane %v1633_v63, 2  ;;  %v4150_v36 = vrot.slane %v4149_v7, 2  ;;  %v3111_v4 = vmul.f32 %v8919_v23, %v8878_v46 }
 0x40b   : > { %5894 = vpow2.f32 %v1831_v43  ;;  %v2254_v25 = vadd.f32 %v2253_v48, %v2252_v1  ;;  %v4155_v52 = vrot.slane %v4154_v60, 4  ;;  %5532 = vmatmul.msk.f32.gmra.mxu3 %vm795_vm1, %v3109_v39  ;;  %v4145_v9 = vrot.slane %v8987_v41, 1  ;;  %v3510_v48 = vpop.f32.mrf.mxu0 }
 0x40c   : > { %5896 = vrcp.f32 %v8985_v62  ;;  %v1635_v42 = vmax.f32 %v1633_v63, %v1634_v58  ;;  %v2259_v2 = vadd.f32 %v2258_v53, %v2257_v14  ;;  %v3773_v54 = vmul.f32 %v3109_v39, %v9895_v32  ;;  %3671 = vst.msk [vmem:[%s7979_s29 + $0x80] sm:$0xff] %vm3654_vm3, %v3510_v48 }
 0x40d   : > { %v3112_v21 = vsub.f32 1.0, %v3111_v4  ;;  %5898 = vrcp.f32 %v8992_v61  ;;  %v3121_v26 = vand.u32 2147483648, %v8878_v46  ;;  %v1638_v35 = vsel %vm795_vm1, %v9004_v33, -inf }
 0x40e   : > { %v1636_v49 = vrot.slane %v1635_v42, 1  ;;  %v9014_v50 = vadd.f32 %v4150_v36, %v4149_v7  ;;  %vm3116_vm11 = vweird.f32 %v8919_v23  ;;  %v3119_v59 = vand.u32 2147483647, %v8878_v46  ;;  %v3582_v8 = vpop.f32.mrf.mxu3 }
 0x40f   : > { %v3113_v19 = vmul.f32 %v8919_v23, %v3112_v21  ;;  %v2255_v29 = vrot.slane %v2254_v25, 1  ;;  %v9019_v5 = vadd.f32 %v4155_v52, %v4154_v60  ;;  %v1639_v10 = vrot.slane %v1638_v35, 4  ;;  %3695 = vst.msk [vmem:[%s7979_s29 + $0x140] sm:$0xff] %vm3654_vm3, %v3582_v8 }
 0x410   : > { %v1637_v6 = vmax.f32 %v1635_v42, %v1636_v49  ;;  %v2260_v16 = vrot.slane %v2259_v2, 2  ;;  %v4161_v47 = vsel %vm795_vm1, %v3773_v54, 0.0  ;;  %vm3115_vm12 = vweird.f32 %v8878_v46 }
 0x411   : > { %v9021_v40 = vpop.eup %5894  ;;  %v3114_v57 = vadd.f32 %v8919_v23, %v3113_v19  ;;  %vm3117_vm13 = vmor %vm3115_vm12, %vm3116_vm11  ;;  %v3122_v3 = vor.u32 1.1754944e-38, %v3121_v26  ;;  %v1640_v30 = vmax.f32 %v1638_v35, %v1639_v10  ;;  %v4152_v0 = vrot.slane %v9014_v50, 1 }
 0x412   : > { %v9026_v34 = vpop.eup %5896  ;;  %v2264_v1 = vsel %vm795_vm1, %v9021_v40, 0.0  ;;  %v1707_v38 = vsub.f32 %v8965_v18, %v1637_v6  ;;  %vm3120_vm2 = vcmp.eq.f32.partialorder %v3119_v59, 8.507059e+37  ;;  %v4162_v46 = vrot.slane %v4161_v47, 4 }
 0x413   : > { %v2265_v13 = vrot.slane %v2264_v1, 4  ;;  %v3118_v56 = vsel %vm3117_vm13, %v8919_v23, %v3114_v57  ;;  %v9033_v12 = vpop.eup %5898  ;;  %v1641_v22 = vrot.slane %v1640_v30, 2  ;;  %v9035_v18 = vadd.f32 %v2260_v16, %v2259_v2 }
 0x414   : > { %v1833_v7 = vmul.f32 1.442695, %v1707_v38  ;;  %v3123_v31 = vsel %vm3120_vm2, %v3122_v3, %v3118_v56  ;;  %v3126_v23 = vmul.f32 %v8960_v11, %v8923_v24  ;;  %v9042_v60 = vadd.f32 %v2255_v29, %v2254_v25 }
 0x415   : > { %v2266_v63 = vadd.f32 %v2265_v13, %v2264_v1  ;;  %v3124_v14 = vmul.f32 %v8783_v51, %v3123_v31  ;;  %v4157_v43 = vrot.slane %v9019_v5, 2  ;;  %v1642_v53 = vmax.f32 %v1640_v30, %v1641_v22 }
 0x416   : > { %v3134_v39 = vand.u32 2147483647, %v8923_v24  ;;  %5900 = vpow2.f32 %v1833_v7  ;;  %v3127_v36 = vsub.f32 1.0, %v3126_v23  ;;  %v4163_v44 = vadd.f32 %v4162_v46, %v4161_v47  ;;  %v3585_v6 = vpop.f32.mrf.mxu3 }
 0x417   : > { %v2267_v58 = vrot.slane %v2266_v63, 2  ;;  %5533 = vmatmul.msk.f32.gmra.mxu3 %vm795_vm1, %v3124_v14  ;;  %v3774_v51 = vmul.f32 %v3124_v14, %v9895_v32  ;;  %v1643_v4 = vrot.slane %v1642_v53, 1  ;;  %v3136_v27 = vand.u32 2147483648, %v8923_v24  ;;  %3696 = vst.msk [vmem:[%s7979_s29 + $0x148] sm:$0xff] %vm3654_vm3, %v3585_v6 }
 0x418   : > { %v3141_v25 = vmul.f32 %v9026_v34, %v8985_v62  ;;  %v2262_v52 = vrot.slane %v9035_v18, 1  ;;  %v3128_v42 = vmul.f32 %v8960_v11, %v3127_v36  ;;  %vm3130_vm9 = vweird.f32 %v8923_v24  ;;  %v3513_v24 = vpop.f32.mrf.mxu0 }
 0x419   : > { %vm3131_vm10 = vweird.f32 %v8960_v11  ;;  %v4168_v2 = vsel %vm795_vm1, %v3774_v51, 0.0  ;;  %v1644_v54 = vmax.f32 %v1642_v53, %v1643_v4  ;;  %vm9058_vm11 = vcmp.eq.f32.partialorder %v3134_v39, 8.507059e+37  ;;  %3672 = vst.msk [vmem:[%s7979_s29 + $0x88] sm:$0xff] %vm3654_vm3, %v3513_v24  ;;  %v9899_v4 = vld [vmem:[#allocation11_spill] sm:$0xff] }
 0x41a   : > { %v3142_v21 = vsub.f32 1.0, %v3141_v25  ;;  %v2268_v49 = vadd.f32 %v2267_v58, %v2266_v63  ;;  %v3129_v26 = vadd.f32 %v8960_v11, %v3128_v42  ;;  %v3137_v35 = vor.u32 1.1754944e-38, %v3136_v27  ;;  %vm3132_vm13 = vmor %vm3130_vm9, %vm3131_vm10 }
 0x41b   : > { %vm3145_vm12 = vweird.f32 %v8985_v62  ;;  %v1708_v19 = vsub.f32 %v9004_v33, %v1644_v54  ;;  %vm3146_vm2 = vweird.f32 %v9026_v34  ;;  %v3151_v29 = vand.u32 2147483648, %v8985_v62 }
 0x41c   : > { %v3143_v59 = vmul.f32 %v9026_v34, %v3142_v21  ;;  %v9068_v10 = vpop.eup %5900  ;;  %v4169_v16 = vrot.slane %v4168_v2, 4  ;;  %v3133_v47 = vsel %vm3132_vm13, %v8960_v11, %v3129_v26  ;;  %v3149_v57 = vand.u32 2147483647, %v8985_v62  ;;  %vm3147_vm9 = vmor %vm3145_vm12, %vm3146_vm2 }
 0x41d   : > { %v4158_v33 = vadd.f32 %v4157_v43, %v9019_v5  ;;  %v2271_v1 = vsel %vm795_vm1, %v9068_v10, 0.0  ;;  %v1835_v38 = vmul.f32 1.442695, %v1708_v19  ;;  %v3138_v3 = vsel %vm9058_vm11, %v3137_v35, %v3133_v47 }
 0x41e   : > { %v3144_v30 = vadd.f32 %v9026_v34, %v3143_v59  ;;  %v2269_v13 = vrot.slane %v2268_v49, 1  ;;  %v2272_v56 = vrot.slane %v2271_v1, 4  ;;  %v9083_v11 = vmul.f32 %v8827_v17, %v3138_v3 }
 0x41f   : > { %v3152_v5 = vor.u32 1.1754944e-38, %v3151_v29  ;;  %5902 = vpow2.f32 %v1835_v38  ;;  %v4159_v7 = vrot.slane %v4158_v33, 1  ;;  %v4164_v31 = vrot.slane %v4163_v44, 2 }
 0x420   : > { %v3148_v46 = vsel %vm3147_vm9, %v9026_v34, %v3144_v30  ;;  %v2273_v22 = vadd.f32 %v2272_v56, %v2271_v1  ;;  %5534 = vmatmul.msk.f32.gmra.mxu3 %vm795_vm1, %v9083_v11  ;;  %vm3150_vm10 = vcmp.eq.f32.partialorder %v3149_v57, 8.507059e+37  ;;  %v4170_v48 = vadd.f32 %v4169_v16, %v4168_v2 }
 0x421   : > { %v4146_v17 = vadd.f32 %v4145_v9, %v8987_v41  ;;  %v9096_v8 = vadd.f32 %v2262_v52, %v9035_v18  ;;  %v3153_v62 = vsel %vm3150_vm10, %v3152_v5, %v3148_v46  ;;  %v4165_v63 = vadd.f32 %v4164_v31, %v4163_v44  ;;  %v3516_v9 = vpop.f32.mrf.mxu0  ;;  %v3588_v18 = vpop.f32.mrf.mxu3  ;;  %v9898_v44 = vld [vmem:[#allocation12_spill] sm:$0xff] }
 0x422   : > { %5904 = vrcp.f32 %v9042_v60  ;;  %v2274_v34 = vrot.slane %v2273_v22, 2  ;;  %v4153_v14 = vadd.f32 %v4152_v0, %v9014_v50  ;;  %v4171_v23 = vrot.slane %v4170_v48, 2  ;;  %3673 = vst.msk [vmem:[%s7979_s29 + $0x90] sm:$0xff] %vm3654_vm3, %v3516_v9 }
 0x423   : > { %v9102_v43 = vadd.f32 %v2269_v13, %v2268_v49  ;;  %v4160_v53 = vadd.f32 %v4159_v7, %v4158_v33  ;;  %v4166_v39 = vrot.slane %v4165_v63, 1  ;;  %v4354_v41 = vsel %vm4306_vm14, %v8996_v15, %v8979_v37  ;;  %3697 = vst.msk [vmem:[%s7979_s29 + $0x150] sm:$0xff] %vm3654_vm3, %v3588_v18 }
 0x424   : > { %v2275_v58 = vadd.f32 %v2274_v34, %v2273_v22  ;;  %v3154_v51 = vmul.f32 %v8869_v20, %v3153_v62  ;;  %v4172_v36 = vadd.f32 %v4171_v23, %v4170_v48  ;;  %v3156_v50 = vmul.f32 %v9033_v12, %v8992_v61 }
 0x425   : > { %v9112_v0 = vpop.eup %5902  ;;  %v9116_v27 = vadd.f32 %v9899_v4, %v9898_v44  ;;  %5906 = vrcp.f32 %v9096_v8  ;;  %v4167_v37 = vadd.f32 %v4166_v39, %v4165_v63  ;;  %v4355_v15 = vsel %vm4308_vm4, %v4146_v17, %v4354_v41 }
 0x426   : > { %v2276_v20 = vrot.slane %v2275_v58, 1  ;;  %v2278_v25 = vsel %vm795_vm1, %v9112_v0, 0.0  ;;  %v4173_v52 = vrot.slane %v4172_v36, 1  ;;  %v4356_v42 = vsel %vm4310_vm6, %v4153_v14, %v4355_v15 }
 0x427   : > { %5908 = vrcp.f32 %v9102_v43  ;;  %v2279_v2 = vrot.slane %v2278_v25, 4  ;;  %v4357_v54 = vsel %vm4312_vm15, %v4160_v53, %v4356_v42  ;;  %v3157_v32 = vsub.f32 1.0, %v3156_v50 }
 0x428   : > { %v9127_v21 = vpop.eup %5904  ;;  %5535 = vmatmul.msk.f32.gmra.mxu3 %vm795_vm1, %v3154_v51  ;;  %v3776_v49 = vmul.f32 %v3154_v51, %v9116_v27  ;;  %v4174_v26 = vadd.f32 %v4173_v52, %v4172_v36  ;;  %v4358_v35 = vsel %vm4314_vm7, %v4167_v37, %v4357_v54  ;;  %vm3161_vm11 = vweird.f32 %v9033_v12 }
 0x429   : > { %v2280_v19 = vadd.f32 %v2279_v2, %v2278_v25  ;;  %v3158_v24 = vmul.f32 %v9033_v12, %v3157_v32  ;;  %v3164_v59 = vand.u32 2147483647, %v8992_v61  ;;  %v3166_v29 = vand.u32 2147483648, %v8992_v61  ;;  %v3519_v1 = vpop.f32.mrf.mxu0  ;;  %v3591_v38 = vpop.f32.mrf.mxu3 }
 0x42a   : > { %v9136_v6 = vadd.f32 %v2276_v20, %v2275_v58  ;;  %v4359_v16 = vsel %vm4316_vm8, %v4174_v26, %v4358_v35  ;;  %vm3160_vm12 = vweird.f32 %v8992_v61  ;;  %v3775_v3 = vmul.f32 %v9083_v11, %v9116_v27  ;;  %3674 = vst.msk [vmem:[%s7979_s29 + $0x98] sm:$0xff] %vm3654_vm3, %v3519_v1 }
 0x42b   : > { %v9139_v47 = vpop.eup %5906  ;;  %v2281_v57 = vrot.slane %v2280_v19, 2  ;;  %5548 = vmatmul.msk.f32.gmra.mxu0 %vm795_vm1, %v4359_v16  ;;  %v3159_v33 = vadd.f32 %v9033_v12, %v3158_v24  ;;  %vm3162_vm13 = vmor %vm3160_vm12, %vm3161_vm11  ;;  %v3167_v30 = vor.u32 1.1754944e-38, %v3166_v29  ;;  %v3171_v13 = vmul.f32 %v9127_v21, %v9042_v60  ;;  %3698 = vst.msk [vmem:[%s7979_s29 + $0x158] sm:$0xff] %vm3654_vm3, %v3591_v38 }
 0x42c   : > { %v4182_v46 = vsel %vm795_vm1, %v3776_v49, 0.0  ;;  %vm3165_vm2 = vcmp.eq.f32.partialorder %v3164_v59, 8.507059e+37  ;;  %5910 = vrcp.f32 %v9136_v6  ;;  %v3179_v31 = vand.u32 2147483647, %v9042_v60 }
 0x42d   : > { %v9152_v56 = vpop.eup %5908  ;;  %v2282_v5 = vadd.f32 %v2281_v57, %v2280_v19  ;;  %v3163_v61 = vsel %vm3162_vm13, %v9033_v12, %v3159_v33  ;;  %v3172_v7 = vsub.f32 1.0, %v3171_v13  ;;  %v3181_v17 = vand.u32 2147483648, %v9042_v60 }
 0x42e   : > { %v3168_v11 = vsel %vm3165_vm2, %v3167_v30, %v3163_v61  ;;  %v3186_v62 = vmul.f32 %v9139_v47, %v9096_v8  ;;  %v9165_v63 = vsel %vm795_vm1, %v3775_v3, 0.0  ;;  %vm3176_vm9 = vweird.f32 %v9127_v21 }
 0x42f   : > { %v2283_v22 = vrot.slane %v2282_v5, 1  ;;  %v3169_v48 = vmul.f32 %v8892_v55, %v3168_v11  ;;  %v3173_v12 = vmul.f32 %v9127_v21, %v3172_v7  ;;  %v4183_v14 = vrot.slane %v4182_v46, 4 }
 0x430   : > { %vm3175_vm10 = vweird.f32 %v9042_v60  ;;  %v3187_v55 = vsub.f32 1.0, %v3186_v62  ;;  %v3194_v53 = vand.u32 2147483647, %v9096_v8  ;;  %v3196_v39 = vand.u32 2147483648, %v9096_v8 }
 0x431   : > { %v9169_v34 = vadd.f32 %v2283_v22, %v2282_v5  ;;  %5536 = vmatmul.msk.f32.gmra.mxu3 %vm795_vm1, %v3169_v48  ;;  %v3174_v23 = vadd.f32 %v9127_v21, %v3173_v12  ;;  %v3201_v41 = vmul.f32 %v9152_v56, %v9102_v43  ;;  %vm3177_vm11 = vmor %vm3175_vm10, %vm3176_vm9  ;;  %vm3180_vm12 = vcmp.eq.f32.partialorder %v3179_v31, 8.507059e+37  ;;  %v3522_v18 = vpop.f32.mrf.mxu0  ;;  %v3594_v60 = vpop.f32.mrf.mxu3 }
 0x432   : > { %v3182_v9 = vor.u32 1.1754944e-38, %v3181_v17  ;;  %v3188_v58 = vmul.f32 %v9139_v47, %v3187_v55  ;;  %vm3191_vm13 = vweird.f32 %v9139_v47  ;;  %v9180_v51 = vpop.eup %5910  ;;  %v3777_v36 = vmul.f32 %v3169_v48, %v9116_v27  ;;  %3675 = vst.msk [vmem:[%s7979_s29 + $0xa0] sm:$0xff] %vm3654_vm3, %v3522_v18  ;;  %v9231_v48 = vld [vmem:[#allocation5] sm:$0xff] }
 0x433   : > { %5912 = vrcp.f32 %v9169_v34  ;;  %v3178_v50 = vsel %vm3177_vm11, %v9127_v21, %v3174_v23  ;;  %vm3190_vm2 = vweird.f32 %v9096_v8  ;;  %vm3195_vm9 = vcmp.eq.f32.partialorder %v3194_v53, 8.507059e+37  ;;  %3699 = vst.msk [vmem:[%s7979_s29 + $0x160] sm:$0xff] %vm3654_vm3, %v3594_v60 }
 0x434   : > { %v3183_v44 = vsel %vm3180_vm12, %v3182_v9, %v3178_v50  ;;  %v3189_v4 = vadd.f32 %v9139_v47, %v3188_v58  ;;  %v3202_v37 = vsub.f32 1.0, %v3201_v41  ;;  %vm3192_vm10 = vmor %vm3190_vm2, %vm3191_vm13  ;;  %v3197_v20 = vor.u32 1.1754944e-38, %v3196_v39 }
 0x435   : > { %v3184_v15 = vmul.f32 %v8950_v28, %v3183_v44  ;;  %v3209_v25 = vand.u32 2147483647, %v9102_v43  ;;  %v3211_v52 = vand.u32 2147483648, %v9102_v43  ;;  %vm3206_vm11 = vweird.f32 %v9152_v56 }
 0x436   : > { %v3193_v42 = vsel %vm3192_vm10, %v9139_v47, %v3189_v4  ;;  %v3203_v2 = vmul.f32 %v9152_v56, %v3202_v37  ;;  %v3216_v8 = vmul.f32 %v9180_v51, %v9136_v6  ;;  %v4176_v54 = vrot.slane %v9165_v63, 4 }
 0x437   : > { %v4189_v32 = vsel %vm795_vm1, %v3777_v36, 0.0  ;;  %v3778_v28 = vmul.f32 %v3184_v15, %v9116_v27  ;;  %v3198_v21 = vsel %vm3195_vm9, %v3197_v20, %v3193_v42  ;;  %vm3205_vm12 = vweird.f32 %v9102_v43  ;;  %v5981_v20 = vld [vmem:[%s6266_s17] sm:$0xff] }
 0x438   : > { %v3199_v49 = vmul.f32 %v8983_v45, %v3198_v21  ;;  %v3204_v26 = vadd.f32 %v9152_v56, %v3203_v2  ;;  %v3217_v35 = vsub.f32 1.0, %v3216_v8  ;;  %v9208_v24 = vadd.f32 %v4183_v14, %v4182_v46  ;;  %vm3207_vm13 = vmor %vm3205_vm12, %vm3206_vm11 }
 0x439   : > { %5537 = vmatmul.msk.f32.gmra.mxu3 %vm795_vm1, %v3184_v15  ;;  %v9206_v19 = vpop.eup %5912  ;;  %v4196_v59 = vsel %vm795_vm1, %v3778_v28, 0.0  ;;  %vm3210_vm2 = vcmp.eq.f32.partialorder %v3209_v25, 8.507059e+37  ;;  %v3212_v29 = vor.u32 1.1754944e-38, %v3211_v52  ;;  %v3525_v47 = vpop.f32.mrf.mxu0  ;;  %vm3221_vm9 = vweird.f32 %v9180_v51 }
 0x43a   : > { %v3779_v16 = vmul.f32 %v3199_v49, %v9116_v27  ;;  %v3208_v45 = vsel %vm3207_vm13, %v9152_v56, %v3204_v26  ;;  %v3597_v57 = vpop.f32.mrf.mxu3  ;;  %v3218_v33 = vmul.f32 %v9180_v51, %v3217_v35  ;;  %v4190_v43 = vrot.slane %v4189_v32, 4  ;;  %3676 = vst.msk [vmem:[%s7979_s29 + $0xa8] sm:$0xff] %vm3654_vm3, %v3525_v47 }
 0x43b   : > { %v3213_v1 = vsel %vm3210_vm2, %v3212_v29, %v3208_v45  ;;  %v3224_v38 = vand.u32 2147483647, %v9136_v6  ;;  %v3226_v3 = vand.u32 2147483648, %v9136_v6  ;;  %3700 = vst.msk [vmem:[%s7979_s29 + $0x168] sm:$0xff] %vm3654_vm3, %v3597_v57  ;;  %vm3220_vm10 = vweird.f32 %v9136_v6 }
 0x43c   : > { %v4203_v30 = vsel %vm795_vm1, %v3779_v16, 0.0  ;;  %v3214_v13 = vmul.f32 %v9021_v40, %v3213_v1  ;;  %v3219_v56 = vadd.f32 %v9180_v51, %v3218_v33  ;;  %v4197_v5 = vrot.slane %v4196_v59, 4  ;;  %vm3222_vm11 = vmor %vm3220_vm10, %vm3221_vm9 }
 0x43d   : > { %v4204_v46 = vrot.slane %v4203_v30, 4  ;;  %v3227_v61 = vor.u32 1.1754944e-38, %v3226_v3  ;;  %vm3225_vm12 = vcmp.eq.f32.partialorder %v3224_v38, 8.507059e+37  ;;  %v3231_v31 = vmul.f32 %v9206_v19, %v9169_v34 }
 0x43e   : > { %v3780_v11 = vmul.f32 %v3214_v13, %v9116_v27  ;;  %v3223_v7 = vsel %vm3222_vm11, %v9180_v51, %v3219_v56  ;;  %v4177_v40 = vadd.f32 %v4176_v54, %v9165_v63  ;;  %v4185_v22 = vrot.slane %v9208_v24, 2 }
 0x43f   : > { %v9234_v6 = vperm.slane %v9231_v48, 1  ;;  %v3228_v17 = vsel %vm3225_vm12, %v3227_v61, %v3223_v7  ;;  %v4191_v62 = vadd.f32 %v4190_v43, %v4189_v32  ;;  %v3232_v55 = vsub.f32 1.0, %v3231_v31 }
 0x440   : > { %v4210_v12 = vsel %vm795_vm1, %v3780_v11, 0.0  ;;  %v9239_v14 = vmul.f32 %v9068_v10, %v3228_v17  ;;  %v4198_v23 = vadd.f32 %v4197_v5, %v4196_v59  ;;  %v4205_v63 = vadd.f32 %v4204_v46, %v4203_v30  ;;  %v5982_v30 = vld [vmem:[%s6266_s17 + $0x8] sm:$0xff] }
 0x441   : > { %5538 = vmatmul.msk.f32.gmra.mxu3 %vm795_vm1, %v3199_v49  ;;  %v4211_v53 = vrot.slane %v4210_v12, 4  ;;  %v3241_v39 = vand.u32 2147483648, %v9169_v34  ;;  %v4400_v41 = vpop.f32.mrf.mxu0  ;;  %v3233_v58 = vmul.f32 %v9206_v19, %v3232_v55  ;;  %vm3236_vm13 = vweird.f32 %v9206_v19 }
 0x442   : > { %v3781_v9 = vmul.f32 %v9239_v14, %v9116_v27  ;;  %v3600_v18 = vpop.f32.mrf.mxu3  ;;  %v3239_v60 = vand.u32 2147483647, %v9169_v34  ;;  %v4178_v10 = vrot.slane %v4177_v40, 2  ;;  %v4401_v36 = vadd.f32 %v4400_v41, %v9234_v6  ;;  %v5983_v41 = vld [vmem:[%s6266_s17 + $0x10] sm:$0xff] }
 0x443   : > { %v4212_v51 = vadd.f32 %v4211_v53, %v4210_v12  ;;  %3701 = vst.msk [vmem:[%s7979_s29 + $0x170] sm:$0xff] %vm3654_vm3, %v3600_v18  ;;  %v4192_v50 = vrot.slane %v4191_v62, 2  ;;  %v3234_v4 = vadd.f32 %v9206_v19, %v3233_v58  ;;  %vm3235_vm2 = vweird.f32 %v9169_v34 }
 0x444   : > { %v4217_v44 = vsel %vm795_vm1, %v3781_v9, 0.0  ;;  %v4199_v37 = vrot.slane %v4198_v23, 2  ;;  %v9254_v25 = vadd.f32 %v5981_v20, %v4401_v36  ;;  %vm3237_vm9 = vmor %vm3235_vm2, %vm3236_vm13  ;;  %v3242_v52 = vor.u32 1.1754944e-38, %v3241_v39  ;;  %v5984_v20 = vld [vmem:[%s6266_s17 + $0x18] sm:$0xff] }
 0x445   : > { %v4218_v15 = vrot.slane %v4217_v44, 4  ;;  %v4186_v42 = vadd.f32 %v4185_v22, %v9208_v24  ;;  %v4206_v2 = vrot.slane %v4205_v63, 2  ;;  %v3238_v8 = vsel %vm3237_vm9, %v9206_v19, %v3234_v4 }
 0x446   : > { %vm3240_vm10 = vcmp.eq.f32.partialorder %v3239_v60, 8.507059e+37  ;;  %v4213_v54 = vrot.slane %v4212_v51, 2  ;;  %v4432_v28 = vsel %vm400_vm0, %v9254_v25, 0.0  ;;  %v4193_v21 = vadd.f32 %v4192_v50, %v4191_v62 }
 0x447   : > { %v4219_v32 = vadd.f32 %v4218_v15, %v4217_v44  ;;  %v3243_v34 = vsel %vm3240_vm10, %v3242_v52, %v3238_v8  ;;  %4433 = vadd.xlane.f32.xlu2 %v4432_v28  ;;  %v4179_v26 = vadd.f32 %v4178_v10, %v4177_v40  ;;  %v4200_v35 = vadd.f32 %v4199_v37, %v4198_v23 }
 0x448   : > { %v3244_v49 = vmul.f32 %v9112_v0, %v3243_v34  ;;  %v4207_v59 = vadd.f32 %v4206_v2, %v4205_v63  ;;  %v4187_v47 = vrot.slane %v4186_v42, 1  ;;  %v4214_v57 = vadd.f32 %v4213_v54, %v4212_v51 }
 0x449   : > { %5539 = vmatmul.msk.f32.gmra.mxu3 %vm795_vm1, %v3214_v13  ;;  %v4220_v24 = vrot.slane %v4219_v32, 2  ;;  %v4403_v19 = vpop.f32.mrf.mxu0  ;;  %v4194_v33 = vrot.slane %v4193_v21, 1  ;;  %v4180_v0 = vrot.slane %v4179_v26, 1  ;;  %v4201_v38 = vrot.slane %v4200_v35, 1 }
 0x44a   : > { %v3782_v29 = vmul.f32 %v3244_v49, %v9116_v27  ;;  %v3603_v16 = vpop.f32.mrf.mxu3  ;;  %v4404_v45 = vadd.f32 %v4403_v19, %v9234_v6  ;;  %v4208_v56 = vrot.slane %v4207_v59, 1  ;;  %v4188_v27 = vadd.f32 %v4187_v47, %v4186_v42 }
 0x44b   : > { %3702 = vst.msk [vmem:[%s7979_s29 + $0x178] sm:$0xff] %vm3654_vm3, %v3603_v16  ;;  %v4221_v1 = vadd.f32 %v4220_v24, %v4219_v32  ;;  %v4215_v46 = vrot.slane %v4214_v57, 1  ;;  %v4195_v11 = vadd.f32 %v4194_v33, %v4193_v21  ;;  %v4181_v31 = vadd.f32 %v4180_v0, %v4179_v26  ;;  %v5985_v32 = vld [vmem:[%s6266_s17 + $0x20] sm:$0xff]  ;;  %v5987_v0 = vld [vmem:[%s6266_s17 + $0x30] sm:$0xff] }
 0x44c   : > { %v4224_v43 = vsel %vm795_vm1, %v3782_v29, 0.0  ;;  %v9268_v13 = vadd.f32 %v5982_v30, %v4404_v45  ;;  %v4202_v40 = vadd.f32 %v4201_v38, %v4200_v35  ;;  %v4209_v12 = vadd.f32 %v4208_v56, %v4207_v59  ;;  %v5986_v35 = vld [vmem:[%s6266_s17 + $0x28] sm:$0xff] }
 0x44d   : > { %v4225_v3 = vrot.slane %v4224_v43, 4  ;;  %v4222_v7 = vrot.slane %v4221_v1, 1  ;;  %v4216_v23 = vadd.f32 %v4215_v46, %v4214_v57  ;;  %v4360_v53 = vsel %vm4304_vm5, %v4188_v27, %v4181_v31 }
 0x44e   : > { %v4435_v5 = vsel %vm400_vm0, %v9268_v13, 0.0  ;;  %v6127_v57 = vmov 32.0  }
 0x44f   : > { %v4226_v61 = vadd.f32 %v4225_v3, %v4224_v43  ;;  %4436 = vadd.xlane.f32.xlu0 %v4435_v5  ;;  %v4223_v39 = vadd.f32 %v4222_v7, %v4221_v1  ;;  %5914 = vrcp.f32 %v6127_v57 }
 0x451   : > { %5540 = vmatmul.msk.f32.gmra.mxu3 %vm795_vm1, %v9239_v14  ;;  %v4227_v22 = vrot.slane %v4226_v61, 2  ;;  %v4406_v17 = vpop.f32.mrf.mxu0  ;;  %v4361_v14 = vsel %vm4306_vm14, %v4195_v11, %v4360_v53 }
 0x452   : > { %v3606_v62 = vpop.f32.mrf.mxu3  ;;  %v4407_v55 = vadd.f32 %v4406_v17, %v9234_v6  ;;  %v4362_v58 = vsel %vm4308_vm4, %v4202_v40, %v4361_v14 }
 0x453   : > { %3703 = vst.msk [vmem:[%s7979_s29 + $0x180] sm:$0xff] %vm3654_vm3, %v3606_v62  ;;  %v4228_v63 = vadd.f32 %v4227_v22, %v4226_v61  ;;  %v4363_v60 = vsel %vm4310_vm6, %v4209_v12, %v4362_v58 }
 0x454   : > { %v9280_v9 = vadd.f32 %v5983_v41, %v4407_v55  ;;  %v4364_v36 = vsel %vm4312_vm15, %v4216_v23, %v4363_v60 }
 0x455   : > { %v4229_v18 = vrot.slane %v4228_v63, 1  ;;  %v4365_v50 = vsel %vm4314_vm7, %v4223_v39, %v4364_v36  ;;  %v5915_v3 = vpop.eup %5914 }
 0x456   : > { %v4438_v10 = vsel %vm400_vm0, %v9280_v9, 0.0  ;;  %v4457_v56 = vmul.f32 32.0, %v5915_v3  ;;  %vm4461_vm5 = vweird.f32 %v5915_v3 }
 0x457   : > { %v4230_v51 = vadd.f32 %v4229_v18, %v4228_v63  ;;  %4439 = vadd.xlane.f32.xlu1 %v4438_v10 }
 0x458   : > { %v4458_v27 = vsub.f32 1.0, %v4457_v56 }
 0x459   : > { %5541 = vmatmul.msk.f32.gmra.mxu3 %vm795_vm1, %v3244_v49  ;;  %v4366_v44 = vsel %vm4316_vm8, %v4230_v51, %v4365_v50  ;;  %v4409_v4 = vpop.f32.mrf.mxu0 }
 0x45a   : > { %5549 = vmatmul.msk.f32.gmra.mxu0 %vm795_vm1, %v4366_v44  ;;  %v3609_v37 = vpop.f32.mrf.mxu3  ;;  %v4410_v15 = vadd.f32 %v4409_v4, %v9234_v6  ;;  %v4459_v5 = vmul.f32 %v5915_v3, %v4458_v27 }
 0x45b   : > { %3704 = vst.msk [vmem:[%s7979_s29 + $0x188] sm:$0xff] %vm3654_vm3, %v3609_v37  ;;  %v5988_v37 = vld [vmem:[%s6266_s17 + $0x38] sm:$0xff]  ;;  %s357_s17 = sand.u32 1, %s6112_s10  }
 0x45c   : > { %v9295_v52 = vadd.f32 %v5984_v20, %v4410_v15  ;;  %v4460_v61 = vadd.f32 %v5915_v3, %v4459_v5  ;;  %s5393_s13 = sshll.u32 %s357_s17, 6  ;;  %s5252_s22 = scalar_lea.sflag [#allocation4], %s357_s17 }
 0x45d   : > { %s9659_s26 = scalar_lea.vmem [#allocation7], %s5393_s13  ;;  %s6070_s13 = scalar_lea.hbm %s9751_s8, 128 }
 0x45e   : > { %v4441_v42 = vsel %vm400_vm0, %v9295_v52, 0.0  ;;  %v9335_v11 = vsel %vm4461_vm5, %v5915_v3, %v4460_v61  ;;  %s5269_s14 = sshll.u32 %s9659_s26, 4  ;;  %s5270_s14 = int_to_ptr.vmem [resolvable:$true] %s5269_s14 }
 0x45f   : > { %4442 = vadd.xlane.f32.xlu2 %v4441_v42 }
 0x461   : > { %v4412_v2 = vpop.f32.mrf.mxu0 }
 0x462   : > { %v3612_v8 = vpop.f32.mrf.mxu3  ;;  %v4413_v54 = vadd.f32 %v4412_v2, %v9234_v6 }
 0x463   : > { %3705 = vst.msk [vmem:[%s7979_s29 + $0x190] sm:$0xff] %vm3654_vm3, %v3612_v8 }
 0x464   : > { %v9303_v28 = vadd.f32 %v5985_v32, %v4413_v54 }
 0x466   : > { %v4444_v34 = vsel %vm400_vm0, %v9303_v28, 0.0 }
 0x467   : > { %4445 = vadd.xlane.f32.xlu2 %v4444_v34 }
 0x46a   : > { %v4415_v21 = vpop.f32.mrf.mxu0 }
 0x46b   : > { %v4416_v49 = vadd.f32 %v4415_v21, %v9234_v6 }
 0x46d   : > { %v9311_v24 = vadd.f32 %v5986_v35, %v4416_v49 }
 0x46e   : > { %v3615_v26 = vpop.f32.mrf.mxu3 }
 0x46f   : > { %3706 = vst.msk [vmem:[%s7979_s29 + $0x198] sm:$0xff] %vm3654_vm3, %v3615_v26  ;;  %v4447_v59 = vsel %vm400_vm0, %v9311_v24, 0.0 }
 0x470   : > { %4448 = vadd.xlane.f32.xlu0 %v4447_v59 }
 0x47c   : > { %v3618_v19 = vpop.f32.mrf.mxu3 }
 0x47d   : > { %3707 = vst.msk [vmem:[%s7979_s29 + $0x1a0] sm:$0xff] %vm3654_vm3, %v3618_v19 }
 0x484   : > { %v3621_v29 = vpop.f32.mrf.mxu3 }
 0x485   : > { %3708 = vst.msk [vmem:[%s7979_s29 + $0x1a8] sm:$0xff] %vm3654_vm3, %v3621_v29 }
 0x48e   : > { %v3624_v16 = vpop.f32.mrf.mxu3 }
 0x48f   : > { %3709 = vst.msk [vmem:[%s7979_s29 + $0x1b0] sm:$0xff] %vm3654_vm3, %v3624_v16  ;;  %v4763_v16 = vld [vmem:[%s9745_s2 + $0x10] sm:$0xff] }
 0x49a   : > { %v3627_v47 = vpop.f32.mrf.mxu3 }
 0x49b   : > { %3710 = vst.msk [vmem:[%s7979_s29 + $0x1b8] sm:$0xff] %vm3654_vm3, %v3627_v47 }
 0x4a3   : > { %v3630_v45 = vpop.f32.mrf.mxu3 }
 0x4a4   : > { %3711 = vst.msk [vmem:[%s7979_s29 + $0x1c0] sm:$0xff] %vm3654_vm3, %v3630_v45 }
 0x4a8   : > { %v4418_v33 = vpop.f32.mrf.mxu0 }
 0x4a9   : > { %v4419_v43 = vadd.f32 %v4418_v33, %v9234_v6 }
 0x4ab   : > { %v3633_v1 = vpop.f32.mrf.mxu3  ;;  %v9327_v38 = vadd.f32 %v5987_v0, %v4419_v43 }
 0x4ac   : > { %3712 = vst.msk [vmem:[%s7979_s29 + $0x1c8] sm:$0xff] %vm3654_vm3, %v3633_v1 }
 0x4ad   : > { %v4450_v30 = vsel %vm400_vm0, %v9327_v38, 0.0 }
 0x4ae   : > { %4451 = vadd.xlane.f32.xlu2 %v4450_v30 }
 0x4b4   : > { %v3636_v46 = vpop.f32.mrf.mxu3 }
 0x4b5   : > { %3713 = vst.msk [vmem:[%s7979_s29 + $0x1d0] sm:$0xff] %vm3654_vm3, %v3636_v46 }
 0x4ba   : > { %v4434_v31 = vpop.xlane.xlu2 %4433 }
 0x4bb   : > { %v4463_v40 = vmul.f32 %v9335_v11, %v4434_v31 }
 0x4bc   : > { %v3639_v7 = vpop.f32.mrf.mxu3 }
 0x4bd   : > { %3714 = vst.msk [vmem:[%s7979_s29 + $0x1d8] sm:$0xff] %vm3654_vm3, %v3639_v7  ;;  %v9341_v22 = vsub.f32 %v9254_v25, %v4463_v40 }
 0x4bf   : > { %v4479_v17 = vmul.f32 %v9341_v22, %v9341_v22 }
 0x4c1   : > { %v4487_v62 = vsel %vm400_vm0, %v4479_v17, 0.0 }
 0x4c2   : > { %v4437_v55 = vpop.xlane.xlu0 %4436  ;;  %4488 = vadd.xlane.f32.xlu1 %v4487_v62 }
 0x4c3   : > { %v4464_v23 = vmul.f32 %v9335_v11, %v4437_v55 }
 0x4c4   : > { %v3642_v12 = vpop.f32.mrf.mxu3 }
 0x4c5   : > { %3715 = vst.msk [vmem:[%s7979_s29 + $0x1e0] sm:$0xff] %vm3654_vm3, %v3642_v12  ;;  %v9350_v63 = vsub.f32 %v9268_v13, %v4464_v23 }
 0x4c7   : > { %v4480_v25 = vmul.f32 %v9350_v63, %v9350_v63 }
 0x4c9   : > { %v4490_v53 = vsel %vm400_vm0, %v4480_v25, 0.0 }
 0x4ca   : > { %v4440_v14 = vpop.xlane.xlu1 %4439  ;;  %4491 = vadd.xlane.f32.xlu0 %v4490_v53 }
 0x4cb   : > { %v4465_v41 = vmul.f32 %v9335_v11, %v4440_v14 }
 0x4cc   : > { %v3645_v39 = vpop.f32.mrf.mxu3 }
 0x4cd   : > { %3716 = vst.msk [vmem:[%s7979_s29 + $0x1e8] sm:$0xff] %vm3654_vm3, %v3645_v39  ;;  %v9359_v18 = vsub.f32 %v9280_v9, %v4465_v41 }
 0x4cf   : > { %v4481_v13 = vmul.f32 %v9359_v18, %v9359_v18 }
 0x4d1   : > { %v4493_v58 = vsel %vm400_vm0, %v4481_v13, 0.0 }
 0x4d2   : > { %4494 = vadd.xlane.f32.xlu2 %v4493_v58  ;;  %v4443_v10 = vpop.xlane.xlu2 %4442 }
 0x4d3   : > { %v4466_v51 = vmul.f32 %v9335_v11, %v4443_v10 }
 0x4d4   : > { %v3648_v60 = vpop.f32.mrf.mxu3 }
 0x4d5   : > { %3717 = vst.msk [vmem:[%s7979_s29 + $0x1f0] sm:$0xff] %vm3654_vm3, %v3648_v60  ;;  %v9368_v36 = vsub.f32 %v9295_v52, %v4466_v51 }
 0x4d7   : > { %v4421_v50 = vpop.f32.mrf.mxu0  ;;  %v4482_v44 = vmul.f32 %v9368_v36, %v9368_v36 }
 0x4d8   : > { %v4422_v9 = vadd.f32 %v4421_v50, %v9234_v6 }
 0x4d9   : > { %v4496_v4 = vsel %vm400_vm0, %v4482_v44, 0.0  ;;  %v4762_v44 = vld [vmem:[%s9745_s2 + $0x8] sm:$0xff] }
 0x4da   : > { %v9375_v15 = vadd.f32 %v5988_v37, %v4422_v9  ;;  %4497 = vadd.xlane.f32.xlu0 %v4496_v4  ;;  %v4446_v42 = vpop.xlane.xlu2 %4445  ;;  %v4761_v4 = vld [vmem:[%s9745_s2] sm:$0xff] }
 0x4db   : > { %v4467_v2 = vmul.f32 %v9335_v11, %v4446_v42 }
 0x4dc   : > { %v3651_v20 = vpop.f32.mrf.mxu3  ;;  %v4453_v52 = vsel %vm400_vm0, %v9375_v15, 0.0 }
 0x4dd   : > { %3718 = vst.msk [vmem:[%s7979_s29 + $0x1f8] sm:$0xff] %vm3654_vm3, %v3651_v20  ;;  %4454 = vadd.xlane.f32.xlu1 %v4453_v52  ;;  %v9383_v6 = vsub.f32 %v9303_v28, %v4467_v2  ;;  %v4764_v28 = vld [vmem:[%s9745_s2 + $0x18] sm:$0xff]  ;;  %s5268_s29 = scalar_lea.hbm %s9751_s8, %s7904_s21 }
 0x4de   : > { %4802 = vmatpush.msrb.mxu1 %v4764_v28  ;;  %s5271_s16 = sshll.u32 %s5268_s29, 4  ;;  %s5272_s16 = int_to_ptr.hbm [resolvable:$true] %s5271_s16 }
 0x4df   : > { %v4483_v8 = vmul.f32 %v9383_v6, %v9383_v6  ;;  %s6064_s23 = sshra.s32 %s5272_s16, 4  ;;  %s6065_s23 = int_to_ptr.hbm [resolvable:$true] %s6064_s23 }
 0x4e0   : > { %4803 = vmatpush.msrb.mxu1 %v4763_v16  ;;  %s6066_s21 = scalar_lea.hbm %s6065_s23, 64  ;;  %p6071_p4 = scmp.lt.s32.totalorder %s6065_s23, %s9751_s8 }
 0x4e1   : > { %v4499_v34 = vsel %vm400_vm0, %v4483_v8, 0.0  ;;  %p6067_p1 = scmp.ne.s32.totalorder %s6065_s23, %s6066_s21  ;;  %p6072_p7 = scmp.lt.s32.totalorder %s6070_s13, %s6066_s21 }
 0x4e2   : > { %4804 = vmatpush.msrb.mxu1 %v4762_v44 }
 0x4e3   : > { %v4449_v54 = vpop.xlane.xlu0 %4448  ;;  %p6068_p2 = pnand %p6067_p1, %p6218_p5  ;;  %p6073_p8 = por %p6072_p7, %p6071_p4 }
 0x4e4   : > { %v4468_v32 = vmul.f32 %v9335_v11, %v4449_v54  ;;  %4805 = vmatpush.msrb.mxu1 %v4761_v4 }
 0x4e5   : > { %4500 = vadd.xlane.f32.xlu1 %v4499_v34  ;;  %p6069_p3 = pneg %p6068_p2 }
 0x4e6   : > { %v9390_v21 = vsub.f32 %v9311_v24, %v4468_v32 }
 0x4e7   : > { %p6074_p9 = pnand %p6073_p8, %p6069_p3 }
 0x4e8   : > { %v4484_v49 = vmul.f32 %v9390_v21, %v9390_v21 }
 0x4ea   : > { %v4502_v26 = vsel %vm400_vm0, %v4484_v49, 0.0 }
 0x4eb   : > { %4503 = vadd.xlane.f32.xlu2 %v4502_v26 }
 0x521   : > { %v4452_v35 = vpop.xlane.xlu2 %4451 }
 0x522   : > { %v4469_v59 = vmul.f32 %v9335_v11, %v4452_v35 }
 0x524   : > { %v9400_v19 = vsub.f32 %v9327_v38, %v4469_v59 }
 0x526   : > { %v4485_v24 = vmul.f32 %v9400_v19, %v9400_v19 }
 0x528   : > { %v4505_v29 = vsel %vm400_vm0, %v4485_v24, 0.0 }
 0x529   : > { %4506 = vadd.xlane.f32.xlu0 %v4505_v29 }
 0x535   : > { %v4489_v47 = vpop.xlane.xlu1 %4488 }
 0x536   : > { %v4511_v45 = vmul.f32 %v4489_v47, %v9335_v11 }
 0x538   : > { %v4519_v57 = vadd.f32 1e-05, %v4511_v45 }
 0x53a   : > { %5916 = vrsqrt.f32 %v4519_v57  ;;  %vm4534_vm14 = vcmp.eq.f32.partialorder %v4519_v57, inf  ;;  %v4537_v62 = vand.u32 2147483648, %v4519_v57  ;;  %vm4536_vm3 = vcmp.eq.f32.partialorder %v4519_v57, 0.0 }
 0x53d   : > { %v4492_v33 = vpop.xlane.xlu0 %4491 }
 0x53e   : > { %v4512_v43 = vmul.f32 %v4492_v33, %v9335_v11 }
 0x540   : > { %v5917_v1 = vpop.eup %5916  ;;  %v4520_v0 = vadd.f32 1e-05, %v4512_v43 }
 0x541   : > { %v4528_v38 = vmul.f32 %v5917_v1, %v4519_v57 }
 0x542   : > { %5918 = vrsqrt.f32 %v4520_v0  ;;  %vm4546_vm4 = vcmp.eq.f32.partialorder %v4520_v0, inf  ;;  %v4549_v42 = vand.u32 2147483648, %v4520_v0  ;;  %vm4548_vm6 = vcmp.eq.f32.partialorder %v4520_v0, 0.0 }
 0x543   : > { %v4529_v3 = vmul.f32 %v5917_v1, %v4528_v38 }
 0x545   : > { %v4530_v30 = vmul.f32 0.5, %v4529_v3  ;;  %v4495_v56 = vpop.xlane.xlu2 %4494 }
 0x546   : > { %v4513_v27 = vmul.f32 %v4495_v56, %v9335_v11  ;;  %v9446_v56 = vperm.slane %v9231_v48, 2 }
 0x547   : > { %v4531_v5 = vsub.f32 1.5, %v4530_v30 }
 0x548   : > { %v5919_v46 = vpop.eup %5918  ;;  %v9411_v61 = vadd.f32 1e-05, %v4513_v27 }
 0x549   : > { %v4532_v7 = vmul.f32 %v5917_v1, %v4531_v5  ;;  %v4540_v31 = vmul.f32 %v5919_v46, %v4520_v0 }
 0x54a   : > { %5920 = vrsqrt.f32 %v9411_v61  ;;  %vm4558_vm7 = vcmp.eq.f32.partialorder %v9411_v61, inf  ;;  %v4561_v33 = vand.u32 2147483648, %v9411_v61  ;;  %vm4560_vm12 = vcmp.eq.f32.partialorder %v9411_v61, 0.0 }
 0x54b   : > { %v4533_v40 = vmul.f32 %v4532_v7, %v4519_v57  ;;  %v4541_v17 = vmul.f32 %v5919_v46, %v4540_v31 }
 0x54d   : > { %v4535_v12 = vsel %vm4534_vm14, %v4519_v57, %v4533_v40  ;;  %v4542_v55 = vmul.f32 0.5, %v4541_v17  ;;  %v4498_v23 = vpop.xlane.xlu0 %4497  ;;  %v9451_v40 = vperm.slane %v9231_v48, 3 }
 0x54e   : > { %v4538_v25 = vsel %vm4536_vm3, %v4537_v62, %v4535_v12  ;;  %v4514_v53 = vmul.f32 %v4498_v23, %v9335_v11 }
 0x54f   : > { %5922 = vrcp.f32 %v4538_v25  ;;  %v4543_v39 = vsub.f32 1.5, %v4542_v55  ;;  %v4634_v24 = vand.u32 2147483648, %v4538_v25  ;;  %v4632_v47 = vand.u32 2147483647, %v4538_v25 }
 0x550   : > { %v4455_v14 = vpop.xlane.xlu1 %4454  ;;  %v5921_v41 = vpop.eup %5920  ;;  %v9415_v13 = vadd.f32 1e-05, %v4514_v53  ;;  %vm4628_vm8 = vweird.f32 %v4538_v25 }
 0x551   : > { %v4470_v58 = vmul.f32 %v9335_v11, %v4455_v14  ;;  %v4544_v60 = vmul.f32 %v5919_v46, %v4543_v39  ;;  %v4552_v10 = vmul.f32 %v5921_v41, %v9411_v61  ;;  %vm4633_vm13 = vcmp.eq.f32.partialorder %v4632_v47, 8.507059e+37 }
 0x552   : > { %5924 = vrsqrt.f32 %v9415_v13  ;;  %vm4570_vm2 = vcmp.eq.f32.partialorder %v9415_v13, inf  ;;  %v4573_v14 = vand.u32 2147483648, %v9415_v13  ;;  %vm4572_vm5 = vcmp.eq.f32.partialorder %v9415_v13, 0.0 }
 0x553   : > { %v9421_v51 = vsub.f32 %v9375_v15, %v4470_v58  ;;  %v4545_v50 = vmul.f32 %v4544_v60, %v4520_v0  ;;  %v4553_v9 = vmul.f32 %v5921_v41, %v4552_v10 }
 0x555   : > { %v4486_v37 = vmul.f32 %v9421_v51, %v9421_v51  ;;  %v5923_v20 = vpop.eup %5922  ;;  %v4554_v2 = vmul.f32 0.5, %v4553_v9  ;;  %v4547_v15 = vsel %vm4546_vm4, %v4520_v0, %v4545_v50  ;;  %v4635_v0 = vor.u32 1.1754944e-38, %v4634_v24 }
 0x556   : > { %v4624_v8 = vmul.f32 %v5923_v20, %v4538_v25  ;;  %v9432_v34 = vsel %vm4548_vm6, %v4549_v42, %v4547_v15  ;;  %vm4629_vm15 = vweird.f32 %v5923_v20 }
 0x557   : > { %v4508_v52 = vsel %vm400_vm0, %v4486_v37, 0.0  ;;  %v4555_v54 = vsub.f32 1.5, %v4554_v2  ;;  %5926 = vrcp.f32 %v9432_v34  ;;  %vm4630_vm11 = vmor %vm4628_vm8, %vm4629_vm15  ;;  %v4647_v23 = vand.u32 2147483647, %v9432_v34 }
 0x558   : > { %4509 = vadd.xlane.f32.xlu1 %v4508_v52  ;;  %v4501_v32 = vpop.xlane.xlu1 %4500  ;;  %v5925_v49 = vpop.eup %5924  ;;  %v4625_v28 = vsub.f32 1.0, %v4624_v8  ;;  %v4649_v25 = vand.u32 2147483648, %v9432_v34  ;;  %vm4643_vm10 = vweird.f32 %v9432_v34 }
 0x559   : > { %v4515_v26 = vmul.f32 %v4501_v32, %v9335_v11  ;;  %v4556_v35 = vmul.f32 %v5921_v41, %v4555_v54  ;;  %v4564_v59 = vmul.f32 %v5925_v49, %v9415_v13  ;;  %vm4648_vm3 = vcmp.eq.f32.partialorder %v4647_v23, 8.507059e+37 }
 0x55a   : > { %v4626_v16 = vmul.f32 %v5923_v20, %v4625_v28  ;;  %v4650_v44 = vor.u32 1.1754944e-38, %v4649_v25 }
 0x55b   : > { %v9437_v29 = vadd.f32 1e-05, %v4515_v26  ;;  %v4557_v45 = vmul.f32 %v4556_v35, %v9411_v61  ;;  %v4565_v57 = vmul.f32 %v5925_v49, %v4564_v59 }
 0x55c   : > { %v4627_v43 = vadd.f32 %v5923_v20, %v4626_v16 }
 0x55d   : > { %5928 = vrsqrt.f32 %v9437_v29  ;;  %v4566_v1 = vmul.f32 0.5, %v4565_v57  ;;  %v4559_v38 = vsel %vm4558_vm7, %v9411_v61, %v4557_v45  ;;  %v5927_v3 = vpop.eup %5926  ;;  %vm4582_vm15 = vcmp.eq.f32.partialorder %v9437_v29, inf }
 0x55e   : > { %v4631_v30 = vsel %vm4630_vm11, %v5923_v20, %v4627_v43  ;;  %v4562_v27 = vsel %vm4560_vm12, %v4561_v33, %v4559_v38  ;;  %v4639_v7 = vmul.f32 %v5927_v3, %v9432_v34  ;;  %v4504_v12 = vpop.xlane.xlu2 %4503  ;;  %vm4644_vm9 = vweird.f32 %v5927_v3 }
 0x55f   : > { %v4567_v5 = vsub.f32 1.5, %v4566_v1  ;;  %v4636_v46 = vsel %vm4633_vm13, %v4635_v0, %v4631_v30  ;;  %5930 = vrcp.f32 %v4562_v27  ;;  %v4516_v60 = vmul.f32 %v4504_v12, %v9335_v11  ;;  %vm4645_vm14 = vmor %vm4643_vm10, %vm4644_vm9 }
 0x560   : > { %v4637_v31 = vmul.f32 %v4636_v46, %v9341_v22  ;;  %v4640_v62 = vsub.f32 1.0, %v4639_v7  ;;  %v4664_v32 = vand.u32 2147483648, %v4562_v27  ;;  %vm4658_vm6 = vweird.f32 %v4562_v27 }
 0x561   : > { %v4568_v17 = vmul.f32 %v5925_v49, %v4567_v5  ;;  %v9471_v52 = vadd.f32 1e-05, %v4516_v60  ;;  %v4585_v16 = vand.u32 2147483648, %v9437_v29  ;;  %vm4584_vm11 = vcmp.eq.f32.partialorder %v9437_v29, 0.0 }
 0x562   : > { %v4744_v55 = vmul.f32 %v9446_v56, %v4637_v31  ;;  %v4641_v39 = vmul.f32 %v5927_v3, %v4640_v62 }
 0x563   : > { %v5929_v61 = vpop.eup %5928  ;;  %v4569_v53 = vmul.f32 %v4568_v17, %v9415_v13 }
 0x564   : > { %v4576_v22 = vmul.f32 %v5929_v61, %v9437_v29  ;;  %v9461_v41 = vadd.f32 %v9451_v40, %v4744_v55  ;;  %v4642_v10 = vadd.f32 %v5927_v3, %v4641_v39 }
 0x565   : > { %v4571_v50 = vsel %vm4570_vm2, %v9415_v13, %v4569_v53  ;;  %v5931_v9 = vpop.eup %5930  ;;  %v4662_v13 = vand.u32 2147483647, %v4562_v27 }
 0x566   : > { %v4577_v58 = vmul.f32 %v5929_v61, %v4576_v22  ;;  %5550 = vmatmul.msk.f32.vlgmr.msrb.gmra.mxu1 %vm400_vm0, %v9461_v41  ;;  %v4574_v4 = vsel %vm4572_vm5, %v4573_v14, %v4571_v50  ;;  %v4646_v20 = vsel %vm4645_vm14, %v5927_v3, %v4642_v10  ;;  %v4654_v42 = vmul.f32 %v5931_v9, %v4562_v27 }
 0x567   : > { %v4651_v2 = vsel %vm4648_vm3, %v4650_v44, %v4646_v20  ;;  %5932 = vrcp.f32 %v4574_v4  ;;  %vm4659_vm4 = vweird.f32 %v5931_v9  ;;  %vm4663_vm8 = vcmp.eq.f32.partialorder %v4662_v13, 8.507059e+37 }
 0x568   : > { %v4578_v37 = vmul.f32 0.5, %v4577_v58  ;;  %v4652_v8 = vmul.f32 %v4651_v2, %v9350_v63  ;;  %v4655_v54 = vsub.f32 1.0, %v4654_v42  ;;  %5934 = vrsqrt.f32 %v9471_v52  ;;  %vm4660_vm7 = vmor %vm4658_vm6, %vm4659_vm4 }
 0x569   : > { %v4665_v63 = vor.u32 1.1754944e-38, %v4664_v32  ;;  %v4679_v38 = vand.u32 2147483648, %v4574_v4  ;;  %v4677_v5 = vand.u32 2147483647, %v4574_v4  ;;  %vm4673_vm13 = vweird.f32 %v4574_v4 }
 0x56a   : > { %v4579_v15 = vsub.f32 1.5, %v4578_v37  ;;  %v4745_v49 = vmul.f32 %v9446_v56, %v4652_v8  ;;  %v4656_v26 = vmul.f32 %v5931_v9, %v4655_v54  ;;  %vm4594_vm4 = vcmp.eq.f32.partialorder %v9471_v52, inf }
 0x56b   : > { %vm4678_vm9 = vcmp.eq.f32.partialorder %v4677_v5, 8.507059e+37  ;;  %v4597_v2 = vand.u32 2147483648, %v9471_v52  ;;  %vm4596_vm6 = vcmp.eq.f32.partialorder %v9471_v52, 0.0 }
 0x56c   : > { %v4580_v34 = vmul.f32 %v5929_v61, %v4579_v15  ;;  %v9478_v35 = vadd.f32 %v9451_v40, %v4745_v49  ;;  %v4657_v59 = vadd.f32 %v5931_v9, %v4656_v26 }
 0x56d   : > { %v5933_v24 = vpop.eup %5932 }
 0x56e   : > { %v4581_v28 = vmul.f32 %v4580_v34, %v9437_v29  ;;  %5551 = vmatmul.msk.f32.gmra.mxu1 %vm400_vm0, %v9478_v35  ;;  %v4661_v47 = vsel %vm4660_vm7, %v5931_v9, %v4657_v59  ;;  %v4669_v45 = vmul.f32 %v5933_v24, %v4574_v4  ;;  %v5935_v3 = vpop.eup %5934  ;;  %vm4674_vm12 = vweird.f32 %v5933_v24 }
 0x56f   : > { %v4666_v57 = vsel %vm4663_vm8, %v4665_v63, %v4661_v47  ;;  %v4588_v31 = vmul.f32 %v5935_v3, %v9471_v52  ;;  %vm4675_vm2 = vmor %vm4673_vm13, %vm4674_vm12 }
 0x570   : > { %v4583_v33 = vsel %vm4582_vm15, %v9437_v29, %v4581_v28  ;;  %v4667_v43 = vmul.f32 %v4666_v57, %v9359_v18  ;;  %v4670_v1 = vsub.f32 1.0, %v4669_v45  ;;  %v4680_v29 = vor.u32 1.1754944e-38, %v4679_v38 }
 0x571   : > { %v4586_v0 = vsel %vm4584_vm11, %v4585_v16, %v4583_v33  ;;  %v4589_v55 = vmul.f32 %v5935_v3, %v4588_v31 }
 0x572   : > { %5936 = vrcp.f32 %v4586_v0  ;;  %v4746_v30 = vmul.f32 %v9446_v56, %v4667_v43  ;;  %v4671_v27 = vmul.f32 %v5933_v24, %v4670_v1  ;;  %v4694_v53 = vand.u32 2147483648, %v4586_v0 }
 0x573   : > { %v4692_v14 = vand.u32 2147483647, %v4586_v0  ;;  %v4590_v58 = vmul.f32 0.5, %v4589_v55  ;;  %vm4688_vm5 = vweird.f32 %v4586_v0 }
 0x574   : > { %v9489_v46 = vadd.f32 %v9451_v40, %v4746_v30  ;;  %v4672_v7 = vadd.f32 %v5933_v24, %v4671_v27 }
 0x575   : > { %vm4693_vm3 = vcmp.eq.f32.partialorder %v4692_v14, 8.507059e+37  ;;  %v4591_v50 = vsub.f32 1.5, %v4590_v58  ;;  %v4843_v14 = vld [vmem:[%s9747_s4 + $0x20] sm:$0xff] }
 0x576   : > { %5552 = vmatmul.msk.f32.gmra.mxu1 %vm400_vm0, %v9489_v46  ;;  %v4676_v18 = vsel %vm4675_vm2, %v5933_v24, %v4672_v7 }
 0x577   : > { %v4681_v62 = vsel %vm4678_vm9, %v4680_v29, %v4676_v18  ;;  %v4592_v37 = vmul.f32 %v5935_v3, %v4591_v50 }
 0x578   : > { %v5937_v17 = vpop.eup %5936  ;;  %v4682_v61 = vmul.f32 %v4681_v62, %v9368_v36  ;;  %v4695_v36 = vor.u32 1.1754944e-38, %v4694_v53 }
 0x579   : > { %v4684_v12 = vmul.f32 %v5937_v17, %v4586_v0  ;;  %vm4689_vm10 = vweird.f32 %v5937_v17  ;;  %v4593_v42 = vmul.f32 %v4592_v37, %v9471_v52 }
 0x57a   : > { %v4747_v23 = vmul.f32 %v9446_v56, %v4682_v61  ;;  %vm4690_vm14 = vmor %vm4688_vm5, %vm4689_vm10  ;;  %v4846_v61 = vld [vmem:[%s9747_s4 + $0x38] sm:$0xff] }
 0x57b   : > { %v4685_v25 = vsub.f32 1.0, %v4684_v12  ;;  %v4595_v15 = vsel %vm4594_vm4, %v9471_v52, %v4593_v42  ;;  %v4845_v12 = vld [vmem:[%s9747_s4 + $0x30] sm:$0xff]  ;;  %4880 = vmatpush.msrb.mxu0 %v4846_v61 }
 0x57c   : > { %v9497_v22 = vadd.f32 %v9451_v40, %v4747_v23 }
 0x57d   : > { %v4686_v39 = vmul.f32 %v5937_v17, %v4685_v25  ;;  %v4844_v25 = vld [vmem:[%s9747_s4 + $0x28] sm:$0xff]  ;;  %4881 = vmatpush.msrb.mxu0 %v4845_v12 }
 0x57e   : > { %5553 = vmatmul.msk.f32.gmra.mxu1 %vm400_vm0, %v9497_v22 }
 0x57f   : > { %v4687_v60 = vadd.f32 %v5937_v17, %v4686_v39  ;;  %4882 = vmatpush.msrb.mxu0 %v4844_v25 }
 0x581   : > { %v4691_v10 = vsel %vm4690_vm14, %v5937_v17, %v4687_v60  ;;  %v4842_v60 = vld [vmem:[%s9747_s4 + $0x18] sm:$0xff]  ;;  %4883 = vmatpush.msrb.mxu0 %v4843_v14 }
 0x582   : > { %v4696_v9 = vsel %vm4693_vm3, %v4695_v36, %v4691_v10  ;;  %v4841_v10 = vld [vmem:[%s9747_s4 + $0x10] sm:$0xff] }
 0x583   : > { %v4697_v44 = vmul.f32 %v4696_v9, %v9383_v6  ;;  %v4598_v6 = vsel %vm4596_vm6, %v4597_v2, %v4595_v15  ;;  %4884 = vmatpush.msrb.mxu0 %v4842_v60 }
 0x584   : > { %5938 = vrcp.f32 %v4598_v6  ;;  %v4709_v34 = vand.u32 2147483648, %v4598_v6  ;;  %v4707_v28 = vand.u32 2147483647, %v4598_v6  ;;  %vm4703_vm7 = vweird.f32 %v4598_v6 }
 0x585   : > { %v4748_v4 = vmul.f32 %v9446_v56, %v4697_v44  ;;  %4885 = vmatpush.msrb.mxu0 %v4841_v10 }
 0x586   : > { %v4710_v63 = vor.u32 1.1754944e-38, %v4709_v34  ;;  %vm4708_vm11 = vcmp.eq.f32.partialorder %v4707_v28, 8.507059e+37 }
 0x587   : > { %v9504_v20 = vadd.f32 %v9451_v40, %v4748_v4  ;;  %v4839_v4 = vld [vmem:[%s9747_s4] sm:$0xff] }
 0x589   : > { %5554 = vmatmul.msk.f32.gmra.mxu1 %vm400_vm0, %v9504_v20 }
 0x58a   : > { %v5939_v8 = vpop.eup %5938 }
 0x58b   : > { %v4699_v54 = vmul.f32 %v5939_v8, %v4598_v6  ;;  %vm4704_vm15 = vweird.f32 %v5939_v8 }
 0x58c   : > { %vm4705_vm8 = vmor %vm4703_vm7, %vm4704_vm15 }
 0x58d   : > { %v4700_v13 = vsub.f32 1.0, %v4699_v54 }
 0x58f   : > { %v4701_v26 = vmul.f32 %v5939_v8, %v4700_v13 }
 0x591   : > { %v4702_v24 = vadd.f32 %v5939_v8, %v4701_v26 }
 0x593   : > { %v4706_v16 = vsel %vm4705_vm8, %v5939_v8, %v4702_v24 }
 0x594   : > { %v4711_v52 = vsel %vm4708_vm11, %v4710_v63, %v4706_v16 }
 0x595   : > { %v4712_v47 = vmul.f32 %v4711_v52, %v9390_v21 }
 0x597   : > { %v4749_v45 = vmul.f32 %v9446_v56, %v4712_v47 }
 0x599   : > { %v9517_v33 = vadd.f32 %v9451_v40, %v4749_v45 }
 0x59b   : > { %5555 = vmatmul.msk.f32.gmra.mxu1 %vm400_vm0, %v9517_v33 }
 0x59c   : > { %v4507_v32 = vpop.xlane.xlu0 %4506 }
 0x59d   : > { %v4517_v49 = vmul.f32 %v4507_v32, %v9335_v11  ;;  %v9554_v32 = vperm.slane %v9231_v48, 4 }
 0x59f   : > { %v4525_v59 = vadd.f32 1e-05, %v4517_v49 }
 0x5a1   : > { %5940 = vrsqrt.f32 %v4525_v59  ;;  %vm4606_vm12 = vcmp.eq.f32.partialorder %v4525_v59, inf  ;;  %v4609_v27 = vand.u32 2147483648, %v4525_v59  ;;  %vm4608_vm13 = vcmp.eq.f32.partialorder %v4525_v59, 0.0 }
 0x5a7   : > { %v5941_v57 = vpop.eup %5940 }
 0x5a8   : > { %v4600_v43 = vmul.f32 %v5941_v57, %v4525_v59 }
 0x5aa   : > { %v4601_v1 = vmul.f32 %v5941_v57, %v4600_v43 }
 0x5ac   : > { %v4602_v0 = vmul.f32 0.5, %v4601_v1 }
 0x5ae   : > { %v4603_v38 = vsub.f32 1.5, %v4602_v0 }
 0x5b0   : > { %v4604_v3 = vmul.f32 %v5941_v57, %v4603_v38 }
 0x5b2   : > { %v4605_v30 = vmul.f32 %v4604_v3, %v4525_v59 }
 0x5b4   : > { %v4607_v5 = vsel %vm4606_vm12, %v4525_v59, %v4605_v30 }
 0x5b5   : > { %v4610_v21 = vsel %vm4608_vm13, %v4609_v27, %v4607_v5 }
 0x5b6   : > { %5942 = vrcp.f32 %v4610_v21  ;;  %v4724_v18 = vand.u32 2147483648, %v4610_v21  ;;  %v4722_v62 = vand.u32 2147483647, %v4610_v21  ;;  %vm4718_vm9 = vweird.f32 %v4610_v21 }
 0x5b8   : > { %v4725_v23 = vor.u32 1.1754944e-38, %v4724_v18  ;;  %vm4723_vm5 = vcmp.eq.f32.partialorder %v4722_v62, 8.507059e+37 }
 0x5bc   : > { %v5943_v7 = vpop.eup %5942 }
 0x5bd   : > { %v4714_v31 = vmul.f32 %v5943_v7, %v4610_v21  ;;  %vm4719_vm2 = vweird.f32 %v5943_v7 }
 0x5be   : > { %vm4720_vm10 = vmor %vm4718_vm9, %vm4719_vm2 }
 0x5bf   : > { %v4715_v29 = vsub.f32 1.0, %v4714_v31 }
 0x5c1   : > { %v4716_v17 = vmul.f32 %v5943_v7, %v4715_v29 }
 0x5c3   : > { %v4717_v55 = vadd.f32 %v5943_v7, %v4716_v17 }
 0x5c5   : > { %v4721_v53 = vsel %vm4720_vm10, %v5943_v7, %v4717_v55 }
 0x5c6   : > { %v4726_v39 = vsel %vm4723_vm5, %v4725_v23, %v4721_v53 }
 0x5c7   : > { %v4727_v58 = vmul.f32 %v4726_v39, %v9400_v19  ;;  %v4840_v19 = vld [vmem:[%s9747_s4 + $0x8] sm:$0xff]  ;;  %v9577_v39 = vld [vmem:[#allocation5] sm:$0xff] }
 0x5c8   : > { %4886 = vmatpush.msrb.mxu0 %v4840_v19  ;;  %v4847_v14 = vperm.slane %v9577_v39, 5 }
 0x5c9   : > { %v4750_v36 = vmul.f32 %v9446_v56, %v4727_v58 }
 0x5ca   : > { %4887 = vmatpush.msrb.mxu0 %v4839_v4 }
 0x5cb   : > { %v9542_v50 = vadd.f32 %v9451_v40, %v4750_v36  ;;  %v4510_v9 = vpop.xlane.xlu1 %4509 }
 0x5cc   : > { %v4518_v44 = vmul.f32 %v4510_v9, %v9335_v11 }
 0x5cd   : > { %5556 = vmatmul.msk.f32.gmra.mxu1 %vm400_vm0, %v9542_v50 }
 0x5ce   : > { %v4526_v37 = vadd.f32 1e-05, %v4518_v44 }
 0x5d0   : > { %5944 = vrsqrt.f32 %v4526_v37  ;;  %vm4618_vm14 = vcmp.eq.f32.partialorder %v4526_v37, inf  ;;  %v4621_v34 = vand.u32 2147483648, %v4526_v37  ;;  %vm4620_vm3 = vcmp.eq.f32.partialorder %v4526_v37, 0.0 }
 0x5d6   : > { %v5945_v42 = vpop.eup %5944 }
 0x5d7   : > { %v4612_v2 = vmul.f32 %v5945_v42, %v4526_v37 }
 0x5d9   : > { %v4613_v15 = vmul.f32 %v5945_v42, %v4612_v2 }
 0x5db   : > { %v4614_v6 = vmul.f32 0.5, %v4613_v15 }
 0x5dd   : > { %v4615_v8 = vsub.f32 1.5, %v4614_v6 }
 0x5df   : > { %v4616_v54 = vmul.f32 %v5945_v42, %v4615_v8 }
 0x5e1   : > { %v4617_v13 = vmul.f32 %v4616_v54, %v4526_v37 }
 0x5e3   : > { %v4619_v49 = vsel %vm4618_vm14, %v4526_v37, %v4617_v13  ;;  %v4807_v26 = vpop.f32.mrf.mxu1 }
 0x5e4   : > { %v4622_v28 = vsel %vm4620_vm3, %v4621_v34, %v4619_v49  ;;  %v4808_v59 = vadd.f32 %v4807_v26, %v9554_v32 }
 0x5e5   : > { %5946 = vrcp.f32 %v4622_v28  ;;  %v4739_v48 = vand.u32 2147483648, %v4622_v28  ;;  %v4737_v1 = vand.u32 2147483647, %v4622_v28  ;;  %vm4733_vm6 = vweird.f32 %v4622_v28 }
 0x5e6   : > { %v4831_v24 = vmax.f32 %v4808_v59, 0.0 }
 0x5e7   : > { %v4740_v38 = vor.u32 1.1754944e-38, %v4739_v48  ;;  %vm4738_vm7 = vcmp.eq.f32.partialorder %v4737_v1, 8.507059e+37 }
 0x5e8   : > { %5558 = vmatmul.msk.f32.vlgmr.msrb.gmra.mxu0 %vm795_vm1, %v4831_v24 }
 0x5eb   : > { %v5947_v63 = vpop.eup %5946  ;;  %v4810_v52 = vpop.f32.mrf.mxu1 }
 0x5ec   : > { %v4729_v16 = vmul.f32 %v5947_v63, %v4622_v28  ;;  %v4811_v47 = vadd.f32 %v4810_v52, %v9554_v32  ;;  %vm4734_vm4 = vweird.f32 %v5947_v63 }
 0x5ed   : > { %vm4735_vm15 = vmor %vm4733_vm6, %vm4734_vm4 }
 0x5ee   : > { %v4730_v45 = vsub.f32 1.0, %v4729_v16  ;;  %v4832_v57 = vmax.f32 %v4811_v47, 0.0 }
 0x5f0   : > { %v4731_v43 = vmul.f32 %v5947_v63, %v4730_v45  ;;  %5559 = vmatmul.msk.f32.gmra.mxu0 %vm795_vm1, %v4832_v57 }
 0x5f2   : > { %v4732_v0 = vadd.f32 %v5947_v63, %v4731_v43 }
 0x5f3   : > { %v4813_v30 = vpop.f32.mrf.mxu1 }
 0x5f4   : > { %v4736_v3 = vsel %vm4735_vm15, %v5947_v63, %v4732_v0  ;;  %v4814_v5 = vadd.f32 %v4813_v30, %v9554_v32 }
 0x5f5   : > { %v4741_v27 = vsel %vm4738_vm7, %v4740_v38, %v4736_v3 }
 0x5f6   : > { %v4742_v21 = vmul.f32 %v4741_v27, %v9421_v51  ;;  %v4833_v7 = vmax.f32 %v4814_v5, 0.0 }
 0x5f8   : > { %v4751_v31 = vmul.f32 %v9446_v56, %v4742_v21  ;;  %5560 = vmatmul.msk.f32.gmra.mxu0 %vm795_vm1, %v4833_v7 }
 0x5fa   : > { %v9565_v29 = vadd.f32 %v9451_v40, %v4751_v31 }
 0x5fb   : > { %v4816_v18 = vpop.f32.mrf.mxu1 }
 0x5fc   : > { %5557 = vmatmul.msk.f32.gmra.mxu1 %vm400_vm0, %v9565_v29  ;;  %v4817_v17 = vadd.f32 %v4816_v18, %v9554_v32 }
 0x5fe   : > { %v4834_v62 = vmax.f32 %v4817_v17, 0.0 }
 0x600   : > { %5561 = vmatmul.msk.f32.gmra.mxu0 %vm795_vm1, %v4834_v62 }
 0x606   : > { %v4819_v61 = vpop.f32.mrf.mxu1 }
 0x607   : > { %v4820_v51 = vadd.f32 %v4819_v61, %v9554_v32 }
 0x609   : > { %v4835_v12 = vmax.f32 %v4820_v51, 0.0 }
 0x60b   : > { %5562 = vmatmul.msk.f32.gmra.mxu0 %vm795_vm1, %v4835_v12 }
 0x618   : > { %v4822_v56 = vpop.f32.mrf.mxu1 }
 0x619   : > { %v4823_v55 = vadd.f32 %v4822_v56, %v9554_v32 }
 0x61b   : > { %v4836_v40 = vmax.f32 %v4823_v55, 0.0 }
 0x61d   : > { %5563 = vmatmul.msk.f32.gmra.mxu0 %vm795_vm1, %v4836_v40 }
 0x64a   : > { %v4825_v23 = vpop.f32.mrf.mxu1 }
 0x64b   : > { %v4826_v25 = vadd.f32 %v4825_v23, %v9554_v32 }
 0x64d   : > { %v4837_v53 = vmax.f32 %v4826_v25, 0.0 }
 0x64f   : > { %5564 = vmatmul.msk.f32.gmra.mxu0 %vm795_vm1, %v4837_v53 }
 0x665   : > { %v4889_v58 = vpop.f32.mrf.mxu0 }
 0x666   : > { %v4890_v60 = vadd.f32 %v4889_v58, %v4847_v14 }
 0x668   : > { %v4913_v36 = vadd.f32 %v4890_v60, %v9461_v41 }
 0x66a   : > { %v4921_v10 = vsel %vm400_vm0, %v4913_v36, 0.0 }
 0x66b   : > { %4922 = vadd.xlane.f32.xlu2 %v4921_v10 }
 0x66d   : > { %v4892_v9 = vpop.f32.mrf.mxu0 }
 0x66e   : > { %v4893_v19 = vadd.f32 %v4892_v9, %v4847_v14 }
 0x670   : > { %v4914_v44 = vadd.f32 %v4893_v19, %v9478_v35 }
 0x672   : > { %v4924_v4 = vsel %vm400_vm0, %v4914_v44, 0.0 }
 0x673   : > { %4925 = vadd.xlane.f32.xlu0 %v4924_v4 }
 0x675   : > { %v4895_v37 = vpop.f32.mrf.mxu0 }
 0x676   : > { %v4896_v42 = vadd.f32 %v4895_v37, %v4847_v14 }
 0x678   : > { %v4915_v6 = vadd.f32 %v4896_v42, %v9489_v46 }
 0x679   : > { %v4828_v2 = vpop.f32.mrf.mxu1 }
 0x67a   : > { %v4829_v15 = vadd.f32 %v4828_v2, %v9554_v32  ;;  %v4927_v41 = vsel %vm400_vm0, %v4915_v6, 0.0 }
 0x67b   : > { %4928 = vadd.xlane.f32.xlu1 %v4927_v41 }
 0x67c   : > { %v4838_v8 = vmax.f32 %v4829_v15, 0.0 }
 0x67d   : > { %v4898_v54 = vpop.f32.mrf.mxu0 }
 0x67e   : > { %5565 = vmatmul.msk.f32.gmra.mxu0 %vm795_vm1, %v4838_v8  ;;  %v4899_v13 = vadd.f32 %v4898_v54, %v4847_v14 }
 0x680   : > { %v4916_v35 = vadd.f32 %v4899_v13, %v9497_v22 }
 0x682   : > { %v4930_v34 = vsel %vm400_vm0, %v4916_v35, 0.0 }
 0x683   : > { %4931 = vadd.xlane.f32.xlu2 %v4930_v34 }
 0x688   : > { %v4901_v49 = vpop.f32.mrf.mxu0 }
 0x689   : > { %v4902_v26 = vadd.f32 %v4901_v49, %v4847_v14 }
 0x68b   : > { %v4917_v28 = vadd.f32 %v4902_v26, %v9504_v20 }
 0x68d   : > { %v4933_v32 = vsel %vm400_vm0, %v4917_v28, 0.0 }
 0x68e   : > { %4934 = vadd.xlane.f32.xlu0 %v4933_v32 }
 0x69a   : > { %v4904_v46 = vpop.f32.mrf.mxu0 }
 0x69b   : > { %v4905_v59 = vadd.f32 %v4904_v46, %v4847_v14 }
 0x69d   : > { %v4918_v24 = vadd.f32 %v4905_v59, %v9517_v33 }
 0x69f   : > { %v4936_v63 = vsel %vm400_vm0, %v4918_v24, 0.0 }
 0x6a0   : > { %4937 = vadd.xlane.f32.xlu1 %v4936_v63 }
 0x6cc   : > { %v4907_v16 = vpop.f32.mrf.mxu0 }
 0x6cd   : > { %v4908_v52 = vadd.f32 %v4907_v16, %v4847_v14 }
 0x6cf   : > { %v4919_v22 = vadd.f32 %v4908_v52, %v9542_v50 }
 0x6d1   : > { %v4939_v47 = vsel %vm400_vm0, %v4919_v22, 0.0 }
 0x6d2   : > { %4940 = vadd.xlane.f32.xlu2 %v4939_v47 }
 0x6de   : > { %v4923_v45 = vpop.xlane.xlu2 %4922 }
 0x6df   : > { %v4945_v20 = vmul.f32 %v4923_v45, %v9335_v11 }
 0x6e1   : > { %v9597_v48 = vsub.f32 %v4913_v36, %v4945_v20 }
 0x6e3   : > { %v4961_v57 = vmul.f32 %v9597_v48, %v9597_v48 }
 0x6e5   : > { %v4969_v33 = vsel %vm400_vm0, %v4961_v57, 0.0 }
 0x6e6   : > { %4970 = vadd.xlane.f32.xlu1 %v4969_v33  ;;  %v4926_v43 = vpop.xlane.xlu0 %4925 }
 0x6e7   : > { %v4946_v1 = vmul.f32 %v4926_v43, %v9335_v11 }
 0x6e9   : > { %v9603_v0 = vsub.f32 %v4914_v44, %v4946_v1 }
 0x6eb   : > { %v4962_v50 = vmul.f32 %v9603_v0, %v9603_v0 }
 0x6ed   : > { %v4972_v38 = vsel %vm400_vm0, %v4962_v50, 0.0 }
 0x6ee   : > { %4973 = vadd.xlane.f32.xlu2 %v4972_v38  ;;  %v4929_v30 = vpop.xlane.xlu1 %4928 }
 0x6ef   : > { %v4947_v7 = vmul.f32 %v4929_v30, %v9335_v11 }
 0x6f1   : > { %v9618_v61 = vsub.f32 %v4915_v6, %v4947_v7 }
 0x6f3   : > { %v4963_v55 = vmul.f32 %v9618_v61, %v9618_v61 }
 0x6f5   : > { %v4975_v23 = vsel %vm400_vm0, %v4963_v55, 0.0  ;;  %v9651_v55 = vperm.slane %v9577_v39, 7 }
 0x6f6   : > { %v4932_v3 = vpop.xlane.xlu2 %4931 }
 0x6f7   : > { %v4948_v27 = vmul.f32 %v4932_v3, %v9335_v11 }
 0x6f9   : > { %v9609_v5 = vsub.f32 %v4916_v35, %v4948_v27 }
 0x6fb   : > { %v4910_v21 = vpop.f32.mrf.mxu0  ;;  %v4964_v18 = vmul.f32 %v9609_v5, %v9609_v5 }
 0x6fc   : > { %v4911_v31 = vadd.f32 %v4910_v21, %v4847_v14 }
 0x6fd   : > { %v4978_v62 = vsel %vm400_vm0, %v4964_v18, 0.0 }
 0x6fe   : > { %v9615_v17 = vadd.f32 %v4911_v31, %v9565_v29  ;;  %4979 = vadd.xlane.f32.xlu1 %v4978_v62  ;;  %v9648_v62 = vperm.slane %v9577_v39, 6 }
 0x700   : > { %v4942_v51 = vsel %vm400_vm0, %v9615_v17, 0.0 }
 0x701   : > { %4943 = vadd.xlane.f32.xlu0 %v4942_v51  ;;  %v4935_v12 = vpop.xlane.xlu0 %4934 }
 0x702   : > { %v4949_v56 = vmul.f32 %v4935_v12, %v9335_v11 }
 0x704   : > { %v9625_v40 = vsub.f32 %v4917_v28, %v4949_v56 }
 0x706   : > { %v4965_v29 = vmul.f32 %v9625_v40, %v9625_v40 }
 0x708   : > { %v4981_v25 = vsel %vm400_vm0, %v4965_v29, 0.0 }
 0x709   : > { %4976 = vadd.xlane.f32.xlu0 %v4975_v23  ;;  %4982 = vadd.xlane.f32.xlu2 %v4981_v25 }
 0x713   : > { %v4938_v53 = vpop.xlane.xlu1 %4937 }
 0x714   : > { %v4950_v14 = vmul.f32 %v4938_v53, %v9335_v11 }
 0x716   : > { %v9632_v58 = vsub.f32 %v4918_v24, %v4950_v14 }
 0x718   : > { %v4966_v60 = vmul.f32 %v9632_v58, %v9632_v58 }
 0x71a   : > { %v4984_v36 = vsel %vm400_vm0, %v4966_v60, 0.0 }
 0x71b   : > { %4985 = vadd.xlane.f32.xlu0 %v4984_v36 }
 0x745   : > { %v4941_v10 = vpop.xlane.xlu2 %4940 }
 0x746   : > { %v4951_v9 = vmul.f32 %v4941_v10, %v9335_v11 }
 0x748   : > { %v9638_v19 = vsub.f32 %v4919_v22, %v4951_v9 }
 0x74a   : > { %v4967_v44 = vmul.f32 %v9638_v19, %v9638_v19 }
 0x74c   : > { %v4987_v4 = vsel %vm400_vm0, %v4967_v44, 0.0 }
 0x74d   : > { %4988 = vadd.xlane.f32.xlu1 %v4987_v4 }
 0x759   : > { %v4971_v37 = vpop.xlane.xlu1 %4970 }
 0x75a   : > { %v4993_v42 = vmul.f32 %v4971_v37, %v9335_v11 }
 0x75c   : > { %v5001_v2 = vadd.f32 1e-05, %v4993_v42 }
 0x75e   : > { %5948 = vrsqrt.f32 %v5001_v2  ;;  %vm5016_vm1 = vcmp.eq.f32.partialorder %v5001_v2, inf  ;;  %v5019_v28 = vand.u32 2147483648, %v5001_v2  ;;  %vm5018_vm8 = vcmp.eq.f32.partialorder %v5001_v2, 0.0 }
 0x761   : > { %v4974_v41 = vpop.xlane.xlu2 %4973 }
 0x762   : > { %v4994_v13 = vmul.f32 %v4974_v41, %v9335_v11 }
 0x764   : > { %v5949_v15 = vpop.eup %5948  ;;  %v5002_v34 = vadd.f32 1e-05, %v4994_v13 }
 0x765   : > { %v5010_v6 = vmul.f32 %v5949_v15, %v5001_v2 }
 0x766   : > { %5950 = vrsqrt.f32 %v5002_v34  ;;  %vm5028_vm12 = vcmp.eq.f32.partialorder %v5002_v34, inf  ;;  %v5031_v30 = vand.u32 2147483648, %v5002_v34  ;;  %vm5030_vm2 = vcmp.eq.f32.partialorder %v5002_v34, 0.0 }
 0x767   : > { %v5011_v8 = vmul.f32 %v5949_v15, %v5010_v6 }
 0x769   : > { %v5012_v54 = vmul.f32 0.5, %v5011_v8 }
 0x76b   : > { %v5013_v35 = vsub.f32 1.5, %v5012_v54 }
 0x76c   : > { %v5951_v59 = vpop.eup %5950 }
 0x76d   : > { %v5014_v49 = vmul.f32 %v5949_v15, %v5013_v35  ;;  %v5022_v24 = vmul.f32 %v5951_v59, %v5002_v34 }
 0x76f   : > { %v5015_v26 = vmul.f32 %v5014_v49, %v5001_v2  ;;  %v5023_v63 = vmul.f32 %v5951_v59, %v5022_v24 }
 0x771   : > { %v5017_v32 = vsel %vm5016_vm1, %v5001_v2, %v5015_v26  ;;  %v4980_v16 = vpop.xlane.xlu1 %4979  ;;  %v5024_v52 = vmul.f32 0.5, %v5023_v63 }
 0x772   : > { %v5020_v46 = vsel %vm5018_vm8, %v5019_v28, %v5017_v32  ;;  %v4996_v22 = vmul.f32 %v4980_v16, %v9335_v11 }
 0x773   : > { %5952 = vrcp.f32 %v5020_v46  ;;  %v5025_v20 = vsub.f32 1.5, %v5024_v52  ;;  %v5116_v1 = vand.u32 2147483648, %v5020_v46  ;;  %v5114_v38 = vand.u32 2147483647, %v5020_v46 }
 0x774   : > { %v5004_v57 = vadd.f32 1e-05, %v4996_v22  ;;  %vm5110_vm13 = vweird.f32 %v5020_v46  ;;  %v4944_v53 = vpop.xlane.xlu0 %4943 }
 0x775   : > { %v5026_v43 = vmul.f32 %v5951_v59, %v5025_v20  ;;  %v5117_v7 = vor.u32 1.1754944e-38, %v5116_v1  ;;  %vm5115_vm10 = vcmp.eq.f32.partialorder %v5114_v38, 8.507059e+37  ;;  %v4952_v44 = vmul.f32 %v4944_v53, %v9335_v11 }
 0x776   : > { %5954 = vrsqrt.f32 %v5004_v57  ;;  %vm5052_vm14 = vcmp.eq.f32.partialorder %v5004_v57, inf  ;;  %vm5054_vm3 = vcmp.eq.f32.partialorder %v5004_v57, 0.0  ;;  %v5055_v15 = vand.u32 2147483648, %v5004_v57 }
 0x777   : > { %v5027_v3 = vmul.f32 %v5026_v43, %v5002_v34  ;;  %v9664_v6 = vsub.f32 %v9615_v17, %v4952_v44 }
 0x779   : > { %v5953_v47 = vpop.eup %5952  ;;  %v5029_v21 = vsel %vm5028_vm12, %v5002_v34, %v5027_v3  ;;  %v4968_v32 = vmul.f32 %v9664_v6, %v9664_v6 }
 0x77a   : > { %v5106_v45 = vmul.f32 %v5953_v47, %v5020_v46  ;;  %vm5111_vm11 = vweird.f32 %v5953_v47  ;;  %v5032_v31 = vsel %vm5030_vm2, %v5031_v30, %v5029_v21 }
 0x77b   : > { %vm5112_vm9 = vmor %vm5110_vm13, %vm5111_vm11  ;;  %5956 = vrcp.f32 %v5032_v31  ;;  %v5131_v4 = vand.u32 2147483648, %v5032_v31  ;;  %v5129_v42 = vand.u32 2147483647, %v5032_v31  ;;  %vm5125_vm4 = vweird.f32 %v5032_v31 }
 0x77c   : > { %v5107_v33 = vsub.f32 1.0, %v5106_v45  ;;  %v5955_v18 = vpop.eup %5954  ;;  %v4977_v8 = vpop.xlane.xlu0 %4976  ;;  %v4990_v59 = vsel %vm400_vm0, %v4968_v32, 0.0 }
 0x77d   : > { %v5046_v56 = vmul.f32 %v5955_v18, %v5004_v57  ;;  %v4995_v13 = vmul.f32 %v4977_v8, %v9335_v11  ;;  %v5132_v35 = vor.u32 1.1754944e-38, %v5131_v4  ;;  %vm5130_vm15 = vcmp.eq.f32.partialorder %v5129_v42, 8.507059e+37  ;;  %v4983_v24 = vpop.xlane.xlu2 %4982  ;;  %4991 = vadd.xlane.f32.xlu2 %v4990_v59 }
 0x77e   : > { %v5108_v50 = vmul.f32 %v5953_v47, %v5107_v33  ;;  %v4997_v63 = vmul.f32 %v4983_v24, %v9335_v11 }
 0x77f   : > { %v5047_v23 = vmul.f32 %v5955_v18, %v5046_v56  ;;  %v5003_v28 = vadd.f32 1e-05, %v4995_v13 }
 0x780   : > { %v5109_v27 = vadd.f32 %v5953_v47, %v5108_v50 }
 0x781   : > { %v5048_v14 = vmul.f32 0.5, %v5047_v23  ;;  %v5957_v60 = vpop.eup %5956  ;;  %vm5040_vm12 = vcmp.eq.f32.partialorder %v5003_v28, inf  ;;  %vm5042_vm13 = vcmp.eq.f32.partialorder %v5003_v28, 0.0 }
 0x782   : > { %v5113_v51 = vsel %vm5112_vm9, %v5953_v47, %v5109_v27  ;;  %v5121_v10 = vmul.f32 %v5957_v60, %v5032_v31  ;;  %vm5126_vm5 = vweird.f32 %v5957_v60  ;;  %v5005_v47 = vadd.f32 1e-05, %v4997_v63 }
 0x783   : > { %v5118_v12 = vsel %vm5115_vm10, %v5117_v7, %v5113_v51  ;;  %v5049_v9 = vsub.f32 1.5, %v5048_v14  ;;  %vm5127_vm6 = vmor %vm5125_vm4, %vm5126_vm5 }
 0x784   : > { %v5119_v29 = vmul.f32 %v5118_v12, %v9597_v48  ;;  %v5122_v39 = vsub.f32 1.0, %v5121_v10  ;;  %vm5064_vm2 = vcmp.eq.f32.partialorder %v5005_v47, inf  ;;  %v5067_v42 = vand.u32 2147483648, %v5005_v47 }
 0x785   : > { %v5050_v48 = vmul.f32 %v5955_v18, %v5049_v9  ;;  %vm5066_vm9 = vcmp.eq.f32.partialorder %v5005_v47, 0.0 }
 0x786   : > { %v5226_v25 = vmul.f32 %v9648_v62, %v5119_v29  ;;  %v5123_v37 = vmul.f32 %v5957_v60, %v5122_v39 }
 0x787   : > { %v5051_v2 = vmul.f32 %v5050_v48, %v5004_v57 }
 0x788   : > { %v5235_v36 = vadd.f32 %v9651_v55, %v5226_v25  ;;  %v5124_v41 = vadd.f32 %v5957_v60, %v5123_v37 }
 0x789   : > { %v5053_v54 = vsel %vm5052_vm14, %v5004_v57, %v5051_v2 }
 0x78a   : > { %5243 = vst.msk [vmem:[%s9659_s26] sm:$0xff] %vm400_vm0, %v5235_v36  ;;  %v5056_v34 = vsel %vm5054_vm3, %v5055_v15, %v5053_v54  ;;  %v5128_v49 = vsel %vm5127_vm6, %v5957_v60, %v5124_v41  ;;  %v5043_v36 = vand.u32 2147483648, %v5003_v28 }
 0x78b   : > { %5958 = vrcp.f32 %v5056_v34  ;;  %v5133_v26 = vsel %vm5130_vm15, %v5132_v35, %v5128_v49  ;;  %v5159_v43 = vand.u32 2147483647, %v5056_v34  ;;  %vm5155_vm1 = vweird.f32 %v5056_v34 }
 0x78c   : > { %v5134_v17 = vmul.f32 %v5133_v26, %v9603_v0  ;;  %5960 = vrsqrt.f32 %v5003_v28  ;;  %v5161_v0 = vand.u32 2147483648, %v5056_v34 }
 0x78d   : > { %5962 = vrsqrt.f32 %v5005_v47  ;;  %vm5160_vm11 = vcmp.eq.f32.partialorder %v5159_v43, 8.507059e+37 }
 0x78e   : > { %v5227_v46 = vmul.f32 %v9648_v62, %v5134_v17  ;;  %v4986_v50 = vpop.xlane.xlu0 %4985  ;;  %v5162_v30 = vor.u32 1.1754944e-38, %v5161_v0 }
 0x78f   : > { %v4998_v3 = vmul.f32 %v4986_v50, %v9335_v11 }
 0x790   : > { %v5236_v52 = vadd.f32 %v9651_v55, %v5227_v46 }
 0x791   : > { %v5959_v16 = vpop.eup %5958  ;;  %v5006_v31 = vadd.f32 1e-05, %v4998_v3 }
 0x792   : > { %v5151_v22 = vmul.f32 %v5959_v16, %v5056_v34  ;;  %5244 = vst.msk [vmem:[%s9659_s26 + $0x8] sm:$0xff] %vm400_vm0, %v5236_v52  ;;  %v5961_v45 = vpop.eup %5960  ;;  %vm5156_vm7 = vweird.f32 %v5959_v16 }
 0x793   : > { %v5034_v57 = vmul.f32 %v5961_v45, %v5003_v28  ;;  %vm5157_vm8 = vmor %vm5155_vm1, %vm5156_vm7  ;;  %v5963_v21 = vpop.eup %5962  ;;  %5964 = vrsqrt.f32 %v5006_v31  ;;  %vm5076_vm14 = vcmp.eq.f32.partialorder %v5006_v31, inf  ;;  %v5079_v59 = vand.u32 2147483648, %v5006_v31 }
 0x794   : > { %v5152_v20 = vsub.f32 1.0, %v5151_v22  ;;  %v5058_v12 = vmul.f32 %v5963_v21, %v5005_v47  ;;  %vm5078_vm4 = vcmp.eq.f32.partialorder %v5006_v31, 0.0 }
 0x795   : > { %v5035_v1 = vmul.f32 %v5961_v45, %v5034_v57 }
 0x796   : > { %v5153_v33 = vmul.f32 %v5959_v16, %v5152_v20  ;;  %v5059_v23 = vmul.f32 %v5963_v21, %v5058_v12 }
 0x797   : > { %v5036_v27 = vmul.f32 0.5, %v5035_v1 }
 0x798   : > { %v5154_v38 = vadd.f32 %v5959_v16, %v5153_v33  ;;  %v5060_v14 = vmul.f32 0.5, %v5059_v23 }
 0x799   : > { %v5037_v51 = vsub.f32 1.5, %v5036_v27  ;;  %v5965_v44 = vpop.eup %5964 }
 0x79a   : > { %v5158_v7 = vsel %vm5157_vm8, %v5959_v16, %v5154_v38  ;;  %v5061_v9 = vsub.f32 1.5, %v5060_v14  ;;  %v5070_v48 = vmul.f32 %v5965_v44, %v5006_v31 }
 0x79b   : > { %v5163_v18 = vsel %vm5160_vm11, %v5162_v30, %v5158_v7  ;;  %v5038_v29 = vmul.f32 %v5961_v45, %v5037_v51 }
 0x79c   : > { %v5164_v56 = vmul.f32 %v5163_v18, %v9609_v5  ;;  %v5062_v5 = vmul.f32 %v5963_v21, %v5061_v9  ;;  %v5071_v37 = vmul.f32 %v5965_v44, %v5070_v48 }
 0x79d   : > { %v5039_v53 = vmul.f32 %v5038_v29, %v5003_v28 }
 0x79e   : > { %v5229_v25 = vmul.f32 %v9648_v62, %v5164_v56  ;;  %v5063_v4 = vmul.f32 %v5062_v5, %v5005_v47  ;;  %v5072_v15 = vmul.f32 0.5, %v5071_v37 }
 0x79f   : > { %v5041_v10 = vsel %vm5040_vm12, %v5003_v28, %v5039_v53 }
 0x7a0   : > { %v5238_v60 = vadd.f32 %v9651_v55, %v5229_v25  ;;  %v5044_v39 = vsel %vm5042_vm13, %v5043_v36, %v5041_v10  ;;  %v5065_v2 = vsel %vm5064_vm2, %v5005_v47, %v5063_v4  ;;  %v5073_v13 = vsub.f32 1.5, %v5072_v15 }
 0x7a1   : > { %5966 = vrcp.f32 %v5044_v39  ;;  %v5068_v41 = vsel %vm5066_vm9, %v5067_v42, %v5065_v2  ;;  %v5146_v34 = vand.u32 2147483648, %v5044_v39  ;;  %v5144_v28 = vand.u32 2147483647, %v5044_v39 }
 0x7a2   : > { %5246 = vst.msk [vmem:[%s9659_s26 + $0x18] sm:$0xff] %vm400_vm0, %v5238_v60  ;;  %5968 = vrcp.f32 %v5068_v41  ;;  %v5074_v49 = vmul.f32 %v5965_v44, %v5073_v13  ;;  %vm5140_vm5 = vweird.f32 %v5044_v39  ;;  %v5176_v0 = vand.u32 2147483648, %v5068_v41 }
 0x7a3   : > { %v5147_v24 = vor.u32 1.1754944e-38, %v5146_v34  ;;  %vm5145_vm6 = vcmp.eq.f32.partialorder %v5144_v28, 8.507059e+37  ;;  %v5174_v33 = vand.u32 2147483647, %v5068_v41  ;;  %vm5170_vm7 = vweird.f32 %v5068_v41 }
 0x7a4   : > { %v5075_v32 = vmul.f32 %v5074_v49, %v5006_v31  ;;  %v5177_v38 = vor.u32 1.1754944e-38, %v5176_v0 }
 0x7a5   : > { %vm5175_vm8 = vcmp.eq.f32.partialorder %v5174_v33, 8.507059e+37 }
 0x7a6   : > { %v5077_v16 = vsel %vm5076_vm14, %v5006_v31, %v5075_v32 }
 0x7a7   : > { %v5967_v8 = vpop.eup %5966  ;;  %v5080_v22 = vsel %vm5078_vm4, %v5079_v59, %v5077_v16 }
 0x7a8   : > { %v5136_v54 = vmul.f32 %v5967_v8, %v5044_v39  ;;  %vm5141_vm10 = vweird.f32 %v5967_v8  ;;  %v5969_v17 = vpop.eup %5968  ;;  %5970 = vrcp.f32 %v5080_v22  ;;  %v5191_v56 = vand.u32 2147483648, %v5080_v22 }
 0x7a9   : > { %vm5142_vm3 = vmor %vm5140_vm5, %vm5141_vm10  ;;  %v5166_v63 = vmul.f32 %v5969_v17, %v5068_v41  ;;  %vm5171_vm15 = vweird.f32 %v5969_v17  ;;  %v5189_v23 = vand.u32 2147483647, %v5080_v22  ;;  %vm5185_vm12 = vweird.f32 %v5080_v22 }
 0x7aa   : > { %v5137_v35 = vsub.f32 1.0, %v5136_v54  ;;  %vm5172_vm1 = vmor %vm5170_vm7, %vm5171_vm15  ;;  %v5192_v14 = vor.u32 1.1754944e-38, %v5191_v56 }
 0x7ab   : > { %v5167_v45 = vsub.f32 1.0, %v5166_v63  ;;  %vm5190_vm2 = vcmp.eq.f32.partialorder %v5189_v23, 8.507059e+37 }
 0x7ac   : > { %v5138_v26 = vmul.f32 %v5967_v8, %v5137_v35 }
 0x7ad   : > { %v5168_v57 = vmul.f32 %v5969_v17, %v5167_v45 }
 0x7ae   : > { %v5139_v46 = vadd.f32 %v5967_v8, %v5138_v26  ;;  %v5971_v30 = vpop.eup %5970 }
 0x7af   : > { %v5169_v1 = vadd.f32 %v5969_v17, %v5168_v57  ;;  %v5181_v7 = vmul.f32 %v5971_v30, %v5080_v22  ;;  %vm5186_vm11 = vweird.f32 %v5971_v30 }
 0x7b0   : > { %v5143_v52 = vsel %vm5142_vm3, %v5967_v8, %v5139_v46  ;;  %vm5187_vm13 = vmor %vm5185_vm12, %vm5186_vm11 }
 0x7b1   : > { %v5148_v47 = vsel %vm5145_vm6, %v5147_v24, %v5143_v52  ;;  %v5173_v27 = vsel %vm5172_vm1, %v5969_v17, %v5169_v1  ;;  %v5182_v51 = vsub.f32 1.0, %v5181_v7 }
 0x7b2   : > { %v5149_v20 = vmul.f32 %v5148_v47, %v9618_v61  ;;  %v5178_v61 = vsel %vm5175_vm8, %v5177_v38, %v5173_v27 }
 0x7b3   : > { %v5179_v31 = vmul.f32 %v5178_v61, %v9625_v40  ;;  %v5183_v29 = vmul.f32 %v5971_v30, %v5182_v51 }
 0x7b4   : > { %v5228_v43 = vmul.f32 %v9648_v62, %v5149_v20 }
 0x7b5   : > { %v5230_v12 = vmul.f32 %v9648_v62, %v5179_v31  ;;  %v5184_v53 = vadd.f32 %v5971_v30, %v5183_v29 }
 0x7b6   : > { %v5237_v50 = vadd.f32 %v9651_v55, %v5228_v43 }
 0x7b7   : > { %v5239_v25 = vadd.f32 %v9651_v55, %v5230_v12  ;;  %v5188_v60 = vsel %vm5187_vm13, %v5971_v30, %v5184_v53 }
 0x7b8   : > { %5245 = vst.msk [vmem:[%s9659_s26 + $0x10] sm:$0xff] %vm400_vm0, %v5237_v50  ;;  %v5193_v36 = vsel %vm5190_vm2, %v5192_v14, %v5188_v60 }
 0x7b9   : > { %5247 = vst.msk [vmem:[%s9659_s26 + $0x20] sm:$0xff] %vm400_vm0, %v5239_v25  ;;  %v5194_v10 = vmul.f32 %v5193_v36, %v9632_v58 }
 0x7bb   : > { %v5231_v44 = vmul.f32 %v9648_v62, %v5194_v10 }
 0x7bd   : > { %v5240_v5 = vadd.f32 %v9651_v55, %v5231_v44 }
 0x7bf   : > { %5248 = vst.msk [vmem:[%s9659_s26 + $0x28] sm:$0xff] %vm400_vm0, %v5240_v5 }
 0x7c0   : > { %v4989_v3 = vpop.xlane.xlu1 %4988 }
 0x7c1   : > { %v4999_v21 = vmul.f32 %v4989_v3, %v9335_v11 }
 0x7c3   : > { %v5007_v18 = vadd.f32 1e-05, %v4999_v21 }
 0x7c5   : > { %5972 = vrsqrt.f32 %v5007_v18  ;;  %vm5088_vm9 = vcmp.eq.f32.partialorder %v5007_v18, inf  ;;  %v5091_v2 = vand.u32 2147483648, %v5007_v18  ;;  %vm5090_vm10 = vcmp.eq.f32.partialorder %v5007_v18, 0.0 }
 0x7cb   : > { %v5973_v40 = vpop.eup %5972 }
 0x7cc   : > { %v5082_v9 = vmul.f32 %v5973_v40, %v5007_v18 }
 0x7ce   : > { %v5083_v39 = vmul.f32 %v5973_v40, %v5082_v9 }
 0x7d0   : > { %v5084_v48 = vmul.f32 0.5, %v5083_v39 }
 0x7d2   : > { %v5085_v4 = vsub.f32 1.5, %v5084_v48 }
 0x7d4   : > { %v5086_v37 = vmul.f32 %v5973_v40, %v5085_v4 }
 0x7d6   : > { %v5087_v42 = vmul.f32 %v5086_v37, %v5007_v18 }
 0x7d8   : > { %v5089_v15 = vsel %vm5088_vm9, %v5007_v18, %v5087_v42 }
 0x7d9   : > { %v5092_v8 = vsel %vm5090_vm10, %v5091_v2, %v5089_v15 }
 0x7da   : > { %5974 = vrcp.f32 %v5092_v8  ;;  %v5206_v13 = vand.u32 2147483648, %v5092_v8  ;;  %v5204_v34 = vand.u32 2147483647, %v5092_v8  ;;  %vm5200_vm14 = vweird.f32 %v5092_v8 }
 0x7dc   : > { %v5207_v26 = vor.u32 1.1754944e-38, %v5206_v13  ;;  %vm5205_vm4 = vcmp.eq.f32.partialorder %v5204_v34, 8.507059e+37 }
 0x7e0   : > { %v5975_v41 = vpop.eup %5974 }
 0x7e1   : > { %v5196_v58 = vmul.f32 %v5975_v41, %v5092_v8  ;;  %vm5201_vm5 = vweird.f32 %v5975_v41 }
 0x7e2   : > { %vm5202_vm3 = vmor %vm5200_vm14, %vm5201_vm5 }
 0x7e3   : > { %v5197_v54 = vsub.f32 1.0, %v5196_v58 }
 0x7e5   : > { %v5198_v35 = vmul.f32 %v5975_v41, %v5197_v54 }
 0x7e7   : > { %v5199_v49 = vadd.f32 %v5975_v41, %v5198_v35 }
 0x7e9   : > { %v5203_v28 = vsel %vm5202_vm3, %v5975_v41, %v5199_v49 }
 0x7ea   : > { %v5208_v32 = vsel %vm5205_vm4, %v5207_v26, %v5203_v28 }
 0x7eb   : > { %v5209_v17 = vmul.f32 %v5208_v32, %v9638_v19 }
 0x7ed   : > { %v5232_v46 = vmul.f32 %v9648_v62, %v5209_v17 }
 0x7ef   : > { %v5241_v59 = vadd.f32 %v9651_v55, %v5232_v46 }
 0x7f0   : > { %v4992_v24 = vpop.xlane.xlu2 %4991 }
 0x7f1   : > { %5249 = vst.msk [vmem:[%s9659_s26 + $0x30] sm:$0xff] %vm400_vm0, %v5241_v59  ;;  %v5000_v63 = vmul.f32 %v4992_v24, %v9335_v11 }
 0x7f3   : > { %v5008_v16 = vadd.f32 1e-05, %v5000_v63 }
 0x7f5   : > { %5976 = vrsqrt.f32 %v5008_v16  ;;  %vm5100_vm6 = vcmp.eq.f32.partialorder %v5008_v16, inf  ;;  %v5103_v19 = vand.u32 2147483648, %v5008_v16  ;;  %vm5102_vm15 = vcmp.eq.f32.partialorder %v5008_v16, 0.0 }
 0x7fb   : > { %v5977_v52 = vpop.eup %5976 }
 0x7fc   : > { %v5094_v22 = vmul.f32 %v5977_v52, %v5008_v16 }
 0x7fe   : > { %v5095_v47 = vmul.f32 %v5977_v52, %v5094_v22 }
 0x800   : > { %v5096_v45 = vmul.f32 0.5, %v5095_v47 }
 0x802   : > { %v5097_v20 = vsub.f32 1.5, %v5096_v45 }
 0x804   : > { %v5098_v0 = vmul.f32 %v5977_v52, %v5097_v20 }
 0x806   : > { %v5099_v57 = vmul.f32 %v5098_v0, %v5008_v16 }
 0x808   : > { %v5101_v33 = vsel %vm5100_vm6, %v5008_v16, %v5099_v57 }
 0x809   : > { %v5104_v43 = vsel %vm5102_vm15, %v5103_v19, %v5101_v33 }
 0x80a   : > { %5978 = vrcp.f32 %v5104_v43  ;;  %v5221_v38 = vand.u32 2147483648, %v5104_v43  ;;  %v5219_v30 = vand.u32 2147483647, %v5104_v43  ;;  %vm5215_vm1 = vweird.f32 %v5104_v43 }
 0x80c   : > { %v5222_v21 = vor.u32 1.1754944e-38, %v5221_v38  ;;  %vm5220_vm11 = vcmp.eq.f32.partialorder %v5219_v30, 8.507059e+37 }
 0x810   : > { %v5979_v1 = vpop.eup %5978 }
 0x811   : > { %v5211_v50 = vmul.f32 %v5979_v1, %v5104_v43  ;;  %vm5216_vm7 = vweird.f32 %v5979_v1 }
 0x812   : > { %vm5217_vm8 = vmor %vm5215_vm1, %vm5216_vm7 }
 0x813   : > { %v5212_v11 = vsub.f32 1.0, %v5211_v50 }
 0x815   : > { %v5213_v3 = vmul.f32 %v5979_v1, %v5212_v11 }
 0x817   : > { %v5214_v27 = vadd.f32 %v5979_v1, %v5213_v3 }
 0x819   : > { %v5218_v61 = vsel %vm5217_vm8, %v5979_v1, %v5214_v27 }
 0x81a   : > { %v5223_v7 = vsel %vm5220_vm11, %v5222_v21, %v5218_v61 }
 0x81b   : > { %v5224_v31 = vmul.f32 %v5223_v7, %v9664_v6 }
 0x81d   : > { %v5233_v18 = vmul.f32 %v9648_v62, %v5224_v31 }
 0x81f   : > { %v5242_v51 = vadd.f32 %v9651_v55, %v5233_v18 }
 0x821   : > { %5250 = vst.msk [vmem:[%s9659_s26 + $0x38] sm:$0xff] %vm400_vm0, %v5242_v51 }
 0x822   : > { %6077 = shalt.err (!%p6074_p9)
}
 0x823   : > { %s6128_s17 = smov 128   ;;  %s6129_s26 = smov 8  }
 0x824   : > { %5600 = dma.vmem_to_hbm [thread:$0]  (%p6218_p5), %s5270_s14, 1024, %s5272_s16, %s5252_s22, %s6128_s17, %s6128_s17, %s6129_s26  }
 0x825 PF: > { %p5617_p10 = scmp.ge.s32.totalorder %s6120_s12, 2  ;;  %s5290_s29 = sand.u32 1, %s6108_s30  }
 0x826   : > { %s5291_s24 = scalar_lea.sflag [#allocation4], %s5290_s29 }
 0x827   : > { %p5610_p11 = pnand %p5617_p10, %p6222_p6 }
 0x829   : > { %p5611_p12 = pneg %p5610_p11 }
 0x82b   : > { %6103 = dma.done.wait (%p5611_p12), %s5291_s24, 1024  }
 0x82c   : > { %6105 = vsyncadd (%p5611_p12), %s5291_s24, 4294966272  ;;  %p22_p13 = scmp.ge.s32.totalorder %s6205_s15, 4   ;;  %s9900_s30 = smov %s6112_s10 }
 0x82d   : > { %s9901_s10 = smov %s6116_s11  ;;  %s9902_s11 = smov %s6216_s18 }
 0x82e   : > { %s9903_s12 = smov %s6205_s15  ;;  %24 = sbr.rel (!%p22_p13) target bundleno = 5 (0x5), region = 108 }
 0x833   :  { %5305 = vsyncpa [#allocation3], 1 }
 0x834   :  { %5307 = vsyncpa [#allocation3 + $0x1], 1 }
 0x835   :  { %5308 = vsyncpa [#allocation6], 1 }
 0x836   :  { %5309 = vsyncpa [#allocation4], 1 }
 0x837   :  { %5311 = vsyncpa [#allocation4 + $0x1], 1 }

</bundles_post_ra>
